<compile_context>
chip_gen: v7x
topology: tpu7x:2x2x1
jax: 0.10.0
libtpu: 0.0.40
codegen_flags: <defaults>
</compile_context>

<pallas_src>
import jax
import jax.numpy as jnp
from jax.experimental import pallas as pl
from jax.experimental.pallas import tpu as pltpu

HIDDEN = 32      # DiffMLP hidden width
N_LAYER = 2      # DiffMLP hidden layers (sr_param.n_layer)
KAN_IN = 3       # number of PDE-library terms feeding the KAN
KAN_HIDDEN = 8   # pde_model KAN hidden width
KAN_G = 5        # basis functions per KAN edge
TN = 2048        # points per grid step (sweep 1024 / 2048 / 4096)


def _kan_basis(v):
    """[silu(v); sin(v); sin(2v); ...; sin(Gv)] stacked on the sublane axis.

    Only one sin + one cos + one sigmoid per element hit the EUP; higher
    harmonics come from sin((k+1)v) = 2 cos(v) sin(kv) - sin((k-1)v).
    Input v is (8, TN) (one full sublane group), output is (48, TN) built from
    8-row aligned blocks, so the concat is contiguous vreg copies.
    """
    sv = jnp.sin(v)
    two_cv = 2.0 * jnp.cos(v)
    blocks = [v * jax.nn.sigmoid(v), sv]      # silu(v), sin(1*v)
    s_prev = sv
    s_cur = two_cv * sv                       # sin(2*v)
    blocks.append(s_cur)
    for _ in range(3, KAN_G + 1):
        s_next = two_cv * s_cur - s_prev      # sin(k*v)
        blocks.append(s_next)
        s_prev, s_cur = s_cur, s_next
    return jnp.concatenate(blocks, axis=0)    # ((G+1)*8, TN)


def vkanpde_kernel(xyt_ref,
                   w1t_ref, b1_ref, w2blk_ref, b2_ref, wf8_ref, bf8_ref,
                   wk1_ref, wk2_ref,
                   out_ref):
    xyt = xyt_ref[...]                        # (3, TN), rows = x, y, t
    w1t = w1t_ref[...]                        # (32, 3)

    # ---- DiffMLP layer 1 + analytic derivative seeds -----------------------
    # d/dx and d/dy of the input are one-hot, d2/dx2 is zero, so the layer-1
    # derivative pre-activations are just columns of w1^T (broadcast on lanes).
    z1 = jnp.dot(w1t, xyt, preferred_element_type=jnp.float32) + b1_ref[...]
    a1 = jnp.tanh(z1)
    s1 = 1.0 - a1 * a1
    zx1 = w1t[:, 0:1]                         # (32, 1)
    zy1 = w1t[:, 1:2]
    h1 = a1
    hx1 = s1 * zx1
    hy1 = s1 * zy1
    hxx1 = (-2.0) * a1 * s1 * (zx1 * zx1)     # zxx1 == 0

    # ---- DiffMLP layer 2: channels stacked on sublanes, block-diag weight ---
    H1 = jnp.concatenate([h1, hx1, hy1, hxx1], axis=0)                # (128, TN)
    Z2 = jnp.dot(w2blk_ref[...], H1, preferred_element_type=jnp.float32)
    z2 = Z2[0:HIDDEN, :] + b2_ref[...]
    zx2 = Z2[HIDDEN:2 * HIDDEN, :]
    zy2 = Z2[2 * HIDDEN:3 * HIDDEN, :]
    zxx2 = Z2[3 * HIDDEN:4 * HIDDEN, :]
    a2 = jnp.tanh(z2)
    s2 = 1.0 - a2 * a2
    H2 = jnp.concatenate(
        [a2, s2 * zx2, s2 * zy2, s2 * zxx2 - 2.0 * a2 * s2 * zx2 * zx2],
        axis=0)                                                       # (128, TN)

    # ---- linear head: (8, 128) block-diag (rows 4..7 zero) ------------------
    # U8 rows = [u_pre_bias, du/dx, du/dy, d2u/dx2, 0, 0, 0, 0]
    U8 = jnp.dot(wf8_ref[...], H2, preferred_element_type=jnp.float32)  # (8, TN)

    # ---- pde_model: 2-layer KAN, one fused dot per layer --------------------
    # wk1 has zero columns for row 0 (u) and rows 4..7, so feeding U8 directly
    # is equivalent to feeding the zero-padded [du/dx, du/dy, d2u/dx2].
    B1 = _kan_basis(U8)                                                 # (48, TN)
    k1 = jnp.dot(wk1_ref[...], B1, preferred_element_type=jnp.float32)  # (8, TN)
    B2 = _kan_basis(k1)                                                 # (48, TN)
    pde8 = jnp.dot(wk2_ref[...], B2, preferred_element_type=jnp.float32)  # (8, TN), row 4 = pde

    # Single unmasked full-sublane store:
    # rows = [u, du/dx, du/dy, d2u/dx2, pde_out, 0, 0, 0]
    out_ref[...] = U8 + pde8 + bf8_ref[...]


# --------------------------- wrapper / weight prep ---------------------------
def _block_diag(w, n):
    m, k = w.shape
    out = jnp.zeros((n * m, n * k), w.dtype)
    for i in range(n):
        out = out.at[i * m:(i + 1) * m, i * k:(i + 1) * k].set(w)
    return out


def _prepare_weights(params):
    f32 = jnp.float32
    p = {k: jnp.asarray(v, f32) for k, v in params.items()}

    w1t = p['w1'].T                                   # (32, 3)
    b1 = p['b1'].T                                    # (32, 1)
    w2blk = _block_diag(p['w2'].T, 4)                 # (128, 128) block-diag of w2^T
    b2 = p['b2'].T                                    # (32, 1)
    wf4 = _block_diag(p['wf'].T, 4)                   # (4, 128) block-diag of wf^T
    wf8 = jnp.concatenate([wf4, jnp.zeros((4, 4 * HIDDEN), f32)], axis=0)  # (8, 128)
    bf8 = jnp.zeros((8, 1), f32).at[0, 0].set(p['bf'][0, 0])

    # KAN layer 1 fused weight (8, 48): blocks [silu | sin1 .. sin5], 8 cols each.
    # Kernel-side input rows are [u_pre, ux, uy, uxx, 0, 0, 0, 0]; real feature
    # columns sit at 1..3 inside every block, all other columns are zero.
    kb1t = p['kb1'].T                                 # (8, 3)
    ks1t = p['ks1'].T                                 # (8, 15)

    def pad_blk(w):
        return jnp.zeros((KAN_HIDDEN, 8), f32).at[:, 1:1 + KAN_IN].set(w)

    wk1 = jnp.concatenate(
        [pad_blk(kb1t)]
        + [pad_blk(ks1t[:, (k - 1) * KAN_IN:k * KAN_IN]) for k in range(1, KAN_G + 1)],
        axis=1)                                       # (8, 48)

    # KAN layer 2 fused weight (8, 48): single real output row placed at row 4 so
    # the kernel's final store is simply U8 + pde8 + bias (no concat, no masking).
    kb2t = p['kb2'].T                                 # (1, 8)
    ks2t = p['ks2'].T                                 # (1, 40)
    row = jnp.concatenate(
        [kb2t] + [ks2t[:, (k - 1) * KAN_HIDDEN:k * KAN_HIDDEN] for k in range(1, KAN_G + 1)],
        axis=1)                                       # (1, 48)
    wk2 = jnp.zeros((8, (KAN_G + 1) * KAN_HIDDEN), f32).at[4:5, :].set(row)

    return (w1t, b1, w2blk, b2, wf8, bf8, wk1, wk2)


def init_params(key):
    ks = jax.random.split(key, 8)

    def w(k, shape, scale):
        return (scale * jax.random.normal(k, shape)).astype(jnp.float32)

    return dict(
        w1=w(ks[0], (3, HIDDEN), (1.0 / 3.0) ** 0.5),
        b1=jnp.zeros((1, HIDDEN), jnp.float32),
        w2=w(ks[1], (HIDDEN, HIDDEN), (1.0 / HIDDEN) ** 0.5),
        b2=jnp.zeros((1, HIDDEN), jnp.float32),
        wf=w(ks[2], (HIDDEN, 1), (1.0 / HIDDEN) ** 0.5),
        bf=jnp.zeros((1, 1), jnp.float32),
        kb1=w(ks[3], (KAN_IN, KAN_HIDDEN), 0.5),
        ks1=w(ks[4], (KAN_G * KAN_IN, KAN_HIDDEN), 0.1),
        kb2=w(ks[5], (KAN_HIDDEN, 1), 0.5),
        ks2=w(ks[6], (KAN_G * KAN_HIDDEN, 1), 0.1),
    )


def vkanpde_forward(x, y, t, params, tn=TN):
    n = x.shape[0]
    # Feature-major input: (3, N), rows = x, y, t.  Pad point axis to a TN multiple.
    xyt_fm = jnp.concatenate([x, y, t], axis=1).T.astype(jnp.float32)
    n_pad = ((n + tn - 1) // tn) * tn
    if n_pad != n:
        xyt_fm = jnp.pad(xyt_fm, ((0, 0), (0, n_pad - n)))

    weights = _prepare_weights(params)

    def full_spec(a):
        nd = a.ndim
        return pl.BlockSpec(a.shape, lambda i, _nd=nd: (0,) * _nd)

    out = pl.pallas_call(
        vkanpde_kernel,
        out_shape=jax.ShapeDtypeStruct((8, n_pad), jnp.float32),
        grid_spec=pltpu.PrefetchScalarGridSpec(
            num_scalar_prefetch=0,
            grid=(n_pad // tn,),
            in_specs=[pl.BlockSpec((3, tn), lambda i: (0, i))]
                     + [full_spec(a) for a in weights],
            out_specs=pl.BlockSpec((8, tn), lambda i: (0, i))),
        compiler_params=pltpu.CompilerParams(
            dimension_semantics=("parallel",),
            vmem_limit_bytes=48 * 1024 * 1024),
    )(xyt_fm, *weights)

    out = out[:, :n]
    u = out[0:1, :].T                      # (N, 1)
    pd_hats = [out[1:2, :].T, out[2:3, :].T, out[3:4, :].T]
    pde = out[4:5, :].T                    # (N, 1)
    # TODO(synk): u_real / img_dx / img_dy finite-difference branch not implemented
    # (forward is exercised with u_real=None, so pd_reals stays empty as in PyTorch).
    return {'u_hat': u, 'pd_reals': [], 'pd_hats': pd_hats, 'pde_out': pde}


# -------- pure-JAX references (autograd / explicit-sin replicas) --------
def _mlp_u(params, xyt):
    h = jnp.tanh(xyt @ params['w1'] + params['b1'])
    h = jnp.tanh(h @ params['w2'] + params['b2'])
    return h @ params['wf'] + params['bf']


def _reference_derivs(params, xyt):
    ex = jnp.zeros_like(xyt).at[:, 0].set(1.0)
    ey = jnp.zeros_like(xyt).at[:, 1].set(1.0)
    u, ux = jax.jvp(lambda z: _mlp_u(params, z), (xyt,), (ex,))
    _, uy = jax.jvp(lambda z: _mlp_u(params, z), (xyt,), (ey,))
    ux_fn = lambda z: jax.jvp(lambda zz: _mlp_u(params, zz), (z,), (ex,))[1]
    _, uxx = jax.jvp(ux_fn, (xyt,), (ex,))
    return u, ux, uy, uxx


def _reference_kan(params, pd):
    def layer(v, wb, ws, g):
        base = (v * jax.nn.sigmoid(v)) @ wb
        phi = jnp.concatenate([jnp.sin(float(k) * v) for k in range(1, g + 1)], axis=1)
        return base + phi @ ws
    h = layer(pd, params['kb1'], params['ks1'], KAN_G)
    return layer(h, params['kb2'], params['ks2'], KAN_G)


if __name__ == "__main__":
    N = 4096                       # 2 grid steps at TN=2048 (feeds both v7x cores)
    key = jax.random.PRNGKey(0)
    kx, ky, kt = jax.random.split(key, 3)
    x = jax.random.uniform(kx, (N, 1), dtype=jnp.float32)
    y = jax.random.uniform(ky, (N, 1), dtype=jnp.float32)
    t = jax.random.uniform(kt, (N, 1), dtype=jnp.float32)
    params = init_params(jax.random.PRNGKey(42))

    out = vkanpde_forward(x, y, t, params)
    jax.block_until_ready(out)

    # correctness check against pure-JAX autodiff replica + explicit-sin KAN
    xyt = jnp.concatenate([x, y, t], axis=1)
    u_r, ux_r, uy_r, uxx_r = _reference_derivs(params, xyt)
    pde_r = _reference_kan(params, jnp.concatenate([ux_r, uy_r, uxx_r], axis=1))
    assert jnp.allclose(out['u_hat'], u_r, atol=1e-4, rtol=1e-4)
    assert jnp.allclose(out['pd_hats'][0], ux_r, atol=1e-4, rtol=1e-4)
    assert jnp.allclose(out['pd_hats'][1], uy_r, atol=1e-4, rtol=1e-4)
    assert jnp.allclose(out['pd_hats'][2], uxx_r, atol=2e-4, rtol=2e-4)
    assert jnp.allclose(out['pde_out'], pde_r, atol=2e-4, rtol=2e-4)
    assert out['pde_out'].shape == (N, 1)

    print("KERNEL_OK")
</pallas_src>

<mosaic_0001>
module attributes {stable_mosaic.version = 11 : i64} {
  func.func @vkanpde_kernel(%arg0: i32, %arg1: memref<3x2048xf32, #tpu.memory_space<vmem>>, %arg2: memref<32x3xf32, #tpu.memory_space<vmem>>, %arg3: memref<32x1xf32, #tpu.memory_space<vmem>>, %arg4: memref<128x128xf32, #tpu.memory_space<vmem>>, %arg5: memref<32x1xf32, #tpu.memory_space<vmem>>, %arg6: memref<8x128xf32, #tpu.memory_space<vmem>>, %arg7: memref<8x1xf32, #tpu.memory_space<vmem>>, %arg8: memref<8x48xf32, #tpu.memory_space<vmem>>, %arg9: memref<8x48xf32, #tpu.memory_space<vmem>>, %arg10: memref<8x2048xf32, #tpu.memory_space<vmem>>) attributes {dimension_semantics = [#tpu.dimension_semantics<parallel>], iteration_bounds = array<i64: 2>, scalar_prefetch = 0 : i64, scratch_operands = 0 : i64, tpu.core_type = #tpu.core_type<tc>, window_params = [{transform_indices = @transform_0, window_bounds = array<i64: 3, 2048>}, {pipeline_mode = #tpu.pipeline_mode<synchronous>, transform_indices = @transform_1, window_bounds = array<i64: 32, 3>}, {pipeline_mode = #tpu.pipeline_mode<synchronous>, transform_indices = @transform_2, window_bounds = array<i64: 32, 1>}, {pipeline_mode = #tpu.pipeline_mode<synchronous>, transform_indices = @transform_3, window_bounds = array<i64: 128, 128>}, {pipeline_mode = #tpu.pipeline_mode<synchronous>, transform_indices = @transform_4, window_bounds = array<i64: 32, 1>}, {pipeline_mode = #tpu.pipeline_mode<synchronous>, transform_indices = @transform_5, window_bounds = array<i64: 8, 128>}, {pipeline_mode = #tpu.pipeline_mode<synchronous>, transform_indices = @transform_6, window_bounds = array<i64: 8, 1>}, {pipeline_mode = #tpu.pipeline_mode<synchronous>, transform_indices = @transform_7, window_bounds = array<i64: 8, 48>}, {pipeline_mode = #tpu.pipeline_mode<synchronous>, transform_indices = @transform_8, window_bounds = array<i64: 8, 48>}, {transform_indices = @transform_9, window_bounds = array<i64: 8, 2048>}]} {
    %c0 = arith.constant 0 : index
    %c0_0 = arith.constant 0 : index
    %0 = vector.load %arg1[%c0, %c0_0] : memref<3x2048xf32, #tpu.memory_space<vmem>>, vector<3x2048xf32>
    %c0_1 = arith.constant 0 : index
    %c0_2 = arith.constant 0 : index
    %1 = vector.load %arg2[%c0_1, %c0_2] : memref<32x3xf32, #tpu.memory_space<vmem>>, vector<32x3xf32>
    %cst = arith.constant dense<0.000000e+00> : vector<32x2048xf32>
    %2 = tpu.matmul %1, %0, %cst {dimension_numbers = #tpu.dot_dimension_numbers<[1], [0], [0], [1], [0, 0, 1, 1], [], []>} : vector<32x3xf32>, vector<3x2048xf32>, vector<32x2048xf32> -> vector<32x2048xf32>
    %c0_3 = arith.constant 0 : index
    %c0_4 = arith.constant 0 : index
    %3 = vector.load %arg3[%c0_3, %c0_4] : memref<32x1xf32, #tpu.memory_space<vmem>>, vector<32x1xf32>
    %4 = vector.broadcast %3 : vector<32x1xf32> to vector<32x2048xf32>
    %5 = arith.addf %2, %4 : vector<32x2048xf32>
    %6 = math.tanh %5 : vector<32x2048xf32>
    %7 = arith.mulf %6, %6 : vector<32x2048xf32>
    %cst_5 = arith.constant 1.000000e+00 : f32
    %8 = vector.broadcast %cst_5 : f32 to vector<32x2048xf32>
    %9 = arith.subf %8, %7 : vector<32x2048xf32>
    %10 = vector.extract_strided_slice %1 {offsets = [0, 0], sizes = [32, 1], strides = [1, 1]} : vector<32x3xf32> to vector<32x1xf32>
    %11 = vector.extract_strided_slice %1 {offsets = [0, 1], sizes = [32, 1], strides = [1, 1]} : vector<32x3xf32> to vector<32x1xf32>
    %12 = vector.broadcast %10 : vector<32x1xf32> to vector<32x2048xf32>
    %13 = arith.mulf %9, %12 : vector<32x2048xf32>
    %14 = vector.broadcast %11 : vector<32x1xf32> to vector<32x2048xf32>
    %15 = arith.mulf %9, %14 : vector<32x2048xf32>
    %cst_6 = arith.constant -2.000000e+00 : f32
    %16 = vector.broadcast %cst_6 : f32 to vector<32x2048xf32>
    %17 = arith.mulf %16, %6 : vector<32x2048xf32>
    %18 = arith.mulf %17, %9 : vector<32x2048xf32>
    %19 = arith.mulf %10, %10 : vector<32x1xf32>
    %20 = vector.broadcast %19 : vector<32x1xf32> to vector<32x2048xf32>
    %21 = arith.mulf %18, %20 : vector<32x2048xf32>
    %22 = tpu.concatenate %6, %13, %15, %21 in 0 : vector<32x2048xf32>, vector<32x2048xf32>, vector<32x2048xf32>, vector<32x2048xf32> -> vector<128x2048xf32>
    %c0_7 = arith.constant 0 : index
    %c0_8 = arith.constant 0 : index
    %23 = vector.load %arg4[%c0_7, %c0_8] : memref<128x128xf32, #tpu.memory_space<vmem>>, vector<128x128xf32>
    %cst_9 = arith.constant dense<0.000000e+00> : vector<128x2048xf32>
    %24 = tpu.matmul %23, %22, %cst_9 {dimension_numbers = #tpu.dot_dimension_numbers<[1], [0], [0], [1], [0, 0, 1, 1], [], []>} : vector<128x128xf32>, vector<128x2048xf32>, vector<128x2048xf32> -> vector<128x2048xf32>
    %25 = vector.extract_strided_slice %24 {offsets = [0, 0], sizes = [32, 2048], strides = [1, 1]} : vector<128x2048xf32> to vector<32x2048xf32>
    %c0_10 = arith.constant 0 : index
    %c0_11 = arith.constant 0 : index
    %26 = vector.load %arg5[%c0_10, %c0_11] : memref<32x1xf32, #tpu.memory_space<vmem>>, vector<32x1xf32>
    %27 = vector.broadcast %26 : vector<32x1xf32> to vector<32x2048xf32>
    %28 = arith.addf %25, %27 : vector<32x2048xf32>
    %29 = vector.extract_strided_slice %24 {offsets = [32, 0], sizes = [32, 2048], strides = [1, 1]} : vector<128x2048xf32> to vector<32x2048xf32>
    %30 = vector.extract_strided_slice %24 {offsets = [64, 0], sizes = [32, 2048], strides = [1, 1]} : vector<128x2048xf32> to vector<32x2048xf32>
    %31 = vector.extract_strided_slice %24 {offsets = [96, 0], sizes = [32, 2048], strides = [1, 1]} : vector<128x2048xf32> to vector<32x2048xf32>
    %32 = math.tanh %28 : vector<32x2048xf32>
    %33 = arith.mulf %32, %32 : vector<32x2048xf32>
    %cst_12 = arith.constant 1.000000e+00 : f32
    %34 = vector.broadcast %cst_12 : f32 to vector<32x2048xf32>
    %35 = arith.subf %34, %33 : vector<32x2048xf32>
    %36 = arith.mulf %35, %29 : vector<32x2048xf32>
    %37 = arith.mulf %35, %30 : vector<32x2048xf32>
    %38 = arith.mulf %35, %31 : vector<32x2048xf32>
    %cst_13 = arith.constant 2.000000e+00 : f32
    %39 = vector.broadcast %cst_13 : f32 to vector<32x2048xf32>
    %40 = arith.mulf %39, %32 : vector<32x2048xf32>
    %41 = arith.mulf %40, %35 : vector<32x2048xf32>
    %42 = arith.mulf %41, %29 : vector<32x2048xf32>
    %43 = arith.mulf %42, %29 : vector<32x2048xf32>
    %44 = arith.subf %38, %43 : vector<32x2048xf32>
    %45 = tpu.concatenate %32, %36, %37, %44 in 0 : vector<32x2048xf32>, vector<32x2048xf32>, vector<32x2048xf32>, vector<32x2048xf32> -> vector<128x2048xf32>
    %c0_14 = arith.constant 0 : index
    %c0_15 = arith.constant 0 : index
    %46 = vector.load %arg6[%c0_14, %c0_15] : memref<8x128xf32, #tpu.memory_space<vmem>>, vector<8x128xf32>
    %cst_16 = arith.constant dense<0.000000e+00> : vector<8x2048xf32>
    %47 = tpu.matmul %46, %45, %cst_16 {dimension_numbers = #tpu.dot_dimension_numbers<[1], [0], [0], [1], [0, 0, 1, 1], [], []>} : vector<8x128xf32>, vector<128x2048xf32>, vector<8x2048xf32> -> vector<8x2048xf32>
    %48 = math.sin %47 : vector<8x2048xf32>
    %49 = math.cos %47 : vector<8x2048xf32>
    %cst_17 = arith.constant 2.000000e+00 : f32
    %50 = vector.broadcast %cst_17 : f32 to vector<8x2048xf32>
    %51 = arith.mulf %50, %49 : vector<8x2048xf32>
    %52 = arith.negf %47 : vector<8x2048xf32>
    %53 = math.exp %52 : vector<8x2048xf32>
    %cst_18 = arith.constant 1.000000e+00 : f32
    %54 = vector.broadcast %cst_18 : f32 to vector<8x2048xf32>
    %55 = arith.addf %54, %53 : vector<8x2048xf32>
    %56 = arith.divf %54, %55 : vector<8x2048xf32>
    %57 = arith.mulf %47, %56 : vector<8x2048xf32>
    %58 = arith.mulf %51, %48 : vector<8x2048xf32>
    %59 = arith.mulf %51, %58 : vector<8x2048xf32>
    %60 = arith.subf %59, %48 : vector<8x2048xf32>
    %61 = arith.mulf %51, %60 : vector<8x2048xf32>
    %62 = arith.subf %61, %58 : vector<8x2048xf32>
    %63 = arith.mulf %51, %62 : vector<8x2048xf32>
    %64 = arith.subf %63, %60 : vector<8x2048xf32>
    %65 = tpu.concatenate %57, %48, %58, %60, %62, %64 in 0 : vector<8x2048xf32>, vector<8x2048xf32>, vector<8x2048xf32>, vector<8x2048xf32>, vector<8x2048xf32>, vector<8x2048xf32> -> vector<48x2048xf32>
    %c0_19 = arith.constant 0 : index
    %c0_20 = arith.constant 0 : index
    %66 = vector.load %arg8[%c0_19, %c0_20] : memref<8x48xf32, #tpu.memory_space<vmem>>, vector<8x48xf32>
    %cst_21 = arith.constant dense<0.000000e+00> : vector<8x2048xf32>
    %67 = tpu.matmul %66, %65, %cst_21 {dimension_numbers = #tpu.dot_dimension_numbers<[1], [0], [0], [1], [0, 0, 1, 1], [], []>} : vector<8x48xf32>, vector<48x2048xf32>, vector<8x2048xf32> -> vector<8x2048xf32>
    %68 = math.sin %67 : vector<8x2048xf32>
    %69 = math.cos %67 : vector<8x2048xf32>
    %cst_22 = arith.constant 2.000000e+00 : f32
    %70 = vector.broadcast %cst_22 : f32 to vector<8x2048xf32>
    %71 = arith.mulf %70, %69 : vector<8x2048xf32>
    %72 = arith.negf %67 : vector<8x2048xf32>
    %73 = math.exp %72 : vector<8x2048xf32>
    %cst_23 = arith.constant 1.000000e+00 : f32
    %74 = vector.broadcast %cst_23 : f32 to vector<8x2048xf32>
    %75 = arith.addf %74, %73 : vector<8x2048xf32>
    %76 = arith.divf %74, %75 : vector<8x2048xf32>
    %77 = arith.mulf %67, %76 : vector<8x2048xf32>
    %78 = arith.mulf %71, %68 : vector<8x2048xf32>
    %79 = arith.mulf %71, %78 : vector<8x2048xf32>
    %80 = arith.subf %79, %68 : vector<8x2048xf32>
    %81 = arith.mulf %71, %80 : vector<8x2048xf32>
    %82 = arith.subf %81, %78 : vector<8x2048xf32>
    %83 = arith.mulf %71, %82 : vector<8x2048xf32>
    %84 = arith.subf %83, %80 : vector<8x2048xf32>
    %85 = tpu.concatenate %77, %68, %78, %80, %82, %84 in 0 : vector<8x2048xf32>, vector<8x2048xf32>, vector<8x2048xf32>, vector<8x2048xf32>, vector<8x2048xf32>, vector<8x2048xf32> -> vector<48x2048xf32>
    %c0_24 = arith.constant 0 : index
    %c0_25 = arith.constant 0 : index
    %86 = vector.load %arg9[%c0_24, %c0_25] : memref<8x48xf32, #tpu.memory_space<vmem>>, vector<8x48xf32>
    %cst_26 = arith.constant dense<0.000000e+00> : vector<8x2048xf32>
    %87 = tpu.matmul %86, %85, %cst_26 {dimension_numbers = #tpu.dot_dimension_numbers<[1], [0], [0], [1], [0, 0, 1, 1], [], []>} : vector<8x48xf32>, vector<48x2048xf32>, vector<8x2048xf32> -> vector<8x2048xf32>
    %88 = arith.addf %47, %87 : vector<8x2048xf32>
    %c0_27 = arith.constant 0 : index
    %c0_28 = arith.constant 0 : index
    %89 = vector.load %arg7[%c0_27, %c0_28] : memref<8x1xf32, #tpu.memory_space<vmem>>, vector<8x1xf32>
    %90 = vector.broadcast %89 : vector<8x1xf32> to vector<8x2048xf32>
    %91 = arith.addf %88, %90 : vector<8x2048xf32>
    %c0_29 = arith.constant 0 : index
    %c0_30 = arith.constant 0 : index
    %92 = vector.load %arg10[%c0_29, %c0_30] : memref<8x2048xf32, #tpu.memory_space<vmem>>, vector<8x2048xf32>
    tpu.vector_store %arg10[%c0_29, %c0_30], %91 {strides = array<i32>} : memref<8x2048xf32, #tpu.memory_space<vmem>>, vector<8x2048xf32>,
    return
  }
  func.func @transform_0(%arg0: i32) -> (i32, i32) {
    %c0_i32 = arith.constant 0 : i32
    %c0_i32_0 = arith.constant 0 : i32
    return %c0_i32, %arg0 : i32, i32
  }
  func.func @transform_1(%arg0: i32) -> (i32, i32) {
    %c0_i32 = arith.constant 0 : i32
    %c0_i32_0 = arith.constant 0 : i32
    %c0_i32_1 = arith.constant 0 : i32
    return %c0_i32, %c0_i32_0 : i32, i32
  }
  func.func @transform_2(%arg0: i32) -> (i32, i32) {
    %c0_i32 = arith.constant 0 : i32
    %c0_i32_0 = arith.constant 0 : i32
    %c0_i32_1 = arith.constant 0 : i32
    return %c0_i32, %c0_i32_0 : i32, i32
  }
  func.func @transform_3(%arg0: i32) -> (i32, i32) {
    %c0_i32 = arith.constant 0 : i32
    %c0_i32_0 = arith.constant 0 : i32
    %c0_i32_1 = arith.constant 0 : i32
    return %c0_i32, %c0_i32_0 : i32, i32
  }
  func.func @transform_4(%arg0: i32) -> (i32, i32) {
    %c0_i32 = arith.constant 0 : i32
    %c0_i32_0 = arith.constant 0 : i32
    %c0_i32_1 = arith.constant 0 : i32
    return %c0_i32, %c0_i32_0 : i32, i32
  }
  func.func @transform_5(%arg0: i32) -> (i32, i32) {
    %c0_i32 = arith.constant 0 : i32
    %c0_i32_0 = arith.constant 0 : i32
    %c0_i32_1 = arith.constant 0 : i32
    return %c0_i32, %c0_i32_0 : i32, i32
  }
  func.func @transform_6(%arg0: i32) -> (i32, i32) {
    %c0_i32 = arith.constant 0 : i32
    %c0_i32_0 = arith.constant 0 : i32
    %c0_i32_1 = arith.constant 0 : i32
    return %c0_i32, %c0_i32_0 : i32, i32
  }
  func.func @transform_7(%arg0: i32) -> (i32, i32) {
    %c0_i32 = arith.constant 0 : i32
    %c0_i32_0 = arith.constant 0 : i32
    %c0_i32_1 = arith.constant 0 : i32
    return %c0_i32, %c0_i32_0 : i32, i32
  }
  func.func @transform_8(%arg0: i32) -> (i32, i32) {
    %c0_i32 = arith.constant 0 : i32
    %c0_i32_0 = arith.constant 0 : i32
    %c0_i32_1 = arith.constant 0 : i32
    return %c0_i32, %c0_i32_0 : i32, i32
  }
  func.func @transform_9(%arg0: i32) -> (i32, i32) {
    %c0_i32 = arith.constant 0 : i32
    %c0_i32_0 = arith.constant 0 : i32
    return %c0_i32, %arg0 : i32, i32
  }
}

</mosaic_0001>

<bundles_post_ra>
// kernel: tpu_custom_call.1
= control target key start
LH: loop header
LB: loop body
LE: loop exit
PB: predicated region body
PF: predicated region fallthrough
CT: control target
= control target key end

     0   :  { %14 = vsyncpa [#allocation3], 0  ;;  %s22648_s0 = inlined_call_operand.hbm [shape: f32[3,4096], index: 0, kind: input, shape index: {}]   ;;  %s22649_s1 = inlined_call_operand.vmem [shape: f32[32,3], index: 1, kind: input, shape index: {}]   ;;  %s22650_s2 = inlined_call_operand.vmem [shape: f32[32,1], index: 2, kind: input, shape index: {}]   ;;  %s22651_s3 = inlined_call_operand.hbm [shape: f32[128,128], index: 3, kind: input, shape index: {}]   ;;  %s22652_s4 = inlined_call_operand.vmem [shape: f32[32,1], index: 4, kind: input, shape index: {}]   ;;  %s22653_s5 = inlined_call_operand.vmem [shape: f32[8,128], index: 5, kind: input, shape index: {}]   ;;  %s22654_s6 = inlined_call_operand.vmem [shape: f32[8,1], index: 6, kind: input, shape index: {}]   ;;  %s22655_s7 = inlined_call_operand.vmem [shape: f32[8,48], index: 7, kind: input, shape index: {}]   ;;  %s22656_s8 = inlined_call_operand.vmem [shape: f32[8,48], index: 8, kind: input, shape index: {}]   ;;  %s22657_s9 = inlined_call_operand.hbm [shape: f32[8,4096], index: 9, kind: output, shape index: {}]  }
   0x1   :  { %16 = vsyncpa [#allocation3 + $0x1], 0 }
   0x2   :  { %17 = vsyncpa [#allocation6], 0 }
   0x3   :  { %18 = vsyncpa [#allocation4], 0 }
   0x4   :  { %20 = vsyncpa [#allocation4 + $0x1], 0  ;;  %s14818_s30 = smov 0   ;;  %s14820_s10 = smov 0  }
   0x5   :  { %s14822_s11 = smov 0   ;;  %s14824_s12 = smov 0  }
   0x6 LB: > { %s14839_s13 = sadd.s32 4294967295, %s14752_s12   ;;  %s12807_s14 = sadd.s32 4294967294, %s14752_s12   ;;  %s14752_s12 = sphi %s14824_s12, %s23627_s12   ;;  %s14748_s11 = sphi %s14822_s11, %s23630_s11   ;;  %s14744_s10 = sphi %s14820_s10, %s23629_s10   ;;  %s14740_s30 = sphi %s14818_s30, %s23628_s30  }
   0x7   : > { %p46_p0 = scmp.ne.s32.totalorder %s14744_s10, %s14740_s30  ;;  %p22658_p1 = scmp.eq.s32.totalorder %s14839_s13, 0 }
   0x8   : > { %p244_p3 = scmp.eq.s32.totalorder %s12807_s14, 1  ;;  %p12808_p5 = scmp.ge.s32.totalorder %s14752_s12, 1 }
   0x9   : > { %p14848_p4 = por %p22658_p1, %p46_p0  ;;  %p251_p7 = scmp.lt.s32.totalorder %s14752_s12, 3 }
   0xa   : > { %p14853_p6 = por %p244_p3, %p46_p0  ;;  %s14754_s18 = smov [#allocation5]  }
   0xb   : > { %s22942_s15 = scalar_select %p14848_p4, 1, 0 }
   0xc   : > { %s22943_s16 = scalar_select %p14853_p6, 1, 0 }
   0xd   : > { %p14858_p8 = pnand %p12808_p5, %p251_p7  ;;  %s269_s19 = sshll.u32 %s14754_s18, 4  ;;  %s14862_s19 = int_to_ptr.vmem [resolvable:$true] %s269_s19 }
   0xe   : > { %22944 = sst [smem:[#allocation11_spill]] %s22943_s16  ;;  %s14874_s21 = sadd.s32 1, %s14752_s12  }
   0xf   : > { %s22945_s17 = scalar_select %p14858_p8, 1, 0 }
  0x10   : > { %p14017_p9 = pneg %p14858_p8  ;;  %22947 = sst [smem:[#allocation12_spill]] %s14874_s21 }
  0x11   : > { %s33_s22 = sadd.s32 1, %s14748_s11  ;;  %s30_s23 = ssub.s32 %s14752_s12, %s14874_s21 }
  0x12   : > { %p14869_p11 = pnand %p14017_p9, %p22658_p1  ;;  %s14624_s26 = scalar_lea.hbm %s22651_s3, 2048 }
  0x13   : > { %p14625_p12 = scmp.ne.s32.totalorder %s22651_s3, %s14624_s26  ;;  %p14631_p5 = scmp.lt.u32.totalorder %s14624_s26, %s22651_s3 }
  0x14   : > { %p14626_p13 = pneg %p14869_p11 }
  0x16   : > { %p14627_p0 = pnand %p14626_p13, %p14625_p12 }
  0x18   : > { %p14628_p3 = pneg %p14627_p0 }
  0x1a   : > { %p14633_p7 = pnand %p14631_p5, %p14628_p3 }
  0x1c   : > { %14636 = shalt.err (!%p14633_p7)
}
  0x1d   : > { %s14637_s18 = scalar_lea.vmem %s14862_s19, 2048  ;;  %p14645_p2 = scmp.lt.s32.totalorder %s14862_s19, %s14862_s19 }
  0x1e   : > { %p14638_p9 = scmp.ne.s32.totalorder %s14862_s19, %s14637_s18  ;;  %p14646_p6 = scmp.lt.s32.totalorder %s14637_s18, %s14637_s18 }
  0x20   : > { %p14640_p10 = pnand %p14638_p9, %p14626_p13  ;;  %p14647_p4 = por %p14646_p6, %p14645_p2 }
  0x22   : > { %p14641_p1 = pneg %p14640_p10 }
  0x24   : > { %p14648_p8 = pnand %p14647_p4, %p14641_p1 }
  0x26   : > { %14651 = shalt.err (!%p14648_p8)
}
  0x27   : > { %s14755_s24 = smov 128   ;;  %s14756_s25 = smov 8  }
  0x28   : > { %14020 = dma.hbm_to_vmem [thread:$0]  (!%p14869_p11), %s22651_s3, 2048, %s14862_s19, [#allocation6], %s14755_s24, %s14755_s24, %s14756_s25  }
  0x29   : > { %p31_p2 = scmp.eq.s32.totalorder %s30_s23, 0  ;;  %p40_p1 = scmp.ne.s32.totalorder %s14748_s11, %s14744_s10 }
  0x2a   : > { %p41_p4 = scmp.eq.s32.totalorder %s14752_s12, 0  ;;  %p14030_p6 = scmp.lt.s32.totalorder %s14752_s12, 2 }
  0x2b   : > { %s14905_s28 = scalar_select %p31_p2, %s14748_s11, %s33_s22  }
  0x2c   : > { %p42_p8 = por %p41_p4, %p40_p1  ;;  %p22948_p10 = scmp.eq.s32.totalorder %s14839_s13, 1 }
  0x2d   : > { %s298_s14 = sand.u32 1, %s14748_s11   ;;  %s13175_s18 = sshll.u32 %s14752_s12, 10 }
  0x2e   : > { %p14909_p12 = por %p22948_p10, %p40_p1  ;;  %s12811_s21 = sshll.u32 %s298_s14, 6 }
  0x2f   : > { %s14918_s26 = scalar_lea.hbm %s22648_s0, %s13175_s18  ;;  %s302_s19 = scalar_lea.vmem [#allocation2], %s12811_s21 }
  0x30   : > { %s310_s22 = sshll.u32 %s302_s19, 4  ;;  %p14920_p11 = pnand %p14030_p6, %p42_p8  ;;  %s14924_s22 = int_to_ptr.vmem [resolvable:$true] %s310_s22 }
  0x31   : > { %s299_s24 = scalar_lea.sflag [#allocation3], %s298_s14  ;;  %s14652_s25 = scalar_lea.hbm %s14918_s26, 1024 }
  0x32   : > { %p14653_p13 = scmp.ne.s32.totalorder %s14918_s26, %s14652_s25  ;;  %p14654_p0 = pneg %p14920_p11 }
  0x33   : > { %s14657_s27 = scalar_lea.hbm %s22648_s0, 2048  ;;  %p14658_p7 = scmp.lt.u32.totalorder %s14918_s26, %s22648_s0 }
  0x34   : > { %p14655_p3 = pnand %p14654_p0, %p14653_p13  ;;  %p14659_p9 = scmp.lt.u32.totalorder %s14657_s27, %s14652_s25 }
  0x35   : > { %p14661_p1 = scmp.lt.u32.totalorder %s14652_s25, %s14918_s26 }
  0x36   : > { %p14656_p5 = pneg %p14655_p3  ;;  %p14660_p2 = por %p14659_p9, %p14658_p7 }
  0x38   : > { %p14662_p4 = por %p14661_p1, %p14660_p2 }
  0x3a   : > { %p14663_p6 = pnand %p14662_p4, %p14656_p5 }
  0x3c   : > { %14666 = shalt.err (!%p14663_p6)
}
  0x3d   : > { %s14667_s14 = scalar_lea.vmem %s14924_s22, 1024  ;;  %s14757_s19 = smov [#allocation2]  }
  0x3e   : > { %p14668_p8 = scmp.ne.s32.totalorder %s14924_s22, %s14667_s14  ;;  %s14672_s16 = sshll.u32 %s14757_s19, 4  ;;  %s14673_s16 = int_to_ptr.vmem [resolvable:$false] %s14672_s16 }
  0x3f   : > { %s14674_s21 = scalar_lea.vmem %s14673_s16, 2048  ;;  %p14675_p3 = scmp.lt.s32.totalorder %s14924_s22, %s14673_s16 }
  0x40   : > { %p14670_p10 = pnand %p14668_p8, %p14654_p0  ;;  %p14676_p7 = scmp.lt.s32.totalorder %s14674_s21, %s14667_s14 }
  0x42   : > { %p14671_p13 = pneg %p14670_p10  ;;  %p14677_p9 = por %p14676_p7, %p14675_p3 }
  0x44   : > { %p14678_p2 = pnand %p14677_p9, %p14671_p13 }
  0x46   : > { %14681 = shalt.err (!%p14678_p2)
}
  0x47   : > { %14024 = dma.hbm_to_vmem [thread:$0]  (!%p14920_p11), %s14918_s26, 1024, %s14924_s22, %s299_s24  }
  0x48   : > { %p22951_p5 = scmp.ne.s32.totalorder %s22945_s17, 0 }
  0x4a   : > { %319 = sbr.rel (%p22951_p5) target bundleno = 2137 (0x859), region = 56 }
  0x51   : > { %s14954_s25 = sand.u32 1, %s14744_s10   ;;  %p22952_p0 = scmp.ne.s32.totalorder %s22942_s15, 0 }
  0x52   : > { %s12815_s27 = sshll.u32 %s14954_s25, 6  ;;  %s322_s18 = scalar_lea.sflag [#allocation3], %s14954_s25 }
  0x53   : > { %s14958_s20 = scalar_lea.vmem [#allocation2], %s12815_s27 }
  0x54   : > { %14727 = dma.done.wait (%p22952_p0), %s322_s18, 1024  }
  0x55   : > { %14729 = vsyncadd (%p22952_p0), %s322_s18, 4294966272  ;;  %p22953_p11 = scmp.eq.s32.totalorder %s14839_s13, 0 }
  0x57   : > { %14731 = dma.done.wait (%p22953_p11), [#allocation6], 2048   ;;  %p22954_p1 = pmov %p22953_p11 }
  0x58   : > { %v22664_v0 = vmov 0.0   ;;  %v14759_v1 = vmov 0   ;;  %v366_v2 = vld [vmem:[%s14958_s20] sm:$0x77]  ;;  %vm431_vm0 = vcmask 1042432   ;;  %vm418_vm1 = vcmask 23552  }
  0x59   : > { %14733 = vsyncadd (%p22954_p1), [#allocation6], 4294965248  ;;  %528 = vmatprep.mubr.f32.mxu0 %v22664_v0  ;;  %617 = vmatprep.mubr.f32.mxu1 %v22664_v0  ;;  %v367_v3 = vld [vmem:[%s14958_s20 + $0x8] sm:$0x77]  ;;  %v410_v4 = vcombine.high %v366_v2, %v366_v2  ;;  %v14977_v6 = vld [vmem:[%s22649_s1] sm:$0xff]  ;;  %v14760_v26 = vmov 1  }
  0x5a   : > { %14078 = vset.pattern.permute.xlu1 %v14759_v1  ;;  %14077 = vset.pattern.permute.xlu0 %v14759_v1  ;;  %v411_v5 = vcombine.high %v367_v3, %v367_v3  ;;  %v368_v7 = vld [vmem:[%s14958_s20 + $0x10] sm:$0x77]  ;;  %v369_v8 = vld [vmem:[%s14958_s20 + $0x18] sm:$0x77]  ;;  %v370_v11 = vld [vmem:[%s14958_s20 + $0x20] sm:$0x77]  ;;  %v1656_v27 = vmul.f32 %v14977_v6, %v14977_v6 }
  0x5b   : > { %12818 = vmatprep.subr.msk.mxu0 %vm431_vm0, %v410_v4  ;;  %v412_v9 = vcombine.high %v368_v7, %v368_v7  ;;  %v413_v10 = vcombine.high %v369_v8, %v369_v8  ;;  %v371_v12 = vld [vmem:[%s14958_s20 + $0x28] sm:$0x77]  ;;  %v414_v14 = vcombine.high %v370_v11, %v370_v11  ;;  %v380_v16 = vld [vmem:[%s22650_s2 + $0x10] sm:$0xff]  ;;  %v378_v17 = vld [vmem:[%s22650_s2] sm:$0xff]  ;;  %s13176_s24 = sshll.u32 %s14839_s13, 11  ;;  %s12713_s13 = scalar_lea.sflag [#allocation4], %s14954_s25 }
  0x5c   : > { %12824 = vmatprep.subr.msk.mxu1 %vm431_vm0, %v411_v5  ;;  %12819 = vmatpush1.msk.msra.mxu0 %vm431_vm0, %v366_v2  ;;  %v14996_v13 = vld [vmem:[%s22649_s1 + $0x8] sm:$0xff]  ;;  %v415_v15 = vcombine.high %v371_v12, %v371_v12  ;;  %v15017_v18 = vld [vmem:[%s22649_s1 + $0x10] sm:$0xff]  ;;  %v381_v19 = vld [vmem:[%s22650_s2 + $0x18] sm:$0xff]  ;;  %s22602_s21 = scalar_lea.hbm %s22657_s9, %s13176_s24  ;;  %s14767_s18 = smov [#allocation7]  }
  0x5d   : > { %12825 = vmatpush1.msk.msra.mxu1 %vm431_vm0, %v367_v3  ;;  %12820 = vmatmul.mubr.msk.f32.vlgmr.msra.gmra.mrb[0].mxu0 %vm418_vm1, %v14977_v6  ;;  %v379_v20 = vld [vmem:[%s22650_s2 + $0x8] sm:$0xff]  ;;  %v15036_v21 = vld [vmem:[%s22649_s1 + $0x18] sm:$0xff]  ;;  %v372_v22 = vld [vmem:[%s14958_s20 + $0x30] sm:$0x77]  ;;  %v1657_v28 = vmul.f32 %v14996_v13, %v14996_v13  ;;  %v1658_v29 = vmul.f32 %v15017_v18, %v15017_v18  ;;  %s14686_s15 = sshll.u32 %s14767_s18, 4  ;;  %s14687_s15 = int_to_ptr.vmem [resolvable:$false] %s14686_s15 }
  0x5e   : > { %12826 = vmatmul.mubr.msk.f32.vlgmr.msra.gmra.mrb[0].mxu1 %vm418_vm1, %v14977_v6  ;;  %534 = vmatprep.mubr.f32.mxu0 %v22664_v0  ;;  %v373_v23 = vld [vmem:[%s14958_s20 + $0x38] sm:$0x77]  ;;  %v416_v24 = vcombine.high %v372_v22, %v372_v22  ;;  %v3048_v30 = vld [vmem:[%s22652_s4] sm:$0xff]  ;;  %v1659_v31 = vmul.f32 %v15036_v21, %v15036_v21  ;;  %v3050_v32 = vld [vmem:[%s22652_s4 + $0x10] sm:$0xff]  ;;  %s12817_s20 = sshll.u32 %s14954_s25, 7  ;;  %s14688_s17 = scalar_lea.vmem %s14687_s15, 4096 }
  0x5f   : > { %623 = vmatprep.mubr.f32.mxu1 %v22664_v0  ;;  %12830 = vmatprep.subr.msk.mxu0 %vm431_vm0, %v412_v9  ;;  %v417_v25 = vcombine.high %v373_v23, %v373_v23  ;;  %v3049_v33 = vld [vmem:[%s22652_s4 + $0x8] sm:$0xff]  ;;  %v12674_v34 = vld [vmem:[%s22654_s6] sm:$0xff]  ;;  %v3051_v35 = vld [vmem:[%s22652_s4 + $0x18] sm:$0xff]  ;;  %s22538_s23 = scalar_lea.vmem [#allocation7], %s12817_s20 }
  0x60   : > { %12836 = vmatprep.subr.msk.mxu1 %vm431_vm0, %v413_v10  ;;  %12831 = vmatpush1.msk.msra.mxu0 %vm431_vm0, %v368_v7  ;;  %s12727_s14 = sshll.u32 %s22538_s23, 4  ;;  %s22604_s14 = int_to_ptr.vmem [resolvable:$true] %s12727_s14 }
  0x61   : > { %12837 = vmatpush1.msk.msra.mxu1 %vm431_vm0, %v369_v8  ;;  %12821 = vmatmul.mubr.msk.f32.gmra.mrb[2].mxu0 %vm418_vm1, %v14996_v13  ;;  %s14682_s27 = scalar_lea.vmem %s22604_s14, 2048  ;;  %p14689_p10 = scmp.lt.s32.totalorder %s22604_s14, %s14687_s15 }
  0x62   : > { %12827 = vmatmul.mubr.msk.f32.gmra.mrb[2].mxu1 %vm418_vm1, %v14996_v13  ;;  %540 = vmatprep.mubr.f32.mxu0 %v22664_v0  ;;  %p14683_p4 = scmp.ne.s32.totalorder %s22604_s14, %s14682_s27  ;;  %p14690_p13 = scmp.lt.s32.totalorder %s14688_s17, %s14682_s27 }
  0x63   : > { %629 = vmatprep.mubr.f32.mxu1 %v22664_v0  ;;  %12842 = vmatprep.subr.msk.mxu0 %vm431_vm0, %v414_v14 }
  0x64   : > { %12848 = vmatprep.subr.msk.mxu1 %vm431_vm0, %v415_v15  ;;  %394 = vperm.xlu1 %14078, %v380_v16   ;;  %p14684_p6 = pnand %p14683_p4, %p14909_p12  ;;  %p14691_p3 = por %p14690_p13, %p14689_p10 }
  0x65   : > { %384 = vperm.xlu0 %14077, %v378_v17   ;;  %12822 = vmatmul.mubr.msk.f32.gmra.mrb[4].mxu0 %vm418_vm1, %v15017_v18 }
  0x66   : > { %12828 = vmatmul.mubr.msk.f32.gmra.mrb[4].mxu1 %vm418_vm1, %v15017_v18  ;;  %546 = vmatprep.mubr.f32.mxu0 %v22664_v0  ;;  %p14685_p8 = pneg %p14684_p6 }
  0x67   : > { %635 = vmatprep.mubr.f32.mxu1 %v22664_v0 }
  0x68   : > { %399 = vperm.xlu1 %14078, %v381_v19   ;;  %p14692_p7 = pnand %p14691_p3, %p14685_p8 }
  0x69   : > { %389 = vperm.xlu0 %14077, %v379_v20   ;;  %12823 = vmatmul.mubr.msk.f32.gmra.mrb[6].mxu0 %vm418_vm1, %v15036_v21 }
  0x6a   : > { %12829 = vmatmul.mubr.msk.f32.gmra.mrb[6].mxu1 %vm418_vm1, %v15036_v21  ;;  %706 = vmatprep.mubr.f32.mxu0 %v22664_v0 }
  0x6b   : > { %795 = vmatprep.mubr.f32.mxu1 %v22664_v0 }
  0x6c   : > { %1373 = vperm.xlu1 %14078, %v14996_v13  }
  0x6d   : > { %1369 = vperm.xlu0 %14077, %v14977_v6   ;;  %12832 = vmatmul.mubr.msk.f32.vlgmr.msra.gmra.mrb[8].mxu0 %vm418_vm1, %v14977_v6 }
  0x6e   : > { %12838 = vmatmul.mubr.msk.f32.vlgmr.msra.gmra.mrb[8].mxu1 %vm418_vm1, %v14977_v6  ;;  %712 = vmatprep.mubr.f32.mxu0 %v22664_v0 }
  0x6f   : > { %801 = vmatprep.mubr.f32.mxu1 %v22664_v0  ;;  %12843 = vmatpush1.msk.msra.mxu0 %vm431_vm0, %v370_v11 }
  0x70   : > { %12849 = vmatpush1.msk.msra.mxu1 %vm431_vm0, %v371_v12  ;;  %12854 = vmatprep.subr.msk.mxu0 %vm431_vm0, %v416_v24 }
  0x71   : > { %12860 = vmatprep.subr.msk.mxu1 %vm431_vm0, %v417_v25  ;;  %12833 = vmatmul.mubr.msk.f32.gmra.mrb[10].mxu0 %vm418_vm1, %v14996_v13 }
  0x72   : > { %12839 = vmatmul.mubr.msk.f32.gmra.mrb[10].mxu1 %vm418_vm1, %v14996_v13  ;;  %718 = vmatprep.mubr.f32.mxu0 %v22664_v0 }
  0x73   : > { %807 = vmatprep.mubr.f32.mxu1 %v22664_v0  ;;  %1381 = vperm.xlu1 %14078, %v15036_v21  }
  0x74   : > { %1377 = vperm.xlu0 %14077, %v15017_v18  }
  0x75   : > { %12834 = vmatmul.mubr.msk.f32.gmra.mrb[12].mxu0 %vm418_vm1, %v15017_v18 }
  0x76   : > { %12840 = vmatmul.mubr.msk.f32.gmra.mrb[12].mxu1 %vm418_vm1, %v15017_v18  ;;  %724 = vmatprep.mubr.f32.mxu0 %v22664_v0 }
  0x77   : > { %813 = vmatprep.mubr.f32.mxu1 %v22664_v0  ;;  %14080 = vset.pattern.permute.xlu1 %v14760_v26 }
  0x78   : > { %14079 = vset.pattern.permute.xlu0 %v14760_v26  ;;  %1453 = vperm.xlu1 %14080, %v14996_v13  }
  0x79   : > { %1449 = vperm.xlu0 %14079, %v14977_v6   ;;  %12835 = vmatmul.mubr.msk.f32.gmra.mrb[14].mxu0 %vm418_vm1, %v15036_v21 }
  0x7a   : > { %12841 = vmatmul.mubr.msk.f32.gmra.mrb[14].mxu1 %vm418_vm1, %v15036_v21  ;;  %884 = vmatprep.mubr.f32.mxu0 %v22664_v0 }
  0x7b   : > { %973 = vmatprep.mubr.f32.mxu1 %v22664_v0 }
  0x7c   : > { %1457 = vperm.xlu1 %14080, %v15017_v18  }
  0x7d   : > { %1461 = vperm.xlu0 %14079, %v15036_v21   ;;  %12844 = vmatmul.mubr.msk.f32.vlgmr.msra.gmra.mrb[16].mxu0 %vm418_vm1, %v14977_v6 }
  0x7e   : > { %12850 = vmatmul.mubr.msk.f32.vlgmr.msra.gmra.mrb[16].mxu1 %vm418_vm1, %v14977_v6  ;;  %890 = vmatprep.mubr.f32.mxu0 %v22664_v0 }
  0x7f   : > { %979 = vmatprep.mubr.f32.mxu1 %v22664_v0  ;;  %12855 = vmatpush1.msk.msra.mxu0 %vm431_vm0, %v372_v22 }
  0x80   : > { %12861 = vmatpush1.msk.msra.mxu1 %vm431_vm0, %v373_v23  ;;  %14081 = vset.pattern.permute.xlu1 %v14759_v1 }
  0x81   : > { %14082 = vset.pattern.permute.xlu0 %v14759_v1  ;;  %12845 = vmatmul.mubr.msk.f32.gmra.mrb[18].mxu0 %vm418_vm1, %v14996_v13 }
  0x82   : > { %12851 = vmatmul.mubr.msk.f32.gmra.mrb[18].mxu1 %vm418_vm1, %v14996_v13  ;;  %896 = vmatprep.mubr.f32.mxu0 %v22664_v0 }
  0x83   : > { %985 = vmatprep.mubr.f32.mxu1 %v22664_v0  ;;  %1662 = vperm.xlu1 %14081, %v1656_v27  }
  0x84   : > { %1667 = vperm.xlu0 %14082, %v1657_v28  }
  0x85   : > { %12846 = vmatmul.mubr.msk.f32.gmra.mrb[20].mxu0 %vm418_vm1, %v15017_v18 }
  0x86   : > { %12852 = vmatmul.mubr.msk.f32.gmra.mrb[20].mxu1 %vm418_vm1, %v15017_v18  ;;  %902 = vmatprep.mubr.f32.mxu0 %v22664_v0 }
  0x87   : > { %991 = vmatprep.mubr.f32.mxu1 %v22664_v0  ;;  %1672 = vperm.xlu1 %14081, %v1658_v29  }
  0x88   : > { %3054 = vperm.xlu0 %14082, %v3048_v30  }
  0x89   : > { %12847 = vmatmul.mubr.msk.f32.gmra.mrb[22].mxu0 %vm418_vm1, %v15036_v21 }
  0x8a   : > { %12853 = vmatmul.mubr.msk.f32.gmra.mrb[22].mxu1 %vm418_vm1, %v15036_v21  ;;  %1062 = vmatprep.mubr.f32.mxu0 %v22664_v0 }
  0x8b   : > { %1151 = vmatprep.mubr.f32.mxu1 %v22664_v0  ;;  %1677 = vperm.xlu1 %14081, %v1659_v31  }
  0x8c   : > { %3064 = vperm.xlu0 %14082, %v3050_v32  }
  0x8d   : > { %12856 = vmatmul.mubr.msk.f32.vlgmr.msra.gmra.mrb[24].mxu0 %vm418_vm1, %v14977_v6 }
  0x8e   : > { %12862 = vmatmul.mubr.msk.f32.vlgmr.msra.gmra.mrb[24].mxu1 %vm418_vm1, %v14977_v6  ;;  %1068 = vmatprep.mubr.f32.mxu0 %v22664_v0 }
  0x8f   : > { %1157 = vmatprep.mubr.f32.mxu1 %v22664_v0  ;;  %3059 = vperm.xlu1 %14081, %v3049_v33  }
  0x90   : > { %12677 = vperm.xlu0 %14082, %v12674_v34  }
  0x91   : > { %12857 = vmatmul.mubr.msk.f32.gmra.mrb[26].mxu0 %vm418_vm1, %v14996_v13 }
  0x92   : > { %12863 = vmatmul.mubr.msk.f32.gmra.mrb[26].mxu1 %vm418_vm1, %v14996_v13  ;;  %1074 = vmatprep.mubr.f32.mxu0 %v22664_v0 }
  0x93   : > { %1163 = vmatprep.mubr.f32.mxu1 %v22664_v0  ;;  %3069 = vperm.xlu1 %14081, %v3051_v35  }
  0x95   : > { %12858 = vmatmul.mubr.msk.f32.gmra.mrb[28].mxu0 %vm418_vm1, %v15017_v18 }
  0x96   : > { %12864 = vmatmul.mubr.msk.f32.gmra.mrb[28].mxu1 %vm418_vm1, %v15017_v18  ;;  %1080 = vmatprep.mubr.f32.mxu0 %v22664_v0 }
  0x97   : > { %1169 = vmatprep.mubr.f32.mxu1 %v22664_v0 }
  0x99   : > { %12859 = vmatmul.mubr.msk.f32.gmra.mrb[30].mxu0 %vm418_vm1, %v15036_v21 }
  0x9a   : > { %12865 = vmatmul.mubr.msk.f32.gmra.mrb[30].mxu1 %vm418_vm1, %v15036_v21  ;;  %1824 = vmatprep.mubr.f32.mxu0 %v22664_v0 }
  0x9b   : > { %1985 = vmatprep.mubr.f32.mxu1 %v22664_v0 }
  0xe3   : > { %v15163_v45 = vpop.permute.xlu1 %394 }
  0xe4   : > { %v15157_v36 = vpop.permute.xlu0 %384 }
  0xe7   : > { %v15175_v63 = vpop.permute.xlu1 %399 }
  0xe8   : > { %v15165_v46 = vpop.permute.xlu0 %389 }
  0xeb   : > { %v15217_v33 = vpop.permute.xlu1 %1373 }
  0xec   : > { %22955 = vst [vmem:[#allocation13_spill] sm:$0xff] %v15217_v33 }
 0x130   : > { %v530_v37 = vpop.f32.mrb[0].mxu0 }
 0x131   : > { %v619_v38 = vpop.f32.mrb[0].mxu1  ;;  %v531_v39 = vadd.f32 %v530_v37, %v15157_v36  ;;  %v532_v41 = vpop.f32.mrb[1].mxu0 }
 0x132   : > { %v620_v40 = vadd.f32 %v619_v38, %v15157_v36  ;;  %v621_v42 = vpop.f32.mrb[1].mxu1  ;;  %v533_v43 = vadd.f32 %v532_v41, %v15157_v36 }
 0x133   : > { %v622_v44 = vadd.f32 %v621_v42, %v15157_v36  ;;  %14091 = vtanh.f32 %v531_v39 }
 0x134   : > { %14093 = vtanh.f32 %v620_v40  ;;  %v536_v47 = vpop.f32.mrb[2].mxu0 }
 0x135   : > { %v625_v48 = vpop.f32.mrb[2].mxu1  ;;  %14095 = vtanh.f32 %v533_v43  ;;  %v537_v49 = vadd.f32 %v536_v47, %v15165_v46  ;;  %v538_v51 = vpop.f32.mrb[3].mxu0 }
 0x136   : > { %v626_v50 = vadd.f32 %v625_v48, %v15165_v46  ;;  %v627_v52 = vpop.f32.mrb[3].mxu1  ;;  %14097 = vtanh.f32 %v622_v44  ;;  %v539_v53 = vadd.f32 %v538_v51, %v15165_v46 }
 0x137   : > { %v628_v54 = vadd.f32 %v627_v52, %v15165_v46  ;;  %14099 = vtanh.f32 %v537_v49 }
 0x138   : > { %14101 = vtanh.f32 %v626_v50  ;;  %v542_v55 = vpop.f32.mrb[4].mxu0 }
 0x139   : > { %v631_v56 = vpop.f32.mrb[4].mxu1  ;;  %14103 = vtanh.f32 %v539_v53  ;;  %v543_v57 = vadd.f32 %v542_v55, %v15163_v45  ;;  %v544_v59 = vpop.f32.mrb[5].mxu0 }
 0x13a   : > { %v632_v58 = vadd.f32 %v631_v56, %v15163_v45  ;;  %v633_v60 = vpop.f32.mrb[5].mxu1  ;;  %14105 = vtanh.f32 %v628_v54  ;;  %v545_v61 = vadd.f32 %v544_v59, %v15163_v45  ;;  %v15240_v53 = vpop.permute.xlu0 %1369 }
 0x13b   : > { %v634_v62 = vadd.f32 %v633_v60, %v15163_v45  ;;  %14107 = vtanh.f32 %v543_v57  ;;  %22957 = vst [vmem:[#allocation15_spill] sm:$0xff] %v15240_v53 }
 0x13c   : > { %14109 = vtanh.f32 %v632_v58  ;;  %v548_v1 = vpop.f32.mrb[6].mxu0 }
 0x13d   : > { %v637_v2 = vpop.f32.mrb[6].mxu1  ;;  %v15177_v3 = vpop.eup %14091  ;;  %14111 = vtanh.f32 %v545_v61  ;;  %v549_v4 = vadd.f32 %v548_v1, %v15175_v63 }
 0x13e   : > { %v638_v5 = vadd.f32 %v637_v2, %v15175_v63  ;;  %v550_v6 = vpop.f32.mrb[7].mxu0  ;;  %v639_v7 = vpop.f32.mrb[7].mxu1  ;;  %14113 = vtanh.f32 %v634_v62  ;;  %v1240_v11 = vmul.f32 %v15177_v3, %v15177_v3  ;;  %v15192_v14 = vmul.f32 -2.0, %v15177_v3 }
 0x13f   : > { %v15181_v8 = vpop.eup %14093  ;;  %v551_v9 = vadd.f32 %v550_v6, %v15175_v63  ;;  %v640_v10 = vadd.f32 %v639_v7, %v15175_v63  ;;  %14115 = vtanh.f32 %v549_v4 }
 0x140   : > { %v14096_v12 = vpop.eup %14095  ;;  %v15189_v13 = vmul.f32 %v15181_v8, %v15181_v8  ;;  %v15195_v15 = vmul.f32 -2.0, %v15181_v8  ;;  %14117 = vtanh.f32 %v638_v5  ;;  %v708_v17 = vpop.f32.mrb[8].mxu0  ;;  %v15199_v20 = vsub.f32 1.0, %v1240_v11 }
 0x141   : > { %v15197_v16 = vpop.eup %14097  ;;  %v797_v18 = vpop.f32.mrb[8].mxu1  ;;  %v1241_v19 = vmul.f32 %v14096_v12, %v14096_v12  ;;  %v15201_v21 = vmul.f32 -2.0, %v14096_v12  ;;  %14119 = vtanh.f32 %v551_v9  ;;  %v709_v23 = vadd.f32 %v708_v17, %v15157_v36 }
 0x142   : > { %v15203_v22 = vpop.eup %14099  ;;  %v798_v24 = vadd.f32 %v797_v18, %v15157_v36  ;;  %v710_v25 = vpop.f32.mrb[9].mxu0  ;;  %v1243_v27 = vmul.f32 %v15197_v16, %v15197_v16  ;;  %14121 = vtanh.f32 %v640_v10  ;;  %v15264_v4 = vmul.f32 %v15240_v53, %v15199_v20 }
 0x143   : > { %v799_v26 = vpop.f32.mrb[9].mxu1  ;;  %v15209_v28 = vpop.eup %14101  ;;  %v711_v29 = vadd.f32 %v710_v25, %v15157_v36  ;;  %v13179_v31 = vpack.c.bf16 %v15203_v22, %v15177_v3  ;;  %14123 = vtanh.f32 %v709_v23  ;;  %v15221_v35 = vsub.f32 1.0, %v1241_v19 }
 0x144   : > { %v800_v30 = vadd.f32 %v799_v26, %v15157_v36  ;;  %v15215_v32 = vpop.eup %14103  ;;  %v13211_v34 = vpack.c.bf16 %v15209_v28, %v15181_v8  ;;  %v15223_v37 = vsub.f32 1.0, %v1243_v27  ;;  %14125 = vtanh.f32 %v798_v24  ;;  %v714_v39 = vpop.f32.mrb[10].mxu0 }
 0x145   : > { %v15225_v38 = vpop.eup %14105  ;;  %v803_v40 = vpop.f32.mrb[10].mxu1  ;;  %v13177_v41 = vpack.c.bf16 %v15215_v32, %v14096_v12  ;;  %v1257_v42 = vmul.f32 %v15215_v32, %v15215_v32  ;;  %v1256_v43 = vmul.f32 %v15203_v22, %v15203_v22  ;;  %14127 = vtanh.f32 %v711_v29 }
 0x146   : > { %v15232_v44 = vpop.eup %14107  ;;  %v715_v47 = vadd.f32 %v714_v39, %v15165_v46  ;;  %v804_v48 = vadd.f32 %v803_v40, %v15165_v46  ;;  %v716_v49 = vpop.f32.mrb[11].mxu0  ;;  %v13209_v51 = vpack.c.bf16 %v15225_v38, %v15197_v16  ;;  %14129 = vtanh.f32 %v800_v30 }
 0x147   : > { %v805_v50 = vpop.f32.mrb[11].mxu1  ;;  %v15238_v52 = vpop.eup %14109  ;;  %v717_v54 = vadd.f32 %v716_v49, %v15165_v46  ;;  %13178 = vmatprep.subr.bf16.mxu0 %v13177_v41  ;;  %v15244_v56 = vsub.f32 1.0, %v1257_v42  ;;  %v1385_v58 = vmul.f32 %v15240_v53, %v15221_v35  ;;  %v1259_v59 = vmul.f32 %v15225_v38, %v15225_v38 }
 0x148   : > { %22956 = vst [vmem:[#allocation14_spill] sm:$0xff] %v15238_v52  ;;  %v806_v55 = vadd.f32 %v805_v50, %v15165_v46  ;;  %v15246_v57 = vpop.eup %14111  ;;  %14131 = vtanh.f32 %v715_v47  ;;  %13210 = vmatprep.subr.bf16.mxu1 %v13209_v51  ;;  %13180 = vmatpush1.bf16.msra.mxu0 %v13179_v31  ;;  %v15254_v60 = vmul.f32 %v15240_v53, %v15223_v37  ;;  %v720_v62 = vpop.f32.mrb[12].mxu0  ;;  %v15260_v3 = vsub.f32 1.0, %v1256_v43 }
 0x149   : > { %v15256_v61 = vpop.eup %14113  ;;  %14133 = vtanh.f32 %v804_v48  ;;  %13212 = vmatpush1.bf16.msra.mxu1 %v13211_v34  ;;  %v809_v1 = vpop.f32.mrb[12].mxu1  ;;  %v1401_v2 = vmul.f32 %v15217_v33, %v15244_v56  ;;  %v721_v6 = vadd.f32 %v720_v62, %v15163_v45  ;;  %v15270_v10 = vsub.f32 1.0, %v1259_v59 }
 0x14a   : > { %v15266_v5 = vpop.eup %14115  ;;  %14135 = vtanh.f32 %v717_v54  ;;  %v810_v7 = vadd.f32 %v809_v1, %v15163_v45  ;;  %v722_v8 = vpop.f32.mrb[13].mxu0  ;;  %v1400_v34 = vmul.f32 %v15217_v33, %v15260_v3  ;;  %v1258_v39 = vmul.f32 %v15209_v28, %v15209_v28 }
 0x14b   : > { %v811_v9 = vpop.f32.mrb[13].mxu1  ;;  %v15272_v11 = vpop.eup %14117  ;;  %14137 = vtanh.f32 %v806_v55  ;;  %v723_v12 = vadd.f32 %v722_v8, %v15163_v45  ;;  %v13183_v18 = vpack.c.bf16 %v15266_v5, %v15232_v44  ;;  %v13185_v25 = vpack.c.bf16 %v1401_v2, %v1385_v58 }
 0x14c   : > { %22958 = vst [vmem:[#allocation16_spill] sm:$0xff] %v15272_v11  ;;  %v812_v17 = vadd.f32 %v811_v9, %v15163_v45  ;;  %v15278_v19 = vpop.eup %14119  ;;  %v15280_v23 = vpop.permute.xlu1 %1381  ;;  %14139 = vtanh.f32 %v721_v6  ;;  %v13215_v24 = vpack.c.bf16 %v15272_v11, %v15238_v52  ;;  %v1403_v26 = vmul.f32 %v15217_v33, %v15270_v10 }
 0x14d   : > { %22959 = vst [vmem:[#allocation17_spill] sm:$0xff] %v15280_v23  ;;  %v15286_v27 = vpop.eup %14121  ;;  %14141 = vtanh.f32 %v810_v7  ;;  %v726_v29 = vpop.f32.mrb[14].mxu0  ;;  %v13181_v31 = vpack.c.bf16 %v15278_v19, %v15246_v57  ;;  %v13187_v58 = vpack.c.bf16 %v1400_v34, %v15264_v4  ;;  %v15309_v59 = vsub.f32 1.0, %v15189_v13 }
 0x14e   : > { %v815_v30 = vpop.f32.mrb[14].mxu1  ;;  %v15294_v40 = vpop.eup %14123  ;;  %14143 = vtanh.f32 %v723_v12  ;;  %v727_v41 = vadd.f32 %v726_v29, %v15175_v63  ;;  %v13213_v48 = vpack.c.bf16 %v15286_v27, %v15256_v61  ;;  %v13217_v54 = vpack.c.bf16 %v1403_v26, %v15254_v60 }
 0x14f   : > { %22960 = vst [vmem:[#allocation18_spill] sm:$0xff] %v15294_v40  ;;  %v816_v42 = vadd.f32 %v815_v30, %v15175_v63  ;;  %v728_v43 = vpop.f32.mrb[15].mxu0  ;;  %v817_v47 = vpop.f32.mrb[15].mxu1  ;;  %14145 = vtanh.f32 %v812_v17  ;;  %13182 = vmatprep.subr.bf16.mxu0 %v13181_v31  ;;  %v15311_v62 = vsub.f32 1.0, %v1258_v39  ;;  %v1273_v60 = vmul.f32 %v15246_v57, %v15246_v57 }
 0x150   : > { %v15300_v49 = vpop.eup %14125  ;;  %v729_v50 = vadd.f32 %v728_v43, %v15175_v63  ;;  %v818_v51 = vadd.f32 %v817_v47, %v15175_v63  ;;  %14147 = vtanh.f32 %v727_v41  ;;  %13214 = vmatprep.subr.bf16.mxu1 %v13213_v48  ;;  %13184 = vmatpush1.bf16.msra.mxu0 %v13183_v18  ;;  %v886_v2 = vpop.f32.mrb[16].mxu0  ;;  %v1289_v7 = vmul.f32 %v15278_v19, %v15278_v19 }
 0x151   : > { %22961 = vst [vmem:[#allocation19_spill] sm:$0xff] %v15300_v49  ;;  %v15305_v55 = vpop.eup %14127  ;;  %14149 = vtanh.f32 %v816_v42  ;;  %13216 = vmatpush1.bf16.msra.mxu1 %v13215_v24  ;;  %13186 = vmatprep.subr.bf16.mxu0 %v13185_v25  ;;  %v975_v6 = vpop.f32.mrb[16].mxu1  ;;  %v1275_v4 = vmul.f32 %v15256_v61, %v15256_v61  ;;  %v887_v8 = vadd.f32 %v886_v2, %v15157_v36  ;;  %v15339_v39 = vsub.f32 1.0, %v1273_v60 }
 0x152   : > { %22962 = vst [vmem:[#allocation20_spill] sm:$0xff] %v15305_v55  ;;  %v15313_v1 = vpop.eup %14129  ;;  %14151 = vtanh.f32 %v729_v50  ;;  %13218 = vmatprep.subr.bf16.mxu1 %v13217_v54  ;;  %v976_v9 = vadd.f32 %v975_v6, %v15157_v36  ;;  %v888_v12 = vpop.f32.mrb[17].mxu0  ;;  %v1386_v18 = vmul.f32 %v15240_v53, %v15309_v59  ;;  %v1402_v29 = vmul.f32 %v15217_v33, %v15311_v62 }
 0x153   : > { %22963 = vst [vmem:[#allocation21_spill] sm:$0xff] %v15313_v1  ;;  %v15321_v13 = vpop.eup %14131  ;;  %v977_v17 = vpop.f32.mrb[17].mxu1  ;;  %14153 = vtanh.f32 %v818_v51  ;;  %v889_v25 = vadd.f32 %v888_v12, %v15157_v36  ;;  %v15341_v41 = vsub.f32 1.0, %v1289_v7  ;;  %v1291_v42 = vmul.f32 %v15286_v27, %v15286_v27 }
 0x154   : > { %22964 = vst [vmem:[#allocation22_spill] sm:$0xff] %v15321_v13  ;;  %v15327_v24 = vpop.eup %14133  ;;  %v978_v26 = vadd.f32 %v977_v17, %v15157_v36  ;;  %v15335_v31 = vpop.permute.xlu0 %1377  ;;  %14155 = vtanh.f32 %v887_v8  ;;  %13188 = vmatpush1.bf16.msra.mxu0 %v13187_v58  ;;  %v13219_v47 = vpack.c.bf16 %v1402_v29, %v1386_v18  ;;  %v15347_v48 = vsub.f32 1.0, %v1275_v4 }
 0x155   : > { %22965 = vst [vmem:[#allocation23_spill] sm:$0xff] %v15327_v24  ;;  %v15333_v30 = vpop.eup %14135  ;;  %22967 = vst [vmem:[#allocation25_spill] sm:$0xff] %v15335_v31  ;;  %v15337_v34 = vpop.permute.xlu1 %1453  ;;  %14157 = vtanh.f32 %v976_v9  ;;  %v1272_v54 = vmul.f32 %v15232_v44, %v15232_v44  ;;  %v1417_v58 = vmul.f32 %v15335_v31, %v15339_v39  ;;  %v1433_v6 = vmul.f32 %v15280_v23, %v15341_v41 }
 0x156   : > { %22966 = vst [vmem:[#allocation24_spill] sm:$0xff] %v15333_v30  ;;  %22968 = vst [vmem:[#allocation26_spill] sm:$0xff] %v15337_v34  ;;  %v15345_v43 = vpop.eup %14137  ;;  %v892_v50 = vpop.f32.mrb[18].mxu0  ;;  %14159 = vtanh.f32 %v889_v25  ;;  %v15357_v60 = vsub.f32 1.0, %v1291_v42  ;;  %13220 = vmatpush1.bf16.msra.mxu1 %v13219_v47  ;;  %v1419_v9 = vmul.f32 %v15335_v31, %v15347_v48 }
 0x157   : > { %22969 = vst [vmem:[#allocation27_spill] sm:$0xff] %v15345_v43  ;;  %v981_v51 = vpop.f32.mrb[18].mxu1  ;;  %v15351_v2 = vpop.eup %14139  ;;  %14161 = vtanh.f32 %v978_v26  ;;  %v893_v12 = vadd.f32 %v892_v50, %v15165_v46  ;;  %v13189_v29 = vpack.c.bf16 %v1433_v6, %v1417_v58  ;;  %v1288_v50 = vmul.f32 %v15266_v5, %v15266_v5 }
 0x158   : > { %22970 = vst [vmem:[#allocation28_spill] sm:$0xff] %v15351_v2  ;;  %v894_v7 = vpop.f32.mrb[19].mxu0  ;;  %v983_v8 = vpop.f32.mrb[19].mxu1  ;;  %v982_v17 = vadd.f32 %v981_v51, %v15165_v46  ;;  %v1435_v42 = vmul.f32 %v15280_v23, %v15357_v60  ;;  %v15377_v33 = vsub.f32 1.0, %v1272_v54  ;;  %v1274_v51 = vmul.f32 %v15238_v52, %v15238_v52 }
 0x159   : > { %v15359_v4 = vpop.eup %14141  ;;  %v15367_v25 = vpop.permute.xlu0 %1449  ;;  %v895_v0 = vadd.f32 %v894_v7, %v15165_v46  ;;  %v984_v26 = vadd.f32 %v983_v8, %v15165_v46  ;;  %14163 = vtanh.f32 %v893_v12  ;;  %13190 = vmatprep.subr.bf16.mxu0 %v13189_v29  ;;  %v1290_v7 = vmul.f32 %v15272_v11, %v15272_v11 }
 0x15a   : > { %22971 = vst [vmem:[#allocation29_spill] sm:$0xff] %v15359_v4  ;;  %v15365_v18 = vpop.eup %14143  ;;  %22973 = vst [vmem:[#allocation31_spill] sm:$0xff] %v15367_v25  ;;  %v898_v53 = vpop.f32.mrb[20].mxu0  ;;  %v13221_v4 = vpack.c.bf16 %v1435_v42, %v1419_v9  ;;  %14165 = vtanh.f32 %v982_v17  ;;  %v1465_v8 = vmul.f32 %v15367_v25, %v15221_v35  ;;  %v1481_v42 = vmul.f32 %v15337_v34, %v15244_v56 }
 0x15b   : > { %22972 = vst [vmem:[#allocation30_spill] sm:$0xff] %v15365_v18  ;;  %v15373_v47 = vpop.eup %14145  ;;  %v987_v58 = vpop.f32.mrb[20].mxu1  ;;  %14167 = vtanh.f32 %v895_v0  ;;  %v1416_v18 = vmul.f32 %v15335_v31, %v15377_v33  ;;  %v15399_v29 = vsub.f32 1.0, %v1290_v7  ;;  %v1467_v0 = vmul.f32 %v15367_v25, %v15223_v37 }
 0x15c   : > { %22974 = vst [vmem:[#allocation32_spill] sm:$0xff] %v15373_v47  ;;  %v15381_v6 = vpop.eup %14147  ;;  %v900_v12 = vpop.f32.mrb[21].mxu0  ;;  %v15389_v47 = vsub.f32 1.0, %v1288_v50  ;;  %13222 = vmatprep.subr.bf16.mxu1 %v13221_v4  ;;  %14169 = vtanh.f32 %v984_v26  ;;  %v1483_v4 = vmul.f32 %v15337_v34, %v15270_v10  ;;  %v899_v26 = vadd.f32 %v898_v53, %v15163_v45 }
 0x15d   : > { %22975 = vst [vmem:[#allocation33_spill] sm:$0xff] %v15381_v6  ;;  %v989_v2 = vpop.f32.mrb[21].mxu1  ;;  %v15387_v54 = vpop.eup %14149  ;;  %v15393_v6 = vsub.f32 1.0, %v1274_v51  ;;  %v1434_v49 = vmul.f32 %v15280_v23, %v15399_v29  ;;  %v13193_v13 = vpack.c.bf16 %v1481_v42, %v1465_v8  ;;  %v901_v40 = vadd.f32 %v900_v12, %v15163_v45 }
 0x15e   : > { %22976 = vst [vmem:[#allocation34_spill] sm:$0xff] %v15387_v54  ;;  %v15395_v9 = vpop.eup %14151  ;;  %v15397_v17 = vpop.permute.xlu1 %1457  ;;  %v1432_v51 = vmul.f32 %v15280_v23, %v15389_v47  ;;  %v13225_v55 = vpack.c.bf16 %v1483_v4, %v1467_v0  ;;  %14171 = vtanh.f32 %v899_v26  ;;  %v990_v53 = vadd.f32 %v989_v2, %v15163_v45 }
 0x15f   : > { %22977 = vst [vmem:[#allocation35_spill] sm:$0xff] %v15395_v9  ;;  %22978 = vst [vmem:[#allocation36_spill] sm:$0xff] %v15397_v17  ;;  %v15405_v50 = vpop.eup %14153  ;;  %v1418_v54 = vmul.f32 %v15335_v31, %v15393_v6  ;;  %v904_v7 = vpop.f32.mrb[22].mxu0  ;;  %v1480_v8 = vmul.f32 %v15337_v34, %v15260_v3  ;;  %v1482_v2 = vmul.f32 %v15337_v34, %v15311_v62 }
 0x160   : > { %22979 = vst [vmem:[#allocation37_spill] sm:$0xff] %v15405_v50  ;;  %v993_v9 = vpop.f32.mrb[22].mxu1  ;;  %v15414_v24 = vpop.eup %14155  ;;  %v988_v50 = vadd.f32 %v987_v58, %v15163_v45  ;;  %v13191_v30 = vpack.c.bf16 %v1432_v51, %v1416_v18  ;;  %v1464_v58 = vmul.f32 %v15367_v25, %v15199_v20  ;;  %v1466_v18 = vmul.f32 %v15367_v25, %v15309_v59 }
 0x161   : > { %22980 = vst [vmem:[#allocation38_spill] sm:$0xff] %v15414_v24  ;;  %v906_v43 = vpop.f32.mrb[23].mxu0  ;;  %v995_v1 = vpop.f32.mrb[23].mxu1  ;;  %v13223_v52 = vpack.c.bf16 %v1434_v49, %v1418_v54  ;;  %v1497_v49 = vmul.f32 %v15397_v17, %v15339_v39 }
 0x162   : > { %v15420_v31 = vpop.eup %14157  ;;  %v15425_v24 = vpop.permute.xlu0 %1461  ;;  %14173 = vtanh.f32 %v988_v50  ;;  %13192 = vmatpush1.bf16.msra.mxu0 %v13191_v30  ;;  %v13195_v0 = vpack.c.bf16 %v1480_v8, %v1464_v58  ;;  %v13227_v26 = vpack.c.bf16 %v1482_v2, %v1466_v18 }
 0x163   : > { %22981 = vst [vmem:[#allocation39_spill] sm:$0xff] %v15420_v31  ;;  %v15423_v11 = vpop.eup %14159  ;;  %22983 = vst [vmem:[#allocation41_spill] sm:$0xff] %v15425_v24  ;;  %14175 = vtanh.f32 %v901_v40  ;;  %v1064_v54 = vpop.f32.mrb[24].mxu0  ;;  %13224 = vmatpush1.bf16.msra.mxu1 %v13223_v52  ;;  %13194 = vmatprep.subr.bf16.mxu0 %v13193_v13  ;;  %v1513_v50 = vmul.f32 %v15425_v24, %v15341_v41  ;;  %v1499_v40 = vmul.f32 %v15397_v17, %v15347_v48 }
 0x164   : > { %22982 = vst [vmem:[#allocation40_spill] sm:$0xff] %v15423_v11  ;;  %v15431_v12 = vpop.eup %14161  ;;  %v1153_v42 = vpop.f32.mrb[24].mxu1  ;;  %14177 = vtanh.f32 %v990_v53  ;;  %13226 = vmatprep.subr.bf16.mxu1 %v13225_v55  ;;  %v1515_v31 = vmul.f32 %v15425_v24, %v15357_v60  ;;  %v905_v52 = vadd.f32 %v904_v7, %v15175_v63  ;;  %v994_v13 = vadd.f32 %v993_v9, %v15175_v63 }
 0x165   : > { %22984 = vst [vmem:[#allocation42_spill] sm:$0xff] %v15431_v12  ;;  %v1066_v30 = vpop.f32.mrb[25].mxu0  ;;  %v1155_v51 = vpop.f32.mrb[25].mxu1  ;;  %v13197_v8 = vpack.c.bf16 %v1513_v50, %v1497_v49  ;;  %v907_v12 = vadd.f32 %v906_v43, %v15175_v63  ;;  %v996_v11 = vadd.f32 %v995_v1, %v15175_v63  ;;  %v1496_v55 = vmul.f32 %v15397_v17, %v15377_v33 }
 0x166   : > { %v15443_v4 = vpop.eup %14163  ;;  %v15451_v58 = vpop.permute.xlu1 %1662  ;;  %13196 = vmatpush1.bf16.msra.mxu0 %v13195_v0  ;;  %v13229_v2 = vpack.c.bf16 %v1515_v31, %v1499_v40  ;;  %14179 = vtanh.f32 %v905_v52  ;;  %v1512_v9 = vmul.f32 %v15425_v24, %v15389_v47  ;;  %v1498_v7 = vmul.f32 %v15397_v17, %v15393_v6 }
 0x167   : > { %22985 = vst [vmem:[#allocation43_spill] sm:$0xff] %v15443_v4  ;;  %v15449_v53 = vpop.eup %14165  ;;  %22987 = vst [vmem:[#allocation45_spill] sm:$0xff] %v15451_v58  ;;  %v15465_v49 = vpop.f32.mrb[26].mxu1  ;;  %13228 = vmatpush1.bf16.msra.mxu1 %v13227_v26  ;;  %13198 = vmatprep.subr.bf16.mxu0 %v13197_v8  ;;  %14181 = vtanh.f32 %v994_v13  ;;  %v1514_v1 = vmul.f32 %v15425_v24, %v15399_v29  ;;  %v1545_v31 = vmul.f32 -2.0, %v15215_v32  ;;  %v1531_v26 = vmul.f32 -2.0, %v15197_v16 }
 0x168   : > { %22986 = vst [vmem:[#allocation44_spill] sm:$0xff] %v15449_v53  ;;  %v15457_v18 = vpop.eup %14167  ;;  %v15463_v53 = vpop.f32.mrb[26].mxu0  ;;  %v1593_v0 = vmul.f32 %v15201_v21, %v15221_v35  ;;  %13230 = vmatprep.subr.bf16.mxu1 %v13229_v2  ;;  %14183 = vtanh.f32 %v907_v12  ;;  %v13199_v4 = vpack.c.bf16 %v1512_v9, %v1496_v55  ;;  %v1547_v13 = vmul.f32 -2.0, %v15225_v38 }
 0x169   : > { %22988 = vst [vmem:[#allocation46_spill] sm:$0xff] %v15457_v18  ;;  %v15467_v43 = vpop.eup %14169  ;;  %v15474_v50 = vpop.f32.mrb[27].mxu0  ;;  %14185 = vtanh.f32 %v996_v11  ;;  %v13231_v32 = vpack.c.bf16 %v1514_v1, %v1498_v7  ;;  %v1595_v18 = vmul.f32 %v1531_v26, %v15223_v37  ;;  %v1065_v55 = vadd.f32 %v1064_v54, %v15157_v36 }
 0x16a   : > { %22989 = vst [vmem:[#allocation47_spill] sm:$0xff] %v15467_v43  ;;  %v15476_v40 = vpop.f32.mrb[27].mxu1  ;;  %v15478_v52 = vpop.permute.xlu0 %1667  ;;  %v1609_v43 = vmul.f32 %v1545_v31, %v15244_v56  ;;  %v1681_v21 = vmul.f32 %v15451_v58, %v1593_v0  ;;  %13200 = vmatpush1.bf16.msra.mxu0 %v13199_v4  ;;  %v1611_v12 = vmul.f32 %v1547_v13, %v15270_v10  ;;  %v1544_v37 = vmul.f32 -2.0, %v15203_v22 }
 0x16b   : > { %22990 = vst [vmem:[#allocation48_spill] sm:$0xff] %v15478_v52  ;;  %v15482_v8 = vpop.permute.xlu1 %1672  ;;  %v15486_v35 = vpop.eup %14171  ;;  %v1154_v16 = vadd.f32 %v1153_v42, %v15157_v36  ;;  %13232 = vmatpush1.bf16.msra.mxu1 %v13231_v32  ;;  %v1067_v9 = vadd.f32 %v1066_v30, %v15157_v36  ;;  %v1156_v4 = vadd.f32 %v1155_v51, %v15157_v36  ;;  %14187 = vtanh.f32 %v1065_v55 }
 0x16c   : > { %22991 = vst [vmem:[#allocation49_spill] sm:$0xff] %v15482_v8  ;;  %v15492_v38 = vpop.f32.mrb[28].mxu0  ;;  %v15494_v2 = vpop.f32.mrb[28].mxu1  ;;  %v1697_v56 = vmul.f32 %v15478_v52, %v1609_v43  ;;  %v1683_v7 = vmul.f32 %v15451_v58, %v1595_v18  ;;  %v1699_v1 = vmul.f32 %v15478_v52, %v1611_v12  ;;  %v1592_v43 = vmul.f32 %v15192_v14, %v15199_v20 }
 0x16d   : > { %v15496_v11 = vpop.eup %14173  ;;  %v15502_v10 = vpop.f32.mrb[29].mxu0  ;;  %14189 = vtanh.f32 %v1154_v16  ;;  %v1608_v36 = vmul.f32 %v1544_v37, %v15260_v3  ;;  %v1546_v22 = vmul.f32 -2.0, %v15209_v28  ;;  %v1594_v18 = vmul.f32 %v15195_v15, %v15309_v59 }
 0x16e   : > { %22992 = vst [vmem:[#allocation50_spill] sm:$0xff] %v15496_v11  ;;  %v15504_v54 = vpop.f32.mrb[29].mxu1  ;;  %v15506_v42 = vpop.eup %14175  ;;  %v13201_v30 = vpack.c.bf16 %v1697_v56, %v1681_v21  ;;  %v13233_v51 = vpack.c.bf16 %v1699_v1, %v1683_v7  ;;  %14191 = vtanh.f32 %v1067_v9  ;;  %v1680_v0 = vmul.f32 %v15451_v58, %v1592_v43 }
 0x16f   : > { %v15512_v31 = vpop.eup %14177  ;;  %v15519_v26 = vpop.f32.mrb[30].mxu0  ;;  %14193 = vtanh.f32 %v1156_v4  ;;  %v1696_v14 = vmul.f32 %v15478_v52, %v1608_v36  ;;  %v1610_v20 = vmul.f32 %v1546_v22, %v15311_v62  ;;  %v1561_v3 = vmul.f32 -2.0, %v15246_v57 }
 0x170   : > { %v15521_v13 = vpop.f32.mrb[30].mxu1  ;;  %13202 = vmatprep.subr.bf16.mxu0 %v13201_v30  ;;  %v15526_v28 = vpop.f32.mrb[31].mxu0  ;;  %13234 = vmatprep.subr.bf16.mxu1 %v13233_v51  ;;  %v1682_v15 = vmul.f32 %v15451_v58, %v1594_v18  ;;  %v1577_v59 = vmul.f32 -2.0, %v15278_v19  ;;  %v1563_v12 = vmul.f32 -2.0, %v15256_v61  ;;  %v1579_v55 = vmul.f32 -2.0, %v15286_v27 }
 0x171   : > { %v15528_v32 = vpop.f32.mrb[31].mxu1  ;;  %v15530_v21 = vpop.eup %14179  ;;  %v13203_v57 = vpack.c.bf16 %v1696_v14, %v1680_v0  ;;  %v1698_v56 = vmul.f32 %v15478_v52, %v1610_v20  ;;  %v1625_v9 = vmul.f32 %v1561_v3, %v15339_v39  ;;  %v1071_v4 = vadd.f32 %v15463_v53, %v15165_v46  ;;  %v22997_v0 = vld [vmem:[#allocation14_spill] sm:$0xff]  ;;  %v22998_v14 = vld [vmem:[#allocation16_spill] sm:$0xff] }
 0x172   : > { %22993 = vst [vmem:[#allocation51_spill] sm:$0xff] %v15530_v21  ;;  %v15536_v16 = vpop.eup %14181  ;;  %v15538_v62 = vpop.permute.xlu1 %1677  ;;  %v1641_v19 = vmul.f32 %v1577_v59, %v15341_v41  ;;  %v1627_v61 = vmul.f32 %v1563_v12, %v15347_v48  ;;  %v1643_v27 = vmul.f32 %v1579_v55, %v15357_v60  ;;  %v1160_v7 = vadd.f32 %v15465_v49, %v15165_v46 }
 0x173   : > { %22994 = vst [vmem:[#allocation52_spill] sm:$0xff] %v15536_v16  ;;  %22995 = vst [vmem:[#allocation53_spill] sm:$0xff] %v15538_v62  ;;  %v15544_v37 = vpop.eup %14183  ;;  %13204 = vmatpush1.bf16.msra.mxu0 %v13203_v57  ;;  %v13235_v43 = vpack.c.bf16 %v1698_v56, %v1682_v15  ;;  %v1713_v39 = vmul.f32 %v15482_v8, %v1625_v9  ;;  %14195 = vtanh.f32 %v1071_v4  ;;  %v1560_v49 = vmul.f32 -2.0, %v15232_v44  ;;  %v23003_v57 = vld [vmem:[#allocation21_spill] sm:$0xff]  ;;  %v23004_v56 = vld [vmem:[#allocation27_spill] sm:$0xff] }
 0x174   : > { %v15551_v1 = vpop.eup %14185  ;;  %v1073_v53 = vadd.f32 %v15474_v50, %v15165_v46  ;;  %v1729_v30 = vmul.f32 %v15538_v62, %v1641_v19  ;;  %v1715_v41 = vmul.f32 %v15482_v8, %v1627_v61  ;;  %v1731_v48 = vmul.f32 %v15538_v62, %v1643_v27 }
 0x175   : > { %14197 = vtanh.f32 %v1160_v7  ;;  %13236 = vmatpush1.bf16.msra.mxu1 %v13235_v43  ;;  %v1162_v60 = vadd.f32 %v15476_v40, %v15165_v46  ;;  %v1576_v36 = vmul.f32 -2.0, %v15266_v5  ;;  %v15563_v22 = vpop.eup %14187  ;;  %v1562_v18 = vmul.f32 -2.0, %v22997_v0  ;;  %v23000_v46 = vld [vmem:[#allocation20_spill] sm:$0xff]  ;;  %v23013_v0 = vld [vmem:[#allocation37_spill] sm:$0xff] }
 0x176   : > { %14199 = vtanh.f32 %v1073_v53  ;;  %22996 = vst [vmem:[#allocation54_spill] sm:$0xff] %v15563_v22  ;;  %v13205_v51 = vpack.c.bf16 %v1729_v30, %v1713_v39  ;;  %v13237_v50 = vpack.c.bf16 %v1731_v48, %v1715_v41  ;;  %v1578_v20 = vmul.f32 -2.0, %v22998_v14  ;;  %v23001_v40 = vld [vmem:[#allocation24_spill] sm:$0xff]  ;;  %v23006_v53 = vld [vmem:[#allocation18_spill] sm:$0xff]  ;;  %v23008_v48 = vld [vmem:[#allocation19_spill] sm:$0xff] }
 0x177   : > { %v15567_v3 = vpop.eup %14189  ;;  %14201 = vtanh.f32 %v1162_v60  ;;  %v1624_v15 = vmul.f32 %v1560_v49, %v15377_v33  ;;  %v1640_v59 = vmul.f32 %v1576_v36, %v15389_v47  ;;  %v13241_v44 = vpack.c.bf16 %v23001_v40, %v23000_v46  ;;  %v23007_v30 = vld [vmem:[#allocation22_spill] sm:$0xff]  ;;  %v23011_v36 = vld [vmem:[#allocation35_spill] sm:$0xff] }
 0x178   : > { %22999 = vst [vmem:[#allocation14_spill] sm:$0xff] %v15567_v3  ;;  %v15573_v12 = vpop.eup %14191  ;;  %13206 = vmatprep.subr.bf16.mxu0 %v13205_v51  ;;  %13238 = vmatprep.subr.bf16.mxu1 %v13237_v50  ;;  %v1626_v5 = vmul.f32 %v1562_v18, %v15393_v6  ;;  %v1642_v55 = vmul.f32 %v1578_v20, %v15399_v29  ;;  %v15580_v4 = vmul.f32 -2.0, %v23000_v46  ;;  %v23012_v50 = vld [vmem:[#allocation32_spill] sm:$0xff] }
 0x179   : > { %23002 = vst [vmem:[#allocation16_spill] sm:$0xff] %v15573_v12  ;;  %v13273_v9 = vpack.c.bf16 %v23004_v56, %v23003_v57  ;;  %v15582_v33 = vpop.eup %14193  ;;  %v1712_v47 = vmul.f32 %v15482_v8, %v1624_v15  ;;  %v1728_v19 = vmul.f32 %v15538_v62, %v1640_v59  ;;  %v1077_v61 = vadd.f32 %v15492_v38, %v15163_v45  ;;  %v23009_v38 = vld [vmem:[#allocation23_spill] sm:$0xff] }
 0x17a   : > { %23005 = vst [vmem:[#allocation20_spill] sm:$0xff] %v15582_v33  ;;  %v1166_v6 = vadd.f32 %v15494_v2, %v15163_v45  ;;  %v1714_v29 = vmul.f32 %v15482_v8, %v1626_v5  ;;  %v1730_v27 = vmul.f32 %v15538_v62, %v1642_v55  ;;  %v1079_v7 = vadd.f32 %v15502_v10, %v15163_v45  ;;  %v23010_v2 = vld [vmem:[#allocation30_spill] sm:$0xff]  ;;  %v23017_v5 = vld [vmem:[#allocation28_spill] sm:$0xff]  ;;  %v23018_v55 = vld [vmem:[#allocation33_spill] sm:$0xff] }
 0x17b   : > { %v1168_v43 = vadd.f32 %v15504_v54, %v15163_v45  ;;  %v13207_v39 = vpack.c.bf16 %v1728_v19, %v1712_v47  ;;  %14203 = vtanh.f32 %v1077_v61  ;;  %v13243_v41 = vpack.c.bf16 %v23007_v30, %v23006_v53  ;;  %v15606_v45 = vld [vmem:[#allocation5] sm:$0xff]  ;;  %v23020_v61 = vld [vmem:[#allocation34_spill] sm:$0xff] }
 0x17c   : > { %v13275_v60 = vpack.c.bf16 %v23009_v38, %v23008_v48  ;;  %v13239_v49 = vpack.c.bf16 %v1730_v27, %v1714_v29  ;;  %14205 = vtanh.f32 %v1166_v6  ;;  %v13245_v51 = vpack.c.bf16 %v23011_v36, %v23010_v2  ;;  %23015 = vst [vmem:[#allocation21_spill] sm:$0xff] %v15606_v45  ;;  %v23019_v19 = vld [vmem:[#allocation29_spill] sm:$0xff] }
 0x17d   : > { %v13277_v18 = vpack.c.bf16 %v23013_v0, %v23012_v50  ;;  %v15604_v10 = vpop.eup %14195  ;;  %13208 = vmatpush1.bf16.msra.mxu0 %v13207_v39  ;;  %14207 = vtanh.f32 %v1079_v7  ;;  %v1083_v54 = vadd.f32 %v15519_v26, %v15175_v63  ;;  %v1172_v14 = vadd.f32 %v15521_v13, %v15175_v63 }
 0x17e   : > { %23014 = vst [vmem:[#allocation24_spill] sm:$0xff] %v15604_v10  ;;  %v1085_v20 = vadd.f32 %v15526_v28, %v15175_v63  ;;  %13240 = vmatpush1.bf16.msra.mxu1 %v13239_v49  ;;  %13242 = vmatprep.subr.bf16.mxu0 %v13241_v44  ;;  %14209 = vtanh.f32 %v1168_v43  ;;  %v1174_v59 = vadd.f32 %v15528_v32, %v15175_v63  ;;  %v15685_v10 = vmul.f32 -2.0, %v23004_v56 }
 0x17f   : > { %v15614_v15 = vpop.eup %14197  ;;  %v13247_v47 = vpack.c.bf16 %v23018_v55, %v23017_v5  ;;  %v13279_v26 = vpack.c.bf16 %v23020_v61, %v23019_v19  ;;  %13274 = vmatprep.subr.bf16.mxu1 %v13273_v9  ;;  %14211 = vtanh.f32 %v1083_v54  ;;  %v1245_v13 = vmul.f32 %v23000_v46, %v23000_v46  ;;  %v15640_v46 = vld [vmem:[#allocation5 + $0x8] sm:$0xff] }
 0x180   : > { %23016 = vst [vmem:[#allocation27_spill] sm:$0xff] %v15614_v15  ;;  %v15622_v6 = vpop.eup %14199  ;;  %v1261_v28 = vmul.f32 %v23001_v40, %v23001_v40  ;;  %v1247_v44 = vmul.f32 %v23003_v57, %v23003_v57  ;;  %1825 = vmatmul.mubr.f32.vlgmr.msra.gmra.mrb[32].mxu0 %v15606_v45  ;;  %14213 = vtanh.f32 %v1172_v14  ;;  %v1263_v63 = vmul.f32 %v23004_v56, %v23004_v56  ;;  %v23025_v14 = vld [vmem:[#allocation15_spill] sm:$0xff] }
 0x181   : > { %23021 = vst [vmem:[#allocation18_spill] sm:$0xff] %v15622_v6  ;;  %v1244_v32 = vmul.f32 %v23006_v53, %v23006_v53  ;;  %v1260_v9 = vmul.f32 %v23007_v30, %v23007_v30  ;;  %v15637_v29 = vpop.eup %14201  ;;  %1986 = vmatmul.mubr.f32.vlgmr.msra.gmra.mrb[32].mxu1 %v15606_v45  ;;  %13244 = vmatpush1.bf16.msra.mxu0 %v13243_v41  ;;  %14215 = vtanh.f32 %v1085_v20  ;;  %23023 = vst [vmem:[#allocation19_spill] sm:$0xff] %v15640_v46  ;;  %v23024_v41 = vmov 0.0  }
 0x182   : > { %23022 = vst [vmem:[#allocation22_spill] sm:$0xff] %v15637_v29  ;;  %v15642_v27 = vsub.f32 1.0, %v1245_v13  ;;  %v15644_v7 = vsub.f32 1.0, %v1261_v28  ;;  %v15646_v43 = vsub.f32 1.0, %v1247_v44  ;;  %13276 = vmatpush1.bf16.msra.mxu1 %v13275_v60  ;;  %13246 = vmatprep.subr.bf16.mxu0 %v13245_v51  ;;  %14217 = vtanh.f32 %v1174_v59  ;;  %v23026_v13 = vld [vmem:[#allocation13_spill] sm:$0xff] }
 0x183   : > { %v15648_v39 = vsub.f32 1.0, %v1263_v63  ;;  %v15650_v49 = vsub.f32 1.0, %v1244_v32  ;;  %v15652_v54 = vsub.f32 1.0, %v1260_v9  ;;  %13278 = vmatprep.subr.bf16.mxu1 %v13277_v18  ;;  %1830 = vmatprep.mubr.f32.mxu0 %v23024_v41  ;;  %v15662_v51 = vmul.f32 -2.0, %v23001_v40  ;;  %v15678_v9 = vld [vmem:[#allocation5 + $0x10] sm:$0xff]  ;;  %v23035_v29 = vld [vmem:[#allocation25_spill] sm:$0xff] }
 0x184   : > { %v1389_v20 = vmul.f32 %v23025_v14, %v15642_v27  ;;  %v1405_v28 = vmul.f32 %v23026_v13, %v15644_v7  ;;  %v1391_v60 = vmul.f32 %v23025_v14, %v15646_v43  ;;  %1991 = vmatprep.mubr.f32.mxu1 %v23024_v41  ;;  %1831 = vmatmul.mubr.f32.gmra.mrb[34].mxu0 %v15640_v46  ;;  %v15673_v63 = vmul.f32 -2.0, %v23003_v57 }
 0x185   : > { %v1407_v18 = vmul.f32 %v23026_v13, %v15648_v39  ;;  %v1388_v59 = vmul.f32 %v23025_v14, %v15650_v49  ;;  %v1404_v44 = vmul.f32 %v23026_v13, %v15652_v54  ;;  %v15675_v32 = vpop.eup %14203  ;;  %1992 = vmatmul.mubr.f32.gmra.mrb[34].mxu1 %v15640_v46  ;;  %13248 = vmatpush1.bf16.msra.mxu0 %v13247_v47 }
 0x186   : > { %23027 = vst [vmem:[#allocation23_spill] sm:$0xff] %v15675_v32  ;;  %v13249_v40 = vpack.c.bf16 %v1405_v28, %v1389_v20  ;;  %23028 = vst [vmem:[#allocation30_spill] sm:$0xff] %v15678_v9  ;;  %v1246_v15 = vmul.f32 %v23008_v48, %v23008_v48  ;;  %v1262_v3 = vmul.f32 %v23009_v38, %v23009_v38  ;;  %v15687_v22 = vpop.eup %14205  ;;  %13280 = vmatpush1.bf16.msra.mxu1 %v13279_v26 }
 0x187   : > { %23029 = vst [vmem:[#allocation35_spill] sm:$0xff] %v15687_v22  ;;  %v13281_v57 = vpack.c.bf16 %v1407_v18, %v1391_v60  ;;  %1836 = vmatprep.mubr.f32.mxu0 %v23024_v41  ;;  %v13251_v32 = vpack.c.bf16 %v1404_v44, %v1388_v59  ;;  %v1277_v47 = vmul.f32 %v23010_v2, %v23010_v2  ;;  %v15693_v20 = vmul.f32 -2.0, %v23006_v53  ;;  %v15695_v28 = vpop.eup %14207 }
 0x188   : > { %23030 = vst [vmem:[#allocation32_spill] sm:$0xff] %v15695_v28  ;;  %13250 = vmatprep.subr.bf16.mxu0 %v13249_v40  ;;  %1997 = vmatprep.mubr.f32.mxu1 %v23024_v41  ;;  %v15698_v56 = vsub.f32 1.0, %v1246_v15  ;;  %v15700_v46 = vsub.f32 1.0, %v1262_v3  ;;  %v1293_v26 = vmul.f32 %v23011_v36, %v23011_v36  ;;  %v1279_v60 = vmul.f32 %v23012_v50, %v23012_v50  ;;  %v15706_v18 = vpop.eup %14209 }
 0x189   : > { %23031 = vst [vmem:[#allocation37_spill] sm:$0xff] %v15706_v18  ;;  %13282 = vmatprep.subr.bf16.mxu1 %v13281_v57  ;;  %1837 = vmatmul.mubr.f32.gmra.mrb[36].mxu0 %v15678_v9  ;;  %v15709_v53 = vsub.f32 1.0, %v1277_v47  ;;  %v1295_v59 = vmul.f32 %v23013_v0, %v23013_v0  ;;  %v1276_v3 = vmul.f32 %v23017_v5, %v23017_v5  ;;  %v15717_v44 = vpop.eup %14211  ;;  %v15728_v18 = vld [vmem:[#allocation5 + $0x18] sm:$0xff] }
 0x18a   : > { %v1292_v15 = vmul.f32 %v23018_v55, %v23018_v55  ;;  %23032 = vst [vmem:[#allocation28_spill] sm:$0xff] %v15717_v44  ;;  %1998 = vmatmul.mubr.f32.gmra.mrb[36].mxu1 %v15678_v9  ;;  %13252 = vmatpush1.bf16.msra.mxu0 %v13251_v32  ;;  %v1390_v40 = vmul.f32 %v23025_v14, %v15698_v56  ;;  %v15724_v47 = vsub.f32 1.0, %v1293_v26  ;;  %v15726_v22 = vsub.f32 1.0, %v1279_v60  ;;  %v15730_v28 = vpop.eup %14213 }
 0x18b   : > { %v1406_v57 = vmul.f32 %v23026_v13, %v15700_v46  ;;  %23033 = vst [vmem:[#allocation33_spill] sm:$0xff] %v15728_v18  ;;  %23034 = vst [vmem:[#allocation29_spill] sm:$0xff] %v15730_v28  ;;  %v1421_v44 = vmul.f32 %v23035_v29, %v15709_v53  ;;  %v15734_v33 = vsub.f32 1.0, %v1295_v59  ;;  %1842 = vmatprep.mubr.f32.mxu0 %v23024_v41  ;;  %2003 = vmatprep.mubr.f32.mxu1 %v23024_v41  ;;  %v15742_v26 = vpop.eup %14215 }
 0x18c   : > { %v15738_v32 = vsub.f32 1.0, %v1276_v3  ;;  %v15740_v9 = vsub.f32 1.0, %v1292_v15  ;;  %23036 = vst [vmem:[#allocation34_spill] sm:$0xff] %v15742_v26  ;;  %v1437_v6 = vmul.f32 %v15280_v23, %v15724_v47  ;;  %v1423_v28 = vmul.f32 %v23035_v29, %v15726_v22  ;;  %v15750_v12 = vpop.eup %14217 }
 0x18d   : > { %v13283_v60 = vpack.c.bf16 %v1406_v57, %v1390_v40  ;;  %v1278_v59 = vmul.f32 %v23019_v19, %v23019_v19  ;;  %23037 = vst [vmem:[#allocation55_spill] sm:$0xff] %v15750_v12  ;;  %v1439_v3 = vmul.f32 %v15280_v23, %v15734_v33  ;;  %1843 = vmatmul.mubr.f32.gmra.mrb[38].mxu0 %v15728_v18 }
 0x18e   : > { %v1420_v15 = vmul.f32 %v23035_v29, %v15738_v32  ;;  %v1436_v40 = vmul.f32 %v15280_v23, %v15740_v9  ;;  %v1294_v57 = vmul.f32 %v23020_v61, %v23020_v61  ;;  %v13253_v26 = vpack.c.bf16 %v1437_v6, %v1421_v44  ;;  %1848 = vmatprep.mubr.f32.mxu0 %v23024_v41  ;;  %v15773_v6 = vld [vmem:[#allocation5 + $0x20] sm:$0xff] }
 0x18f   : > { %13284 = vmatpush1.bf16.msra.mxu1 %v13283_v60  ;;  %v15761_v45 = vsub.f32 1.0, %v1278_v59  ;;  %v1469_v12 = vmul.f32 %v15367_v25, %v15642_v27  ;;  %v1485_v13 = vmul.f32 %v15337_v34, %v15644_v7  ;;  %v13285_v14 = vpack.c.bf16 %v1439_v3, %v1423_v28  ;;  %23038 = vst [vmem:[#allocation56_spill] sm:$0xff] %v15773_v6 }
 0x190   : > { %2004 = vmatmul.mubr.f32.gmra.mrb[38].mxu1 %v15728_v18  ;;  %v13255_v16 = vpack.c.bf16 %v1436_v40, %v1420_v15  ;;  %v15769_v11 = vsub.f32 1.0, %v1294_v57  ;;  %v1471_v60 = vmul.f32 %v15367_v25, %v15646_v43  ;;  %13254 = vmatprep.subr.bf16.mxu0 %v13253_v26  ;;  %v1487_v21 = vmul.f32 %v15337_v34, %v15648_v39 }
 0x191   : > { %v1422_v44 = vmul.f32 %v23035_v29, %v15761_v45  ;;  %v13257_v59 = vpack.c.bf16 %v1485_v13, %v1469_v12  ;;  %2009 = vmatprep.mubr.f32.mxu1 %v23024_v41  ;;  %v1548_v28 = vmul.f32 -2.0, %v23007_v30  ;;  %13286 = vmatprep.subr.bf16.mxu1 %v13285_v14  ;;  %v1468_v15 = vmul.f32 %v15367_v25, %v15650_v49 }
 0x192   : > { %13256 = vmatpush1.bf16.msra.mxu0 %v13255_v16  ;;  %v1438_v3 = vmul.f32 %v15280_v23, %v15769_v11  ;;  %v1484_v26 = vmul.f32 %v15337_v34, %v15652_v54  ;;  %v1534_v12 = vmul.f32 -2.0, %v23008_v48  ;;  %v13289_v13 = vpack.c.bf16 %v1487_v21, %v1471_v60  ;;  %v15799_v48 = vld [vmem:[#allocation5 + $0x28] sm:$0xff] }
 0x193   : > { %13258 = vmatprep.subr.bf16.mxu0 %v13257_v59  ;;  %1849 = vmatmul.mubr.f32.gmra.mrb[40].mxu0 %v15773_v6  ;;  %v1470_v30 = vmul.f32 %v15367_v25, %v15698_v56  ;;  %v1486_v16 = vmul.f32 %v15337_v34, %v15700_v46  ;;  %v1550_v14 = vmul.f32 -2.0, %v23009_v38  ;;  %v1501_v18 = vmul.f32 %v15397_v17, %v15709_v53 }
 0x194   : > { %v13287_v40 = vpack.c.bf16 %v1438_v3, %v1422_v44  ;;  %2010 = vmatmul.mubr.f32.gmra.mrb[40].mxu1 %v15773_v6  ;;  %v13259_v57 = vpack.c.bf16 %v1484_v26, %v1468_v15  ;;  %v1517_v21 = vmul.f32 %v15425_v24, %v15724_v47  ;;  %23039 = vst [vmem:[#allocation57_spill] sm:$0xff] %v15799_v48  ;;  %v1565_v38 = vmul.f32 -2.0, %v23010_v2 }
 0x195   : > { %v13291_v60 = vpack.c.bf16 %v1486_v16, %v1470_v30  ;;  %v1503_v59 = vmul.f32 %v15397_v17, %v15726_v22  ;;  %v1519_v34 = vmul.f32 %v15425_v24, %v15734_v33  ;;  %1854 = vmatprep.mubr.f32.mxu0 %v23024_v41  ;;  %2015 = vmatprep.mubr.f32.mxu1 %v23024_v41  ;;  %v1581_v26 = vmul.f32 -2.0, %v23011_v36  ;;  %v15824_v36 = vld [vmem:[#allocation5 + $0x30] sm:$0xff] }
 0x196   : > { %13288 = vmatpush1.bf16.msra.mxu1 %v13287_v40  ;;  %13260 = vmatpush1.bf16.msra.mxu0 %v13259_v57  ;;  %v13261_v44 = vpack.c.bf16 %v1517_v21, %v1501_v18  ;;  %v1500_v3 = vmul.f32 %v15397_v17, %v15738_v32  ;;  %v1516_v15 = vmul.f32 %v15425_v24, %v15740_v9  ;;  %v1567_v18 = vmul.f32 -2.0, %v23012_v50 }
 0x197   : > { %13290 = vmatprep.subr.bf16.mxu1 %v13289_v13  ;;  %v13293_v30 = vpack.c.bf16 %v1519_v34, %v1503_v59  ;;  %1855 = vmatmul.mubr.f32.gmra.mrb[42].mxu0 %v15799_v48  ;;  %v1502_v16 = vmul.f32 %v15397_v17, %v15761_v45  ;;  %v1518_v2 = vmul.f32 %v15425_v24, %v15769_v11  ;;  %v1583_v13 = vmul.f32 -2.0, %v23013_v0 }
 0x198   : > { %13262 = vmatprep.subr.bf16.mxu0 %v13261_v44  ;;  %2016 = vmatmul.mubr.f32.gmra.mrb[42].mxu1 %v15799_v48  ;;  %v13263_v40 = vpack.c.bf16 %v1516_v15, %v1500_v3  ;;  %v1597_v57 = vmul.f32 %v15580_v4, %v15642_v27  ;;  %v1613_v34 = vmul.f32 %v15662_v51, %v15644_v7  ;;  %v1564_v4 = vmul.f32 -2.0, %v23017_v5 }
 0x199   : > { %23040 = vst [vmem:[#allocation58_spill] sm:$0xff] %v15824_v36  ;;  %v13295_v21 = vpack.c.bf16 %v1518_v2, %v1502_v16  ;;  %v1599_v59 = vmul.f32 %v15673_v63, %v15646_v43  ;;  %v1615_v50 = vmul.f32 %v15685_v10, %v15648_v39  ;;  %1860 = vmatprep.mubr.f32.mxu0 %v23024_v41  ;;  %v1580_v43 = vmul.f32 -2.0, %v23018_v55 }
 0x19a   : > { %2021 = vmatprep.mubr.f32.mxu1 %v23024_v41  ;;  %13292 = vmatpush1.bf16.msra.mxu1 %v13291_v60  ;;  %v1685_v27 = vmul.f32 %v15451_v58, %v1597_v57  ;;  %v1701_v7 = vmul.f32 %v15478_v52, %v1613_v34  ;;  %v1596_v0 = vmul.f32 %v15693_v20, %v15650_v49  ;;  %v1566_v51 = vmul.f32 -2.0, %v23019_v19 }
 0x19b   : > { %13264 = vmatpush1.bf16.msra.mxu0 %v13263_v40  ;;  %13294 = vmatprep.subr.bf16.mxu1 %v13293_v30  ;;  %v1687_v10 = vmul.f32 %v15451_v58, %v1599_v59  ;;  %v1703_v39 = vmul.f32 %v15478_v52, %v1615_v50  ;;  %v1612_v5 = vmul.f32 %v1548_v28, %v15652_v54  ;;  %v15852_v54 = vld [vmem:[#allocation5 + $0x38] sm:$0xff]  ;;  %v23044_v40 = vld [vmem:[#allocation46_spill] sm:$0xff] }
 0x19c   : > { %1861 = vmatmul.mubr.f32.gmra.mrb[44].mxu0 %v15824_v36  ;;  %v13265_v63 = vpack.c.bf16 %v1701_v7, %v1685_v27  ;;  %2022 = vmatmul.mubr.f32.gmra.mrb[44].mxu1 %v15824_v36  ;;  %v1684_v60 = vmul.f32 %v15451_v58, %v1596_v0  ;;  %v1598_v49 = vmul.f32 %v1534_v12, %v15698_v56  ;;  %v15874_v57 = vmul.f32 -2.0, %v23044_v40 }
 0x19d   : > { %v1614_v55 = vmul.f32 %v1550_v14, %v15700_v46  ;;  %v13297_v20 = vpack.c.bf16 %v1703_v39, %v1687_v10  ;;  %v1700_v44 = vmul.f32 %v15478_v52, %v1612_v5  ;;  %v1629_v3 = vmul.f32 %v1565_v38, %v15709_v53  ;;  %1866 = vmatprep.mubr.f32.mxu0 %v23024_v41 }
 0x19e   : > { %v1645_v15 = vmul.f32 %v1581_v26, %v15724_v47  ;;  %23041 = vst [vmem:[#allocation59_spill] sm:$0xff] %v15852_v54  ;;  %13296 = vmatpush1.bf16.msra.mxu1 %v13295_v21  ;;  %13266 = vmatprep.subr.bf16.mxu0 %v13265_v63  ;;  %v1686_v19 = vmul.f32 %v15451_v58, %v1598_v49  ;;  %v1582_v46 = vmul.f32 -2.0, %v23020_v61  ;;  %v23050_v63 = vld [vmem:[#allocation44_spill] sm:$0xff] }
 0x19f   : > { %v1702_v28 = vmul.f32 %v15478_v52, %v1614_v55  ;;  %v1631_v56 = vmul.f32 %v1567_v18, %v15726_v22  ;;  %13298 = vmatprep.subr.bf16.mxu1 %v13297_v20  ;;  %v13267_v12 = vpack.c.bf16 %v1700_v44, %v1684_v60  ;;  %v1717_v53 = vmul.f32 %v15482_v8, %v1629_v3  ;;  %v23042_v22 = vld [vmem:[#allocation40_spill] sm:$0xff]  ;;  %v15871_v18 = vld [vmem:[#allocation5 + $0x40] sm:$0xff]  ;;  %v15907_v44 = vld [vmem:[#allocation5 + $0x48] sm:$0xff] }
 0x1a0   : > { %v1733_v47 = vmul.f32 %v15538_v62, %v1645_v15  ;;  %v1647_v14 = vmul.f32 %v1583_v13, %v15734_v33  ;;  %2027 = vmatprep.mubr.f32.mxu1 %v23024_v41  ;;  %1867 = vmatmul.mubr.f32.gmra.mrb[46].mxu0 %v15852_v54  ;;  %v1628_v30 = vmul.f32 %v1564_v4, %v15738_v32  ;;  %v15866_v16 = vmul.f32 -2.0, %v23042_v22  ;;  %v23046_v4 = vld [vmem:[#allocation47_spill] sm:$0xff] }
 0x1a1   : > { %v13299_v38 = vpack.c.bf16 %v1702_v28, %v1686_v19  ;;  %v1719_v26 = vmul.f32 %v15482_v8, %v1631_v56  ;;  %13268 = vmatpush1.bf16.msra.mxu0 %v13267_v12  ;;  %2028 = vmatmul.mubr.f32.gmra.mrb[46].mxu1 %v15852_v54  ;;  %v1644_v33 = vmul.f32 %v1580_v43, %v15740_v9  ;;  %v23045_v9 = vld [vmem:[#allocation42_spill] sm:$0xff]  ;;  %v23048_v43 = vld [vmem:[#allocation43_spill] sm:$0xff]  ;;  %v15895_v39 = vmul.f32 -2.0, %v23046_v4  ;;  %v16041_v54 = vld [vmem:[#allocation5 + $0x60] sm:$0xff] }
 0x1a2   : > { %v13269_v61 = vpack.c.bf16 %v1733_v47, %v1717_v53  ;;  %v1735_v2 = vmul.f32 %v15538_v62, %v1647_v14  ;;  %23043 = vst [vmem:[#allocation40_spill] sm:$0xff] %v15871_v18  ;;  %v1716_v34 = vmul.f32 %v15482_v8, %v1628_v30  ;;  %v1630_v32 = vmul.f32 %v1566_v51, %v15761_v45  ;;  %v23049_v51 = vld [vmem:[#allocation39_spill] sm:$0xff]  ;;  %v23053_v56 = vld [vmem:[#allocation50_spill] sm:$0xff] }
 0x1a3   : > { %13300 = vmatpush1.bf16.msra.mxu1 %v13299_v38  ;;  %v1646_v13 = vmul.f32 %v1582_v46, %v15769_v11  ;;  %v13305_v21 = vpack.c.bf16 %v23044_v40, %v23042_v22  ;;  %v1732_v50 = vmul.f32 %v15538_v62, %v1644_v33  ;;  %v13337_v27 = vpack.c.bf16 %v23046_v4, %v23045_v9  ;;  %v23047_v11 = vld [vmem:[#allocation38_spill] sm:$0xff]  ;;  %v23052_v15 = vld [vmem:[#allocation51_spill] sm:$0xff]  ;;  %v23054_v46 = vld [vmem:[#allocation52_spill] sm:$0xff] }
 0x1a4   : > { %13270 = vmatprep.subr.bf16.mxu0 %v13269_v61  ;;  %v13301_v59 = vpack.c.bf16 %v1735_v2, %v1719_v26  ;;  %1872 = vmatprep.mubr.f32.mxu0 %v23024_v41  ;;  %v15886_v7 = vmul.f32 -2.0, %v23045_v9  ;;  %v1718_v0 = vmul.f32 %v15482_v8, %v1630_v32  ;;  %v15903_v55 = vmul.f32 -2.0, %v23047_v11  ;;  %23051 = vst [vmem:[#allocation46_spill] sm:$0xff] %v15907_v44 }
 0x1a5   : > { %v1734_v45 = vmul.f32 %v15538_v62, %v1646_v13  ;;  %2033 = vmatprep.mubr.f32.mxu1 %v23024_v41  ;;  %1873 = vmatmul.mubr.f32.gmra.mrb[48].mxu0 %v15871_v18  ;;  %v13271_v5 = vpack.c.bf16 %v1732_v50, %v1716_v34  ;;  %v15914_v28 = vmul.f32 -2.0, %v23048_v43  ;;  %v1249_v53 = vmul.f32 %v23042_v22, %v23042_v22  ;;  %v15944_v34 = vld [vmem:[#allocation5 + $0x50] sm:$0xff] }
 0x1a6   : > { %13302 = vmatprep.subr.bf16.mxu1 %v13301_v59  ;;  %2034 = vmatmul.mubr.f32.gmra.mrb[48].mxu1 %v15871_v18  ;;  %v1265_v47 = vmul.f32 %v23044_v40, %v23044_v40  ;;  %v1251_v14 = vmul.f32 %v23045_v9, %v23045_v9  ;;  %v1267_v38 = vmul.f32 %v23046_v4, %v23046_v4  ;;  %v15931_v61 = vmul.f32 -2.0, %v23049_v51  ;;  %v23056_v50 = vld [vmem:[#allocation15_spill] sm:$0xff]  ;;  %v23057_v4 = vld [vmem:[#allocation13_spill] sm:$0xff] }
 0x1a7   : > { %v13303_v20 = vpack.c.bf16 %v1734_v45, %v1718_v0  ;;  %1878 = vmatprep.mubr.f32.mxu0 %v23024_v41  ;;  %2039 = vmatprep.mubr.f32.mxu1 %v23024_v41  ;;  %v1248_v26 = vmul.f32 %v23047_v11, %v23047_v11  ;;  %v1264_v30 = vmul.f32 %v23048_v43, %v23048_v43  ;;  %v15934_v22 = vsub.f32 1.0, %v1249_v53 }
 0x1a8   : > { %13272 = vmatpush1.bf16.msra.mxu0 %v13271_v5  ;;  %v15936_v2 = vsub.f32 1.0, %v1265_v47  ;;  %v15938_v33 = vsub.f32 1.0, %v1251_v14  ;;  %v1250_v40 = vmul.f32 %v23049_v51, %v23049_v51  ;;  %23055 = vst [vmem:[#allocation42_spill] sm:$0xff] %v15944_v34  ;;  %v15946_v32 = vsub.f32 1.0, %v1267_v38  ;;  %23065 = vst [vmem:[#allocation52_spill] sm:$0xff] %v16041_v54 }
 0x1a9   : > { %13304 = vmatpush1.bf16.msra.mxu1 %v13303_v20  ;;  %13306 = vmatprep.subr.bf16.mxu0 %v13305_v21  ;;  %v15948_v13 = vsub.f32 1.0, %v1248_v26  ;;  %v15950_v21 = vsub.f32 1.0, %v1264_v30  ;;  %v1266_v59 = vmul.f32 %v23050_v63, %v23050_v63  ;;  %v15957_v9 = vmul.f32 %v23056_v50, %v15934_v22 }
 0x1aa   : > { %13338 = vmatprep.subr.bf16.mxu1 %v13337_v27  ;;  %1879 = vmatmul.mubr.f32.gmra.mrb[50].mxu0 %v15907_v44  ;;  %v15961_v27 = vmul.f32 %v23057_v4, %v15936_v2  ;;  %v15965_v0 = vmul.f32 %v23056_v50, %v15938_v33  ;;  %v15967_v45 = vsub.f32 1.0, %v1250_v40  ;;  %v15971_v5 = vmul.f32 %v23057_v4, %v15946_v32  ;;  %v15996_v40 = vld [vmem:[#allocation5 + $0x58] sm:$0xff] }
 0x1ab   : > { %2040 = vmatmul.mubr.f32.gmra.mrb[50].mxu1 %v15907_v44  ;;  %1884 = vmatprep.mubr.f32.mxu0 %v23024_v41  ;;  %v15975_v20 = vmul.f32 %v23056_v50, %v15948_v13  ;;  %v15979_v53 = vmul.f32 %v23057_v4, %v15950_v21  ;;  %v15981_v47 = vsub.f32 1.0, %v1266_v59  ;;  %v1281_v26 = vmul.f32 %v15506_v42, %v15506_v42 }
 0x1ac   : > { %2045 = vmatprep.mubr.f32.mxu1 %v23024_v41  ;;  %v15988_v38 = vmul.f32 %v23056_v50, %v15967_v45  ;;  %v1297_v30 = vmul.f32 %v15544_v37, %v15544_v37  ;;  %23061 = vst [vmem:[#allocation39_spill] sm:$0xff] %v15996_v40  ;;  %v16007_v19 = vmul.f32 -2.0, %v23050_v63  ;;  %v1283_v60 = vmul.f32 %v15512_v31, %v15512_v31 }
 0x1ad   : > { %23058 = vst [vmem:[#allocation47_spill] sm:$0xff] %v15975_v20  ;;  %23059 = vst [vmem:[#allocation38_spill] sm:$0xff] %v15979_v53  ;;  %v16004_v12 = vmul.f32 %v23057_v4, %v15981_v47  ;;  %v16010_v3 = vsub.f32 1.0, %v1281_v26  ;;  %v1299_v59 = vmul.f32 %v15551_v1, %v15551_v1  ;;  %v1280_v10 = vmul.f32 %v15486_v35, %v15486_v35 }
 0x1ae   : > { %1885 = vmatmul.mubr.f32.gmra.mrb[52].mxu0 %v15944_v34  ;;  %23060 = vst [vmem:[#allocation43_spill] sm:$0xff] %v15988_v38  ;;  %v16012_v49 = vsub.f32 1.0, %v1297_v30  ;;  %v1282_v26 = vmul.f32 %v23053_v56, %v23053_v56  ;;  %v16035_v14 = vsub.f32 1.0, %v1283_v60  ;;  %v1298_v6 = vmul.f32 %v23054_v46, %v23054_v46 }
 0x1af   : > { %2046 = vmatmul.mubr.f32.gmra.mrb[52].mxu1 %v15944_v34  ;;  %1890 = vmatprep.mubr.f32.mxu0 %v23024_v41  ;;  %23062 = vst [vmem:[#allocation44_spill] sm:$0xff] %v16004_v12  ;;  %v1296_v34 = vmul.f32 %v23052_v15, %v23052_v15  ;;  %v16029_v30 = vmul.f32 %v23035_v29, %v16010_v3  ;;  %v16037_v18 = vsub.f32 1.0, %v1299_v59  ;;  %v16043_v36 = vsub.f32 1.0, %v1280_v10 }
 0x1b0   : > { %2051 = vmatprep.mubr.f32.mxu1 %v23024_v41  ;;  %v16033_v44 = vmul.f32 %v15280_v23, %v16012_v49  ;;  %v16049_v4 = vsub.f32 1.0, %v1282_v26  ;;  %v16056_v59 = vmul.f32 %v23035_v29, %v16035_v14  ;;  %v16074_v60 = vsub.f32 1.0, %v1298_v6 }
 0x1b1   : > { %23063 = vst [vmem:[#allocation51_spill] sm:$0xff] %v16029_v30  ;;  %v16045_v48 = vsub.f32 1.0, %v1296_v34  ;;  %v16060_v10 = vmul.f32 %v15280_v23, %v16037_v18  ;;  %v16064_v34 = vmul.f32 %v15367_v25, %v15934_v22  ;;  %v16068_v26 = vmul.f32 %v23035_v29, %v16043_v36 }
 0x1b2   : > { %1891 = vmatmul.mubr.f32.gmra.mrb[54].mxu0 %v15996_v40  ;;  %23064 = vst [vmem:[#allocation50_spill] sm:$0xff] %v16033_v44  ;;  %23066 = vst [vmem:[#allocation60_spill] sm:$0xff] %v16056_v59  ;;  %v16078_v50 = vmul.f32 %v23035_v29, %v16049_v4  ;;  %v23071_v44 = vld [vmem:[#allocation26_spill] sm:$0xff]  ;;  %v16089_v12 = vmul.f32 %v15367_v25, %v15938_v33  ;;  %v16103_v59 = vmul.f32 %v15280_v23, %v16074_v60 }
 0x1b3   : > { %2052 = vmatmul.mubr.f32.gmra.mrb[54].mxu1 %v15996_v40  ;;  %1896 = vmatprep.mubr.f32.mxu0 %v23024_v41  ;;  %23067 = vst [vmem:[#allocation61_spill] sm:$0xff] %v16060_v10  ;;  %23068 = vst [vmem:[#allocation62_spill] sm:$0xff] %v16064_v34  ;;  %v16072_v40 = vmul.f32 %v15280_v23, %v16045_v48  ;;  %v16085_v38 = vmul.f32 %v23071_v44, %v15936_v2  ;;  %v16097_v29 = vld [vmem:[#allocation5 + $0x68] sm:$0xff]  ;;  %v1569_v20 = vmul.f32 -2.0, %v15506_v42 }
 0x1b4   : > { %2057 = vmatprep.mubr.f32.mxu1 %v23024_v41  ;;  %23069 = vst [vmem:[#allocation63_spill] sm:$0xff] %v16068_v26  ;;  %23073 = vst [vmem:[#allocation66_spill] sm:$0xff] %v16089_v12  ;;  %v16093_v6 = vmul.f32 %v23071_v44, %v15946_v32  ;;  %v16107_v10 = vmul.f32 %v15367_v25, %v15948_v13  ;;  %v16117_v30 = vmul.f32 %v23071_v44, %v15950_v21 }
 0x1b5   : > { %23070 = vst [vmem:[#allocation64_spill] sm:$0xff] %v16072_v40  ;;  %23072 = vst [vmem:[#allocation65_spill] sm:$0xff] %v16085_v38  ;;  %v16121_v23 = vmul.f32 %v15367_v25, %v15967_v45  ;;  %v16127_v40 = vmul.f32 %v23071_v44, %v15981_v47  ;;  %v16135_v53 = vmul.f32 %v15425_v24, %v16012_v49  ;;  %v1585_v34 = vmul.f32 -2.0, %v15544_v37 }
 0x1b6   : > { %1897 = vmatmul.mubr.f32.gmra.mrb[56].mxu0 %v16041_v54  ;;  %23074 = vst [vmem:[#allocation67_spill] sm:$0xff] %v16093_v6  ;;  %23075 = vst [vmem:[#allocation68_spill] sm:$0xff] %v16097_v29  ;;  %v16142_v26 = vmul.f32 %v15397_v17, %v16035_v14  ;;  %v16146_v44 = vmul.f32 %v15425_v24, %v16037_v18  ;;  %v16150_v12 = vmul.f32 %v15397_v17, %v16043_v36  ;;  %v16154_v6 = vld [vmem:[#allocation5 + $0x70] sm:$0xff] }
 0x1b7   : > { %2058 = vmatmul.mubr.f32.gmra.mrb[56].mxu1 %v16041_v54  ;;  %1902 = vmatprep.mubr.f32.mxu0 %v23024_v41  ;;  %23076 = vst [vmem:[#allocation69_spill] sm:$0xff] %v16107_v10  ;;  %23077 = vst [vmem:[#allocation70_spill] sm:$0xff] %v16117_v30  ;;  %v16131_v54 = vmul.f32 %v15397_v17, %v16010_v3  ;;  %v16162_v30 = vmul.f32 %v15425_v24, %v16045_v48 }
 0x1b8   : > { %2063 = vmatprep.mubr.f32.mxu1 %v23024_v41  ;;  %23079 = vst [vmem:[#allocation72_spill] sm:$0xff] %v16135_v53  ;;  %23080 = vst [vmem:[#allocation73_spill] sm:$0xff] %v16142_v26  ;;  %v16170_v38 = vmul.f32 %v15397_v17, %v16049_v4  ;;  %v16174_v25 = vmul.f32 %v15425_v24, %v16074_v60  ;;  %v1601_v10 = vmul.f32 %v15866_v16, %v15934_v22  ;;  %v23114_v24 = vld [vmem:[#allocation47_spill] sm:$0xff] }
 0x1b9   : > { %23078 = vst [vmem:[#allocation71_spill] sm:$0xff] %v16131_v54  ;;  %23081 = vst [vmem:[#allocation74_spill] sm:$0xff] %v16154_v6  ;;  %v1617_v53 = vmul.f32 %v15874_v57, %v15936_v2  ;;  %v1619_v17 = vmul.f32 %v15895_v39, %v15946_v32  ;;  %v1600_v16 = vmul.f32 %v15903_v55, %v15948_v13  ;;  %v1571_v55 = vmul.f32 -2.0, %v15512_v31  ;;  %v23085_v13 = vld [vmem:[#allocation18_spill] sm:$0xff] }
 0x1ba   : > { %1903 = vmatmul.mubr.f32.gmra.mrb[58].mxu0 %v16097_v29  ;;  %v16190_v26 = vmul.f32 %v15451_v58, %v1601_v10  ;;  %v1616_v57 = vmul.f32 %v15914_v28, %v15950_v21  ;;  %v1602_v32 = vmul.f32 %v15931_v61, %v15967_v45  ;;  %v1633_v21 = vmul.f32 %v1569_v20, %v16010_v3  ;;  %v23084_v10 = vld [vmem:[#allocation16_spill] sm:$0xff] }
 0x1bb   : > { %2064 = vmatmul.mubr.f32.gmra.mrb[58].mxu1 %v16097_v29  ;;  %1908 = vmatprep.mubr.f32.mxu0 %v23024_v41  ;;  %v1603_v29 = vmul.f32 %v15886_v7, %v15938_v33  ;;  %v16198_v7 = vld [vmem:[#allocation5 + $0x78] sm:$0xff]  ;;  %v16201_v39 = vmul.f32 %v15478_v52, %v1617_v53  ;;  %v16207_v2 = vmul.f32 %v15478_v52, %v1619_v17  ;;  %v1587_v45 = vmul.f32 -2.0, %v15551_v1  ;;  %v23107_v17 = vld [vmem:[#allocation35_spill] sm:$0xff] }
 0x1bc   : > { %2069 = vmatprep.mubr.f32.mxu1 %v23024_v41  ;;  %23082 = vst [vmem:[#allocation75_spill] sm:$0xff] %v16198_v7  ;;  %v16212_v28 = vmul.f32 %v15451_v58, %v1600_v16  ;;  %v16215_v33 = vmul.f32 %v15478_v52, %v1616_v57  ;;  %v1649_v53 = vmul.f32 %v1585_v34, %v16012_v49  ;;  %v1584_v57 = vmul.f32 -2.0, %v23052_v15 }
 0x1bd   : > { %v16204_v22 = vmul.f32 %v15451_v58, %v1603_v29  ;;  %v1618_v29 = vmul.f32 %v16007_v19, %v15981_v47  ;;  %v16231_v61 = vmul.f32 %v15451_v58, %v1602_v32  ;;  %v16240_v3 = vmul.f32 %v15482_v8, %v1633_v21  ;;  %v23135_v58 = vld [vmem:[#allocation64_spill] sm:$0xff] }
 0x1be   : > { %1909 = vmatmul.mubr.f32.gmra.mrb[60].mxu0 %v16154_v6  ;;  %v16243_v49 = vmul.f32 %v15538_v62, %v1649_v53  ;;  %v1635_v20 = vmul.f32 %v1571_v55, %v16035_v14  ;;  %v1568_v47 = vmul.f32 -2.0, %v15486_v35  ;;  %v1651_v16 = vmul.f32 %v1587_v45, %v16037_v18  ;;  %v23083_v53 = vld [vmem:[#allocation21_spill] sm:$0xff] }
 0x1bf   : > { %2070 = vmatmul.mubr.f32.gmra.mrb[60].mxu1 %v16154_v6  ;;  %1914 = vmatprep.mubr.f32.mxu0 %v23024_v41  ;;  %v16234_v19 = vmul.f32 %v15478_v52, %v1618_v29  ;;  %v1570_v32 = vmul.f32 -2.0, %v23053_v56  ;;  %v1586_v55 = vmul.f32 -2.0, %v23054_v46  ;;  %v1648_v18 = vmul.f32 %v1584_v57, %v16045_v48  ;;  %v23089_v29 = vld [vmem:[#allocation22_spill] sm:$0xff] }
 0x1c0   : > { %2075 = vmatprep.mubr.f32.mxu1 %v23024_v41  ;;  %v16256_v21 = vmul.f32 %v15482_v8, %v1635_v20  ;;  %v1632_v14 = vmul.f32 %v1568_v47, %v16043_v36  ;;  %v16262_v34 = vmul.f32 %v15538_v62, %v1651_v16  ;;  %v23086_v20 = vpack.c.bf16 %v23048_v43, %v23047_v11  ;;  %v23088_v16 = vld [vmem:[#allocation20_spill] sm:$0xff] }
 0x1c1   : > { %v1634_v45 = vmul.f32 %v1570_v32, %v16049_v4  ;;  %v1650_v47 = vmul.f32 %v1586_v55, %v16074_v60  ;;  %v23090_v48 = vpack.c.bf16 %v23050_v63, %v23049_v51  ;;  %v23091_v4 = vpack.c.bf16 %v15544_v37, %v15506_v42  ;;  %v23095_v42 = vld [vmem:[#allocation54_spill] sm:$0xff]  ;;  %v23096_v37 = vld [vmem:[#allocation24_spill] sm:$0xff]  ;;  %v23105_v55 = vld [vmem:[#allocation23_spill] sm:$0xff] }
 0x1c2   : > { %1915 = vmatmul.mubr.f32.gmra.mrb[62].mxu0 %v16198_v7  ;;  %v16273_v36 = vmul.f32 %v15482_v8, %v1632_v14  ;;  %v16287_v43 = vmul.f32 %v15538_v62, %v1648_v18  ;;  %v23093_v60 = vpack.c.bf16 %v15551_v1, %v15512_v31  ;;  %v23097_v32 = vld [vmem:[#allocation14_spill] sm:$0xff]  ;;  %v23098_v14 = vld [vmem:[#allocation27_spill] sm:$0xff]  ;;  %v23100_v31 = vld [vmem:[#allocation32_spill] sm:$0xff]  ;;  %v23111_v11 = vpack.c.bf16 %v15971_v5, %v15965_v0 }
 0x1c3   : > { %2076 = vmatmul.mubr.f32.gmra.mrb[62].mxu1 %v16198_v7  ;;  %2146 = vmatprep.mubr.f32.mxu0 %v23024_v41  ;;  %v16290_v57 = vmul.f32 %v15482_v8, %v1634_v45  ;;  %v16297_v51 = vmul.f32 %v15538_v62, %v1650_v47  ;;  %v23101_v1 = vld [vmem:[#allocation34_spill] sm:$0xff]  ;;  %v23106_v63 = vld [vmem:[#allocation28_spill] sm:$0xff]  ;;  %v23108_v18 = vld [vmem:[#allocation29_spill] sm:$0xff]  ;;  %v23109_v45 = vpack.c.bf16 %v23054_v46, %v23053_v56 }
 0x1c4   : > { %2307 = vmatprep.mubr.f32.mxu1 %v23024_v41  ;;  %23087 = vst [vmem:[#allocation21_spill] sm:$0xff] %v16273_v36  ;;  %v1271_v56 = vmul.f32 %v23089_v29, %v23089_v29  ;;  %v1252_v46 = vmul.f32 %v23095_v42, %v23095_v42  ;;  %v1254_v5 = vmul.f32 %v23097_v32, %v23097_v32  ;;  %v23119_v62 = vld [vmem:[#allocation50_spill] sm:$0xff]  ;;  %v23120_v8 = vld [vmem:[#allocation51_spill] sm:$0xff] }
 0x1c5   : > { %23092 = vst [vmem:[#allocation16_spill] sm:$0xff] %v16290_v57  ;;  %23094 = vst [vmem:[#allocation18_spill] sm:$0xff] %v16297_v51  ;;  %v1285_v52 = vmul.f32 %v23100_v31, %v23100_v31  ;;  %v23136_v57 = vld [vmem:[#allocation63_spill] sm:$0xff]  ;;  %v23144_v51 = vld [vmem:[#allocation66_spill] sm:$0xff] }
 0x1c6   : > { %2147 = vmatmul.mubr.f32.vlgmr.msra.gmra.mrb[64].mxu0 %v23083_v53  ;;  %v16359_v54 = vsub.f32 1.0, %v1252_v46  ;;  %v23143_v36 = vld [vmem:[#allocation67_spill] sm:$0xff] }
 0x1c7   : > { %2308 = vmatmul.mubr.f32.vlgmr.msra.gmra.mrb[64].mxu1 %v23083_v53  ;;  %13308 = vmatpush1.bf16.msra.mxu0 %v23086_v20  ;;  %v23099_v53 = vld [vmem:[#allocation19_spill] sm:$0xff]  ;;  %v23102_v20 = vld [vmem:[#allocation37_spill] sm:$0xff] }
 0x1c8   : > { %13340 = vmatpush1.bf16.msra.mxu1 %v23090_v48  ;;  %13310 = vmatprep.subr.bf16.mxu0 %v23091_v4  ;;  %v23103_v48 = vld [vmem:[#allocation55_spill] sm:$0xff]  ;;  %v23104_v4 = vpack.c.bf16 %v23052_v15, %v15486_v35  ;;  %v1253_v35 = vmul.f32 %v23084_v10, %v23084_v10  ;;  %v1269_v15 = vmul.f32 %v23085_v13, %v23085_v13 }
 0x1c9   : > { %13342 = vmatprep.subr.bf16.mxu1 %v23093_v60  ;;  %2152 = vmatprep.mubr.f32.mxu0 %v23024_v41  ;;  %v16357_v60 = vsub.f32 1.0, %v1271_v56  ;;  %v23124_v56 = vld [vmem:[#allocation13_spill] sm:$0xff] }
 0x1ca   : > { %2313 = vmatprep.mubr.f32.mxu1 %v23024_v41  ;;  %2153 = vmatmul.mubr.f32.gmra.mrb[66].mxu0 %v23099_v53 }
 0x1cb   : > { %2314 = vmatmul.mubr.f32.gmra.mrb[66].mxu1 %v23099_v53  ;;  %13312 = vmatpush1.bf16.msra.mxu0 %v23104_v4  ;;  %v23110_v53 = vpack.c.bf16 %v15961_v27, %v15957_v9  ;;  %v1255_v4 = vmul.f32 %v23088_v16, %v23088_v16  ;;  %v1268_v9 = vmul.f32 %v23096_v37, %v23096_v37  ;;  %v23112_v27 = vld [vmem:[#allocation30_spill] sm:$0xff] }
 0x1cc   : > { %13344 = vmatpush1.bf16.msra.mxu1 %v23109_v45  ;;  %2158 = vmatprep.mubr.f32.mxu0 %v23024_v41  ;;  %v16345_v45 = vsub.f32 1.0, %v1253_v35  ;;  %v1270_v35 = vmul.f32 %v23098_v14, %v23098_v14 }
 0x1cd   : > { %13314 = vmatprep.subr.bf16.mxu0 %v23110_v53  ;;  %13346 = vmatprep.subr.bf16.mxu1 %v23111_v11  ;;  %v16347_v53 = vsub.f32 1.0, %v1269_v15  ;;  %v16349_v0 = vsub.f32 1.0, %v1255_v4  ;;  %v23113_v11 = vld [vmem:[#allocation38_spill] sm:$0xff]  ;;  %v16361_v7 = vsub.f32 1.0, %v1268_v9  ;;  %v23116_v15 = vld [vmem:[#allocation44_spill] sm:$0xff]  ;;  %v23117_v4 = vld [vmem:[#allocation43_spill] sm:$0xff] }
 0x1ce   : > { %2319 = vmatprep.mubr.f32.mxu1 %v23024_v41  ;;  %2159 = vmatmul.mubr.f32.gmra.mrb[68].mxu0 %v23112_v27  ;;  %v23115_v47 = vpack.c.bf16 %v23113_v11, %v23114_v24  ;;  %v23118_v6 = vpack.c.bf16 %v23116_v15, %v23117_v4  ;;  %v23122_v24 = vld [vmem:[#allocation15_spill] sm:$0xff]  ;;  %v16383_v11 = vsub.f32 1.0, %v1254_v5  ;;  %v23127_v15 = vld [vmem:[#allocation61_spill] sm:$0xff]  ;;  %v16401_v5 = vsub.f32 1.0, %v1270_v35 }
 0x1cf   : > { %2320 = vmatmul.mubr.f32.gmra.mrb[68].mxu1 %v23112_v27  ;;  %v23121_v27 = vpack.c.bf16 %v23119_v62, %v23120_v8  ;;  %v16377_v46 = vmul.f32 %v23124_v56, %v16347_v53  ;;  %v16381_v9 = vmul.f32 %v23122_v24, %v16349_v0  ;;  %2164 = vmatprep.mubr.f32.mxu0 %v23024_v41 }
 0x1d0   : > { %13316 = vmatpush1.bf16.msra.mxu0 %v23115_v47  ;;  %13348 = vmatpush1.bf16.msra.mxu1 %v23118_v6  ;;  %v16373_v47 = vmul.f32 %v23122_v24, %v16345_v45  ;;  %v23128_v6 = vld [vmem:[#allocation60_spill] sm:$0xff]  ;;  %v16391_v8 = vmul.f32 %v23124_v56, %v16357_v60  ;;  %v16395_v62 = vmul.f32 %v23122_v24, %v16359_v54 }
 0x1d1   : > { %13318 = vmatprep.subr.bf16.mxu0 %v23121_v27  ;;  %23125 = vst [vmem:[#allocation22_spill] sm:$0xff] %v16377_v46  ;;  %23126 = vst [vmem:[#allocation54_spill] sm:$0xff] %v16381_v9  ;;  %v23129_v4 = vpack.c.bf16 %v23127_v15, %v23128_v6  ;;  %v16399_v27 = vmul.f32 %v23124_v56, %v16361_v7  ;;  %2325 = vmatprep.mubr.f32.mxu1 %v23024_v41  ;;  %v23133_v15 = vld [vmem:[#allocation33_spill] sm:$0xff] }
 0x1d2   : > { %23123 = vst [vmem:[#allocation20_spill] sm:$0xff] %v16373_v47  ;;  %23130 = vst [vmem:[#allocation24_spill] sm:$0xff] %v16391_v8  ;;  %2165 = vmatmul.mubr.f32.gmra.mrb[70].mxu0 %v23133_v15  ;;  %v23137_v35 = vpack.c.bf16 %v23135_v58, %v23136_v57  ;;  %v16423_v6 = vmul.f32 %v23124_v56, %v16401_v5  ;;  %v23140_v47 = vld [vmem:[#allocation65_spill] sm:$0xff]  ;;  %v1301_v58 = vmul.f32 %v23101_v1, %v23101_v1 }
 0x1d3   : > { %13350 = vmatprep.subr.bf16.mxu1 %v23129_v4  ;;  %23131 = vst [vmem:[#allocation14_spill] sm:$0xff] %v16395_v62  ;;  %23132 = vst [vmem:[#allocation27_spill] sm:$0xff] %v16399_v27  ;;  %v16409_v4 = vmul.f32 %v23122_v24, %v16383_v11  ;;  %2326 = vmatmul.mubr.f32.gmra.mrb[70].mxu1 %v23133_v15  ;;  %v23139_v24 = vpack.c.bf16 %v16103_v59, %v16078_v50  ;;  %v23141_v15 = vld [vmem:[#allocation62_spill] sm:$0xff]  ;;  %v16433_v57 = vsub.f32 1.0, %v1285_v52  ;;  %v23149_v50 = vld [vmem:[#allocation69_spill] sm:$0xff] }
 0x1d4   : > { %13320 = vmatpush1.bf16.msra.mxu0 %v23137_v35  ;;  %23138 = vst [vmem:[#allocation32_spill] sm:$0xff] %v16423_v6  ;;  %v23142_v46 = vpack.c.bf16 %v23140_v47, %v23141_v15  ;;  %v1287_v35 = vmul.f32 %v23102_v20, %v23102_v20  ;;  %v1303_v56 = vmul.f32 %v23103_v48, %v23103_v48  ;;  %v23146_v47 = vld [vmem:[#allocation56_spill] sm:$0xff]  ;;  %v23148_v15 = vld [vmem:[#allocation70_spill] sm:$0xff] }
 0x1d5   : > { %23134 = vst [vmem:[#allocation19_spill] sm:$0xff] %v16409_v4  ;;  %13352 = vmatpush1.bf16.msra.mxu1 %v23139_v24  ;;  %v23145_v62 = vpack.c.bf16 %v23143_v36, %v23144_v51  ;;  %2170 = vmatprep.mubr.f32.mxu0 %v23024_v41  ;;  %v1284_v59 = vmul.f32 %v23105_v55, %v23105_v55  ;;  %v23147_v36 = vld [vmem:[#allocation25_spill] sm:$0xff] }
 0x1d6   : > { %13322 = vmatprep.subr.bf16.mxu0 %v23142_v46  ;;  %v1300_v52 = vmul.f32 %v23106_v63, %v23106_v63  ;;  %2331 = vmatprep.mubr.f32.mxu1 %v23024_v41  ;;  %v16451_v46 = vsub.f32 1.0, %v1301_v58  ;;  %v16455_v51 = vmul.f32 %v23147_v36, %v16433_v57  ;;  %v16459_v24 = vsub.f32 1.0, %v1303_v56  ;;  %v23152_v56 = vld [vmem:[#allocation72_spill] sm:$0xff] }
 0x1d7   : > { %13354 = vmatprep.subr.bf16.mxu1 %v23145_v62  ;;  %2171 = vmatmul.mubr.f32.gmra.mrb[72].mxu0 %v23146_v47  ;;  %v16457_v62 = vsub.f32 1.0, %v1287_v35  ;;  %v23150_v4 = vpack.c.bf16 %v23148_v15, %v23149_v50  ;;  %v16465_v6 = vsub.f32 1.0, %v1284_v59  ;;  %v1286_v58 = vmul.f32 %v23107_v17, %v23107_v17  ;;  %v23157_v15 = vld [vmem:[#allocation73_spill] sm:$0xff] }
 0x1d8   : > { %2332 = vmatmul.mubr.f32.gmra.mrb[72].mxu1 %v23146_v47  ;;  %v16467_v27 = vsub.f32 1.0, %v1300_v52  ;;  %v1302_v9 = vmul.f32 %v23108_v18, %v23108_v18  ;;  %v23151_v35 = vpack.c.bf16 %v16127_v40, %v16121_v23  ;;  %v23153_v47 = vld [vmem:[#allocation71_spill] sm:$0xff]  ;;  %v23158_v23 = vpack.c.bf16 %v16146_v44, %v23157_v15  ;;  %2176 = vmatprep.mubr.f32.mxu0 %v23024_v41 }
 0x1d9   : > { %13324 = vmatpush1.bf16.msra.mxu0 %v23150_v4  ;;  %v23154_v8 = vpack.c.bf16 %v23152_v56, %v23153_v47  ;;  %v23155_v4 = vld [vmem:[#allocation17_spill] sm:$0xff]  ;;  %v16485_v59 = vmul.f32 %v23147_v36, %v16457_v62  ;;  %v16497_v40 = vmul.f32 %v23147_v36, %v16465_v6  ;;  %2337 = vmatprep.mubr.f32.mxu1 %v23024_v41  ;;  %v1541_v17 = vmul.f32 -2.0, %v23084_v10 }
 0x1da   : > { %13356 = vmatpush1.bf16.msra.mxu1 %v23151_v35  ;;  %v16481_v50 = vmul.f32 %v23155_v4, %v16451_v46  ;;  %v16489_v52 = vmul.f32 %v23155_v4, %v16459_v24  ;;  %v16503_v35 = vsub.f32 1.0, %v1286_v58  ;;  %v16505_v56 = vsub.f32 1.0, %v1302_v9  ;;  %v23159_v47 = vld [vmem:[#allocation57_spill] sm:$0xff] }
 0x1db   : > { %13326 = vmatprep.subr.bf16.mxu0 %v23154_v8  ;;  %23156 = vst [vmem:[#allocation34_spill] sm:$0xff] %v16485_v59  ;;  %13358 = vmatprep.subr.bf16.mxu1 %v23158_v23  ;;  %v16501_v8 = vmul.f32 %v23155_v4, %v16467_v27  ;;  %v23160_v23 = vld [vmem:[#allocation31_spill] sm:$0xff]  ;;  %v23161_v9 = vpack.c.bf16 %v16162_v30, %v16150_v12  ;;  %v1557_v59 = vmul.f32 -2.0, %v23085_v13  ;;  %v23166_v30 = vld [vmem:[#allocation26_spill] sm:$0xff]  ;;  %v1543_v58 = vmul.f32 -2.0, %v23088_v16 }
 0x1dc   : > { %2177 = vmatmul.mubr.f32.gmra.mrb[74].mxu0 %v23159_v47  ;;  %v16515_v18 = vmul.f32 %v23160_v23, %v16345_v45  ;;  %2338 = vmatmul.mubr.f32.gmra.mrb[74].mxu1 %v23159_v47  ;;  %v16526_v44 = vmul.f32 %v23147_v36, %v16503_v35  ;;  %v16530_v15 = vmul.f32 %v23155_v4, %v16505_v56 }
 0x1dd   : > { %13328 = vmatpush1.bf16.msra.mxu0 %v23161_v9  ;;  %v23164_v47 = vpack.c.bf16 %v16174_v25, %v16170_v38  ;;  %v23165_v12 = vpack.c.bf16 %v16201_v39, %v16190_v26  ;;  %v16541_v9 = vmul.f32 %v23166_v30, %v16347_v53  ;;  %v16545_v36 = vmul.f32 %v23160_v23, %v16349_v0 }
 0x1de   : > { %23162 = vst [vmem:[#allocation37_spill] sm:$0xff] %v16526_v44  ;;  %23163 = vst [vmem:[#allocation55_spill] sm:$0xff] %v16530_v15  ;;  %v16549_v4 = vmul.f32 %v23166_v30, %v16357_v60  ;;  %v23168_v25 = vpack.c.bf16 %v16207_v2, %v16204_v22  ;;  %2182 = vmatprep.mubr.f32.mxu0 %v23024_v41  ;;  %v16560_v26 = vmul.f32 %v23160_v23, %v16359_v54  ;;  %v23175_v2 = vld [vmem:[#allocation36_spill] sm:$0xff] }
 0x1df   : > { %13360 = vmatpush1.bf16.msra.mxu1 %v23164_v47  ;;  %13330 = vmatprep.subr.bf16.mxu0 %v23165_v12  ;;  %23167 = vst [vmem:[#allocation23_spill] sm:$0xff] %v16545_v36  ;;  %v16564_v39 = vmul.f32 %v23166_v30, %v16361_v7  ;;  %v1559_v47 = vmul.f32 -2.0, %v23089_v29  ;;  %v23171_v12 = vld [vmem:[#allocation58_spill] sm:$0xff]  ;;  %v1540_v38 = vmul.f32 -2.0, %v23095_v42  ;;  %v23173_v44 = vpack.c.bf16 %v16215_v33, %v16212_v28  ;;  %v23179_v33 = vld [vmem:[#allocation41_spill] sm:$0xff] }
 0x1e0   : > { %13362 = vmatprep.subr.bf16.mxu1 %v23168_v25  ;;  %23169 = vst [vmem:[#allocation28_spill] sm:$0xff] %v16560_v26  ;;  %2343 = vmatprep.mubr.f32.mxu1 %v23024_v41  ;;  %v16575_v25 = vmul.f32 %v23160_v23, %v16383_v11  ;;  %v16586_v22 = vmul.f32 %v23166_v30, %v16401_v5  ;;  %v1556_v23 = vmul.f32 -2.0, %v23096_v37  ;;  %v1542_v26 = vmul.f32 -2.0, %v23097_v32 }
 0x1e1   : > { %23170 = vst [vmem:[#allocation30_spill] sm:$0xff] %v16564_v39  ;;  %2183 = vmatmul.mubr.f32.gmra.mrb[76].mxu0 %v23171_v12  ;;  %2344 = vmatmul.mubr.f32.gmra.mrb[76].mxu1 %v23171_v12  ;;  %v16590_v36 = vmul.f32 %v23175_v2, %v16433_v57  ;;  %v23177_v12 = vpack.c.bf16 %v16234_v19, %v16231_v61  ;;  %v1573_v19 = vmul.f32 -2.0, %v23100_v31 }
 0x1e2   : > { %23172 = vst [vmem:[#allocation38_spill] sm:$0xff] %v16575_v25  ;;  %13332 = vmatpush1.bf16.msra.mxu0 %v23173_v44  ;;  %23174 = vst [vmem:[#allocation47_spill] sm:$0xff] %v16586_v22  ;;  %v23178_v28 = vpack.c.bf16 %v16243_v49, %v16240_v3  ;;  %v16601_v44 = vmul.f32 %v23179_v33, %v16451_v46  ;;  %v16605_v30 = vmul.f32 %v23175_v2, %v16457_v62  ;;  %v23184_v25 = vld [vmem:[#allocation21_spill] sm:$0xff] }
 0x1e3   : > { %23176 = vst [vmem:[#allocation44_spill] sm:$0xff] %v16590_v36  ;;  %13364 = vmatpush1.bf16.msra.mxu1 %v23177_v12  ;;  %v16609_v15 = vmul.f32 %v23179_v33, %v16459_v24  ;;  %v23182_v61 = vpack.c.bf16 %v16262_v34, %v16256_v21  ;;  %2188 = vmatprep.mubr.f32.mxu0 %v23024_v41  ;;  %v1558_v12 = vmul.f32 -2.0, %v23098_v14 }
 0x1e4   : > { %13334 = vmatprep.subr.bf16.mxu0 %v23178_v28  ;;  %23180 = vst [vmem:[#allocation43_spill] sm:$0xff] %v16605_v30  ;;  %v16620_v3 = vmul.f32 %v23175_v2, %v16465_v6  ;;  %v16624_v49 = vmul.f32 %v23179_v33, %v16467_v27  ;;  %2349 = vmatprep.mubr.f32.mxu1 %v23024_v41  ;;  %v23183_v28 = vld [vmem:[#allocation59_spill] sm:$0xff]  ;;  %v23186_v30 = vld [vmem:[#allocation18_spill] sm:$0xff] }
 0x1e5   : > { %23181 = vst [vmem:[#allocation50_spill] sm:$0xff] %v16609_v15  ;;  %13366 = vmatprep.subr.bf16.mxu1 %v23182_v61  ;;  %2189 = vmatmul.mubr.f32.gmra.mrb[78].mxu0 %v23183_v28  ;;  %v16635_v61 = vmul.f32 %v23175_v2, %v16503_v35  ;;  %v23185_v22 = vpack.c.bf16 %v16287_v43, %v23184_v25  ;;  %v1589_v2 = vmul.f32 -2.0, %v23101_v1  ;;  %v23187_v15 = vld [vmem:[#allocation16_spill] sm:$0xff] }
 0x1e6   : > { %2350 = vmatmul.mubr.f32.gmra.mrb[78].mxu1 %v23183_v28  ;;  %v13391_v39 = vpack.c.bf16 %v16624_v49, %v16620_v3  ;;  %v16646_v34 = vmul.f32 %v23179_v33, %v16505_v56  ;;  %v1605_v21 = vmul.f32 %v1541_v17, %v16345_v45  ;;  %v23188_v36 = vpack.c.bf16 %v23186_v30, %v23187_v15  ;;  %v23191_v15 = vld [vmem:[#allocation45_spill] sm:$0xff]  ;;  %v16966_v49 = vpop.permute.xlu0 %3054 }
 0x1e7   : > { %13336 = vmatpush1.bf16.msra.mxu0 %v23185_v22  ;;  %v23189_v28 = vpack.c.bf16 %v23085_v13, %v23084_v10  ;;  %v1621_v43 = vmul.f32 %v1557_v59, %v16347_v53  ;;  %v1607_v22 = vmul.f32 %v1543_v58, %v16349_v0  ;;  %v1623_v25 = vmul.f32 %v1559_v47, %v16357_v60  ;;  %v23192_v60 = vld [vmem:[#allocation40_spill] sm:$0xff]  ;;  %v23194_v47 = vld [vmem:[#allocation35_spill] sm:$0xff] }
 0x1e8   : > { %13368 = vmatpush1.bf16.msra.mxu1 %v23188_v36  ;;  %v1575_v33 = vmul.f32 -2.0, %v23102_v20  ;;  %v23190_v17 = vpack.c.bf16 %v23089_v29, %v23088_v16  ;;  %2194 = vmatprep.mubr.f32.mxu0 %v23024_v41  ;;  %v13423_v45 = vpack.c.bf16 %v16646_v34, %v16635_v61  ;;  %v16667_v13 = vmul.f32 %v23191_v15, %v1605_v21  ;;  %v23193_v0 = vld [vmem:[#allocation48_spill] sm:$0xff] }
 0x1e9   : > { %13370 = vmatprep.subr.bf16.mxu0 %v23189_v28  ;;  %v1604_v10 = vmul.f32 %v1540_v38, %v16359_v54  ;;  %v1591_v53 = vmul.f32 -2.0, %v23103_v48  ;;  %2355 = vmatprep.mubr.f32.mxu1 %v23024_v41  ;;  %v16674_v59 = vmul.f32 %v23193_v0, %v1621_v43  ;;  %v16677_v29 = vmul.f32 %v23191_v15, %v1607_v22 }
 0x1ea   : > { %13402 = vmatprep.subr.bf16.mxu1 %v23190_v17  ;;  %2195 = vmatmul.mubr.f32.gmra.mrb[80].mxu0 %v23192_v60  ;;  %v16680_v16 = vmul.f32 %v23193_v0, %v1623_v25  ;;  %v1572_v58 = vmul.f32 -2.0, %v23105_v55  ;;  %v1620_v54 = vmul.f32 %v1556_v23, %v16361_v7  ;;  %v1606_v36 = vmul.f32 %v1542_v26, %v16383_v11  ;;  %v23195_v25 = vld [vmem:[#allocation46_spill] sm:$0xff] }
 0x1eb   : > { %2356 = vmatmul.mubr.f32.gmra.mrb[80].mxu1 %v23192_v60  ;;  %2200 = vmatprep.mubr.f32.mxu0 %v23024_v41  ;;  %v1588_v38 = vmul.f32 -2.0, %v23106_v63  ;;  %v1574_v30 = vmul.f32 -2.0, %v23194_v47  ;;  %v13393_v21 = vpack.c.bf16 %v16674_v59, %v16667_v13  ;;  %v1622_v43 = vmul.f32 %v1558_v12, %v16401_v5  ;;  %v23197_v12 = vld [vmem:[#allocation53_spill] sm:$0xff]  ;;  %23246 = vst [vmem:[#allocation51_spill] sm:$0xff] %v16966_v49 }
 0x1ec   : > { %2361 = vmatprep.mubr.f32.mxu1 %v23024_v41  ;;  %v1637_v22 = vmul.f32 %v1573_v19, %v16433_v57  ;;  %v16697_v7 = vmul.f32 %v23191_v15, %v1604_v10  ;;  %v16700_v11 = vmul.f32 %v23193_v0, %v1620_v54  ;;  %v1653_v26 = vmul.f32 %v1589_v2, %v16451_v46 }
 0x1ed   : > { %v1639_v23 = vmul.f32 %v1575_v33, %v16457_v62  ;;  %v16706_v17 = vmul.f32 %v23191_v15, %v1606_v36  ;;  %v16709_v28 = vmul.f32 %v23193_v0, %v1622_v43  ;;  %v1655_v5 = vmul.f32 %v1591_v53, %v16459_v24  ;;  %v23196_v62 = vld [vmem:[#allocation49_spill] sm:$0xff]  ;;  %v23199_v36 = vld [vmem:[#allocation42_spill] sm:$0xff] }
 0x1ee   : > { %2201 = vmatmul.mubr.f32.gmra.mrb[82].mxu0 %v23195_v25  ;;  %v1636_v57 = vmul.f32 %v1572_v58, %v16465_v6  ;;  %v13395_v46 = vpack.c.bf16 %v16700_v11, %v16697_v7  ;;  %v16718_v19 = vmul.f32 %v23196_v62, %v1637_v22  ;;  %v16721_v2 = vmul.f32 %v23197_v12, %v1653_v26  ;;  %v23198_v33 = vld [vmem:[#allocation29_spill] sm:$0xff] }
 0x1ef   : > { %2362 = vmatmul.mubr.f32.gmra.mrb[82].mxu1 %v23195_v25  ;;  %2206 = vmatprep.mubr.f32.mxu0 %v23024_v41  ;;  %v1590_v15 = vmul.f32 -2.0, %v23198_v33  ;;  %v13427_v6 = vpack.c.bf16 %v16709_v28, %v16706_v17  ;;  %v16728_v24 = vmul.f32 %v23196_v62, %v1639_v23  ;;  %v16731_v10 = vmul.f32 %v23197_v12, %v1655_v5  ;;  %v23201_v23 = vld [vmem:[#allocation52_spill] sm:$0xff] }
 0x1f0   : > { %2367 = vmatprep.mubr.f32.mxu1 %v23024_v41  ;;  %v1652_v53 = vmul.f32 %v1588_v38, %v16467_v27  ;;  %v13397_v0 = vpack.c.bf16 %v16721_v2, %v16718_v19  ;;  %v1638_v58 = vmul.f32 %v1574_v30, %v16503_v35  ;;  %v16742_v22 = vmul.f32 %v23196_v62, %v1636_v57  ;;  %v23200_v30 = vld [vmem:[#allocation39_spill] sm:$0xff]  ;;  %v23202_v5 = vld [vmem:[#allocation68_spill] sm:$0xff]  ;;  %v23203_v57 = vld [vmem:[#allocation74_spill] sm:$0xff] }
 0x1f1   : > { %v1654_v54 = vmul.f32 %v1590_v15, %v16505_v56  ;;  %v13429_v43 = vpack.c.bf16 %v16731_v10, %v16728_v24  ;;  %v23205_v15 = vpack.c.bf16 %v23096_v37, %v23095_v42  ;;  %v16798_v38 = vld [vmem:[#allocation5 + $0x8] sm:$0xff]  ;;  %v23209_v42 = vpack.c.bf16 %v23106_v63, %v23105_v55  ;;  %v23217_v63 = vld [vmem:[#allocation27_spill] sm:$0xff] }
 0x1f2   : > { %2207 = vmatmul.mubr.f32.gmra.mrb[84].mxu0 %v23199_v36  ;;  %v16745_v26 = vmul.f32 %v23197_v12, %v1652_v53  ;;  %v16750_v27 = vmul.f32 %v23196_v62, %v1638_v58  ;;  %v23204_v62 = vld [vmem:[#allocation75_spill] sm:$0xff]  ;;  %v23206_v53 = vpack.c.bf16 %v23098_v14, %v23097_v32  ;;  %v23207_v58 = vpack.c.bf16 %v23101_v1, %v23100_v31  ;;  %v23211_v32 = vld [vmem:[#allocation22_spill] sm:$0xff]  ;;  %v23212_v14 = vld [vmem:[#allocation20_spill] sm:$0xff] }
 0x1f3   : > { %2368 = vmatmul.mubr.f32.gmra.mrb[84].mxu1 %v23199_v36  ;;  %2212 = vmatprep.mubr.f32.mxu0 %v23024_v41  ;;  %v16753_v35 = vmul.f32 %v23197_v12, %v1654_v54  ;;  %v16780_v12 = vld [vmem:[#allocation5] sm:$0xff]  ;;  %v23208_v54 = vpack.c.bf16 %v23103_v48, %v23102_v20  ;;  %v23210_v37 = vpack.c.bf16 %v23198_v33, %v23194_v47  ;;  %v23214_v1 = vld [vmem:[#allocation24_spill] sm:$0xff]  ;;  %v23215_v20 = vld [vmem:[#allocation54_spill] sm:$0xff] }
 0x1f4   : > { %2373 = vmatprep.mubr.f32.mxu1 %v23024_v41  ;;  %v13399_v56 = vpack.c.bf16 %v16745_v26, %v16742_v22  ;;  %v23213_v31 = vpack.c.bf16 %v23211_v32, %v23212_v14  ;;  %v23216_v48 = vpack.c.bf16 %v23214_v1, %v23215_v20  ;;  %v23218_v55 = vld [vmem:[#allocation14_spill] sm:$0xff]  ;;  %v23220_v33 = vld [vmem:[#allocation32_spill] sm:$0xff]  ;;  %v23226_v14 = vpack.c.bf16 %v16501_v8, %v16497_v40  ;;  %v23231_v1 = vld [vmem:[#allocation23_spill] sm:$0xff] }
 0x1f5   : > { %v23219_v47 = vpack.c.bf16 %v23217_v63, %v23218_v55  ;;  %v16834_v32 = vld [vmem:[#allocation5 + $0x18] sm:$0xff]  ;;  %v23232_v20 = vpack.c.bf16 %v16549_v4, %v23231_v1  ;;  %v23233_v40 = vld [vmem:[#allocation30_spill] sm:$0xff]  ;;  %v23245_v3 = vpack.c.bf16 %v16753_v35, %v16750_v27  ;;  %v14611_v1 = vld [vmem:[#allocation5 + $0x40] sm:$0xff] }
 0x1f6   : > { %2213 = vmatmul.mubr.f32.gmra.mrb[86].mxu0 %v23200_v30  ;;  %v23234_v8 = vld [vmem:[#allocation28_spill] sm:$0xff] }
 0x1f7   : > { %2374 = vmatmul.mubr.f32.gmra.mrb[86].mxu1 %v23200_v30  ;;  %2218 = vmatprep.mubr.f32.mxu0 %v23024_v41  ;;  %v23235_v63 = vpack.c.bf16 %v23233_v40, %v23234_v8  ;;  %v23239_v4 = vld [vmem:[#allocation44_spill] sm:$0xff] }
 0x1f8   : > { %2379 = vmatprep.mubr.f32.mxu1 %v23024_v41 }
 0x1fa   : > { %2219 = vmatmul.mubr.f32.gmra.mrb[88].mxu0 %v23201_v23 }
 0x1fb   : > { %2380 = vmatmul.mubr.f32.gmra.mrb[88].mxu1 %v23201_v23  ;;  %2224 = vmatprep.mubr.f32.mxu0 %v23024_v41 }
 0x1fc   : > { %2385 = vmatprep.mubr.f32.mxu1 %v23024_v41 }
 0x1fe   : > { %2225 = vmatmul.mubr.f32.gmra.mrb[90].mxu0 %v23202_v5 }
 0x1ff   : > { %2386 = vmatmul.mubr.f32.gmra.mrb[90].mxu1 %v23202_v5  ;;  %2230 = vmatprep.mubr.f32.mxu0 %v23024_v41 }
 0x200   : > { %2391 = vmatprep.mubr.f32.mxu1 %v23024_v41 }
 0x202   : > { %2231 = vmatmul.mubr.f32.gmra.mrb[92].mxu0 %v23203_v57 }
 0x203   : > { %2392 = vmatmul.mubr.f32.gmra.mrb[92].mxu1 %v23203_v57  ;;  %2236 = vmatprep.mubr.f32.mxu0 %v23024_v41 }
 0x204   : > { %2397 = vmatprep.mubr.f32.mxu1 %v23024_v41 }
 0x206   : > { %2237 = vmatmul.mubr.f32.gmra.mrb[94].mxu0 %v23204_v62 }
 0x207   : > { %2398 = vmatmul.mubr.f32.gmra.mrb[94].mxu1 %v23204_v62  ;;  %2468 = vmatprep.mubr.f32.mxu0 %v23024_v41 }
 0x208   : > { %2629 = vmatprep.mubr.f32.mxu1 %v23024_v41 }
 0x20a   : > { %2469 = vmatmul.mubr.f32.vlgmr.msra.gmra.mrb[96].mxu0 %v16780_v12 }
 0x20b   : > { %2630 = vmatmul.mubr.f32.vlgmr.msra.gmra.mrb[96].mxu1 %v16780_v12  ;;  %13372 = vmatpush1.bf16.msra.mxu0 %v23205_v15  ;;  %v16816_v15 = vld [vmem:[#allocation5 + $0x10] sm:$0xff] }
 0x20c   : > { %13404 = vmatpush1.bf16.msra.mxu1 %v23206_v53  ;;  %13374 = vmatprep.subr.bf16.mxu0 %v23207_v58  ;;  %v23221_v53 = vld [vmem:[#allocation19_spill] sm:$0xff] }
 0x20d   : > { %13406 = vmatprep.subr.bf16.mxu1 %v23208_v54  ;;  %2474 = vmatprep.mubr.f32.mxu0 %v23024_v41  ;;  %v23222_v58 = vpack.c.bf16 %v23220_v33, %v23221_v53  ;;  %v23223_v54 = vpack.c.bf16 %v16481_v50, %v16455_v51  ;;  %v23227_v51 = vld [vmem:[#allocation55_spill] sm:$0xff]  ;;  %v23228_v50 = vld [vmem:[#allocation37_spill] sm:$0xff]  ;;  %v23241_v33 = vld [vmem:[#allocation50_spill] sm:$0xff] }
 0x20e   : > { %2635 = vmatprep.mubr.f32.mxu1 %v23024_v41  ;;  %2475 = vmatmul.mubr.f32.gmra.mrb[98].mxu0 %v16798_v38  ;;  %v23242_v53 = vld [vmem:[#allocation43_spill] sm:$0xff] }
 0x20f   : > { %2636 = vmatmul.mubr.f32.gmra.mrb[98].mxu1 %v16798_v38  ;;  %13376 = vmatpush1.bf16.msra.mxu0 %v23209_v42  ;;  %v23224_v42 = vld [vmem:[#allocation34_spill] sm:$0xff] }
 0x210   : > { %13408 = vmatpush1.bf16.msra.mxu1 %v23210_v37  ;;  %13378 = vmatprep.subr.bf16.mxu0 %v23213_v31  ;;  %v23225_v37 = vpack.c.bf16 %v16489_v52, %v23224_v42  ;;  %v23229_v31 = vpack.c.bf16 %v23227_v51, %v23228_v50  ;;  %v23230_v52 = vpack.c.bf16 %v16541_v9, %v16515_v18  ;;  %v23236_v18 = vld [vmem:[#allocation47_spill] sm:$0xff]  ;;  %v23237_v9 = vld [vmem:[#allocation38_spill] sm:$0xff] }
 0x211   : > { %13410 = vmatprep.subr.bf16.mxu1 %v23216_v48  ;;  %2480 = vmatprep.mubr.f32.mxu0 %v23024_v41  ;;  %v16852_v48 = vld [vmem:[#allocation5 + $0x20] sm:$0xff]  ;;  %v23238_v55 = vpack.c.bf16 %v23236_v18, %v23237_v9  ;;  %v16888_v42 = vld [vmem:[#allocation5 + $0x30] sm:$0xff] }
 0x212   : > { %2641 = vmatprep.mubr.f32.mxu1 %v23024_v41  ;;  %2481 = vmatmul.mubr.f32.gmra.mrb[100].mxu0 %v16816_v15 }
 0x213   : > { %2642 = vmatmul.mubr.f32.gmra.mrb[100].mxu1 %v16816_v15  ;;  %13380 = vmatpush1.bf16.msra.mxu0 %v23219_v47  ;;  %v23240_v47 = vpack.c.bf16 %v16601_v44, %v23239_v4  ;;  %v23244_v44 = vpack.c.bf16 %v16680_v16, %v16677_v29 }
 0x214   : > { %13412 = vmatpush1.bf16.msra.mxu1 %v23222_v58  ;;  %13382 = vmatprep.subr.bf16.mxu0 %v23223_v54  ;;  %v23243_v58 = vpack.c.bf16 %v23241_v33, %v23242_v53  ;;  %v16870_v54 = vld [vmem:[#allocation5 + $0x28] sm:$0xff] }
 0x215   : > { %13414 = vmatprep.subr.bf16.mxu1 %v23225_v37  ;;  %2486 = vmatprep.mubr.f32.mxu0 %v23024_v41 }
 0x216   : > { %2647 = vmatprep.mubr.f32.mxu1 %v23024_v41  ;;  %2487 = vmatmul.mubr.f32.gmra.mrb[102].mxu0 %v16834_v32 }
 0x217   : > { %2648 = vmatmul.mubr.f32.gmra.mrb[102].mxu1 %v16834_v32  ;;  %13384 = vmatpush1.bf16.msra.mxu0 %v23226_v14 }
 0x218   : > { %13416 = vmatpush1.bf16.msra.mxu1 %v23229_v31  ;;  %13386 = vmatprep.subr.bf16.mxu0 %v23230_v52 }
 0x219   : > { %13418 = vmatprep.subr.bf16.mxu1 %v23232_v20  ;;  %2492 = vmatprep.mubr.f32.mxu0 %v23024_v41 }
 0x21a   : > { %2653 = vmatprep.mubr.f32.mxu1 %v23024_v41  ;;  %2493 = vmatmul.mubr.f32.gmra.mrb[104].mxu0 %v16852_v48 }
 0x21b   : > { %2654 = vmatmul.mubr.f32.gmra.mrb[104].mxu1 %v16852_v48  ;;  %13388 = vmatpush1.bf16.msra.mxu0 %v23235_v63 }
 0x21c   : > { %13420 = vmatpush1.bf16.msra.mxu1 %v23238_v55  ;;  %13390 = vmatprep.subr.bf16.mxu0 %v23240_v47 }
 0x21d   : > { %13422 = vmatprep.subr.bf16.mxu1 %v23243_v58  ;;  %2498 = vmatprep.mubr.f32.mxu0 %v23024_v41 }
 0x21e   : > { %2659 = vmatprep.mubr.f32.mxu1 %v23024_v41  ;;  %2499 = vmatmul.mubr.f32.gmra.mrb[106].mxu0 %v16870_v54 }
 0x21f   : > { %2660 = vmatmul.mubr.f32.gmra.mrb[106].mxu1 %v16870_v54  ;;  %13392 = vmatpush1.bf16.msra.mxu0 %v13391_v39  ;;  %v16906_v39 = vld [vmem:[#allocation5 + $0x38] sm:$0xff] }
 0x220   : > { %13424 = vmatpush1.bf16.msra.mxu1 %v13423_v45  ;;  %13394 = vmatprep.subr.bf16.mxu0 %v13393_v21  ;;  %v16976_v21 = vpop.permute.xlu1 %3059 }
 0x221   : > { %13426 = vmatprep.subr.bf16.mxu1 %v23244_v44  ;;  %2504 = vmatprep.mubr.f32.mxu0 %v23024_v41  ;;  %23247 = vst [vmem:[#allocation15_spill] sm:$0xff] %v16976_v21 }
 0x222   : > { %2665 = vmatprep.mubr.f32.mxu1 %v23024_v41  ;;  %2505 = vmatmul.mubr.f32.gmra.mrb[108].mxu0 %v16888_v42 }
 0x223   : > { %2666 = vmatmul.mubr.f32.gmra.mrb[108].mxu1 %v16888_v42  ;;  %13396 = vmatpush1.bf16.msra.mxu0 %v13395_v46 }
 0x224   : > { %13428 = vmatpush1.bf16.msra.mxu1 %v13427_v6  ;;  %13398 = vmatprep.subr.bf16.mxu0 %v13397_v0  ;;  %v16986_v6 = vpop.permute.xlu0 %3064  ;;  %v16996_v35 = vpop.permute.xlu1 %3069 }
 0x225   : > { %13430 = vmatprep.subr.bf16.mxu1 %v13429_v43  ;;  %2510 = vmatprep.mubr.f32.mxu0 %v23024_v41  ;;  %23248 = vst [vmem:[#allocation13_spill] sm:$0xff] %v16986_v6  ;;  %23249 = vst [vmem:[#allocation61_spill] sm:$0xff] %v16996_v35 }
 0x226   : > { %2671 = vmatprep.mubr.f32.mxu1 %v23024_v41  ;;  %2511 = vmatmul.mubr.f32.gmra.mrb[110].mxu0 %v16906_v39 }
 0x227   : > { %2672 = vmatmul.mubr.f32.gmra.mrb[110].mxu1 %v16906_v39  ;;  %13400 = vmatpush1.bf16.msra.mxu0 %v13399_v56 }
 0x228   : > { %13432 = vmatpush1.bf16.msra.mxu1 %v23245_v3  ;;  %2516 = vmatprep.mubr.f32.mxu0 %v23024_v41 }
 0x229   : > { %2677 = vmatprep.mubr.f32.mxu1 %v23024_v41 }
 0x22a   : > { %2517 = vmatmul.mubr.f32.gmra.mrb[112].mxu0 %v23192_v60 }
 0x22b   : > { %2678 = vmatmul.mubr.f32.gmra.mrb[112].mxu1 %v23192_v60  ;;  %2522 = vmatprep.mubr.f32.mxu0 %v23024_v41 }
 0x22c   : > { %2683 = vmatprep.mubr.f32.mxu1 %v23024_v41 }
 0x22e   : > { %2523 = vmatmul.mubr.f32.gmra.mrb[114].mxu0 %v23195_v25 }
 0x22f   : > { %2684 = vmatmul.mubr.f32.gmra.mrb[114].mxu1 %v23195_v25  ;;  %2528 = vmatprep.mubr.f32.mxu0 %v23024_v41 }
 0x230   : > { %2689 = vmatprep.mubr.f32.mxu1 %v23024_v41 }
 0x232   : > { %2529 = vmatmul.mubr.f32.gmra.mrb[116].mxu0 %v23199_v36 }
 0x233   : > { %2690 = vmatmul.mubr.f32.gmra.mrb[116].mxu1 %v23199_v36  ;;  %2534 = vmatprep.mubr.f32.mxu0 %v23024_v41 }
 0x234   : > { %2695 = vmatprep.mubr.f32.mxu1 %v23024_v41 }
 0x236   : > { %2535 = vmatmul.mubr.f32.gmra.mrb[118].mxu0 %v23200_v30 }
 0x237   : > { %2696 = vmatmul.mubr.f32.gmra.mrb[118].mxu1 %v23200_v30  ;;  %2540 = vmatprep.mubr.f32.mxu0 %v23024_v41 }
 0x238   : > { %2701 = vmatprep.mubr.f32.mxu1 %v23024_v41 }
 0x23a   : > { %2541 = vmatmul.mubr.f32.gmra.mrb[120].mxu0 %v23201_v23 }
 0x23b   : > { %2702 = vmatmul.mubr.f32.gmra.mrb[120].mxu1 %v23201_v23  ;;  %2546 = vmatprep.mubr.f32.mxu0 %v23024_v41 }
 0x23c   : > { %2707 = vmatprep.mubr.f32.mxu1 %v23024_v41 }
 0x23e   : > { %2547 = vmatmul.mubr.f32.gmra.mrb[122].mxu0 %v23202_v5 }
 0x23f   : > { %2708 = vmatmul.mubr.f32.gmra.mrb[122].mxu1 %v23202_v5  ;;  %2552 = vmatprep.mubr.f32.mxu0 %v23024_v41 }
 0x240   : > { %2713 = vmatprep.mubr.f32.mxu1 %v23024_v41 }
 0x242   : > { %2553 = vmatmul.mubr.f32.gmra.mrb[124].mxu0 %v23203_v57 }
 0x243   : > { %2714 = vmatmul.mubr.f32.gmra.mrb[124].mxu1 %v23203_v57  ;;  %2558 = vmatprep.mubr.f32.mxu0 %v23024_v41 }
 0x244   : > { %2719 = vmatprep.mubr.f32.mxu1 %v23024_v41 }
 0x246   : > { %2559 = vmatmul.mubr.f32.gmra.mrb[126].mxu0 %v23204_v62 }
 0x247   : > { %2720 = vmatmul.mubr.f32.gmra.mrb[126].mxu1 %v23204_v62  ;;  %2790 = vmatprep.mubr.f32.mxu0 %v23024_v41 }
 0x248   : > { %2951 = vmatprep.mubr.f32.mxu1 %v23024_v41 }
 0x24a   : > { %2791 = vmatmul.mubr.f32.vlgmr.msra.gmra.mrb[128].mxu0 %v16780_v12 }
 0x24b   : > { %2952 = vmatmul.mubr.f32.vlgmr.msra.gmra.mrb[128].mxu1 %v16780_v12  ;;  %2796 = vmatprep.mubr.f32.mxu0 %v23024_v41 }
 0x24c   : > { %2957 = vmatprep.mubr.f32.mxu1 %v23024_v41 }
 0x24e   : > { %2797 = vmatmul.mubr.f32.gmra.mrb[130].mxu0 %v16798_v38 }
 0x24f   : > { %2958 = vmatmul.mubr.f32.gmra.mrb[130].mxu1 %v16798_v38  ;;  %2802 = vmatprep.mubr.f32.mxu0 %v23024_v41 }
 0x250   : > { %2963 = vmatprep.mubr.f32.mxu1 %v23024_v41 }
 0x252   : > { %2803 = vmatmul.mubr.f32.gmra.mrb[132].mxu0 %v16816_v15 }
 0x253   : > { %2964 = vmatmul.mubr.f32.gmra.mrb[132].mxu1 %v16816_v15  ;;  %2808 = vmatprep.mubr.f32.mxu0 %v23024_v41  ;;  %v1826_v34 = vpop.f32.mrb[32].mxu0 }
 0x254   : > { %2969 = vmatprep.mubr.f32.mxu1 %v23024_v41  ;;  %v3072_v61 = vadd.f32 %v16966_v49, %v1826_v34  ;;  %v1987_v45 = vpop.f32.mrb[32].mxu1  ;;  %v1828_v13 = vpop.f32.mrb[33].mxu0 }
 0x255   : > { %v3074_v60 = vadd.f32 %v16966_v49, %v1987_v45  ;;  %v3073_v59 = vadd.f32 %v16966_v49, %v1828_v13  ;;  %v1989_v29 = vpop.f32.mrb[33].mxu1 }
 0x256   : > { %2809 = vmatmul.mubr.f32.gmra.mrb[134].mxu0 %v16834_v32  ;;  %14219 = vtanh.f32 %v3072_v61  ;;  %v3075_v16 = vadd.f32 %v16966_v49, %v1989_v29 }
 0x257   : > { %2970 = vmatmul.mubr.f32.gmra.mrb[134].mxu1 %v16834_v32  ;;  %2814 = vmatprep.mubr.f32.mxu0 %v23024_v41  ;;  %14221 = vtanh.f32 %v3074_v60  ;;  %v1832_v28 = vpop.f32.mrb[34].mxu0 }
 0x258   : > { %2975 = vmatprep.mubr.f32.mxu1 %v23024_v41  ;;  %14223 = vtanh.f32 %v3073_v59  ;;  %v3088_v7 = vadd.f32 %v16976_v21, %v1832_v28  ;;  %v1993_v11 = vpop.f32.mrb[34].mxu1  ;;  %v1834_v25 = vpop.f32.mrb[35].mxu0  ;;  %v14612_v59 = vld [vmem:[#allocation5 + $0x48] sm:$0xff] }
 0x259   : > { %14225 = vtanh.f32 %v3075_v16  ;;  %v3090_v17 = vadd.f32 %v16976_v21, %v1993_v11  ;;  %v3089_v46 = vadd.f32 %v16976_v21, %v1834_v25  ;;  %v1995_v19 = vpop.f32.mrb[35].mxu1 }
 0x25a   : > { %2815 = vmatmul.mubr.f32.gmra.mrb[136].mxu0 %v16852_v48  ;;  %14227 = vtanh.f32 %v3088_v7  ;;  %v3091_v2 = vadd.f32 %v16976_v21, %v1995_v19 }
 0x25b   : > { %2976 = vmatmul.mubr.f32.gmra.mrb[136].mxu1 %v16852_v48  ;;  %2820 = vmatprep.mubr.f32.mxu0 %v23024_v41  ;;  %14229 = vtanh.f32 %v3090_v17 }
 0x25c   : > { %2981 = vmatprep.mubr.f32.mxu1 %v23024_v41  ;;  %v1838_v24 = vpop.f32.mrb[36].mxu0  ;;  %14231 = vtanh.f32 %v3089_v46 }
 0x25d   : > { %v3104_v10 = vadd.f32 %v16986_v6, %v1838_v24  ;;  %v1999_v0 = vpop.f32.mrb[36].mxu1  ;;  %v1840_v36 = vpop.f32.mrb[37].mxu0  ;;  %14233 = vtanh.f32 %v3091_v2 }
 0x25e   : > { %2821 = vmatmul.mubr.f32.gmra.mrb[138].mxu0 %v16870_v54  ;;  %v3106_v43 = vadd.f32 %v16986_v6, %v1999_v0  ;;  %v3105_v22 = vadd.f32 %v16986_v6, %v1840_v36  ;;  %v2001_v26 = vpop.f32.mrb[37].mxu1 }
 0x25f   : > { %2982 = vmatmul.mubr.f32.gmra.mrb[138].mxu1 %v16870_v54  ;;  %2826 = vmatprep.mubr.f32.mxu0 %v23024_v41  ;;  %14235 = vtanh.f32 %v3104_v10  ;;  %v3107_v27 = vadd.f32 %v16986_v6, %v2001_v26 }
 0x260   : > { %2987 = vmatprep.mubr.f32.mxu1 %v23024_v41  ;;  %14237 = vtanh.f32 %v3106_v43  ;;  %v1844_v56 = vpop.f32.mrb[38].mxu0  ;;  %v16999_v38 = vpop.eup %14219 }
 0x261   : > { %14239 = vtanh.f32 %v3105_v22  ;;  %v3120_v30 = vadd.f32 %v16996_v35, %v1844_v56  ;;  %v1846_v23 = vpop.f32.mrb[39].mxu0  ;;  %v17004_v5 = vpop.eup %14221  ;;  %v3200_v12 = vmul.f32 %v16999_v38, %v16999_v38  ;;  %v3520_v15 = vmul.f32 2.0, %v16999_v38 }
 0x262   : > { %2827 = vmatmul.mubr.f32.gmra.mrb[140].mxu0 %v16888_v42  ;;  %14241 = vtanh.f32 %v3107_v27  ;;  %v3121_v62 = vadd.f32 %v16996_v35, %v1846_v23  ;;  %v17011_v37 = vpop.eup %14223  ;;  %v3202_v51 = vmul.f32 %v17004_v5, %v17004_v5  ;;  %v3522_v50 = vmul.f32 2.0, %v17004_v5 }
 0x263   : > { %2988 = vmatmul.mubr.f32.gmra.mrb[140].mxu1 %v16888_v42  ;;  %2832 = vmatprep.mubr.f32.mxu0 %v23024_v41  ;;  %v2005_v57 = vpop.f32.mrb[38].mxu1  ;;  %14243 = vtanh.f32 %v3120_v30  ;;  %v17017_v31 = vpop.eup %14225  ;;  %v17020_v20 = vsub.f32 1.0, %v3200_v12  ;;  %v3201_v48 = vmul.f32 %v17011_v37, %v17011_v37  ;;  %v3521_v18 = vmul.f32 2.0, %v17011_v37 }
 0x264   : > { %2993 = vmatprep.mubr.f32.mxu1 %v23024_v41  ;;  %v3122_v32 = vadd.f32 %v16996_v35, %v2005_v57  ;;  %v2007_v14 = vpop.f32.mrb[39].mxu1  ;;  %14245 = vtanh.f32 %v3121_v62  ;;  %v17024_v40 = vpop.eup %14227  ;;  %v17026_v63 = vsub.f32 1.0, %v3202_v51  ;;  %v3203_v9 = vmul.f32 %v17017_v31, %v17017_v31 }
 0x265   : > { %v3123_v52 = vadd.f32 %v16996_v35, %v2007_v14  ;;  %v17032_v55 = vpop.eup %14229  ;;  %v3584_v47 = vmul.f32 %v3520_v15, %v17020_v20  ;;  %v17039_v58 = vsub.f32 1.0, %v3201_v48  ;;  %v3523_v34 = vmul.f32 2.0, %v17017_v31 }
 0x266   : > { %2833 = vmatmul.mubr.f32.gmra.mrb[142].mxu0 %v16906_v39  ;;  %14247 = vtanh.f32 %v3122_v32  ;;  %v1850_v8 = vpop.f32.mrb[40].mxu0  ;;  %v17041_v54 = vpop.eup %14231  ;;  %v3586_v42 = vmul.f32 %v3522_v50, %v17026_v63  ;;  %v17047_v3 = vsub.f32 1.0, %v3203_v9  ;;  %v3216_v29 = vmul.f32 %v17024_v40, %v17024_v40  ;;  %v14613_v32 = vld [vmem:[#allocation5 + $0x50] sm:$0xff] }
 0x267   : > { %2994 = vmatmul.mubr.f32.gmra.mrb[142].mxu1 %v16906_v39  ;;  %2838 = vmatprep.mubr.f32.mxu0 %v23024_v41  ;;  %14249 = vtanh.f32 %v3123_v52  ;;  %v17035_v4 = vmul.f32 %v17020_v20, %v1850_v8  ;;  %v2011_v33 = vpop.f32.mrb[40].mxu1  ;;  %v1852_v53 = vpop.f32.mrb[41].mxu0  ;;  %v3648_v45 = vmul.f32 %v3584_v47, %v1850_v8  ;;  %v3585_v60 = vmul.f32 %v3521_v18, %v17039_v58 }
 0x268   : > { %2999 = vmatprep.mubr.f32.mxu1 %v23024_v41  ;;  %v17044_v44 = vmul.f32 %v17026_v63, %v2011_v33  ;;  %v2013_v39 = vpop.f32.mrb[41].mxu1  ;;  %v17050_v61 = vpop.eup %14233  ;;  %v17053_v13 = vmul.f32 %v17039_v58, %v1852_v53  ;;  %v3650_v28 = vmul.f32 %v3586_v42, %v2011_v33  ;;  %v3587_v11 = vmul.f32 %v3523_v34, %v17047_v3 }
 0x269   : > { %v17058_v16 = vpop.eup %14235  ;;  %v17061_v7 = vmul.f32 %v17047_v3, %v2013_v39  ;;  %v3536_v17 = vmul.f32 2.0, %v17024_v40  ;;  %v17068_v19 = vmul.f32 %v3648_v45, %v1850_v8  ;;  %v3649_v2 = vmul.f32 %v3585_v60, %v1852_v53 }
 0x26a   : > { %2839 = vmatmul.mubr.f32.gmra.mrb[144].mxu0 %v14611_v1  ;;  %v1856_v25 = vpop.f32.mrb[42].mxu0  ;;  %v17066_v46 = vpop.eup %14237  ;;  %v17070_v24 = vsub.f32 1.0, %v3216_v29  ;;  %v3218_v0 = vmul.f32 %v17032_v55, %v17032_v55  ;;  %v17077_v22 = vmul.f32 %v3650_v28, %v2011_v33  ;;  %v3651_v26 = vmul.f32 %v3587_v11, %v2013_v39 }
 0x26b   : > { %3000 = vmatmul.mubr.f32.gmra.mrb[144].mxu1 %v14611_v1  ;;  %2844 = vmatprep.mubr.f32.mxu0 %v23024_v41  ;;  %v2017_v10 = vpop.f32.mrb[42].mxu1  ;;  %v1858_v36 = vpop.f32.mrb[43].mxu0  ;;  %v3538_v27 = vmul.f32 2.0, %v17032_v55  ;;  %v3217_v56 = vmul.f32 %v17041_v54, %v17041_v54  ;;  %v17086_v57 = vmul.f32 %v3649_v2, %v1852_v53  ;;  %v3537_v52 = vmul.f32 2.0, %v17041_v54 }
 0x26c   : > { %3005 = vmatprep.mubr.f32.mxu1 %v23024_v41  ;;  %v17075_v43 = vpop.eup %14239  ;;  %v17082_v30 = vpop.f32.mrb[43].mxu1  ;;  %v17089_v62 = vmul.f32 %v17070_v24, %v1856_v25  ;;  %v3600_v12 = vmul.f32 %v3536_v17, %v17070_v24  ;;  %v17092_v15 = vsub.f32 1.0, %v3218_v0  ;;  %v17096_v51 = vmul.f32 %v3651_v26, %v2013_v39  ;;  %v14614_v26 = vld [vmem:[#allocation5 + $0x58] sm:$0xff] }
 0x26d   : > { %v17084_v23 = vpop.eup %14241  ;;  %23250 = vst [vmem:[#allocation60_spill] sm:$0xff] %v17086_v57  ;;  %v17098_v50 = vsub.f32 1.0, %v3217_v56  ;;  %v3219_v1 = vmul.f32 %v17050_v61, %v17050_v61  ;;  %v13433_v0 = vpack.c.bf16 %v17041_v54, %v17011_v37  ;;  %v13467_v37 = vpack.c.bf16 %v17032_v55, %v17004_v5 }
 0x26e   : > { %2845 = vmatmul.mubr.f32.gmra.mrb[146].mxu0 %v14612_v59  ;;  %v17094_v14 = vpop.eup %14243  ;;  %23251 = vst [vmem:[#allocation33_spill] sm:$0xff] %v17096_v51  ;;  %v3664_v18 = vmul.f32 %v3600_v12, %v1856_v25  ;;  %v17111_v47 = vmul.f32 %v17092_v15, %v2017_v10  ;;  %v3602_v33 = vmul.f32 %v3538_v27, %v17092_v15 }
 0x26f   : > { %3006 = vmatmul.mubr.f32.gmra.mrb[146].mxu1 %v14612_v59  ;;  %2850 = vmatprep.mubr.f32.mxu0 %v23024_v41  ;;  %v17103_v48 = vpop.f32.mrb[44].mxu0  ;;  %v17106_v8 = vpop.eup %14245  ;;  %v17122_v34 = vmul.f32 %v17098_v50, %v1858_v36  ;;  %v3601_v45 = vmul.f32 %v3537_v52, %v17098_v50  ;;  %v17125_v60 = vsub.f32 1.0, %v3219_v1  ;;  %v3539_v59 = vmul.f32 2.0, %v17050_v61 }
 0x270   : > { %3011 = vmatprep.mubr.f32.mxu1 %v23024_v41  ;;  %v17114_v53 = vpop.f32.mrb[44].mxu1  ;;  %v17117_v42 = vpop.f32.mrb[45].mxu0  ;;  %v17132_v11 = vmul.f32 %v3664_v18, %v1856_v25  ;;  %v3666_v17 = vmul.f32 %v3602_v33, %v2017_v10  ;;  %v13465_v25 = vpack.c.bf16 %v17050_v61, %v17017_v31  ;;  %13434 = vmatprep.subr.bf16.mxu0 %v13433_v0  ;;  %v3552_v31 = vmul.f32 2.0, %v17058_v16 }
 0x271   : > { %v17119_v39 = vpop.eup %14247  ;;  %v17128_v29 = vpop.f32.mrb[45].mxu1  ;;  %v3665_v27 = vmul.f32 %v3601_v45, %v1858_v36  ;;  %v17140_v56 = vmul.f32 %v17125_v60, %v17082_v30  ;;  %v3603_v12 = vmul.f32 %v3539_v59, %v17125_v60  ;;  %v13435_v52 = vpack.c.bf16 %v17024_v40, %v16999_v38 }
 0x272   : > { %2851 = vmatmul.mubr.f32.gmra.mrb[148].mxu0 %v14613_v32  ;;  %v17130_v28 = vpop.eup %14249  ;;  %23252 = vst [vmem:[#allocation64_spill] sm:$0xff] %v17132_v11  ;;  %v3232_v54 = vmul.f32 %v17058_v16, %v17058_v16  ;;  %13466 = vmatprep.subr.bf16.mxu1 %v13465_v25  ;;  %v3234_v61 = vmul.f32 %v17066_v46, %v17066_v46  ;;  %v3554_v40 = vmul.f32 2.0, %v17066_v46  ;;  %v3570_v51 = vmul.f32 2.0, %v17119_v39 }
 0x273   : > { %3012 = vmatmul.mubr.f32.gmra.mrb[148].mxu1 %v14613_v32  ;;  %2856 = vmatprep.mubr.f32.mxu0 %v23024_v41  ;;  %v17145_v32 = vmul.f32 %v3666_v17, %v2017_v10  ;;  %v17153_v1 = vpop.f32.mrb[46].mxu0  ;;  %v17155_v18 = vmul.f32 %v3665_v27, %v1858_v36  ;;  %v3667_v33 = vmul.f32 %v3603_v12, %v17082_v30  ;;  %v3553_v36 = vmul.f32 2.0, %v17075_v43  ;;  %v14615_v27 = vld [vmem:[#allocation5 + $0x60] sm:$0xff] }
 0x274   : > { %3017 = vmatprep.mubr.f32.mxu1 %v23024_v41  ;;  %v17161_v10 = vpop.f32.mrb[46].mxu1  ;;  %v17164_v38 = vpop.f32.mrb[47].mxu0  ;;  %13436 = vmatpush1.bf16.msra.mxu0 %v13435_v52  ;;  %v17166_v5 = vsub.f32 1.0, %v3232_v54  ;;  %v3233_v55 = vmul.f32 %v17075_v43, %v17075_v43  ;;  %v17177_v17 = vsub.f32 1.0, %v3234_v61  ;;  %v3235_v0 = vmul.f32 %v17084_v23, %v17084_v23 }
 0x275   : > { %23253 = vst [vmem:[#allocation63_spill] sm:$0xff] %v17145_v32  ;;  %23254 = vst [vmem:[#allocation65_spill] sm:$0xff] %v17155_v18  ;;  %13468 = vmatpush1.bf16.msra.mxu1 %v13467_v37  ;;  %v17172_v45 = vpop.f32.mrb[47].mxu1  ;;  %v17175_v59 = vmul.f32 %v3667_v33, %v17082_v30  ;;  %v3248_v30 = vmul.f32 %v17094_v14, %v17094_v14 }
 0x276   : > { %2857 = vmatmul.mubr.f32.gmra.mrb[150].mxu0 %v14614_v26  ;;  %v17185_v12 = vmul.f32 %v17166_v5, %v17103_v48  ;;  %v3616_v25 = vmul.f32 %v3552_v31, %v17166_v5  ;;  %v17188_v52 = vsub.f32 1.0, %v3233_v55  ;;  %v17197_v54 = vmul.f32 %v17177_v17, %v17114_v53 }
 0x277   : > { %3018 = vmatmul.mubr.f32.gmra.mrb[150].mxu1 %v14614_v26  ;;  %2862 = vmatprep.mubr.f32.mxu0 %v23024_v41  ;;  %23255 = vst [vmem:[#allocation62_spill] sm:$0xff] %v17175_v59  ;;  %v3555_v26 = vmul.f32 2.0, %v17084_v23  ;;  %v3618_v33 = vmul.f32 %v3554_v40, %v17177_v17  ;;  %v17200_v61 = vsub.f32 1.0, %v3235_v0  ;;  %v3568_v31 = vmul.f32 2.0, %v17094_v14  ;;  %v14616_v59 = vld [vmem:[#allocation5 + $0x68] sm:$0xff] }
 0x278   : > { %3023 = vmatprep.mubr.f32.mxu1 %v23024_v41  ;;  %v17192_v37 = vpop.f32.mrb[48].mxu0  ;;  %v17211_v9 = vmul.f32 %v17188_v52, %v17117_v42  ;;  %v3617_v35 = vmul.f32 %v3553_v36, %v17188_v52  ;;  %v17214_v6 = vsub.f32 1.0, %v3248_v30 }
 0x279   : > { %v17203_v55 = vpop.f32.mrb[48].mxu1  ;;  %v17206_v2 = vpop.f32.mrb[49].mxu0  ;;  %v3682_v0 = vmul.f32 %v3618_v33, %v17114_v53  ;;  %v17221_v21 = vmul.f32 %v17200_v61, %v17128_v29  ;;  %v3619_v49 = vmul.f32 %v3555_v26, %v17200_v61 }
 0x27a   : > { %2863 = vmatmul.mubr.f32.gmra.mrb[152].mxu0 %v14615_v27  ;;  %v17216_v40 = vpop.f32.mrb[49].mxu1  ;;  %v3681_v36 = vmul.f32 %v3617_v35, %v17117_v42  ;;  %v17232_v30 = vmul.f32 %v17214_v6, %v17153_v1  ;;  %v3632_v33 = vmul.f32 %v3568_v31, %v17214_v6 }
 0x27b   : > { %3024 = vmatmul.mubr.f32.gmra.mrb[152].mxu1 %v14615_v27  ;;  %2868 = vmatprep.mubr.f32.mxu0 %v23024_v41  ;;  %v3680_v27 = vmul.f32 %v3616_v25, %v17103_v48  ;;  %v3250_v25 = vmul.f32 %v17119_v39, %v17119_v39  ;;  %v17236_v32 = vmul.f32 %v3682_v0, %v17114_v53 }
 0x27c   : > { %3029 = vmatprep.mubr.f32.mxu1 %v23024_v41  ;;  %v3683_v26 = vmul.f32 %v3619_v49, %v17128_v29  ;;  %v17245_v35 = vmul.f32 %v3681_v36, %v17117_v42  ;;  %v3696_v31 = vmul.f32 %v3632_v33, %v17153_v1  ;;  %v3249_v49 = vmul.f32 %v17106_v8, %v17106_v8 }
 0x27d   : > { %v17227_v18 = vmul.f32 %v3680_v27, %v17103_v48  ;;  %23257 = vst [vmem:[#allocation66_spill] sm:$0xff] %v17236_v32  ;;  %v17239_v11 = vsub.f32 1.0, %v3250_v25  ;;  %v1880_v48 = vpop.f32.mrb[50].mxu0  ;;  %v3569_v36 = vmul.f32 2.0, %v17106_v8 }
 0x27e   : > { %2869 = vmatmul.mubr.f32.gmra.mrb[154].mxu0 %v14616_v59  ;;  %23258 = vst [vmem:[#allocation56_spill] sm:$0xff] %v17245_v35  ;;  %v1882_v27 = vpop.f32.mrb[51].mxu0  ;;  %v17253_v0 = vmul.f32 %v3683_v26, %v17128_v29  ;;  %v14617_v35 = vld [vmem:[#allocation5 + $0x70] sm:$0xff]  ;;  %v17262_v53 = vmul.f32 %v3696_v31, %v17153_v1  ;;  %v17264_v32 = vsub.f32 1.0, %v3249_v49  ;;  %v3251_v29 = vmul.f32 %v17130_v28, %v17130_v28 }
 0x27f   : > { %23256 = vst [vmem:[#allocation67_spill] sm:$0xff] %v17227_v18  ;;  %3030 = vmatmul.mubr.f32.gmra.mrb[154].mxu1 %v14616_v59  ;;  %2874 = vmatprep.mubr.f32.mxu0 %v23024_v41  ;;  %v2041_v59 = vpop.f32.mrb[50].mxu1  ;;  %v17257_v25 = vmul.f32 %v17239_v11, %v17161_v10  ;;  %v3634_v42 = vmul.f32 %v3570_v51, %v17239_v11  ;;  %v3571_v26 = vmul.f32 2.0, %v17130_v28 }
 0x280   : > { %3035 = vmatprep.mubr.f32.mxu1 %v23024_v41  ;;  %23259 = vst [vmem:[#allocation25_spill] sm:$0xff] %v17253_v0  ;;  %v2043_v33 = vpop.f32.mrb[51].mxu1  ;;  %23260 = vst [vmem:[#allocation70_spill] sm:$0xff] %v17262_v53  ;;  %v13437_v18 = vpack.c.bf16 %v17106_v8, %v17075_v43  ;;  %v13469_v1 = vpack.c.bf16 %v17130_v28, %v17084_v23  ;;  %v3377_v49 = vmul.f32 %v17264_v32, %v17164_v38 }
 0x281   : > { %v3698_v51 = vmul.f32 %v3634_v42, %v17161_v10  ;;  %v1886_v31 = vpop.f32.mrb[52].mxu0  ;;  %v17281_v53 = vsub.f32 1.0, %v3251_v29  ;;  %v13439_v42 = vpack.c.bf16 %v17094_v14, %v17058_v16  ;;  %v13471_v23 = vpack.c.bf16 %v17119_v39, %v17066_v46 }
 0x282   : > { %2875 = vmatmul.mubr.f32.gmra.mrb[156].mxu0 %v14617_v35  ;;  %v2047_v0 = vpop.f32.mrb[52].mxu1  ;;  %v1888_v57 = vpop.f32.mrb[53].mxu0  ;;  %13438 = vmatprep.subr.bf16.mxu0 %v13437_v18  ;;  %v13441_v8 = vpack.c.bf16 %v17122_v34, %v17053_v13  ;;  %v13473_v14 = vpack.c.bf16 %v17140_v56, %v17061_v7  ;;  %v17300_v46 = vmul.f32 %v17020_v20, %v17192_v37 }
 0x283   : > { %3036 = vmatmul.mubr.f32.gmra.mrb[156].mxu1 %v14617_v35  ;;  %2880 = vmatprep.mubr.f32.mxu0 %v23024_v41  ;;  %v3633_v35 = vmul.f32 %v3569_v36, %v17264_v32  ;;  %v17286_v43 = vmul.f32 %v3698_v51, %v17161_v10  ;;  %v2049_v28 = vpop.f32.mrb[53].mxu1  ;;  %v3379_v29 = vmul.f32 %v17281_v53, %v17172_v45 }
 0x284   : > { %3041 = vmatprep.mubr.f32.mxu1 %v23024_v41  ;;  %13470 = vmatprep.subr.bf16.mxu1 %v13469_v1  ;;  %v3635_v16 = vmul.f32 %v3571_v26, %v17281_v53  ;;  %v17304_v13 = vmul.f32 %v17026_v63, %v17203_v55  ;;  %v3393_v39 = vmul.f32 %v17039_v58, %v17206_v2 }
 0x285   : > { %v3697_v36 = vmul.f32 %v3633_v35, %v17164_v38  ;;  %13440 = vmatpush1.bf16.msra.mxu0 %v13439_v42  ;;  %13472 = vmatpush1.bf16.msra.mxu1 %v13471_v23  ;;  %v1892_v34 = vpop.f32.mrb[54].mxu0  ;;  %v3395_v7 = vmul.f32 %v17047_v3, %v17216_v40  ;;  %v13445_v56 = vpack.c.bf16 %v3377_v49, %v17211_v9 }
 0x286   : > { %13442 = vmatprep.subr.bf16.mxu0 %v13441_v8  ;;  %v3699_v10 = vmul.f32 %v3635_v16, %v17172_v45  ;;  %13474 = vmatprep.subr.bf16.mxu1 %v13473_v14  ;;  %v2053_v37 = vpop.f32.mrb[54].mxu1  ;;  %v1894_v26 = vpop.f32.mrb[55].mxu0  ;;  %v13477_v55 = vpack.c.bf16 %v3379_v29, %v17221_v21  ;;  %v3408_v51 = vmul.f32 %v17070_v24, %v1880_v48 }
 0x287   : > { %v17309_v18 = vmul.f32 %v3697_v36, %v17164_v38  ;;  %v3410_v2 = vmul.f32 %v17092_v15, %v2041_v59  ;;  %v3409_v1 = vmul.f32 %v17098_v50, %v1882_v27  ;;  %v14618_v38 = vld [vmem:[#allocation5 + $0x78] sm:$0xff]  ;;  %v2055_v35 = vpop.f32.mrb[55].mxu1  ;;  %v23261_v40 = vpack.c.bf16 %v17089_v62, %v17035_v4 }
 0x288   : > { %2881 = vmatmul.mubr.f32.gmra.mrb[158].mxu0 %v14618_v38  ;;  %v17320_v42 = vmul.f32 %v3699_v10, %v17172_v45  ;;  %v3411_v9 = vmul.f32 %v17125_v60, %v2043_v33  ;;  %v17327_v21 = vmul.f32 %v17166_v5, %v1886_v31  ;;  %v17330_v48 = vmul.f32 %v17177_v17, %v2047_v0 }
 0x289   : > { %13444 = vmatpush1.bf16.msra.mxu0 %v23261_v40  ;;  %v23262_v59 = vpack.c.bf16 %v17111_v47, %v17044_v44  ;;  %v13451_v45 = vpack.c.bf16 %v3408_v51, %v17300_v46  ;;  %v13483_v27 = vpack.c.bf16 %v3410_v2, %v17304_v13  ;;  %v13449_v49 = vpack.c.bf16 %v3409_v1, %v3393_v39  ;;  %v1898_v4 = vpop.f32.mrb[56].mxu0  ;;  %v23268_v1 = vld [vmem:[#allocation63_spill] sm:$0xff] }
 0x28a   : > { %13446 = vmatprep.subr.bf16.mxu0 %v13445_v56  ;;  %v13481_v62 = vpack.c.bf16 %v3411_v9, %v3395_v7  ;;  %v3425_v33 = vmul.f32 %v17188_v52, %v1888_v57  ;;  %v3427_v31 = vmul.f32 %v17200_v61, %v2049_v28  ;;  %3042 = vmatmul.mubr.f32.gmra.mrb[158].mxu1 %v14618_v38  ;;  %v2059_v0 = vpop.f32.mrb[56].mxu1  ;;  %v1900_v23 = vpop.f32.mrb[57].mxu0 }
 0x28b   : > { %13476 = vmatpush1.bf16.msra.mxu1 %v23262_v59  ;;  %v3440_v8 = vmul.f32 %v17214_v6, %v1892_v34  ;;  %v3442_v44 = vmul.f32 %v17239_v11, %v2053_v37  ;;  %v3441_v47 = vmul.f32 %v17264_v32, %v1894_v26  ;;  %v3443_v36 = vmul.f32 %v17281_v53, %v2055_v35  ;;  %v2061_v29 = vpop.f32.mrb[57].mxu1  ;;  %v23266_v37 = vld [vmem:[#allocation33_spill] sm:$0xff] }
 0x28c   : > { %13478 = vmatprep.subr.bf16.mxu1 %v13477_v55  ;;  %3905 = vmatprep.mubr.f32.mxu0 %v23024_v41  ;;  %v23263_v16 = vpack.c.bf16 %v17232_v30, %v17185_v12  ;;  %v3456_v57 = vmul.f32 %v17020_v20, %v1898_v4  ;;  %v3458_v28 = vmul.f32 %v17026_v63, %v2059_v0  ;;  %v23269_v35 = vld [vmem:[#allocation65_spill] sm:$0xff]  ;;  %v23271_v4 = vld [vmem:[#allocation67_spill] sm:$0xff] }
 0x28d   : > { %v3457_v14 = vmul.f32 %v17039_v58, %v1900_v23  ;;  %v3459_v46 = vmul.f32 %v17047_v3, %v2061_v29  ;;  %v23264_v13 = vpack.c.bf16 %v17257_v25, %v17197_v54  ;;  %v13455_v39 = vpack.c.bf16 %v3440_v8, %v17327_v21  ;;  %v1904_v12 = vpop.f32.mrb[58].mxu0  ;;  %v23265_v58 = vld [vmem:[#allocation60_spill] sm:$0xff]  ;;  %3976 = vmatprep.mubr.f32.mxu1 %v23024_v41  ;;  %v23272_v23 = vld [vmem:[#allocation66_spill] sm:$0xff] }
 0x28e   : > { %13448 = vmatpush1.bf16.msra.mxu0 %v23263_v16  ;;  %v13487_v34 = vpack.c.bf16 %v3442_v44, %v17330_v48  ;;  %v13453_v10 = vpack.c.bf16 %v3441_v47, %v3425_v33  ;;  %v13485_v30 = vpack.c.bf16 %v3443_v36, %v3427_v31  ;;  %v3776_v20 = vsub.f32 %v3456_v57, %v17068_v19  ;;  %v2065_v3 = vpop.f32.mrb[58].mxu1  ;;  %v1906_v56 = vpop.f32.mrb[59].mxu0  ;;  %v23274_v36 = vld [vmem:[#allocation25_spill] sm:$0xff] }
 0x28f   : > { %13480 = vmatpush1.bf16.msra.mxu1 %v23264_v13  ;;  %13450 = vmatprep.subr.bf16.mxu0 %v13449_v49  ;;  %v3778_v63 = vsub.f32 %v3458_v28, %v17077_v22  ;;  %v3777_v7 = vsub.f32 %v3457_v14, %v23265_v58  ;;  %v3779_v54 = vsub.f32 %v3459_v46, %v23266_v37  ;;  %v2067_v51 = vpop.f32.mrb[59].mxu1  ;;  %v23267_v22 = vld [vmem:[#allocation64_spill] sm:$0xff]  ;;  %v23275_v14 = vld [vmem:[#allocation70_spill] sm:$0xff] }
 0x290   : > { %13482 = vmatprep.subr.bf16.mxu1 %v13481_v62  ;;  %v3472_v25 = vmul.f32 %v17070_v24, %v1904_v12  ;;  %v3474_v26 = vmul.f32 %v17092_v15, %v2065_v3  ;;  %v3473_v55 = vmul.f32 %v17098_v50, %v1906_v56  ;;  %v3475_v19 = vmul.f32 %v17125_v60, %v2067_v51  ;;  %v23270_v24 = vld [vmem:[#allocation62_spill] sm:$0xff] }
 0x291   : > { %v1910_v9 = vpop.f32.mrb[60].mxu0 }
 0x292   : > { %13452 = vmatpush1.bf16.msra.mxu0 %v13451_v45  ;;  %v3792_v2 = vsub.f32 %v3472_v25, %v23267_v22  ;;  %v3794_v38 = vsub.f32 %v3474_v26, %v23268_v1  ;;  %v3793_v40 = vsub.f32 %v3473_v55, %v23269_v35  ;;  %v3795_v15 = vsub.f32 %v3475_v19, %v23270_v24  ;;  %v2071_v21 = vpop.f32.mrb[60].mxu1  ;;  %v1912_v48 = vpop.f32.mrb[61].mxu0  ;;  %v17393_v26 = vld [vmem:[%s22653_s5] sm:$0xff] }
 0x293   : > { %13484 = vmatpush1.bf16.msra.mxu1 %v13483_v27  ;;  %13454 = vmatprep.subr.bf16.mxu0 %v13453_v10  ;;  %v3488_v50 = vmul.f32 %v17166_v5, %v1910_v9  ;;  %v3490_v60 = vmul.f32 %v17177_v17, %v2071_v21  ;;  %v3489_v27 = vmul.f32 %v17188_v52, %v1912_v48  ;;  %v2073_v49 = vpop.f32.mrb[61].mxu1  ;;  %v23273_v5 = vld [vmem:[#allocation56_spill] sm:$0xff]  ;;  %v23279_v1 = vld [vmem:[#allocation13_spill] sm:$0xff] }
 0x294   : > { %13486 = vmatprep.subr.bf16.mxu1 %v13485_v30  ;;  %v13459_v59 = vpack.c.bf16 %v3792_v2, %v3776_v20  ;;  %v13491_v45 = vpack.c.bf16 %v3794_v38, %v3778_v63  ;;  %v3491_v33 = vmul.f32 %v17200_v61, %v2073_v49  ;;  %v13457_v31 = vpack.c.bf16 %v3793_v40, %v3777_v7  ;;  %v23276_v30 = vld [vmem:[#allocation51_spill] sm:$0xff] }
 0x295   : > { %v3808_v62 = vsub.f32 %v3488_v50, %v23271_v4  ;;  %v13489_v0 = vpack.c.bf16 %v3795_v15, %v3779_v54  ;;  %v3810_v8 = vsub.f32 %v3490_v60, %v23272_v23  ;;  %v3809_v44 = vsub.f32 %v3489_v27, %v23273_v5  ;;  %v1916_v47 = vpop.f32.mrb[62].mxu0  ;;  %23278 = vst [vmem:[#allocation69_spill] sm:$0xff] %v17393_v26 }
 0x296   : > { %13456 = vmatpush1.bf16.msra.mxu0 %v13455_v39  ;;  %v3811_v29 = vsub.f32 %v3491_v33, %v23274_v36  ;;  %v3504_v17 = vmul.f32 %v17214_v6, %v1916_v47  ;;  %v2077_v16 = vpop.f32.mrb[62].mxu1  ;;  %v1918_v52 = vpop.f32.mrb[63].mxu0 }
 0x297   : > { %13488 = vmatpush1.bf16.msra.mxu1 %v13487_v34  ;;  %13458 = vmatprep.subr.bf16.mxu0 %v13457_v31  ;;  %v3506_v57 = vmul.f32 %v17239_v11, %v2077_v16  ;;  %v3505_v61 = vmul.f32 %v17264_v32, %v1918_v52  ;;  %v2079_v28 = vpop.f32.mrb[63].mxu1 }
 0x298   : > { %13490 = vmatprep.subr.bf16.mxu1 %v13489_v0  ;;  %v3824_v46 = vsub.f32 %v3504_v17, %v23275_v14  ;;  %v3507_v13 = vmul.f32 %v17281_v53, %v2079_v28 }
 0x299   : > { %v3826_v39 = vsub.f32 %v3506_v57, %v17286_v43  ;;  %v3825_v34 = vsub.f32 %v3505_v61, %v17309_v18  ;;  %v2148_v6 = vpop.f32.mrb[64].mxu0 }
 0x29a   : > { %13460 = vmatpush1.bf16.msra.mxu0 %v13459_v59  ;;  %v13463_v10 = vpack.c.bf16 %v3824_v46, %v3808_v62  ;;  %v3827_v12 = vsub.f32 %v3507_v13, %v17320_v42  ;;  %v3076_v20 = vadd.f32 %v23276_v30, %v2148_v6  ;;  %v2309_v11 = vpop.f32.mrb[64].mxu1  ;;  %v2150_v63 = vpop.f32.mrb[65].mxu0  ;;  %v23277_v42 = vld [vmem:[#allocation15_spill] sm:$0xff]  ;;  %v23280_v59 = vld [vmem:[#allocation61_spill] sm:$0xff] }
 0x29b   : > { %13492 = vmatpush1.bf16.msra.mxu1 %v13491_v45  ;;  %v13495_v32 = vpack.c.bf16 %v3826_v39, %v3810_v8  ;;  %v3078_v58 = vadd.f32 %v23276_v30, %v2309_v11  ;;  %v3077_v7 = vadd.f32 %v23276_v30, %v2150_v63  ;;  %v2311_v53 = vpop.f32.mrb[65].mxu1  ;;  %v13461_v3 = vpack.c.bf16 %v3825_v34, %v3809_v44 }
 0x29c   : > { %14251 = vtanh.f32 %v3076_v20  ;;  %v3079_v43 = vadd.f32 %v23276_v30, %v2311_v53  ;;  %v13493_v18 = vpack.c.bf16 %v3827_v12, %v3811_v29 }
 0x29d   : > { %14253 = vtanh.f32 %v3078_v58  ;;  %v2154_v56 = vpop.f32.mrb[66].mxu0  ;;  %13462 = vmatprep.subr.bf16.mxu0 %v13461_v3 }
 0x29e   : > { %14255 = vtanh.f32 %v3077_v7  ;;  %v3092_v37 = vadd.f32 %v23277_v42, %v2154_v56  ;;  %v2315_v54 = vpop.f32.mrb[66].mxu1  ;;  %13494 = vmatprep.subr.bf16.mxu1 %v13493_v18  ;;  %v2156_v25 = vpop.f32.mrb[67].mxu0  ;;  %13464 = vmatpush1.bf16.msra.mxu0 %v13463_v10 }
 0x29f   : > { %14257 = vtanh.f32 %v3079_v43  ;;  %v3094_v55 = vadd.f32 %v23277_v42, %v2315_v54  ;;  %v3093_v51 = vadd.f32 %v23277_v42, %v2156_v25  ;;  %v2317_v19 = vpop.f32.mrb[67].mxu1  ;;  %13496 = vmatpush1.bf16.msra.mxu1 %v13495_v32 }
 0x2a0   : > { %14259 = vtanh.f32 %v3092_v37  ;;  %v3095_v22 = vadd.f32 %v23277_v42, %v2317_v19 }
 0x2a1   : > { %14261 = vtanh.f32 %v3094_v55  ;;  %v2160_v2 = vpop.f32.mrb[68].mxu0  ;;  %3906 = vmatmul.mubr.f32.vlgmr.msra.gmra.mrb[160].mxu0 %v17393_v26 }
 0x2a2   : > { %14263 = vtanh.f32 %v3093_v51  ;;  %v3108_v38 = vadd.f32 %v23279_v1, %v2160_v2  ;;  %v2321_v35 = vpop.f32.mrb[68].mxu1  ;;  %3977 = vmatmul.mubr.f32.vlgmr.msra.gmra.mrb[160].mxu1 %v17393_v26  ;;  %v2162_v40 = vpop.f32.mrb[69].mxu0  ;;  %4047 = vmatprep.mubr.f32.mxu0 %v23024_v41 }
 0x2a3   : > { %14265 = vtanh.f32 %v3095_v22  ;;  %v3110_v9 = vadd.f32 %v23279_v1, %v2321_v35  ;;  %v3109_v24 = vadd.f32 %v23279_v1, %v2162_v40  ;;  %v2323_v15 = vpop.f32.mrb[69].mxu1  ;;  %4118 = vmatprep.mubr.f32.mxu1 %v23024_v41 }
 0x2a4   : > { %14267 = vtanh.f32 %v3108_v38  ;;  %v3111_v50 = vadd.f32 %v23279_v1, %v2323_v15 }
 0x2a5   : > { %14269 = vtanh.f32 %v3110_v9  ;;  %v2166_v21 = vpop.f32.mrb[70].mxu0 }
 0x2a6   : > { %v17406_v48 = vpop.eup %14251  ;;  %14271 = vtanh.f32 %v3109_v24  ;;  %v3124_v45 = vadd.f32 %v23280_v59, %v2166_v21  ;;  %v2327_v60 = vpop.f32.mrb[70].mxu1 }
 0x2a7   : > { %v2168_v27 = vpop.f32.mrb[71].mxu0  ;;  %v17409_v49 = vpop.eup %14253  ;;  %14273 = vtanh.f32 %v3111_v50  ;;  %v3126_v4 = vadd.f32 %v23280_v59, %v2327_v60  ;;  %v3204_v31 = vmul.f32 %v17406_v48, %v17406_v48  ;;  %v3524_v8 = vmul.f32 2.0, %v17406_v48 }
 0x2a8   : > { %v3125_v62 = vadd.f32 %v23280_v59, %v2168_v27  ;;  %v2329_v33 = vpop.f32.mrb[71].mxu1  ;;  %v17415_v0 = vpop.eup %14255  ;;  %14275 = vtanh.f32 %v3124_v45  ;;  %v3206_v5 = vmul.f32 %v17409_v49, %v17409_v49  ;;  %v3526_v29 = vmul.f32 2.0, %v17409_v49 }
 0x2a9   : > { %v3127_v23 = vadd.f32 %v23280_v59, %v2329_v33  ;;  %v17421_v44 = vpop.eup %14257  ;;  %14277 = vtanh.f32 %v3126_v4  ;;  %v17423_v36 = vsub.f32 1.0, %v3204_v31  ;;  %v3205_v17 = vmul.f32 %v17415_v0, %v17415_v0 }
 0x2aa   : > { %v2172_v47 = vpop.f32.mrb[72].mxu0  ;;  %v17428_v16 = vpop.eup %14259  ;;  %14279 = vtanh.f32 %v3125_v62  ;;  %v17430_v57 = vsub.f32 1.0, %v3206_v5  ;;  %v3525_v28 = vmul.f32 2.0, %v17415_v0  ;;  %v3207_v14 = vmul.f32 %v17421_v44, %v17421_v44 }
 0x2ab   : > { %v2333_v52 = vpop.f32.mrb[72].mxu1  ;;  %v2174_v61 = vpop.f32.mrb[73].mxu0  ;;  %14281 = vtanh.f32 %v3127_v23  ;;  %v17438_v13 = vmul.f32 %v17423_v36, %v2172_v47  ;;  %v3588_v39 = vmul.f32 %v3524_v8, %v17423_v36  ;;  %v17441_v34 = vsub.f32 1.0, %v3205_v17 }
 0x2ac   : > { %v17435_v46 = vpop.eup %14261  ;;  %v2335_v6 = vpop.f32.mrb[73].mxu1  ;;  %v17446_v12 = vmul.f32 %v17430_v57, %v2333_v52  ;;  %v3590_v20 = vmul.f32 %v3526_v29, %v17430_v57  ;;  %v17449_v11 = vsub.f32 1.0, %v3207_v14  ;;  %v3527_v63 = vmul.f32 2.0, %v17421_v44 }
 0x2ad   : > { %v17443_v10 = vpop.eup %14263  ;;  %v3652_v58 = vmul.f32 %v3588_v39, %v2172_v47  ;;  %v17455_v7 = vmul.f32 %v17441_v34, %v2174_v61  ;;  %v3589_v53 = vmul.f32 %v3525_v28, %v17441_v34  ;;  %v3220_v43 = vmul.f32 %v17428_v16, %v17428_v16 }
 0x2ae   : > { %v17452_v32 = vpop.eup %14265  ;;  %v3654_v56 = vmul.f32 %v3590_v20, %v2333_v52  ;;  %v17463_v37 = vmul.f32 %v17449_v11, %v2335_v6  ;;  %v3591_v54 = vmul.f32 %v3527_v63, %v17449_v11  ;;  %v3540_v25 = vmul.f32 2.0, %v17428_v16 }
 0x2af   : > { %v2178_v3 = vpop.f32.mrb[74].mxu0  ;;  %v17460_v18 = vpop.eup %14267  ;;  %v17469_v22 = vmul.f32 %v3652_v58, %v2172_v47  ;;  %v3653_v2 = vmul.f32 %v3589_v53, %v2174_v61  ;;  %v17471_v38 = vsub.f32 1.0, %v3220_v43  ;;  %v3222_v35 = vmul.f32 %v17435_v46, %v17435_v46 }
 0x2b0   : > { %v2339_v55 = vpop.f32.mrb[74].mxu1  ;;  %v2180_v51 = vpop.f32.mrb[75].mxu0  ;;  %v17477_v24 = vmul.f32 %v3654_v56, %v2333_v52  ;;  %v3655_v15 = vmul.f32 %v3591_v54, %v2335_v6  ;;  %v3542_v50 = vmul.f32 2.0, %v17435_v46  ;;  %v3221_v21 = vmul.f32 %v17443_v10, %v17443_v10 }
 0x2b1   : > { %v17467_v19 = vpop.eup %14269  ;;  %23281 = vst [vmem:[#allocation72_spill] sm:$0xff] %v17469_v22  ;;  %v2341_v40 = vpop.f32.mrb[75].mxu1  ;;  %v17484_v60 = vmul.f32 %v3653_v2, %v2174_v61  ;;  %v17487_v27 = vmul.f32 %v17471_v38, %v2178_v3  ;;  %v3604_v4 = vmul.f32 %v3540_v25, %v17471_v38  ;;  %v17490_v62 = vsub.f32 1.0, %v3222_v35 }
 0x2b2   : > { %v17475_v9 = vpop.eup %14271  ;;  %23282 = vst [vmem:[#allocation71_spill] sm:$0xff] %v17477_v24  ;;  %v17496_v23 = vmul.f32 %v3655_v15, %v2335_v6  ;;  %v17498_v8 = vsub.f32 1.0, %v3221_v21  ;;  %v3541_v5 = vmul.f32 2.0, %v17443_v10  ;;  %v3223_v47 = vmul.f32 %v17452_v32, %v17452_v32 }
 0x2b3   : > { %v17482_v45 = vpop.eup %14273  ;;  %23283 = vst [vmem:[#allocation17_spill] sm:$0xff] %v17484_v60  ;;  %v3668_v61 = vmul.f32 %v3604_v4, %v2178_v3  ;;  %v17512_v14 = vmul.f32 %v17490_v62, %v2339_v55  ;;  %v3606_v39 = vmul.f32 %v3542_v50, %v17490_v62  ;;  %v3543_v43 = vmul.f32 2.0, %v17452_v32 }
 0x2b4   : > { %v17492_v33 = vpop.f32.mrb[76].mxu0  ;;  %v17494_v31 = vpop.eup %14275  ;;  %23284 = vst [vmem:[#allocation73_spill] sm:$0xff] %v17496_v23  ;;  %v17520_v63 = vmul.f32 %v17498_v8, %v2180_v51  ;;  %v3605_v58 = vmul.f32 %v3541_v5, %v17498_v8  ;;  %v17523_v53 = vsub.f32 1.0, %v3223_v47  ;;  %v13497_v35 = vpack.c.bf16 %v17443_v10, %v17415_v0 }
 0x2b5   : > { %v17503_v29 = vpop.f32.mrb[76].mxu1  ;;  %v17505_v17 = vpop.f32.mrb[77].mxu0  ;;  %v17528_v54 = vmul.f32 %v3668_v61, %v2178_v3  ;;  %v3670_v25 = vmul.f32 %v3606_v39, %v2339_v55  ;;  %v13529_v5 = vpack.c.bf16 %v17452_v32, %v17421_v44  ;;  %v13499_v0 = vpack.c.bf16 %v17428_v16, %v17406_v48 }
 0x2b6   : > { %v17507_v52 = vpop.eup %14277  ;;  %v17515_v6 = vpop.f32.mrb[77].mxu1  ;;  %v3669_v50 = vmul.f32 %v3605_v58, %v2180_v51  ;;  %v17537_v21 = vmul.f32 %v17523_v53, %v2341_v40  ;;  %v3607_v4 = vmul.f32 %v3543_v43, %v17523_v53  ;;  %13498 = vmatprep.subr.bf16.mxu0 %v13497_v35  ;;  %v13531_v10 = vpack.c.bf16 %v17435_v46, %v17409_v49 }
 0x2b7   : > { %v17517_v20 = vpop.eup %14279  ;;  %23285 = vst [vmem:[#allocation57_spill] sm:$0xff] %v17528_v54  ;;  %v17546_v61 = vmul.f32 %v3670_v25, %v2339_v55  ;;  %v3236_v39 = vmul.f32 %v17460_v18, %v17460_v18  ;;  %13530 = vmatprep.subr.bf16.mxu1 %v13529_v5  ;;  %v3556_v32 = vmul.f32 2.0, %v17460_v18  ;;  %v3238_v55 = vmul.f32 %v17467_v19, %v17467_v19 }
 0x2b8   : > { %v17526_v56 = vpop.eup %14281  ;;  %v17534_v15 = vpop.f32.mrb[78].mxu0  ;;  %v17556_v43 = vmul.f32 %v3669_v50, %v2180_v51  ;;  %v3671_v44 = vmul.f32 %v3607_v4, %v2341_v40  ;;  %13500 = vmatpush1.bf16.msra.mxu0 %v13499_v0  ;;  %13532 = vmatpush1.bf16.msra.mxu1 %v13531_v10  ;;  %v3558_v49 = vmul.f32 2.0, %v17467_v19  ;;  %v3237_v16 = vmul.f32 %v17475_v9, %v17475_v9 }
 0x2b9   : > { %v17542_v3 = vpop.f32.mrb[78].mxu1  ;;  %v17544_v47 = vpop.f32.mrb[79].mxu0  ;;  %23286 = vst [vmem:[#allocation31_spill] sm:$0xff] %v17546_v61  ;;  %v17561_v48 = vsub.f32 1.0, %v3236_v39  ;;  %v3557_v46 = vmul.f32 2.0, %v17475_v9  ;;  %v17571_v35 = vsub.f32 1.0, %v3238_v55  ;;  %v3239_v50 = vmul.f32 %v17482_v45, %v17482_v45 }
 0x2ba   : > { %v17554_v58 = vpop.f32.mrb[79].mxu1  ;;  %23287 = vst [vmem:[#allocation26_spill] sm:$0xff] %v17556_v43  ;;  %v17569_v25 = vmul.f32 %v3671_v44, %v2341_v40  ;;  %v3559_v4 = vmul.f32 2.0, %v17482_v45  ;;  %v17585_v2 = vsub.f32 1.0, %v3237_v16  ;;  %v3252_v40 = vmul.f32 %v17494_v31, %v17494_v31 }
 0x2bb   : > { %v17582_v10 = vmul.f32 %v17561_v48, %v17492_v33  ;;  %v3620_v39 = vmul.f32 %v3556_v32, %v17561_v48  ;;  %v17593_v55 = vmul.f32 %v17571_v35, %v17503_v29  ;;  %v3622_v28 = vmul.f32 %v3558_v49, %v17571_v35 }
 0x2bc   : > { %23288 = vst [vmem:[#allocation58_spill] sm:$0xff] %v17569_v25  ;;  %v17596_v59 = vsub.f32 1.0, %v3239_v50  ;;  %v3572_v41 = vmul.f32 2.0, %v17494_v31  ;;  %v17602_v32 = vmul.f32 %v17585_v2, %v17505_v17  ;;  %v3621_v16 = vmul.f32 %v3557_v46, %v17585_v2 }
 0x2bd   : > { %v17567_v51 = vpop.f32.mrb[80].mxu0  ;;  %23289 = vst [vmem:[#allocation36_spill] sm:$0xff] %v17582_v10  ;;  %v3684_v26 = vmul.f32 %v3620_v39, %v17492_v33  ;;  %v17605_v1 = vsub.f32 1.0, %v3252_v40  ;;  %v3686_v30 = vmul.f32 %v3622_v28, %v17503_v29  ;;  %v3254_v39 = vmul.f32 %v17507_v52, %v17507_v52 }
 0x2be   : > { %v17576_v5 = vpop.f32.mrb[80].mxu1  ;;  %v17578_v0 = vpop.f32.mrb[81].mxu0  ;;  %v17612_v49 = vmul.f32 %v17596_v59, %v17515_v6  ;;  %v3623_v50 = vmul.f32 %v3559_v4, %v17596_v59  ;;  %v3685_v46 = vmul.f32 %v3621_v16, %v17505_v17  ;;  %v3574_v24 = vmul.f32 2.0, %v17507_v52 }
 0x2bf   : > { %v17589_v44 = vpop.f32.mrb[81].mxu1  ;;  %v17618_v61 = vmul.f32 %v3684_v26, %v17492_v33  ;;  %v17623_v40 = vmul.f32 %v17605_v1, %v17534_v15  ;;  %v3636_v28 = vmul.f32 %v3572_v41, %v17605_v1  ;;  %v17627_v23 = vmul.f32 %v3686_v30, %v17503_v29 }
 0x2c0   : > { %v3687_v4 = vmul.f32 %v3623_v50, %v17515_v6  ;;  %v17630_v60 = vsub.f32 1.0, %v3254_v39  ;;  %v17634_v26 = vmul.f32 %v3685_v46, %v17505_v17  ;;  %v3253_v41 = vmul.f32 %v17517_v20, %v17517_v20 }
 0x2c1   : > { %v17607_v42 = vpop.f32.mrb[82].mxu0  ;;  %23290 = vst [vmem:[#allocation41_spill] sm:$0xff] %v17618_v61  ;;  %23291 = vst [vmem:[#allocation59_spill] sm:$0xff] %v17627_v23  ;;  %v3700_v33 = vmul.f32 %v3636_v28, %v17534_v15  ;;  %v3573_v17 = vmul.f32 2.0, %v17517_v20  ;;  %v13501_v23 = vpack.c.bf16 %v17517_v20, %v17475_v9  ;;  %v13503_v22 = vpack.c.bf16 %v17494_v31, %v17460_v18 }
 0x2c2   : > { %v2363_v25 = vpop.f32.mrb[82].mxu1  ;;  %v2204_v43 = vpop.f32.mrb[83].mxu0  ;;  %23292 = vst [vmem:[#allocation21_spill] sm:$0xff] %v17634_v26  ;;  %v17642_v30 = vmul.f32 %v3687_v4, %v17515_v6  ;;  %v17646_v29 = vmul.f32 %v17630_v60, %v17542_v3  ;;  %v3638_v50 = vmul.f32 %v3574_v24, %v17630_v60  ;;  %v17653_v16 = vsub.f32 1.0, %v3253_v41 }
 0x2c3   : > { %v2365_v54 = vpop.f32.mrb[83].mxu1  ;;  %v17651_v28 = vmul.f32 %v3700_v33, %v17534_v15  ;;  %v3255_v26 = vmul.f32 %v17526_v56, %v17526_v56  ;;  %v3575_v6 = vmul.f32 2.0, %v17526_v56  ;;  %v13533_v15 = vpack.c.bf16 %v17526_v56, %v17482_v45  ;;  %13502 = vmatprep.subr.bf16.mxu0 %v13501_v23 }
 0x2c4   : > { %23293 = vst [vmem:[#allocation18_spill] sm:$0xff] %v17642_v30  ;;  %v3702_v30 = vmul.f32 %v3638_v50, %v17542_v3  ;;  %v13543_v24 = vpack.c.bf16 %v17646_v29, %v17593_v55  ;;  %v3381_v33 = vmul.f32 %v17653_v16, %v17544_v47  ;;  %v3637_v41 = vmul.f32 %v3573_v17, %v17653_v16 }
 0x2c5   : > { %v2208_v61 = vpop.f32.mrb[84].mxu0  ;;  %23294 = vst [vmem:[#allocation16_spill] sm:$0xff] %v17651_v28  ;;  %v17668_v28 = vsub.f32 1.0, %v3255_v26  ;;  %13534 = vmatprep.subr.bf16.mxu1 %v13533_v15  ;;  %v13535_v9 = vpack.c.bf16 %v17507_v52, %v17467_v19  ;;  %v13505_v45 = vpack.c.bf16 %v17520_v63, %v17455_v7  ;;  %13504 = vmatpush1.bf16.msra.mxu0 %v13503_v22 }
 0x2c6   : > { %v2369_v39 = vpop.f32.mrb[84].mxu1  ;;  %v2210_v46 = vpop.f32.mrb[85].mxu0  ;;  %v17673_v10 = vmul.f32 %v3702_v30, %v17542_v3  ;;  %v3701_v26 = vmul.f32 %v3637_v41, %v17544_v47  ;;  %v13537_v31 = vpack.c.bf16 %v17537_v21, %v17463_v37  ;;  %v3396_v19 = vmul.f32 %v17423_v36, %v17567_v51 }
 0x2c7   : > { %v2371_v4 = vpop.f32.mrb[85].mxu1  ;;  %v3383_v17 = vmul.f32 %v17668_v28, %v17554_v58  ;;  %v3639_v18 = vmul.f32 %v3575_v6, %v17668_v28  ;;  %13536 = vmatpush1.bf16.msra.mxu1 %v13535_v9  ;;  %13506 = vmatprep.subr.bf16.mxu0 %v13505_v45  ;;  %v17689_v7 = vmul.f32 %v17430_v57, %v17576_v5 }
 0x2c8   : > { %v3397_v52 = vmul.f32 %v17441_v34, %v17578_v0  ;;  %v17694_v63 = vmul.f32 %v3701_v26, %v17544_v47  ;;  %13538 = vmatprep.subr.bf16.mxu1 %v13537_v31  ;;  %v3399_v37 = vmul.f32 %v17449_v11, %v17589_v44  ;;  %v13509_v21 = vpack.c.bf16 %v3381_v33, %v17602_v32 }
 0x2c9   : > { %v2214_v50 = vpop.f32.mrb[86].mxu0  ;;  %v3703_v22 = vmul.f32 %v3639_v18, %v17554_v58  ;;  %v13541_v51 = vpack.c.bf16 %v3383_v17, %v17612_v49  ;;  %v3412_v5 = vmul.f32 %v17471_v38, %v17607_v42  ;;  %v3414_v30 = vmul.f32 %v17490_v62, %v2363_v25  ;;  %v23297_v18 = vld [vmem:[#allocation36_spill] sm:$0xff] }
 0x2ca   : > { %v2375_v20 = vpop.f32.mrb[86].mxu1  ;;  %v2216_v56 = vpop.f32.mrb[87].mxu0  ;;  %v3413_v0 = vmul.f32 %v17498_v8, %v2204_v43  ;;  %v23295_v44 = vpack.c.bf16 %v17487_v27, %v17438_v13  ;;  %v3415_v32 = vmul.f32 %v17523_v53, %v2365_v54  ;;  %v17713_v49 = vmul.f32 %v17561_v48, %v2208_v61 }
 0x2cb   : > { %v2377_v23 = vpop.f32.mrb[87].mxu1  ;;  %v17706_v15 = vmul.f32 %v3703_v22, %v17554_v58  ;;  %v17716_v42 = vmul.f32 %v17571_v35, %v2369_v39  ;;  %v23296_v43 = vpack.c.bf16 %v17512_v14, %v17446_v12  ;;  %v13515_v58 = vpack.c.bf16 %v3412_v5, %v3396_v19 }
 0x2cc   : > { %13508 = vmatpush1.bf16.msra.mxu0 %v23295_v44  ;;  %v13547_v33 = vpack.c.bf16 %v3414_v30, %v17689_v7  ;;  %v13513_v41 = vpack.c.bf16 %v3413_v0, %v3397_v52  ;;  %v13545_v13 = vpack.c.bf16 %v3415_v32, %v3399_v37  ;;  %v3429_v27 = vmul.f32 %v17585_v2, %v2210_v46  ;;  %v23300_v52 = vld [vmem:[#allocation71_spill] sm:$0xff]  ;;  %v23303_v44 = vld [vmem:[#allocation57_spill] sm:$0xff] }
 0x2cd   : > { %v2220_v3 = vpop.f32.mrb[88].mxu0  ;;  %13540 = vmatpush1.bf16.msra.mxu1 %v23296_v43  ;;  %13510 = vmatprep.subr.bf16.mxu0 %v13509_v21  ;;  %v3431_v54 = vmul.f32 %v17596_v59, %v2371_v4  ;;  %v3444_v61 = vmul.f32 %v17605_v1, %v2214_v50  ;;  %v3446_v9 = vmul.f32 %v17630_v60, %v2375_v20  ;;  %v23304_v32 = vld [vmem:[#allocation31_spill] sm:$0xff] }
 0x2ce   : > { %v2381_v47 = vpop.f32.mrb[88].mxu1  ;;  %v2222_v6 = vpop.f32.mrb[89].mxu0  ;;  %13542 = vmatprep.subr.bf16.mxu1 %v13541_v51  ;;  %v3445_v45 = vmul.f32 %v17653_v16, %v2216_v56  ;;  %v3447_v12 = vmul.f32 %v17668_v28, %v2377_v23  ;;  %v3460_v14 = vmul.f32 %v17423_v36, %v2220_v3  ;;  %v23298_v31 = vpack.c.bf16 %v17623_v40, %v23297_v18  ;;  %v23299_v40 = vld [vmem:[#allocation72_spill] sm:$0xff] }
 0x2cf   : > { %v2383_v25 = vpop.f32.mrb[89].mxu1  ;;  %v13519_v46 = vpack.c.bf16 %v3444_v61, %v17713_v49  ;;  %v3462_v4 = vmul.f32 %v17430_v57, %v2381_v47  ;;  %v3461_v50 = vmul.f32 %v17441_v34, %v2222_v6  ;;  %v13551_v36 = vpack.c.bf16 %v3446_v9, %v17716_v42  ;;  %v23301_v57 = vld [vmem:[#allocation17_spill] sm:$0xff]  ;;  %v23305_v49 = vld [vmem:[#allocation26_spill] sm:$0xff] }
 0x2d0   : > { %13512 = vmatpush1.bf16.msra.mxu0 %v23298_v31  ;;  %v3463_v20 = vmul.f32 %v17449_v11, %v2383_v25  ;;  %v13517_v56 = vpack.c.bf16 %v3445_v45, %v3429_v27  ;;  %v13549_v23 = vpack.c.bf16 %v3447_v12, %v3431_v54  ;;  %v3780_v7 = vsub.f32 %v3460_v14, %v23299_v40  ;;  %v23302_v34 = vld [vmem:[#allocation73_spill] sm:$0xff]  ;;  %v23311_v31 = vld [vmem:[#allocation16_spill] sm:$0xff] }
 0x2d1   : > { %v2226_v39 = vpop.f32.mrb[90].mxu0  ;;  %13544 = vmatpush1.bf16.msra.mxu1 %v13543_v24  ;;  %13514 = vmatprep.subr.bf16.mxu0 %v13513_v41  ;;  %v3782_v22 = vsub.f32 %v3462_v4, %v23300_v52  ;;  %v3781_v37 = vsub.f32 %v3461_v50, %v23301_v57  ;;  %v23307_v25 = vld [vmem:[#allocation41_spill] sm:$0xff] }
 0x2d2   : > { %v2387_v26 = vpop.f32.mrb[90].mxu1  ;;  %v2228_v17 = vpop.f32.mrb[91].mxu0  ;;  %13546 = vmatprep.subr.bf16.mxu1 %v13545_v13  ;;  %v3783_v21 = vsub.f32 %v3463_v20, %v23302_v34  ;;  %v3476_v3 = vmul.f32 %v17471_v38, %v2226_v39  ;;  %v23309_v41 = vld [vmem:[#allocation21_spill] sm:$0xff] }
 0x2d3   : > { %v2389_v19 = vpop.f32.mrb[91].mxu1  ;;  %v3478_v55 = vmul.f32 %v17490_v62, %v2387_v26  ;;  %v3477_v29 = vmul.f32 %v17498_v8, %v2228_v17  ;;  %v23310_v17 = vld [vmem:[#allocation18_spill] sm:$0xff] }
 0x2d4   : > { %v3479_v24 = vmul.f32 %v17523_v53, %v2389_v19  ;;  %13516 = vmatpush1.bf16.msra.mxu0 %v13515_v58  ;;  %v3796_v38 = vsub.f32 %v3476_v3, %v23303_v44  ;;  %v23306_v53 = vld [vmem:[#allocation58_spill] sm:$0xff]  ;;  %v23308_v58 = vld [vmem:[#allocation59_spill] sm:$0xff] }
 0x2d5   : > { %v2232_v11 = vpop.f32.mrb[92].mxu0  ;;  %13548 = vmatpush1.bf16.msra.mxu1 %v13547_v33  ;;  %13518 = vmatprep.subr.bf16.mxu0 %v13517_v56  ;;  %v3798_v62 = vsub.f32 %v3478_v55, %v23304_v32  ;;  %v3797_v8 = vsub.f32 %v3477_v29, %v23305_v49  ;;  %v23312_v19 = vld [vmem:[#allocation51_spill] sm:$0xff] }
 0x2d6   : > { %v2393_v51 = vpop.f32.mrb[92].mxu1  ;;  %v2234_v5 = vpop.f32.mrb[93].mxu0  ;;  %v3492_v30 = vmul.f32 %v17561_v48, %v2232_v11  ;;  %13550 = vmatprep.subr.bf16.mxu1 %v13549_v23  ;;  %v3799_v42 = vsub.f32 %v3479_v24, %v23306_v53  ;;  %v23314_v24 = vld [vmem:[#allocation13_spill] sm:$0xff] }
 0x2d7   : > { %v3494_v0 = vmul.f32 %v17571_v35, %v2393_v51  ;;  %v3493_v47 = vmul.f32 %v17585_v2, %v2234_v5  ;;  %v2395_v6 = vpop.f32.mrb[93].mxu1  ;;  %v13523_v2 = vpack.c.bf16 %v3796_v38, %v3780_v7  ;;  %v13555_v27 = vpack.c.bf16 %v3798_v62, %v3782_v22 }
 0x2d8   : > { %v3812_v43 = vsub.f32 %v3492_v30, %v23307_v25  ;;  %v3495_v33 = vmul.f32 %v17596_v59, %v2395_v6  ;;  %13520 = vmatpush1.bf16.msra.mxu0 %v13519_v46  ;;  %v13521_v45 = vpack.c.bf16 %v3797_v8, %v3781_v37  ;;  %v13553_v12 = vpack.c.bf16 %v3799_v42, %v3783_v21  ;;  %v23315_v30 = vld [vmem:[#allocation69_spill] sm:$0xff] }
 0x2d9   : > { %v3814_v48 = vsub.f32 %v3494_v0, %v23308_v58  ;;  %v3813_v35 = vsub.f32 %v3493_v47, %v23309_v41  ;;  %v2238_v13 = vpop.f32.mrb[94].mxu0  ;;  %13552 = vmatpush1.bf16.msra.mxu1 %v13551_v36  ;;  %v23316_v38 = vmov 0.0   ;;  %v23317_v8 = vld [vmem:[#allocation61_spill] sm:$0xff] }
 0x2da   : > { %v3508_v54 = vmul.f32 %v17605_v1, %v2238_v13  ;;  %v2399_v61 = vpop.f32.mrb[94].mxu1  ;;  %v2240_v39 = vpop.f32.mrb[95].mxu0  ;;  %v3815_v18 = vsub.f32 %v3495_v33, %v23310_v17  ;;  %13522 = vmatprep.subr.bf16.mxu0 %v13521_v45  ;;  %13554 = vmatprep.subr.bf16.mxu1 %v13553_v12 }
 0x2db   : > { %v3510_v9 = vmul.f32 %v17630_v60, %v2399_v61  ;;  %v3509_v14 = vmul.f32 %v17653_v16, %v2240_v39  ;;  %v2401_v26 = vpop.f32.mrb[95].mxu1 }
 0x2dc   : > { %v3828_v4 = vsub.f32 %v3508_v54, %v23311_v31  ;;  %v3511_v50 = vmul.f32 %v17668_v28, %v2401_v26  ;;  %13524 = vmatpush1.bf16.msra.mxu0 %v13523_v2 }
 0x2dd   : > { %v3830_v59 = vsub.f32 %v3510_v9, %v17673_v10  ;;  %v3829_v1 = vsub.f32 %v3509_v14, %v17694_v63  ;;  %v2470_v46 = vpop.f32.mrb[96].mxu0  ;;  %13556 = vmatpush1.bf16.msra.mxu1 %v13555_v27 }
 0x2de   : > { %v13527_v60 = vpack.c.bf16 %v3828_v4, %v3812_v43  ;;  %v3831_v20 = vsub.f32 %v3511_v50, %v17706_v15  ;;  %v3080_v16 = vadd.f32 %v23312_v19, %v2470_v46  ;;  %v2631_v56 = vpop.f32.mrb[96].mxu1  ;;  %v2472_v36 = vpop.f32.mrb[97].mxu0  ;;  %v23313_v15 = vld [vmem:[#allocation15_spill] sm:$0xff] }
 0x2df   : > { %v13559_v23 = vpack.c.bf16 %v3830_v59, %v3814_v48  ;;  %v3082_v40 = vadd.f32 %v23312_v19, %v2631_v56  ;;  %v3081_v28 = vadd.f32 %v23312_v19, %v2472_v36  ;;  %v2633_v7 = vpop.f32.mrb[97].mxu1  ;;  %v13525_v10 = vpack.c.bf16 %v3829_v1, %v3813_v35 }
 0x2e0   : > { %14283 = vtanh.f32 %v3080_v16  ;;  %v3083_v63 = vadd.f32 %v23312_v19, %v2633_v7  ;;  %v13557_v52 = vpack.c.bf16 %v3831_v20, %v3815_v18 }
 0x2e1   : > { %14285 = vtanh.f32 %v3082_v40  ;;  %v2476_v22 = vpop.f32.mrb[98].mxu0  ;;  %13526 = vmatprep.subr.bf16.mxu0 %v13525_v10 }
 0x2e2   : > { %14287 = vtanh.f32 %v3081_v28  ;;  %v3096_v57 = vadd.f32 %v23313_v15, %v2476_v22  ;;  %v2637_v37 = vpop.f32.mrb[98].mxu1  ;;  %13558 = vmatprep.subr.bf16.mxu1 %v13557_v52  ;;  %v2478_v34 = vpop.f32.mrb[99].mxu0  ;;  %13528 = vmatpush1.bf16.msra.mxu0 %v13527_v60 }
 0x2e3   : > { %14289 = vtanh.f32 %v3083_v63  ;;  %v3098_v21 = vadd.f32 %v23313_v15, %v2637_v37  ;;  %v3097_v11 = vadd.f32 %v23313_v15, %v2478_v34  ;;  %v2639_v3 = vpop.f32.mrb[99].mxu1  ;;  %13560 = vmatpush1.bf16.msra.mxu1 %v13559_v23 }
 0x2e4   : > { %14291 = vtanh.f32 %v3096_v57  ;;  %v3099_v55 = vadd.f32 %v23313_v15, %v2639_v3 }
 0x2e5   : > { %14293 = vtanh.f32 %v3098_v21  ;;  %v2482_v29 = vpop.f32.mrb[100].mxu0  ;;  %4048 = vmatmul.mubr.f32.vlgmr.msra.gmra.mrb[162].mxu0 %v23315_v30 }
 0x2e6   : > { %14295 = vtanh.f32 %v3097_v11  ;;  %v3112_v51 = vadd.f32 %v23314_v24, %v2482_v29  ;;  %v2643_v5 = vpop.f32.mrb[100].mxu1  ;;  %v2484_v0 = vpop.f32.mrb[101].mxu0  ;;  %4119 = vmatmul.mubr.f32.vlgmr.msra.gmra.mrb[162].mxu1 %v23315_v30  ;;  %4189 = vmatprep.mubr.f32.mxu0 %v23316_v38 }
 0x2e7   : > { %14297 = vtanh.f32 %v3099_v55  ;;  %v3114_v47 = vadd.f32 %v23314_v24, %v2643_v5  ;;  %v3113_v6 = vadd.f32 %v23314_v24, %v2484_v0  ;;  %v2645_v44 = vpop.f32.mrb[101].mxu1  ;;  %4260 = vmatprep.mubr.f32.mxu1 %v23316_v38 }
 0x2e8   : > { %14299 = vtanh.f32 %v3112_v51  ;;  %v3115_v32 = vadd.f32 %v23314_v24, %v2645_v44 }
 0x2e9   : > { %14301 = vtanh.f32 %v3114_v47  ;;  %v2488_v62 = vpop.f32.mrb[102].mxu0 }
 0x2ea   : > { %v17784_v49 = vpop.eup %14283  ;;  %14303 = vtanh.f32 %v3113_v6  ;;  %v3128_v53 = vadd.f32 %v23317_v8, %v2488_v62  ;;  %v2649_v42 = vpop.f32.mrb[102].mxu1 }
 0x2eb   : > { %v2490_v25 = vpop.f32.mrb[103].mxu0  ;;  %v17787_v43 = vpop.eup %14285  ;;  %14305 = vtanh.f32 %v3115_v32  ;;  %v3130_v58 = vadd.f32 %v23317_v8, %v2649_v42  ;;  %v3208_v35 = vmul.f32 %v17784_v49, %v17784_v49  ;;  %v3528_v27 = vmul.f32 2.0, %v17784_v49 }
 0x2ec   : > { %v3129_v48 = vadd.f32 %v23317_v8, %v2490_v25  ;;  %v2651_v41 = vpop.f32.mrb[103].mxu1  ;;  %v17793_v13 = vpop.eup %14287  ;;  %14307 = vtanh.f32 %v3128_v53  ;;  %v3210_v33 = vmul.f32 %v17787_v43, %v17787_v43  ;;  %v3530_v9 = vmul.f32 2.0, %v17787_v43 }
 0x2ed   : > { %v3131_v2 = vadd.f32 %v23317_v8, %v2651_v41  ;;  %v17799_v54 = vpop.eup %14289  ;;  %14309 = vtanh.f32 %v3130_v58  ;;  %v2494_v61 = vpop.f32.mrb[104].mxu0  ;;  %v17801_v39 = vsub.f32 1.0, %v3208_v35  ;;  %v3209_v45 = vmul.f32 %v17793_v13, %v17793_v13 }
 0x2ee   : > { %v17806_v12 = vpop.eup %14291  ;;  %14311 = vtanh.f32 %v3129_v48  ;;  %v2655_v14 = vpop.f32.mrb[104].mxu1  ;;  %v17808_v26 = vsub.f32 1.0, %v3210_v33  ;;  %v3529_v18 = vmul.f32 2.0, %v17793_v13  ;;  %v3211_v31 = vmul.f32 %v17799_v54, %v17799_v54 }
 0x2ef   : > { %v2496_v17 = vpop.f32.mrb[105].mxu0  ;;  %v17813_v4 = vpop.eup %14293  ;;  %14313 = vtanh.f32 %v3131_v2  ;;  %v17816_v50 = vmul.f32 %v17801_v39, %v2494_v61  ;;  %v3592_v59 = vmul.f32 %v3528_v27, %v17801_v39  ;;  %v17819_v1 = vsub.f32 1.0, %v3209_v45 }
 0x2f0   : > { %v2657_v46 = vpop.f32.mrb[105].mxu1  ;;  %v17821_v60 = vpop.eup %14295  ;;  %v17824_v20 = vmul.f32 %v17808_v26, %v2655_v14  ;;  %v3594_v16 = vmul.f32 %v3530_v9, %v17808_v26  ;;  %v17827_v56 = vsub.f32 1.0, %v3211_v31  ;;  %v3531_v36 = vmul.f32 2.0, %v17799_v54 }
 0x2f1   : > { %v17830_v23 = vpop.eup %14297  ;;  %v3656_v40 = vmul.f32 %v3592_v59, %v2494_v61  ;;  %v17833_v28 = vmul.f32 %v17819_v1, %v2496_v17  ;;  %v3593_v7 = vmul.f32 %v3529_v18, %v17819_v1  ;;  %v2500_v10 = vpop.f32.mrb[106].mxu0  ;;  %v3224_v63 = vmul.f32 %v17806_v12, %v17806_v12 }
 0x2f2   : > { %v17838_v52 = vpop.eup %14299  ;;  %v3658_v22 = vmul.f32 %v3594_v16, %v2655_v14  ;;  %v17841_v57 = vmul.f32 %v17827_v56, %v2657_v46  ;;  %v3595_v37 = vmul.f32 %v3531_v36, %v17827_v56  ;;  %v3544_v34 = vmul.f32 2.0, %v17806_v12  ;;  %v2661_v21 = vpop.f32.mrb[106].mxu1 }
 0x2f3   : > { %v2502_v11 = vpop.f32.mrb[107].mxu0  ;;  %v17845_v3 = vpop.eup %14301  ;;  %v17847_v55 = vmul.f32 %v3656_v40, %v2494_v61  ;;  %v3657_v29 = vmul.f32 %v3593_v7, %v2496_v17  ;;  %v17849_v51 = vsub.f32 1.0, %v3224_v63  ;;  %v3226_v5 = vmul.f32 %v17813_v4, %v17813_v4 }
 0x2f4   : > { %v2663_v30 = vpop.f32.mrb[107].mxu1  ;;  %v17853_v0 = vpop.eup %14303  ;;  %v17855_v47 = vmul.f32 %v3658_v22, %v2655_v14  ;;  %v3659_v6 = vmul.f32 %v3595_v37, %v2657_v46  ;;  %v3546_v44 = vmul.f32 2.0, %v17813_v4  ;;  %v3225_v32 = vmul.f32 %v17821_v60, %v17821_v60 }
 0x2f5   : > { %23318 = vst [vmem:[#allocation45_spill] sm:$0xff] %v17847_v55  ;;  %v17860_v62 = vpop.eup %14305  ;;  %v17862_v53 = vmul.f32 %v3657_v29, %v2496_v17  ;;  %v17865_v42 = vmul.f32 %v17849_v51, %v2500_v10  ;;  %v3608_v25 = vmul.f32 %v3544_v34, %v17849_v51  ;;  %v17868_v58 = vsub.f32 1.0, %v3226_v5  ;;  %v17870_v48 = vpop.f32.mrb[108].mxu0 }
 0x2f6   : > { %23319 = vst [vmem:[#allocation40_spill] sm:$0xff] %v17855_v47  ;;  %v17872_v41 = vpop.eup %14307  ;;  %v17874_v35 = vmul.f32 %v3659_v6, %v2657_v46  ;;  %v17876_v2 = vsub.f32 1.0, %v3225_v32  ;;  %v3545_v27 = vmul.f32 2.0, %v17821_v60  ;;  %v3227_v33 = vmul.f32 %v17830_v23, %v17830_v23  ;;  %v17881_v61 = vpop.f32.mrb[108].mxu1 }
 0x2f7   : > { %23320 = vst [vmem:[#allocation48_spill] sm:$0xff] %v17862_v53  ;;  %v17883_v9 = vpop.f32.mrb[109].mxu0  ;;  %v17885_v45 = vpop.eup %14309  ;;  %v3672_v14 = vmul.f32 %v3608_v25, %v2500_v10  ;;  %v17890_v18 = vmul.f32 %v17868_v58, %v2661_v21  ;;  %v3610_v31 = vmul.f32 %v3546_v44, %v17868_v58  ;;  %v3547_v7 = vmul.f32 2.0, %v17830_v23 }
 0x2f8   : > { %23321 = vst [vmem:[#allocation35_spill] sm:$0xff] %v17874_v35  ;;  %v17893_v59 = vpop.f32.mrb[109].mxu1  ;;  %v17895_v46 = vpop.eup %14311  ;;  %v17898_v16 = vmul.f32 %v17876_v2, %v2502_v11  ;;  %v3609_v36 = vmul.f32 %v3545_v27, %v17876_v2  ;;  %v17901_v40 = vsub.f32 1.0, %v3227_v33  ;;  %v13561_v29 = vpack.c.bf16 %v17821_v60, %v17793_v13 }
 0x2f9   : > { %v17904_v63 = vpop.eup %14313  ;;  %v17906_v22 = vmul.f32 %v3672_v14, %v2500_v10  ;;  %v3674_v37 = vmul.f32 %v3610_v31, %v2661_v21  ;;  %v17912_v5 = vpop.f32.mrb[110].mxu0  ;;  %v13593_v25 = vpack.c.bf16 %v17830_v23, %v17799_v54  ;;  %v13563_v13 = vpack.c.bf16 %v17806_v12, %v17784_v49 }
 0x2fa   : > { %v3673_v6 = vmul.f32 %v3609_v36, %v2502_v11  ;;  %v17915_v44 = vmul.f32 %v17901_v40, %v2663_v30  ;;  %v3611_v32 = vmul.f32 %v3547_v7, %v17901_v40  ;;  %v17920_v10 = vpop.f32.mrb[110].mxu1  ;;  %v17922_v27 = vpop.f32.mrb[111].mxu0  ;;  %13562 = vmatprep.subr.bf16.mxu0 %v13561_v29  ;;  %v13595_v60 = vpack.c.bf16 %v17813_v4, %v17787_v43 }
 0x2fb   : > { %23322 = vst [vmem:[#allocation46_spill] sm:$0xff] %v17906_v22  ;;  %v17924_v33 = vmul.f32 %v3674_v37, %v2661_v21  ;;  %v3240_v14 = vmul.f32 %v17838_v52, %v17838_v52  ;;  %v17932_v31 = vpop.f32.mrb[111].mxu1  ;;  %13594 = vmatprep.subr.bf16.mxu1 %v13593_v25  ;;  %v3560_v23 = vmul.f32 2.0, %v17838_v52  ;;  %v3242_v21 = vmul.f32 %v17845_v3, %v17845_v3 }
 0x2fc   : > { %v17934_v36 = vmul.f32 %v3673_v6, %v2502_v11  ;;  %v3675_v54 = vmul.f32 %v3611_v32, %v2663_v30  ;;  %13564 = vmatpush1.bf16.msra.mxu0 %v13563_v13  ;;  %13596 = vmatpush1.bf16.msra.mxu1 %v13595_v60  ;;  %v3562_v43 = vmul.f32 2.0, %v17845_v3  ;;  %v3241_v12 = vmul.f32 %v17853_v0, %v17853_v0 }
 0x2fd   : > { %23323 = vst [vmem:[#allocation49_spill] sm:$0xff] %v17924_v33  ;;  %v17939_v49 = vsub.f32 1.0, %v3240_v14  ;;  %v3561_v4 = vmul.f32 2.0, %v17853_v0  ;;  %v17945_v11 = vpop.f32.mrb[112].mxu0  ;;  %v17949_v37 = vsub.f32 1.0, %v3242_v21  ;;  %v3243_v29 = vmul.f32 %v17860_v62, %v17860_v62 }
 0x2fe   : > { %23324 = vst [vmem:[#allocation53_spill] sm:$0xff] %v17934_v36  ;;  %v17947_v7 = vmul.f32 %v3675_v54, %v2663_v30  ;;  %v3563_v6 = vmul.f32 2.0, %v17860_v62  ;;  %v17954_v32 = vpop.f32.mrb[112].mxu1  ;;  %v17956_v25 = vpop.f32.mrb[113].mxu0  ;;  %v17963_v14 = vsub.f32 1.0, %v3241_v12  ;;  %v3256_v30 = vmul.f32 %v17872_v41, %v17872_v41 }
 0x2ff   : > { %v17960_v13 = vmul.f32 %v17939_v49, %v17870_v48  ;;  %v3624_v60 = vmul.f32 %v3560_v23, %v17939_v49  ;;  %v17967_v54 = vpop.f32.mrb[113].mxu1  ;;  %v17971_v21 = vmul.f32 %v17949_v37, %v17881_v61  ;;  %v3626_v34 = vmul.f32 %v3562_v43, %v17949_v37 }
 0x300   : > { %23325 = vst [vmem:[#allocation29_spill] sm:$0xff] %v17947_v7  ;;  %v17974_v17 = vsub.f32 1.0, %v3243_v29  ;;  %v3576_v8 = vmul.f32 2.0, %v17872_v41  ;;  %v17980_v23 = vmul.f32 %v17963_v14, %v17883_v9  ;;  %v3625_v12 = vmul.f32 %v3561_v4, %v17963_v14 }
 0x301   : > { %23326 = vst [vmem:[#allocation42_spill] sm:$0xff] %v17960_v13  ;;  %v3688_v38 = vmul.f32 %v3624_v60, %v17870_v48  ;;  %v17983_v24 = vsub.f32 1.0, %v3256_v30  ;;  %v17985_v15 = vpop.f32.mrb[114].mxu0  ;;  %v3690_v19 = vmul.f32 %v3626_v34, %v17881_v61  ;;  %v3258_v60 = vmul.f32 %v17885_v45, %v17885_v45 }
 0x302   : > { %v17990_v43 = vmul.f32 %v17974_v17, %v17893_v59  ;;  %v3627_v29 = vmul.f32 %v3563_v6, %v17974_v17  ;;  %v2685_v7 = vpop.f32.mrb[114].mxu1  ;;  %v2526_v36 = vpop.f32.mrb[115].mxu0  ;;  %v3689_v4 = vmul.f32 %v3625_v12, %v17883_v9  ;;  %v3578_v47 = vmul.f32 2.0, %v17885_v45 }
 0x303   : > { %v17996_v33 = vmul.f32 %v3688_v38, %v17870_v48  ;;  %v18001_v30 = vmul.f32 %v17983_v24, %v17912_v5  ;;  %v3640_v34 = vmul.f32 %v3576_v8, %v17983_v24  ;;  %v2687_v22 = vpop.f32.mrb[115].mxu1  ;;  %v18005_v35 = vmul.f32 %v3690_v19, %v17881_v61 }
 0x304   : > { %v3691_v6 = vmul.f32 %v3627_v29, %v17893_v59  ;;  %v18008_v53 = vsub.f32 1.0, %v3258_v60  ;;  %v18012_v38 = vmul.f32 %v3689_v4, %v17883_v9  ;;  %v3257_v8 = vmul.f32 %v17895_v46, %v17895_v46 }
 0x305   : > { %23327 = vst [vmem:[#allocation39_spill] sm:$0xff] %v17996_v33  ;;  %23328 = vst [vmem:[#allocation52_spill] sm:$0xff] %v18005_v35  ;;  %v3704_v48 = vmul.f32 %v3640_v34, %v17912_v5  ;;  %v2530_v33 = vpop.f32.mrb[116].mxu0  ;;  %v3577_v9 = vmul.f32 2.0, %v17895_v46  ;;  %v13565_v35 = vpack.c.bf16 %v17895_v46, %v17853_v0  ;;  %v13567_v55 = vpack.c.bf16 %v17872_v41, %v17838_v52 }
 0x306   : > { %23329 = vst [vmem:[#allocation68_spill] sm:$0xff] %v18012_v38  ;;  %v18020_v19 = vmul.f32 %v3691_v6, %v17893_v59  ;;  %v18024_v61 = vmul.f32 %v18008_v53, %v17920_v10  ;;  %v3642_v29 = vmul.f32 %v3578_v47, %v18008_v53  ;;  %v2691_v60 = vpop.f32.mrb[116].mxu1  ;;  %v2532_v4 = vpop.f32.mrb[117].mxu0  ;;  %v18031_v12 = vsub.f32 1.0, %v3257_v8 }
 0x307   : > { %v18029_v34 = vmul.f32 %v3704_v48, %v17912_v5  ;;  %v3259_v38 = vmul.f32 %v17904_v63, %v17904_v63  ;;  %v3579_v59 = vmul.f32 2.0, %v17904_v63  ;;  %v2693_v6 = vpop.f32.mrb[117].mxu1  ;;  %v13597_v5 = vpack.c.bf16 %v17904_v63, %v17860_v62  ;;  %13566 = vmatprep.subr.bf16.mxu0 %v13565_v35 }
 0x308   : > { %23330 = vst [vmem:[#allocation74_spill] sm:$0xff] %v18020_v19  ;;  %v3706_v19 = vmul.f32 %v3642_v29, %v17920_v10  ;;  %v13607_v47 = vpack.c.bf16 %v18024_v61, %v17971_v21  ;;  %v3385_v48 = vmul.f32 %v18031_v12, %v17922_v27  ;;  %v3641_v8 = vmul.f32 %v3577_v9, %v18031_v12 }
 0x309   : > { %23331 = vst [vmem:[#allocation75_spill] sm:$0xff] %v18029_v34  ;;  %v18046_v34 = vsub.f32 1.0, %v3259_v38  ;;  %v2536_v29 = vpop.f32.mrb[118].mxu0  ;;  %13598 = vmatprep.subr.bf16.mxu1 %v13597_v5  ;;  %v13599_v0 = vpack.c.bf16 %v17885_v45, %v17845_v3  ;;  %v13569_v62 = vpack.c.bf16 %v17898_v16, %v17833_v28  ;;  %13568 = vmatpush1.bf16.msra.mxu0 %v13567_v55 }
 0x30a   : > { %v18051_v13 = vmul.f32 %v3706_v19, %v17920_v10  ;;  %v2697_v46 = vpop.f32.mrb[118].mxu1  ;;  %v2538_v63 = vpop.f32.mrb[119].mxu0  ;;  %v3705_v38 = vmul.f32 %v3641_v8, %v17922_v27  ;;  %v13601_v41 = vpack.c.bf16 %v17915_v44, %v17841_v57  ;;  %v3400_v3 = vmul.f32 %v17801_v39, %v17945_v11 }
 0x30b   : > { %v3387_v9 = vmul.f32 %v18046_v34, %v17932_v31  ;;  %v3643_v52 = vmul.f32 %v3579_v59, %v18046_v34  ;;  %v2699_v35 = vpop.f32.mrb[119].mxu1  ;;  %13600 = vmatpush1.bf16.msra.mxu1 %v13599_v0  ;;  %13570 = vmatprep.subr.bf16.mxu0 %v13569_v62  ;;  %v18067_v28 = vmul.f32 %v17808_v26, %v17954_v32 }
 0x30c   : > { %v3401_v45 = vmul.f32 %v17819_v1, %v17956_v25  ;;  %v18072_v16 = vmul.f32 %v3705_v38, %v17922_v27  ;;  %13602 = vmatprep.subr.bf16.mxu1 %v13601_v41  ;;  %v3403_v57 = vmul.f32 %v17827_v56, %v17967_v54  ;;  %v13573_v44 = vpack.c.bf16 %v3385_v48, %v17980_v23 }
 0x30d   : > { %v3707_v55 = vmul.f32 %v3643_v52, %v17932_v31  ;;  %v2542_v10 = vpop.f32.mrb[120].mxu0  ;;  %v13605_v11 = vpack.c.bf16 %v3387_v9, %v17990_v43  ;;  %v3416_v32 = vmul.f32 %v17849_v51, %v17985_v15  ;;  %v3418_v19 = vmul.f32 %v17868_v58, %v2685_v7  ;;  %v23334_v52 = vld [vmem:[#allocation42_spill] sm:$0xff] }
 0x30e   : > { %v3417_v25 = vmul.f32 %v17876_v2, %v2526_v36  ;;  %v2703_v27 = vpop.f32.mrb[120].mxu1  ;;  %v2544_v59 = vpop.f32.mrb[121].mxu0  ;;  %v23332_v54 = vpack.c.bf16 %v17865_v42, %v17816_v50  ;;  %v3419_v23 = vmul.f32 %v17901_v40, %v2687_v22  ;;  %v18091_v43 = vmul.f32 %v17939_v49, %v2530_v33 }
 0x30f   : > { %v18084_v5 = vmul.f32 %v3707_v55, %v17932_v31  ;;  %v18094_v15 = vmul.f32 %v17949_v37, %v2691_v60  ;;  %v2705_v7 = vpop.f32.mrb[121].mxu1  ;;  %v23333_v36 = vpack.c.bf16 %v17890_v18, %v17824_v20  ;;  %v13579_v31 = vpack.c.bf16 %v3416_v32, %v3400_v3 }
 0x310   : > { %13572 = vmatpush1.bf16.msra.mxu0 %v23332_v54  ;;  %v13611_v48 = vpack.c.bf16 %v3418_v19, %v18067_v28  ;;  %v13577_v8 = vpack.c.bf16 %v3417_v25, %v3401_v45  ;;  %v13609_v50 = vpack.c.bf16 %v3419_v23, %v3403_v57  ;;  %v3433_v42 = vmul.f32 %v17963_v14, %v2532_v4  ;;  %v23337_v45 = vld [vmem:[#allocation40_spill] sm:$0xff]  ;;  %v23340_v54 = vld [vmem:[#allocation46_spill] sm:$0xff]  ;;  %v23341_v23 = vld [vmem:[#allocation49_spill] sm:$0xff] }
 0x311   : > { %13604 = vmatpush1.bf16.msra.mxu1 %v23333_v36  ;;  %13574 = vmatprep.subr.bf16.mxu0 %v13573_v44  ;;  %v3435_v22 = vmul.f32 %v17974_v17, %v2693_v6  ;;  %v3448_v33 = vmul.f32 %v17983_v24, %v2536_v29  ;;  %v2548_v60 = vpop.f32.mrb[122].mxu0  ;;  %v3450_v0 = vmul.f32 %v18008_v53, %v2697_v46 }
 0x312   : > { %13606 = vmatprep.subr.bf16.mxu1 %v13605_v11  ;;  %v3449_v62 = vmul.f32 %v18031_v12, %v2538_v63  ;;  %v3451_v20 = vmul.f32 %v18046_v34, %v2699_v35  ;;  %v3464_v18 = vmul.f32 %v17801_v39, %v2542_v10  ;;  %v2709_v38 = vpop.f32.mrb[122].mxu1  ;;  %v2550_v9 = vpop.f32.mrb[123].mxu0  ;;  %v23335_v41 = vpack.c.bf16 %v18001_v30, %v23334_v52  ;;  %v23336_v30 = vld [vmem:[#allocation45_spill] sm:$0xff] }
 0x313   : > { %v13583_v4 = vpack.c.bf16 %v3448_v33, %v18091_v43  ;;  %v3466_v6 = vmul.f32 %v17808_v26, %v2703_v27  ;;  %v3465_v29 = vmul.f32 %v17819_v1, %v2544_v59  ;;  %v3467_v46 = vmul.f32 %v17827_v56, %v2705_v7  ;;  %v2711_v3 = vpop.f32.mrb[123].mxu1  ;;  %v23338_v26 = vld [vmem:[#allocation48_spill] sm:$0xff]  ;;  %v23339_v1 = vld [vmem:[#allocation35_spill] sm:$0xff]  ;;  %v23342_v43 = vld [vmem:[#allocation53_spill] sm:$0xff] }
 0x314   : > { %13576 = vmatpush1.bf16.msra.mxu0 %v23335_v41  ;;  %v13615_v39 = vpack.c.bf16 %v3450_v0, %v18094_v15  ;;  %v13581_v63 = vpack.c.bf16 %v3449_v62, %v3433_v42  ;;  %v13613_v35 = vpack.c.bf16 %v3451_v20, %v3435_v22  ;;  %v3784_v28 = vsub.f32 %v3464_v18, %v23336_v30  ;;  %v23344_v7 = vld [vmem:[#allocation39_spill] sm:$0xff] }
 0x315   : > { %13608 = vmatpush1.bf16.msra.mxu1 %v13607_v47  ;;  %13578 = vmatprep.subr.bf16.mxu0 %v13577_v8  ;;  %v3786_v55 = vsub.f32 %v3466_v6, %v23337_v45  ;;  %v3785_v57 = vsub.f32 %v3465_v29, %v23338_v26  ;;  %v3787_v44 = vsub.f32 %v3467_v46, %v23339_v1  ;;  %v2554_v56 = vpop.f32.mrb[124].mxu0  ;;  %v23346_v8 = vld [vmem:[#allocation68_spill] sm:$0xff]  ;;  %v23348_v41 = vld [vmem:[#allocation75_spill] sm:$0xff] }
 0x316   : > { %13610 = vmatprep.subr.bf16.mxu1 %v13609_v50  ;;  %v3480_v10 = vmul.f32 %v17849_v51, %v2548_v60  ;;  %v3482_v21 = vmul.f32 %v17868_v58, %v2709_v38  ;;  %v3481_v61 = vmul.f32 %v17876_v2, %v2550_v9  ;;  %v3483_v47 = vmul.f32 %v17901_v40, %v2711_v3  ;;  %v2715_v11 = vpop.f32.mrb[124].mxu1  ;;  %v2556_v32 = vpop.f32.mrb[125].mxu0  ;;  %v23343_v40 = vld [vmem:[#allocation29_spill] sm:$0xff]  ;;  %v23347_v9 = vld [vmem:[#allocation74_spill] sm:$0xff]  ;;  %v23349_v3 = vld [vmem:[#allocation51_spill] sm:$0xff] }
 0x317   : > { %v3496_v19 = vmul.f32 %v17939_v49, %v2554_v56  ;;  %v3498_v25 = vmul.f32 %v17949_v37, %v2715_v11  ;;  %v3497_v27 = vmul.f32 %v17963_v14, %v2556_v32  ;;  %v2717_v59 = vpop.f32.mrb[125].mxu1 }
 0x318   : > { %13580 = vmatpush1.bf16.msra.mxu0 %v13579_v31  ;;  %v3800_v51 = vsub.f32 %v3480_v10, %v23340_v54  ;;  %v3802_v58 = vsub.f32 %v3482_v21, %v23341_v23  ;;  %v3801_v2 = vsub.f32 %v3481_v61, %v23342_v43  ;;  %v3803_v15 = vsub.f32 %v3483_v47, %v23343_v40  ;;  %v23345_v31 = vld [vmem:[#allocation52_spill] sm:$0xff]  ;;  %v23351_v47 = vld [vmem:[#allocation13_spill] sm:$0xff] }
 0x319   : > { %13612 = vmatpush1.bf16.msra.mxu1 %v13611_v48  ;;  %13582 = vmatprep.subr.bf16.mxu0 %v13581_v63  ;;  %v3816_v36 = vsub.f32 %v3496_v19, %v23344_v7  ;;  %v3818_v49 = vsub.f32 %v3498_v25, %v23345_v31  ;;  %v3817_v37 = vsub.f32 %v3497_v27, %v23346_v8  ;;  %v2560_v50 = vpop.f32.mrb[126].mxu0  ;;  %v18158_v19 = vld [vmem:[%s22653_s5] sm:$0xff] }
 0x31a   : > { %13614 = vmatprep.subr.bf16.mxu1 %v13613_v35  ;;  %v13587_v14 = vpack.c.bf16 %v3800_v51, %v3784_v28  ;;  %v13619_v42 = vpack.c.bf16 %v3802_v58, %v3786_v55  ;;  %v3499_v48 = vmul.f32 %v17974_v17, %v2717_v59  ;;  %v3512_v22 = vmul.f32 %v17983_v24, %v2560_v50  ;;  %v2721_v33 = vpop.f32.mrb[126].mxu1  ;;  %v2562_v60 = vpop.f32.mrb[127].mxu0 }
 0x31b   : > { %v3514_v0 = vmul.f32 %v18008_v53, %v2721_v33  ;;  %v13585_v62 = vpack.c.bf16 %v3801_v2, %v3785_v57  ;;  %v13617_v20 = vpack.c.bf16 %v3803_v15, %v3787_v44  ;;  %v3513_v18 = vmul.f32 %v18031_v12, %v2562_v60  ;;  %v2723_v38 = vpop.f32.mrb[127].mxu1  ;;  %23352 = vst [vmem:[#allocation22_spill] sm:$0xff] %v18158_v19  ;;  %v23354_v2 = vld [vmem:[#allocation61_spill] sm:$0xff] }
 0x31c   : > { %13584 = vmatpush1.bf16.msra.mxu0 %v13583_v4  ;;  %v3819_v52 = vsub.f32 %v3499_v48, %v23347_v9  ;;  %v3832_v6 = vsub.f32 %v3512_v22, %v23348_v41  ;;  %v3515_v29 = vmul.f32 %v18046_v34, %v2723_v38  ;;  %v23353_v51 = vmov 0.0  }
 0x31d   : > { %13616 = vmatpush1.bf16.msra.mxu1 %v13615_v39  ;;  %v3834_v17 = vsub.f32 %v3514_v0, %v18051_v13  ;;  %13586 = vmatprep.subr.bf16.mxu0 %v13585_v62  ;;  %v3833_v24 = vsub.f32 %v3513_v18, %v18072_v16  ;;  %v2792_v4 = vpop.f32.mrb[128].mxu0 }
 0x31e   : > { %13618 = vmatprep.subr.bf16.mxu1 %v13617_v20  ;;  %v13591_v53 = vpack.c.bf16 %v3832_v6, %v3816_v36  ;;  %v3835_v46 = vsub.f32 %v3515_v29, %v18084_v5  ;;  %v3084_v12 = vadd.f32 %v23349_v3, %v2792_v4  ;;  %v2953_v63 = vpop.f32.mrb[128].mxu1  ;;  %v2794_v39 = vpop.f32.mrb[129].mxu0  ;;  %v23350_v5 = vld [vmem:[#allocation15_spill] sm:$0xff] }
 0x31f   : > { %v13623_v35 = vpack.c.bf16 %v3834_v17, %v3818_v49  ;;  %v3086_v30 = vadd.f32 %v23349_v3, %v2953_v63  ;;  %v3085_v34 = vadd.f32 %v23349_v3, %v2794_v39  ;;  %v2955_v28 = vpop.f32.mrb[129].mxu1  ;;  %v13589_v13 = vpack.c.bf16 %v3833_v24, %v3817_v37 }
 0x320   : > { %13588 = vmatpush1.bf16.msra.mxu0 %v13587_v14  ;;  %14315 = vtanh.f32 %v3084_v12  ;;  %v3087_v16 = vadd.f32 %v23349_v3, %v2955_v28  ;;  %v13621_v45 = vpack.c.bf16 %v3835_v46, %v3819_v52 }
 0x321   : > { %13620 = vmatpush1.bf16.msra.mxu1 %v13619_v42  ;;  %14317 = vtanh.f32 %v3086_v30  ;;  %v2798_v55 = vpop.f32.mrb[130].mxu0  ;;  %13590 = vmatprep.subr.bf16.mxu0 %v13589_v13 }
 0x322   : > { %14319 = vtanh.f32 %v3085_v34  ;;  %v3100_v26 = vadd.f32 %v23350_v5, %v2798_v55  ;;  %v2959_v57 = vpop.f32.mrb[130].mxu1  ;;  %13622 = vmatprep.subr.bf16.mxu1 %v13621_v45  ;;  %v2800_v1 = vpop.f32.mrb[131].mxu0 }
 0x323   : > { %14321 = vtanh.f32 %v3087_v16  ;;  %v3102_v44 = vadd.f32 %v23350_v5, %v2959_v57  ;;  %v3101_v56 = vadd.f32 %v23350_v5, %v2800_v1  ;;  %v2961_v10 = vpop.f32.mrb[131].mxu1 }
 0x324   : > { %13592 = vmatpush1.bf16.msra.mxu0 %v13591_v53  ;;  %14323 = vtanh.f32 %v3100_v26  ;;  %v3103_v21 = vadd.f32 %v23350_v5, %v2961_v10 }
 0x325   : > { %13624 = vmatpush1.bf16.msra.mxu1 %v13623_v35  ;;  %14325 = vtanh.f32 %v3102_v44  ;;  %v2804_v61 = vpop.f32.mrb[132].mxu0 }
 0x326   : > { %14327 = vtanh.f32 %v3101_v56  ;;  %v3116_v11 = vadd.f32 %v23351_v47, %v2804_v61  ;;  %v2965_v32 = vpop.f32.mrb[132].mxu1  ;;  %v2806_v25 = vpop.f32.mrb[133].mxu0 }
 0x327   : > { %4190 = vmatmul.mubr.f32.vlgmr.msra.gmra.mrb[164].mxu0 %v18158_v19  ;;  %14329 = vtanh.f32 %v3103_v21  ;;  %v3118_v27 = vadd.f32 %v23351_v47, %v2965_v32  ;;  %v3117_v59 = vadd.f32 %v23351_v47, %v2806_v25  ;;  %v2967_v54 = vpop.f32.mrb[133].mxu1 }
 0x328   : > { %4261 = vmatmul.mubr.f32.vlgmr.msra.gmra.mrb[164].mxu1 %v18158_v19  ;;  %4331 = vmatprep.mubr.f32.mxu0 %v23353_v51  ;;  %14331 = vtanh.f32 %v3116_v11  ;;  %v3119_v23 = vadd.f32 %v23351_v47, %v2967_v54 }
 0x329   : > { %4402 = vmatprep.mubr.f32.mxu1 %v23353_v51  ;;  %14333 = vtanh.f32 %v3118_v27  ;;  %v2810_v58 = vpop.f32.mrb[134].mxu0 }
 0x32a   : > { %v18167_v43 = vpop.eup %14315  ;;  %14335 = vtanh.f32 %v3117_v59  ;;  %v3132_v40 = vadd.f32 %v23354_v2, %v2810_v58  ;;  %v2971_v15 = vpop.f32.mrb[134].mxu1 }
 0x32b   : > { %v2812_v7 = vpop.f32.mrb[135].mxu0  ;;  %v18170_v36 = vpop.eup %14317  ;;  %14337 = vtanh.f32 %v3119_v23  ;;  %v3134_v31 = vadd.f32 %v23354_v2, %v2971_v15  ;;  %v3212_v37 = vmul.f32 %v18167_v43, %v18167_v43  ;;  %v3532_v42 = vmul.f32 2.0, %v18167_v43 }
 0x32c   : > { %v3133_v49 = vadd.f32 %v23354_v2, %v2812_v7  ;;  %v2973_v8 = vpop.f32.mrb[135].mxu1  ;;  %v18176_v50 = vpop.eup %14319  ;;  %14339 = vtanh.f32 %v3132_v40  ;;  %v3214_v48 = vmul.f32 %v18170_v36, %v18170_v36  ;;  %v3534_v0 = vmul.f32 2.0, %v18170_v36 }
 0x32d   : > { %v3135_v14 = vadd.f32 %v23354_v2, %v2973_v8  ;;  %v18182_v22 = vpop.eup %14321  ;;  %14341 = vtanh.f32 %v3134_v31  ;;  %v2816_v33 = vpop.f32.mrb[136].mxu0  ;;  %v18184_v60 = vsub.f32 1.0, %v3212_v37  ;;  %v3213_v62 = vmul.f32 %v18176_v50, %v18176_v50 }
 0x32e   : > { %v18189_v20 = vpop.eup %14323  ;;  %14343 = vtanh.f32 %v3133_v49  ;;  %v2977_v18 = vpop.f32.mrb[136].mxu1  ;;  %v18191_v38 = vsub.f32 1.0, %v3214_v48  ;;  %v3533_v52 = vmul.f32 2.0, %v18176_v50  ;;  %v3215_v41 = vmul.f32 %v18182_v22, %v18182_v22 }
 0x32f   : > { %v2818_v9 = vpop.f32.mrb[137].mxu0  ;;  %v18196_v6 = vpop.eup %14325  ;;  %14345 = vtanh.f32 %v3135_v14  ;;  %v18199_v29 = vmul.f32 %v18184_v60, %v2816_v33  ;;  %v3596_v17 = vmul.f32 %v3532_v42, %v18184_v60  ;;  %v18202_v24 = vsub.f32 1.0, %v3213_v62 }
 0x330   : > { %v2979_v4 = vpop.f32.mrb[137].mxu1  ;;  %v18204_v53 = vpop.eup %14327  ;;  %v18207_v46 = vmul.f32 %v18191_v38, %v2977_v18  ;;  %v3598_v3 = vmul.f32 %v3534_v0, %v18191_v38  ;;  %v18210_v12 = vsub.f32 1.0, %v3215_v41  ;;  %v3535_v63 = vmul.f32 2.0, %v18182_v22 }
 0x331   : > { %v18213_v39 = vpop.eup %14329  ;;  %v3660_v35 = vmul.f32 %v3596_v17, %v2816_v33  ;;  %v18216_v30 = vmul.f32 %v18202_v24, %v2818_v9  ;;  %v3597_v34 = vmul.f32 %v3533_v52, %v18202_v24  ;;  %v2822_v28 = vpop.f32.mrb[138].mxu0  ;;  %v3228_v13 = vmul.f32 %v18189_v20, %v18189_v20 }
 0x332   : > { %v18221_v16 = vpop.eup %14331  ;;  %v3662_v45 = vmul.f32 %v3598_v3, %v2977_v18  ;;  %v18224_v55 = vmul.f32 %v18210_v12, %v2979_v4  ;;  %v3599_v5 = vmul.f32 %v3535_v63, %v18210_v12  ;;  %v3548_v26 = vmul.f32 2.0, %v18189_v20  ;;  %v2983_v57 = vpop.f32.mrb[138].mxu1 }
 0x333   : > { %v2824_v1 = vpop.f32.mrb[139].mxu0  ;;  %v18228_v44 = vpop.eup %14333  ;;  %v18230_v56 = vmul.f32 %v3660_v35, %v2816_v33  ;;  %v3661_v10 = vmul.f32 %v3597_v34, %v2818_v9  ;;  %v18232_v21 = vsub.f32 1.0, %v3228_v13  ;;  %v3230_v61 = vmul.f32 %v18196_v6, %v18196_v6 }
 0x334   : > { %v2985_v47 = vpop.f32.mrb[139].mxu1  ;;  %v18236_v11 = vpop.eup %14335  ;;  %v18238_v32 = vmul.f32 %v3662_v45, %v2977_v18  ;;  %v3663_v25 = vmul.f32 %v3599_v5, %v2979_v4  ;;  %v3550_v27 = vmul.f32 2.0, %v18196_v6  ;;  %v3229_v59 = vmul.f32 %v18204_v53, %v18204_v53 }
 0x335   : > { %23355 = vst [vmem:[#allocation20_spill] sm:$0xff] %v18230_v56  ;;  %v18243_v54 = vpop.eup %14337  ;;  %v18245_v23 = vmul.f32 %v3661_v10, %v2818_v9  ;;  %v18248_v58 = vmul.f32 %v18232_v21, %v2822_v28  ;;  %v3612_v2 = vmul.f32 %v3548_v26, %v18232_v21  ;;  %v18251_v40 = vsub.f32 1.0, %v3230_v61  ;;  %v18253_v15 = vpop.f32.mrb[140].mxu0 }
 0x336   : > { %23356 = vst [vmem:[#allocation24_spill] sm:$0xff] %v18238_v32  ;;  %v18255_v7 = vpop.eup %14339  ;;  %v18257_v31 = vmul.f32 %v3663_v25, %v2979_v4  ;;  %v18259_v49 = vsub.f32 1.0, %v3229_v59  ;;  %v3549_v8 = vmul.f32 2.0, %v18204_v53  ;;  %v3231_v37 = vmul.f32 %v18213_v39, %v18213_v39  ;;  %v18264_v14 = vpop.f32.mrb[140].mxu1 }
 0x337   : > { %23357 = vst [vmem:[#allocation54_spill] sm:$0xff] %v18245_v23  ;;  %v18266_v42 = vpop.f32.mrb[141].mxu0  ;;  %v18268_v48 = vpop.eup %14341  ;;  %v3676_v33 = vmul.f32 %v3612_v2, %v2822_v28  ;;  %v18273_v62 = vmul.f32 %v18251_v40, %v2983_v57  ;;  %v3614_v18 = vmul.f32 %v3550_v27, %v18251_v40  ;;  %v3551_v3 = vmul.f32 2.0, %v18213_v39 }
 0x338   : > { %23358 = vst [vmem:[#allocation27_spill] sm:$0xff] %v18257_v31  ;;  %v18276_v9 = vpop.f32.mrb[141].mxu1  ;;  %v18278_v52 = vpop.eup %14343  ;;  %v18281_v41 = vmul.f32 %v18259_v49, %v2824_v1  ;;  %v3613_v17 = vmul.f32 %v3549_v8, %v18259_v49  ;;  %v18284_v4 = vsub.f32 1.0, %v3231_v37  ;;  %v13625_v45 = vpack.c.bf16 %v18204_v53, %v18176_v50 }
 0x339   : > { %v18287_v63 = vpop.eup %14345  ;;  %v18289_v35 = vmul.f32 %v3676_v33, %v2822_v28  ;;  %v3678_v34 = vmul.f32 %v3614_v18, %v2983_v57  ;;  %v18295_v5 = vpop.f32.mrb[142].mxu0  ;;  %v13657_v25 = vpack.c.bf16 %v18213_v39, %v18182_v22  ;;  %v13627_v50 = vpack.c.bf16 %v18189_v20, %v18167_v43 }
 0x33a   : > { %v3677_v26 = vmul.f32 %v3613_v17, %v2824_v1  ;;  %v18298_v10 = vmul.f32 %v18284_v4, %v2985_v47  ;;  %v3615_v61 = vmul.f32 %v3551_v3, %v18284_v4  ;;  %v18303_v28 = vpop.f32.mrb[142].mxu1  ;;  %v18305_v27 = vpop.f32.mrb[143].mxu0  ;;  %13626 = vmatprep.subr.bf16.mxu0 %v13625_v45  ;;  %v13659_v53 = vpack.c.bf16 %v18196_v6, %v18170_v36 }
 0x33b   : > { %23359 = vst [vmem:[#allocation14_spill] sm:$0xff] %v18289_v35  ;;  %v18307_v59 = vmul.f32 %v3678_v34, %v2983_v57  ;;  %v3244_v2 = vmul.f32 %v18221_v16, %v18221_v16  ;;  %v18315_v8 = vpop.f32.mrb[143].mxu1  ;;  %13658 = vmatprep.subr.bf16.mxu1 %v13657_v25  ;;  %v3564_v39 = vmul.f32 2.0, %v18221_v16  ;;  %v3246_v57 = vmul.f32 %v18228_v44, %v18228_v44 }
 0x33c   : > { %v18317_v37 = vmul.f32 %v3677_v26, %v2824_v1  ;;  %v3679_v22 = vmul.f32 %v3615_v61, %v2985_v47  ;;  %13628 = vmatpush1.bf16.msra.mxu0 %v13627_v50  ;;  %13660 = vmatpush1.bf16.msra.mxu1 %v13659_v53  ;;  %v3566_v36 = vmul.f32 2.0, %v18228_v44  ;;  %v3245_v20 = vmul.f32 %v18236_v11, %v18236_v11 }
 0x33d   : > { %23360 = vst [vmem:[#allocation32_spill] sm:$0xff] %v18307_v59  ;;  %v18322_v43 = vsub.f32 1.0, %v3244_v2  ;;  %v3565_v6 = vmul.f32 2.0, %v18236_v11  ;;  %v18328_v1 = vpop.f32.mrb[144].mxu0  ;;  %v18332_v18 = vsub.f32 1.0, %v3246_v57  ;;  %v3247_v17 = vmul.f32 %v18243_v54, %v18243_v54 }
 0x33e   : > { %23361 = vst [vmem:[#allocation19_spill] sm:$0xff] %v18317_v37  ;;  %v18330_v33 = vmul.f32 %v3679_v22, %v2985_v47  ;;  %v3567_v3 = vmul.f32 2.0, %v18243_v54  ;;  %v18337_v34 = vpop.f32.mrb[144].mxu1  ;;  %v18339_v45 = vpop.f32.mrb[145].mxu0  ;;  %v18346_v25 = vsub.f32 1.0, %v3245_v20  ;;  %v3260_v47 = vmul.f32 %v18255_v7, %v18255_v7 }
 0x33f   : > { %v18343_v26 = vmul.f32 %v18322_v43, %v18253_v15  ;;  %v3628_v61 = vmul.f32 %v3564_v39, %v18322_v43  ;;  %v18350_v50 = vpop.f32.mrb[145].mxu1  ;;  %v18354_v53 = vmul.f32 %v18332_v18, %v18264_v14  ;;  %v3630_v2 = vmul.f32 %v3566_v36, %v18332_v18 }
 0x340   : > { %23362 = vst [vmem:[#allocation34_spill] sm:$0xff] %v18330_v33  ;;  %v18357_v22 = vsub.f32 1.0, %v3247_v17  ;;  %v3580_v57 = vmul.f32 2.0, %v18255_v7  ;;  %v18363_v39 = vmul.f32 %v18346_v25, %v18266_v42  ;;  %v3629_v20 = vmul.f32 %v3565_v6, %v18346_v25 }
 0x341   : > { %23363 = vst [vmem:[#allocation55_spill] sm:$0xff] %v18343_v26  ;;  %v3692_v13 = vmul.f32 %v3628_v61, %v18253_v15  ;;  %v18366_v0 = vsub.f32 1.0, %v3260_v47  ;;  %v18368_v51 = vpop.f32.mrb[146].mxu0  ;;  %v3694_v19 = vmul.f32 %v3630_v2, %v18264_v14  ;;  %v3262_v61 = vmul.f32 %v18268_v48, %v18268_v48 }
 0x342   : > { %v18373_v36 = vmul.f32 %v18357_v22, %v18276_v9  ;;  %v3631_v17 = vmul.f32 %v3567_v3, %v18357_v22  ;;  %v3007_v33 = vpop.f32.mrb[146].mxu1  ;;  %v2848_v37 = vpop.f32.mrb[147].mxu0  ;;  %v3693_v6 = vmul.f32 %v3629_v20, %v18266_v42  ;;  %v3582_v32 = vmul.f32 2.0, %v18268_v48 }
 0x343   : > { %v18379_v59 = vmul.f32 %v3692_v13, %v18253_v15  ;;  %v18384_v47 = vmul.f32 %v18366_v0, %v18295_v5  ;;  %v3644_v2 = vmul.f32 %v3580_v57, %v18366_v0  ;;  %v3009_v35 = vpop.f32.mrb[147].mxu1  ;;  %v18388_v31 = vmul.f32 %v3694_v19, %v18264_v14 }
 0x344   : > { %v3695_v3 = vmul.f32 %v3631_v17, %v18276_v9  ;;  %v18391_v23 = vsub.f32 1.0, %v3262_v61  ;;  %v18395_v15 = vmul.f32 %v3693_v6, %v18266_v42  ;;  %v3261_v57 = vmul.f32 %v18278_v52, %v18278_v52 }
 0x345   : > { %23364 = vst [vmem:[#allocation37_spill] sm:$0xff] %v18379_v59  ;;  %23365 = vst [vmem:[#allocation23_spill] sm:$0xff] %v18388_v31  ;;  %v3708_v13 = vmul.f32 %v3644_v2, %v18295_v5  ;;  %v2852_v59 = vpop.f32.mrb[148].mxu0  ;;  %v3581_v42 = vmul.f32 2.0, %v18278_v52  ;;  %v13629_v31 = vpack.c.bf16 %v18278_v52, %v18236_v11  ;;  %v13631_v56 = vpack.c.bf16 %v18255_v7, %v18221_v16 }
 0x346   : > { %23366 = vst [vmem:[#allocation30_spill] sm:$0xff] %v18395_v15  ;;  %v18403_v19 = vmul.f32 %v3695_v3, %v18276_v9  ;;  %v18407_v14 = vmul.f32 %v18391_v23, %v18303_v28  ;;  %v3646_v17 = vmul.f32 %v3582_v32, %v18391_v23  ;;  %v3013_v61 = vpop.f32.mrb[148].mxu1  ;;  %v2854_v6 = vpop.f32.mrb[149].mxu0  ;;  %v18414_v20 = vsub.f32 1.0, %v3261_v57 }
 0x347   : > { %v18412_v2 = vmul.f32 %v3708_v13, %v18295_v5  ;;  %v3263_v15 = vmul.f32 %v18287_v63, %v18287_v63  ;;  %v3583_v9 = vmul.f32 2.0, %v18287_v63  ;;  %v3015_v3 = vpop.f32.mrb[149].mxu1  ;;  %v13661_v5 = vpack.c.bf16 %v18287_v63, %v18243_v54  ;;  %13630 = vmatprep.subr.bf16.mxu0 %v13629_v31 }
 0x348   : > { %23367 = vst [vmem:[#allocation28_spill] sm:$0xff] %v18403_v19  ;;  %v3710_v19 = vmul.f32 %v3646_v17, %v18303_v28  ;;  %v13671_v32 = vpack.c.bf16 %v18407_v14, %v18354_v53  ;;  %v3389_v13 = vmul.f32 %v18414_v20, %v18305_v27  ;;  %v3645_v57 = vmul.f32 %v3581_v42, %v18414_v20 }
 0x349   : > { %23368 = vst [vmem:[#allocation47_spill] sm:$0xff] %v18412_v2  ;;  %v18429_v2 = vsub.f32 1.0, %v3263_v15  ;;  %v2858_v17 = vpop.f32.mrb[150].mxu0  ;;  %13662 = vmatprep.subr.bf16.mxu1 %v13661_v5  ;;  %v13663_v11 = vpack.c.bf16 %v18268_v48, %v18228_v44  ;;  %v13633_v54 = vpack.c.bf16 %v18281_v41, %v18216_v30  ;;  %13632 = vmatpush1.bf16.msra.mxu0 %v13631_v56 }
 0x34a   : > { %v18434_v26 = vmul.f32 %v3710_v19, %v18303_v28  ;;  %v3019_v52 = vpop.f32.mrb[150].mxu1  ;;  %v2860_v63 = vpop.f32.mrb[151].mxu0  ;;  %v3709_v15 = vmul.f32 %v3645_v57, %v18305_v27  ;;  %v13665_v7 = vpack.c.bf16 %v18298_v10, %v18224_v55  ;;  %v3404_v44 = vmul.f32 %v18184_v60, %v18328_v1 }
 0x34b   : > { %v3391_v42 = vmul.f32 %v18429_v2, %v18315_v8  ;;  %v3647_v16 = vmul.f32 %v3583_v9, %v18429_v2  ;;  %v3021_v31 = vpop.f32.mrb[151].mxu1  ;;  %13664 = vmatpush1.bf16.msra.mxu1 %v13663_v11  ;;  %13634 = vmatprep.subr.bf16.mxu0 %v13633_v54  ;;  %v3406_v30 = vmul.f32 %v18191_v38, %v18337_v34 }
 0x34c   : > { %v3405_v48 = vmul.f32 %v18202_v24, %v18339_v45  ;;  %v18453_v41 = vmul.f32 %v3709_v15, %v18305_v27  ;;  %13666 = vmatprep.subr.bf16.mxu1 %v13665_v7  ;;  %v3407_v55 = vmul.f32 %v18210_v12, %v18350_v50  ;;  %v13637_v10 = vpack.c.bf16 %v3389_v13, %v18363_v39  ;;  %v23371_v15 = vld [vmem:[#allocation55_spill] sm:$0xff] }
 0x34d   : > { %v3711_v56 = vmul.f32 %v3647_v16, %v18315_v8  ;;  %v13669_v28 = vpack.c.bf16 %v3391_v42, %v18373_v36  ;;  %v3420_v1 = vmul.f32 %v18232_v21, %v18368_v51  ;;  %v3422_v34 = vmul.f32 %v18251_v40, %v3007_v33  ;;  %v2864_v19 = vpop.f32.mrb[152].mxu0 }
 0x34e   : > { %v3421_v45 = vmul.f32 %v18259_v49, %v2848_v37  ;;  %v23369_v9 = vpack.c.bf16 %v18248_v58, %v18199_v29  ;;  %v3423_v50 = vmul.f32 %v18284_v4, %v3009_v35  ;;  %v3436_v39 = vmul.f32 %v18322_v43, %v2852_v59  ;;  %v3025_v51 = vpop.f32.mrb[152].mxu1  ;;  %v2866_v5 = vpop.f32.mrb[153].mxu0 }
 0x34f   : > { %v18465_v27 = vmul.f32 %v3711_v56, %v18315_v8  ;;  %v18473_v36 = vmul.f32 %v18332_v18, %v3013_v61  ;;  %v23370_v37 = vpack.c.bf16 %v18273_v62, %v18207_v46  ;;  %v13643_v8 = vpack.c.bf16 %v3420_v1, %v3404_v44  ;;  %v3027_v57 = vpop.f32.mrb[153].mxu1  ;;  %v23373_v44 = vld [vmem:[#allocation20_spill] sm:$0xff] }
 0x350   : > { %13636 = vmatpush1.bf16.msra.mxu0 %v23369_v9  ;;  %v13675_v33 = vpack.c.bf16 %v3422_v34, %v3406_v30  ;;  %v13641_v13 = vpack.c.bf16 %v3421_v45, %v3405_v48  ;;  %v13673_v29 = vpack.c.bf16 %v3423_v50, %v3407_v55  ;;  %v3437_v58 = vmul.f32 %v18346_v25, %v2854_v6  ;;  %v23378_v50 = vld [vmem:[#allocation32_spill] sm:$0xff] }
 0x351   : > { %13668 = vmatpush1.bf16.msra.mxu1 %v23370_v37  ;;  %13638 = vmatprep.subr.bf16.mxu0 %v13637_v10  ;;  %v3439_v35 = vmul.f32 %v18357_v22, %v3015_v3  ;;  %v3452_v59 = vmul.f32 %v18366_v0, %v2858_v17  ;;  %v3454_v61 = vmul.f32 %v18391_v23, %v3019_v52  ;;  %v2870_v54 = vpop.f32.mrb[154].mxu0 }
 0x352   : > { %13670 = vmatprep.subr.bf16.mxu1 %v13669_v28  ;;  %v3453_v11 = vmul.f32 %v18414_v20, %v2860_v63  ;;  %v3455_v46 = vmul.f32 %v18429_v2, %v3021_v31  ;;  %v3468_v62 = vmul.f32 %v18184_v60, %v2864_v19  ;;  %v23372_v42 = vpack.c.bf16 %v18384_v47, %v23371_v15  ;;  %v3031_v7 = vpop.f32.mrb[154].mxu1  ;;  %v2872_v52 = vpop.f32.mrb[155].mxu0  ;;  %v23377_v19 = vld [vmem:[#allocation14_spill] sm:$0xff] }
 0x353   : > { %v13647_v16 = vpack.c.bf16 %v3452_v59, %v3436_v39  ;;  %v3470_v6 = vmul.f32 %v18191_v38, %v3025_v51  ;;  %v3469_v3 = vmul.f32 %v18202_v24, %v2866_v5  ;;  %v3471_v17 = vmul.f32 %v18210_v12, %v3027_v57  ;;  %v3033_v47 = vpop.f32.mrb[155].mxu1  ;;  %v23374_v38 = vld [vmem:[#allocation24_spill] sm:$0xff]  ;;  %v23375_v24 = vld [vmem:[#allocation54_spill] sm:$0xff]  ;;  %v23376_v12 = vld [vmem:[#allocation27_spill] sm:$0xff] }
 0x354   : > { %13640 = vmatpush1.bf16.msra.mxu0 %v23372_v42  ;;  %v13679_v60 = vpack.c.bf16 %v3454_v61, %v18473_v36  ;;  %v13645_v63 = vpack.c.bf16 %v3453_v11, %v3437_v58  ;;  %v13677_v31 = vpack.c.bf16 %v3455_v46, %v3439_v35  ;;  %v3788_v30 = vsub.f32 %v3468_v62, %v23373_v44  ;;  %v23379_v36 = vld [vmem:[#allocation19_spill] sm:$0xff]  ;;  %v23381_v5 = vld [vmem:[#allocation37_spill] sm:$0xff]  ;;  %v23383_v35 = vld [vmem:[#allocation30_spill] sm:$0xff] }
 0x355   : > { %13672 = vmatpush1.bf16.msra.mxu1 %v13671_v32  ;;  %13642 = vmatprep.subr.bf16.mxu0 %v13641_v13  ;;  %v3790_v48 = vsub.f32 %v3470_v6, %v23374_v38  ;;  %v3789_v56 = vsub.f32 %v3469_v3, %v23375_v24  ;;  %v3791_v55 = vsub.f32 %v3471_v17, %v23376_v12  ;;  %v2876_v28 = vpop.f32.mrb[156].mxu0  ;;  %v23384_v11 = vld [vmem:[#allocation28_spill] sm:$0xff] }
 0x356   : > { %13674 = vmatprep.subr.bf16.mxu1 %v13673_v29  ;;  %v3484_v10 = vmul.f32 %v18232_v21, %v2870_v54  ;;  %v3486_v53 = vmul.f32 %v18251_v40, %v3031_v7  ;;  %v3485_v14 = vmul.f32 %v18259_v49, %v2872_v52  ;;  %v3487_v32 = vmul.f32 %v18284_v4, %v3033_v47  ;;  %v3037_v34 = vpop.f32.mrb[156].mxu1  ;;  %v2878_v45 = vpop.f32.mrb[157].mxu0  ;;  %v23380_v40 = vld [vmem:[#allocation34_spill] sm:$0xff]  ;;  %v23382_v29 = vld [vmem:[#allocation23_spill] sm:$0xff] }
 0x357   : > { %v3500_v1 = vmul.f32 %v18322_v43, %v2876_v28  ;;  %v3039_v51 = vpop.f32.mrb[157].mxu1  ;;  %v3502_v37 = vmul.f32 %v18332_v18, %v3037_v34  ;;  %v3501_v43 = vmul.f32 %v18346_v25, %v2878_v45 }
 0x358   : > { %13644 = vmatpush1.bf16.msra.mxu0 %v13643_v8  ;;  %v3804_v9 = vsub.f32 %v3484_v10, %v23377_v19  ;;  %v3806_v39 = vsub.f32 %v3486_v53, %v23378_v50  ;;  %v3805_v21 = vsub.f32 %v3485_v14, %v23379_v36  ;;  %v3807_v49 = vsub.f32 %v3487_v32, %v23380_v40 }
 0x359   : > { %13676 = vmatpush1.bf16.msra.mxu1 %v13675_v33  ;;  %13646 = vmatprep.subr.bf16.mxu0 %v13645_v63  ;;  %v3820_v4 = vsub.f32 %v3500_v1, %v23381_v5  ;;  %v3503_v33 = vmul.f32 %v18357_v22, %v3039_v51  ;;  %v3822_v58 = vsub.f32 %v3502_v37, %v23382_v29  ;;  %v23385_v22 = vld [vmem:[#allocation47_spill] sm:$0xff]  ;;  %v22849_v51 = vmov 683565275  }
 0x35a   : > { %13678 = vmatprep.subr.bf16.mxu1 %v13677_v31  ;;  %v13651_v8 = vpack.c.bf16 %v3804_v9, %v3788_v30  ;;  %v13683_v13 = vpack.c.bf16 %v3806_v39, %v3790_v48  ;;  %v13649_v57 = vpack.c.bf16 %v3805_v21, %v3789_v56  ;;  %v3821_v59 = vsub.f32 %v3501_v43, %v23383_v35  ;;  %v23386_v31 = vld [vmem:[#allocation22_spill] sm:$0xff] }
 0x35b   : > { %v13681_v61 = vpack.c.bf16 %v3807_v49, %v3791_v55  ;;  %v3823_v46 = vsub.f32 %v3503_v33, %v23384_v11  ;;  %v2882_v62 = vpop.f32.mrb[158].mxu0  ;;  %v22851_v49 = vmov 2475754826   ;;  %v22857_v43 = vmov 2102212464  }
 0x35c   : > { %13648 = vmatpush1.bf16.msra.mxu0 %v13647_v16  ;;  %v3516_v18 = vmul.f32 %v18366_v0, %v2882_v62  ;;  %v2884_v25 = vpop.f32.mrb[159].mxu0 }
 0x35d   : > { %13680 = vmatpush1.bf16.msra.mxu1 %v13679_v60  ;;  %13650 = vmatprep.subr.bf16.mxu0 %v13649_v57  ;;  %v3517_v54 = vmul.f32 %v18414_v20, %v2884_v25  ;;  %v3043_v42 = vpop.f32.mrb[158].mxu1 }
 0x35e   : > { %13682 = vmatprep.subr.bf16.mxu1 %v13681_v61  ;;  %v3836_v15 = vsub.f32 %v3516_v18, %v23385_v22  ;;  %v3518_v16 = vmul.f32 %v18391_v23, %v3043_v42  ;;  %v3045_v3 = vpop.f32.mrb[159].mxu1  ;;  %v23387_v23 = vmov 0.0   ;;  %v22845_v61 = vmov 1326507024  }
 0x35f   : > { %v3837_v6 = vsub.f32 %v3517_v54, %v18453_v41  ;;  %v3519_v7 = vmul.f32 %v18429_v2, %v3045_v3 }
 0x360   : > { %13652 = vmatpush1.bf16.msra.mxu0 %v13651_v8  ;;  %v13655_v17 = vpack.c.bf16 %v3836_v15, %v3820_v4  ;;  %v3838_v52 = vsub.f32 %v3518_v16, %v18434_v26  ;;  %v22854_v4 = vmov 2131351028  }
 0x361   : > { %13684 = vmatpush1.bf16.msra.mxu1 %v13683_v13  ;;  %v13653_v60 = vpack.c.bf16 %v3837_v6, %v3821_v59  ;;  %v3839_v0 = vsub.f32 %v3519_v7, %v18465_v27  ;;  %v22860_v13 = vmov 920167782  }
 0x362   : > { %v13687_v63 = vpack.c.bf16 %v3838_v52, %v3822_v58 }
 0x363   : > { %13654 = vmatprep.subr.bf16.mxu0 %v13653_v60  ;;  %v13685_v20 = vpack.c.bf16 %v3839_v0, %v3823_v46 }
 0x364   : > { %13656 = vmatpush1.bf16.msra.mxu0 %v13655_v17 }
 0x365   : > { %13686 = vmatprep.subr.bf16.mxu1 %v13685_v20 }
 0x366   : > { %13688 = vmatpush1.bf16.msra.mxu1 %v13687_v63 }
 0x367   : > { %4332 = vmatmul.mubr.f32.vlgmr.msra.gmra.mrb[166].mxu0 %v23386_v31 }
 0x368   : > { %8030 = vmatprep.mubr.f32.mxu0 %v23387_v23 }
 0x369   : > { %4403 = vmatmul.mubr.f32.vlgmr.msra.gmra.mrb[166].mxu1 %v23386_v31 }
 0x36a   : > { %8101 = vmatprep.mubr.f32.mxu1 %v23387_v23 }
 0x374   : > { %v18527_v2 = vpop.f32.mrb[160].mxu0 }
 0x375   : > { %23388 = vst [vmem:[#allocation38_spill] sm:$0xff] %v18527_v2  ;;  %v4409_v26 = vand.u32 2147483647, %v18527_v2  ;;  %v4412_v41 = vand.u32 2139095040, %v18527_v2  ;;  %v18531_v27 = vpop.f32.mrb[160].mxu1  ;;  %v18533_v47 = vpop.f32.mrb[161].mxu0 }
 0x376   : > { %23389 = vst [vmem:[#allocation44_spill] sm:$0xff] %v18531_v27  ;;  %23390 = vst [vmem:[#allocation50_spill] sm:$0xff] %v18533_v47  ;;  %v18535_v30 = vpop.f32.mrb[161].mxu1  ;;  %v4617_v48 = vand.u32 2147483647, %v18531_v27  ;;  %v4620_v24 = vand.u32 2139095040, %v18531_v27 }
 0x377   : > { %v4413_v44 = vshrl.u32 %v4412_v41, 23  ;;  %23391 = vst [vmem:[#allocation43_spill] sm:$0xff] %v18535_v30  ;;  %v4416_v38 = vand.u32 8388607, %v4409_v26  ;;  %v4516_v12 = vand.u32 2139095040, %v18533_v47 }
 0x378   : > { %v4621_v55 = vshrl.u32 %v4620_v24, 23  ;;  %v4624_v10 = vand.u32 8388607, %v4617_v48 }
 0x379   : > { %v12866_v56 = vadd.s32 4294967169, %v4413_v44  ;;  %v4417_v14 = vor.u32 8388608, %v4416_v38  ;;  %v4517_v1 = vshrl.u32 %v4516_v12, 23 }
 0x37a   : > { %v12874_v32 = vadd.s32 4294967169, %v4621_v55  ;;  %v4625_v28 = vor.u32 8388608, %v4624_v10 }
 0x37b   : > { %v4419_v53 = vadd.s32 1, %v12866_v56  ;;  %v18544_v50 = vshll.u32 %v4417_v14, 8  ;;  %v18548_v36 = vadd.s32 4294967169, %v4517_v1 }
 0x37c   : > { %v4627_v45 = vadd.s32 1, %v12874_v32  ;;  %v18546_v39 = vshll.u32 %v4625_v28, 8 }
 0x37d   : > { %vm4420_vm2 = vcmp.gt.s32.totalorder %v4419_v53, 0 }
 0x37e   : > { %v4421_v34 = vsel %vm4420_vm2, %v4419_v53, 0  ;;  %vm4628_vm3 = vcmp.gt.s32.totalorder %v4627_v45, 0 }
 0x37f   : > { %v4422_v19 = vshrl.u32 %v4421_v34, 5  ;;  %v4423_v9 = vand.u32 31, %v4421_v34  ;;  %v4629_v25 = vsel %vm4628_vm3, %v4627_v45, 0 }
 0x380   : > { %v4630_v15 = vshrl.u32 %v4629_v25, 5  ;;  %v4631_v42 = vand.u32 31, %v4629_v25 }
 0x381   : > { %v4424_v21 = vsub.s32 32, %v4423_v9  ;;  %v4426_v40 = vshll.u32 %v22849_v51, %v4423_v9  ;;  %v4429_v5 = vshll.u32 %v22851_v49, %v4423_v9  ;;  %v4432_v37 = vshll.u32 %v22854_v4, %v4423_v9 }
 0x382   : > { %v4435_v8 = vshll.u32 %v22857_v43, %v4423_v9  ;;  %v4438_v33 = vshll.u32 %v22860_v13, %v4423_v9  ;;  %vm4441_vm4 = vcmp.lt.s32.totalorder %v4422_v19, 1  ;;  %vm4442_vm5 = vcmp.lt.s32.totalorder %v4422_v19, 2 }
 0x383   : > { %v4425_v57 = vshrl.u32 %v22849_v51, %v4424_v21  ;;  %v4427_v29 = vshrl.u32 %v22851_v49, %v4424_v21  ;;  %v4430_v58 = vshrl.u32 %v22854_v4, %v4424_v21  ;;  %v4433_v35 = vshrl.u32 %v22857_v43, %v4424_v21 }
 0x384   : > { %v4436_v59 = vshrl.u32 %v22860_v13, %v4424_v21  ;;  %v4439_v11 = vshrl.u32 %v22845_v61, %v4424_v21  ;;  %vm4443_vm6 = vcmp.lt.s32.totalorder %v4422_v19, 3  ;;  %vm4444_vm7 = vcmp.lt.s32.totalorder %v4422_v19, 4 }
 0x385   : > { %v4428_v46 = vor.u32 %v4427_v29, %v4426_v40  ;;  %v4431_v62 = vor.u32 %v4430_v58, %v4429_v5  ;;  %v4434_v18 = vor.u32 %v4433_v35, %v4432_v37  ;;  %v4632_v0 = vsub.s32 32, %v4631_v42 }
 0x386   : > { %v4437_v54 = vor.u32 %v4436_v59, %v4435_v8  ;;  %v4440_v22 = vor.u32 %v4439_v11, %v4438_v33  ;;  %v4634_v41 = vshll.u32 %v22849_v51, %v4631_v42  ;;  %v4637_v32 = vshll.u32 %v22851_v49, %v4631_v42 }
 0x387   : > { %v4445_v16 = vsel %vm4441_vm4, %v4425_v57, %v4428_v46  ;;  %v4446_v6 = vsel %vm4444_vm7, %v4434_v18, 2102212464  ;;  %v4449_v3 = vsel %vm4441_vm4, %v4428_v46, %v4431_v62  ;;  %v4453_v17 = vsel %vm4441_vm4, %v4431_v62, %v4434_v18 }
 0x388   : > { %v4447_v7 = vsel %vm4443_vm6, %v4431_v62, %v4446_v6  ;;  %v4450_v52 = vsel %vm4444_vm7, %v4437_v54, 920167782  ;;  %v4454_v60 = vsel %vm4444_vm7, %v4440_v22, 1326507024  ;;  %v4633_v56 = vshrl.u32 %v22849_v51, %v4632_v0 }
 0x389   : > { %v4448_v63 = vsel %vm4442_vm5, %v4445_v16, %v4447_v7  ;;  %v4451_v20 = vsel %vm4443_vm6, %v4434_v18, %v4450_v52  ;;  %v4455_v31 = vsel %vm4443_vm6, %v4437_v54, %v4454_v60  ;;  %v4635_v14 = vshrl.u32 %v22851_v49, %v4632_v0 }
 0x38a   : > { %v4452_v44 = vsel %vm4442_vm5, %v4449_v3, %v4451_v20  ;;  %v4456_v38 = vsel %vm4442_vm5, %v4453_v17, %v4455_v31  ;;  %v4464_v24 = vmul.u32 %v18544_v50, %v4448_v63  ;;  %v4638_v28 = vshrl.u32 %v22854_v4, %v4632_v0 }
 0x38b   : > { %v18575_v12 = vmul.u32.u64.low %v18544_v50, %v4456_v38  ;;  %v18576_v55 = vmul.u32.u64.high %v18544_v50, %v4456_v38, %v18575_v12  ;;  %v18579_v10 = vmul.u32.u64.low %v18544_v50, %v4452_v44  ;;  %v18580_v53 = vmul.u32.u64.high %v18544_v50, %v4452_v44, %v18579_v10 }
 0x38c   : > { %v4640_v1 = vshll.u32 %v22854_v4, %v4631_v42  ;;  %v4641_v34 = vshrl.u32 %v22857_v43, %v4632_v0  ;;  %v4643_v45 = vshll.u32 %v22857_v43, %v4631_v42  ;;  %v4644_v19 = vshrl.u32 %v22860_v13, %v4632_v0 }
 0x38d   : > { %v4646_v9 = vshll.u32 %v22860_v13, %v4631_v42  ;;  %v4636_v21 = vor.u32 %v4635_v14, %v4634_v41  ;;  %v4639_v50 = vor.u32 %v4638_v28, %v4637_v32  ;;  %v4647_v40 = vshrl.u32 %v22845_v61, %v4632_v0 }
 0x38e   : > { %vm4649_vm8 = vcmp.lt.s32.totalorder %v4630_v15, 1  ;;  %vm4466_vm9 = vc.u32 %v18576_v55, %v18579_v10  ;;  %v4467_v5 = vadd.s32 1, %v18580_v53  ;;  %v4642_v37 = vor.u32 %v4641_v34, %v4640_v1 }
 0x38f   : > { %v4523_v8 = vadd.s32 1, %v18548_v36  ;;  %v4645_v33 = vor.u32 %v4644_v19, %v4643_v45  ;;  %v4648_v57 = vor.u32 %v4647_v40, %v4646_v9  ;;  %vm4650_vm10 = vcmp.lt.s32.totalorder %v4630_v15, 2 }
 0x390   : > { %vm4651_vm11 = vcmp.lt.s32.totalorder %v4630_v15, 3  ;;  %v4468_v29 = vsel %vm4466_vm9, %v4467_v5, %v18580_v53  ;;  %vm4652_vm12 = vcmp.lt.s32.totalorder %v4630_v15, 4  ;;  %v4653_v58 = vsel %vm4649_vm8, %v4633_v56, %v4636_v21 }
 0x391   : > { %v4657_v35 = vsel %vm4649_vm8, %v4636_v21, %v4639_v50  ;;  %v4469_v59 = vadd.s32 %v4468_v29, %v4464_v24  ;;  %v4654_v11 = vsel %vm4652_vm12, %v4642_v37, 2102212464  ;;  %v4658_v46 = vsel %vm4652_vm12, %v4645_v33, 920167782 }
 0x392   : > { %v4661_v62 = vsel %vm4649_vm8, %v4639_v50, %v4642_v37  ;;  %v4655_v18 = vsel %vm4651_vm11, %v4639_v50, %v4654_v11  ;;  %v4659_v25 = vsel %vm4651_vm11, %v4642_v37, %v4658_v46  ;;  %v4662_v54 = vsel %vm4652_vm12, %v4648_v57, 1326507024 }
 0x393   : > { %vm4524_vm13 = vcmp.gt.s32.totalorder %v4523_v8, 0  ;;  %v4470_v36 = vadd.s32 536870912, %v4469_v59  ;;  %v4660_v22 = vsel %vm4650_vm10, %v4657_v35, %v4659_v25  ;;  %v4663_v42 = vsel %vm4651_vm11, %v4645_v33, %v4662_v54 }
 0x394   : > { %v4656_v16 = vsel %vm4650_vm10, %v4653_v58, %v4655_v18  ;;  %v4664_v6 = vsel %vm4650_vm10, %v4661_v62, %v4663_v42  ;;  %v18604_v3 = vmul.u32.u64.low %v18546_v39, %v4660_v22  ;;  %v18605_v17 = vmul.u32.u64.high %v18546_v39, %v4660_v22, %v18604_v3 }
 0x395   : > { %v18608_v7 = vshrl.u32 %v4470_v36, 30  ;;  %v18611_v52 = vmul.u32.u64.low %v18546_v39, %v4664_v6  ;;  %v18612_v60 = vmul.u32.u64.high %v18546_v39, %v4664_v6, %v18611_v52  ;;  %v4525_v0 = vsel %vm4524_vm13, %v4523_v8, 0 }
 0x396   : > { %v4527_v63 = vand.u32 31, %v4525_v0  ;;  %v4672_v31 = vmul.u32 %v18546_v39, %v4656_v16  ;;  %v4675_v15 = vadd.s32 1, %v18605_v17  ;;  %v18626_v32 = vshrl.u32 %v4525_v0, 5 }
 0x397   : > { %v4472_v20 = vshll.u32 %v18608_v7, 30  ;;  %vm4674_vm14 = vc.u32 %v18612_v60, %v18604_v3  ;;  %v22844_v34 = vand.u32 2147483647, %v18533_v47  ;;  %v4724_v19 = vand.u32 2139095040, %v18535_v30 }
 0x398   : > { %v4528_v41 = vsub.s32 32, %v4527_v63  ;;  %v4676_v38 = vsel %vm4674_vm14, %v4675_v15, %v18605_v17  ;;  %v4539_v12 = vshll.u32 %v22857_v43, %v4527_v63  ;;  %v4542_v28 = vshll.u32 %v22860_v13, %v4527_v63 }
 0x399   : > { %v18617_v44 = vsub.s32 %v4469_v59, %v4472_v20  ;;  %v4677_v56 = vadd.s32 %v4676_v38, %v4672_v31  ;;  %v4530_v21 = vshll.u32 %v22849_v51, %v4527_v63  ;;  %v4533_v40 = vshll.u32 %v22851_v49, %v4527_v63 }
 0x39a   : > { %v4540_v53 = vshrl.u32 %v22860_v13, %v4528_v41  ;;  %v4543_v1 = vshrl.u32 %v22845_v61, %v4528_v41  ;;  %v4531_v50 = vshrl.u32 %v22851_v49, %v4528_v41  ;;  %v4534_v8 = vshrl.u32 %v22854_v4, %v4528_v41 }
 0x39b   : > { %v4475_v24 = vsub.s32 0, %v18617_v44  ;;  %v4678_v39 = vadd.s32 536870912, %v4677_v56  ;;  %v4536_v33 = vshll.u32 %v22854_v4, %v4527_v63  ;;  %vm4548_vm15 = vcmp.lt.s32.totalorder %v18626_v32, 4 }
 0x39c   : > { %v4541_v9 = vor.u32 %v4540_v53, %v4539_v12  ;;  %v4544_v57 = vor.u32 %v4543_v1, %v4542_v28  ;;  %v4520_v29 = vand.u32 8388607, %v22844_v34  ;;  %v4537_v58 = vshrl.u32 %v22857_v43, %v4528_v41 }
 0x39d   : > { %v12867_v14 = vmin.u32 %v4475_v24, %v18617_v44  ;;  %v18631_v45 = vshrl.u32 %v4678_v39, 30  ;;  %v4532_v59 = vor.u32 %v4531_v50, %v4530_v21  ;;  %v4535_v11 = vor.u32 %v4534_v8, %v4533_v40 }
 0x39e   : > { %v4538_v46 = vor.u32 %v4537_v58, %v4536_v33  ;;  %v4554_v25 = vsel %vm4548_vm15, %v4541_v9, 920167782  ;;  %vm4545_vm0 = vcmp.lt.s32.totalorder %v18626_v32, 1  ;;  %v4558_v54 = vsel %vm4548_vm15, %v4544_v57, 1326507024 }
 0x39f   : > { %v4477_v5 = vclz %v12867_v14  ;;  %v4680_v37 = vshll.u32 %v18631_v45, 30  ;;  %v4725_v36 = vshrl.u32 %v4724_v19, 23  ;;  %v4521_v22 = vor.u32 8388608, %v4520_v29 }
 0x3a0   : > { %vm4547_vm1 = vcmp.lt.s32.totalorder %v18626_v32, 3  ;;  %vm4546_vm2 = vcmp.lt.s32.totalorder %v18626_v32, 2  ;;  %v4553_v16 = vsel %vm4545_vm0, %v4532_v59, %v4535_v11  ;;  %v4557_v17 = vsel %vm4545_vm0, %v4535_v11, %v4538_v46 }
 0x3a1   : > { %v18644_v35 = vsub.s32 %v4677_v56, %v4680_v37  ;;  %v12868_v62 = vadd.s32 4294967294, %v4477_v5  ;;  %v4555_v6 = vsel %vm4547_vm1, %v4538_v46, %v4554_v25  ;;  %v4559_v52 = vsel %vm4547_vm1, %v4541_v9, %v4558_v54 }
 0x3a2   : > { %v12878_v63 = vadd.s32 4294967169, %v4725_v36  ;;  %v4561_v20 = vshll.u32 %v4521_v22, 8  ;;  %v4556_v31 = vsel %vm4546_vm2, %v4553_v16, %v4555_v6  ;;  %v4560_v38 = vsel %vm4546_vm2, %v4557_v17, %v4559_v52 }
 0x3a3   : > { %v4683_v18 = vsub.s32 0, %v18644_v35  ;;  %vm12869_vm3 = vcmp.lt.s32.totalorder %v12868_v62, 0  ;;  %v4529_v39 = vshrl.u32 %v22849_v51, %v4528_v41  ;;  %v4550_v19 = vsel %vm4548_vm15, %v4538_v46, 2102212464 }
 0x3a4   : > { %v4480_v15 = vsel %vm12869_vm3, 0, %v12868_v62  ;;  %v4731_v56 = vadd.s32 1, %v12878_v63  ;;  %v18667_v12 = vmul.u32.u64.low %v4561_v20, %v4556_v31  ;;  %v18668_v53 = vmul.u32.u64.high %v4561_v20, %v4556_v31, %v18667_v12 }
 0x3a5   : > { %v12875_v42 = vmin.u32 %v4683_v18, %v18644_v35  ;;  %v4485_v14 = vsub.s32 4294967266, %v4480_v15  ;;  %v18672_v28 = vmul.u32.u64.low %v4561_v20, %v4560_v38  ;;  %v18673_v1 = vmul.u32.u64.high %v4561_v20, %v4560_v38, %v18672_v28 }
 0x3a6   : > { %v4465_v9 = vadd.s32 %v18579_v10, %v18576_v55  ;;  %vm4732_vm5 = vcmp.gt.s32.totalorder %v4731_v56, 0  ;;  %v4481_v21 = vsub.s32 32, %v4480_v15  ;;  %v4549_v40 = vsel %vm4545_vm0, %v4529_v39, %v4532_v59 }
 0x3a7   : > { %v4685_v0 = vclz %v12875_v42  ;;  %v4486_v50 = vadd.s32 127, %v4485_v14  ;;  %v4551_v5 = vsel %vm4547_vm1, %v4535_v11, %v4550_v19  ;;  %v18690_v55 = vsel %vm4732_vm5, %v4731_v56, 0 }
 0x3a8   : > { %v4552_v58 = vsel %vm4546_vm2, %v4549_v40, %v4551_v5  ;;  %v4571_v59 = vadd.s32 1, %v18668_v53  ;;  %v4482_v11 = vshll.u32 %v18617_v44, %v4480_v15  ;;  %v4483_v46 = vshrl.u32 %v4465_v9, %v4481_v21 }
 0x3a9   : > { %v12876_v24 = vadd.s32 4294967294, %v4685_v0  ;;  %v4487_v62 = vshll.u32 %v4486_v50, 23  ;;  %vm4570_vm6 = vc.u32 %v18673_v1, %v18667_v12  ;;  %v4673_v18 = vadd.s32 %v18604_v3, %v18612_v60 }
 0x3aa   : > { %v4568_v16 = vmul.u32 %v4561_v20, %v4552_v58  ;;  %v18708_v44 = vand.u32 31, %v18690_v55  ;;  %v4572_v17 = vsel %vm4570_vm6, %v4571_v59, %v18668_v53  ;;  %v18711_v52 = vor.u32 %v4483_v46, %v4482_v11 }
 0x3ab   : > { %vm12877_vm4 = vcmp.lt.s32.totalorder %v12876_v24, 0  ;;  %v18713_v3 = vor.u32 4788187, %v4487_v62  ;;  %v18725_v53 = vmul.f32 -1.442695, %v18533_v47  ;;  %vm4411_vm2 = vcmp.lt.s32.totalorder %v18527_v2, 0 }
 0x3ac   : > { %v4688_v37 = vsel %vm12877_vm4, 0, %v12876_v24  ;;  %v18722_v56 = vadd.s32 %v4572_v17, %v4568_v16  ;;  %v18728_v14 = vsub.s32 32, %v18708_v44  ;;  %v4491_v39 = vcvt.s32.f32 %v18711_v52 }
 0x3ad   : > { %v4689_v25 = vsub.s32 32, %v4688_v37  ;;  %v4693_v54 = vsub.s32 4294967266, %v4688_v37  ;;  %v4690_v0 = vshll.u32 %v18644_v35, %v4688_v37  ;;  %v4489_v35 = vand.u32 2147483647, %v18713_v3 }
 0x3ae   : > { %vm18819_vm3 = vcmp.le.f32.partialorder %v4409_v26, 0.7853982  ;;  %14347 = vpow2.f32 %v18725_v53  ;;  %v4750_v26 = vshll.u32 %v22860_v13, %v18708_v44  ;;  %v4751_v3 = vshrl.u32 %v22845_v61, %v18728_v14 }
 0x3af   : > { %v4691_v63 = vshrl.u32 %v4673_v18, %v4689_v25  ;;  %v18716_v31 = vadd.s32 127, %v4693_v54  ;;  %vm4619_vm5 = vcmp.lt.s32.totalorder %v18531_v27, 0 }
 0x3b1   : > { %v18732_v9 = vor.u32 %v4691_v63, %v4690_v0  ;;  %v4695_v21 = vshll.u32 %v18716_v31, 23  ;;  %v12994_v31 = vmul.f32 -1.442695, %v18527_v2 }
 0x3b3   : > { %14349 = vpow2.f32 %v12994_v31  ;;  %v4739_v31 = vshrl.u32 %v22851_v49, %v18728_v14 }
 0x3b8   : > { %v18683_v41 = vpop.f32.mrb[162].mxu0 }
 0x3b9   : > { %23392 = vst [vmem:[#allocation60_spill] sm:$0xff] %v18683_v41  ;;  %v22843_v8 = vand.u32 2147483647, %v18683_v41  ;;  %v18686_v33 = vpop.f32.mrb[162].mxu1  ;;  %v18688_v57 = vpop.f32.mrb[163].mxu0  ;;  %v4828_v10 = vand.u32 2139095040, %v18683_v41 }
 0x3ba   : > { %23393 = vst [vmem:[#allocation33_spill] sm:$0xff] %v18686_v33  ;;  %23394 = vst [vmem:[#allocation64_spill] sm:$0xff] %v18688_v57  ;;  %v18693_v29 = vpop.f32.mrb[163].mxu1  ;;  %v22842_v32 = vand.u32 2147483647, %v18686_v33  ;;  %v5036_v42 = vand.u32 2139095040, %v18686_v33 }
 0x3bb   : > { %23395 = vst [vmem:[#allocation63_spill] sm:$0xff] %v18693_v29  ;;  %v4829_v36 = vshrl.u32 %v4828_v10, 23  ;;  %v4832_v22 = vand.u32 8388607, %v22843_v8  ;;  %v18739_v10 = vadd.s32 536870912, %v18722_v56 }
 0x3bc   : > { %v5037_v60 = vshrl.u32 %v5036_v42, 23  ;;  %v18720_v20 = vand.u32 8388607, %v22842_v32 }
 0x3bd   : > { %v12882_v6 = vadd.s32 4294967169, %v4829_v36  ;;  %v4833_v38 = vor.u32 8388608, %v4832_v22 }
 0x3be   : > { %v12890_v24 = vadd.s32 4294967169, %v5037_v60  ;;  %v5041_v37 = vor.u32 8388608, %v18720_v20 }
 0x3bf   : > { %v4835_v15 = vadd.s32 1, %v12882_v6  ;;  %v18735_v5 = vshll.u32 %v4833_v38, 8 }
 0x3c0   : > { %v5043_v19 = vadd.s32 1, %v12890_v24 }
 0x3c1   : > { %vm4836_vm7 = vcmp.gt.s32.totalorder %v4835_v15, 0 }
 0x3c2   : > { %v4837_v28 = vsel %vm4836_vm7, %v4835_v15, 0  ;;  %vm5044_vm8 = vcmp.gt.s32.totalorder %v5043_v19, 0  ;;  %vm18861_vm7 = vcmp.le.f32.partialorder %v4617_v48, 0.7853982 }
 0x3c3   : > { %v4838_v50 = vshrl.u32 %v4837_v28, 5  ;;  %v4839_v40 = vand.u32 31, %v4837_v28  ;;  %v5045_v0 = vsel %vm5044_vm8, %v5043_v19, 0  ;;  %vm4515_vm8 = vcmp.lt.s32.totalorder %v18533_v47, 0 }
 0x3c4   : > { %v5046_v38 = vshrl.u32 %v5045_v0, 5  ;;  %v5047_v24 = vand.u32 31, %v5045_v0 }
 0x3c5   : > { %v4840_v58 = vsub.s32 32, %v4839_v40  ;;  %v4842_v59 = vshll.u32 %v22849_v51, %v4839_v40  ;;  %v4845_v11 = vshll.u32 %v22851_v49, %v4839_v40  ;;  %v4848_v46 = vshll.u32 %v22854_v4, %v4839_v40 }
 0x3c6   : > { %v4851_v62 = vshll.u32 %v22857_v43, %v4839_v40  ;;  %v4854_v18 = vshll.u32 %v22860_v13, %v4839_v40  ;;  %vm4857_vm9 = vcmp.lt.s32.totalorder %v4838_v50, 1  ;;  %vm4858_vm10 = vcmp.lt.s32.totalorder %v4838_v50, 2 }
 0x3c7   : > { %v4841_v25 = vshrl.u32 %v22849_v51, %v4840_v58  ;;  %v4843_v54 = vshrl.u32 %v22851_v49, %v4840_v58  ;;  %v4846_v36 = vshrl.u32 %v22854_v4, %v4840_v58  ;;  %v4849_v22 = vshrl.u32 %v22857_v43, %v4840_v58 }
 0x3c8   : > { %v4852_v42 = vshrl.u32 %v22860_v13, %v4840_v58  ;;  %v4855_v16 = vshrl.u32 %v22845_v61, %v4840_v58  ;;  %vm4859_vm11 = vcmp.lt.s32.totalorder %v4838_v50, 3  ;;  %vm4860_vm12 = vcmp.lt.s32.totalorder %v4838_v50, 4 }
 0x3c9   : > { %v4844_v6 = vor.u32 %v4843_v54, %v4842_v59  ;;  %v4847_v17 = vor.u32 %v4846_v36, %v4845_v11  ;;  %v4850_v60 = vor.u32 %v4849_v22, %v4848_v46  ;;  %v5048_v59 = vsub.s32 32, %v5047_v24 }
 0x3ca   : > { %v4853_v63 = vor.u32 %v4852_v42, %v4851_v62  ;;  %v4856_v15 = vor.u32 %v4855_v16, %v4854_v18  ;;  %v5050_v62 = vshll.u32 %v22849_v51, %v5047_v24  ;;  %vm5065_vm13 = vcmp.lt.s32.totalorder %v5046_v38, 1 }
 0x3cb   : > { %v4861_v20 = vsel %vm4857_vm9, %v4841_v25, %v4844_v6  ;;  %v4862_v28 = vsel %vm4860_vm12, %v4850_v60, 2102212464  ;;  %v4865_v40 = vsel %vm4857_vm9, %v4844_v6, %v4847_v17  ;;  %v4869_v32 = vsel %vm4857_vm9, %v4847_v17, %v4850_v60 }
 0x3cc   : > { %v4863_v58 = vsel %vm4859_vm11, %v4847_v17, %v4862_v28  ;;  %v4866_v8 = vsel %vm4860_vm12, %v4853_v63, 920167782  ;;  %v4870_v34 = vsel %vm4860_vm12, %v4856_v15, 1326507024  ;;  %v5049_v36 = vshrl.u32 %v22849_v51, %v5048_v59 }
 0x3cd   : > { %v4864_v11 = vsel %vm4858_vm10, %v4861_v20, %v4863_v58  ;;  %v4867_v19 = vsel %vm4859_vm11, %v4850_v60, %v4866_v8  ;;  %v4871_v46 = vsel %vm4859_vm11, %v4853_v63, %v4870_v34  ;;  %v5051_v34 = vshrl.u32 %v22851_v49, %v5048_v59 }
 0x3ce   : > { %v4868_v18 = vsel %vm4858_vm10, %v4865_v40, %v4867_v19  ;;  %v4872_v25 = vsel %vm4858_vm10, %v4869_v32, %v4871_v46  ;;  %v4880_v54 = vmul.u32 %v18735_v5, %v4864_v11  ;;  %v5053_v8 = vshll.u32 %v22851_v49, %v5047_v24 }
 0x3cf   : > { %v18766_v22 = vmul.u32.u64.low %v18735_v5, %v4872_v25  ;;  %v18767_v42 = vmul.u32.u64.high %v18735_v5, %v4872_v25, %v18766_v22  ;;  %v18770_v16 = vmul.u32.u64.low %v18735_v5, %v4868_v18  ;;  %v18771_v6 = vmul.u32.u64.high %v18735_v5, %v4868_v18, %v18770_v16 }
 0x3d0   : > { %v5054_v50 = vshrl.u32 %v22854_v4, %v5048_v59  ;;  %v5056_v32 = vshll.u32 %v22854_v4, %v5047_v24  ;;  %v5057_v17 = vshrl.u32 %v22857_v43, %v5048_v59  ;;  %v5059_v60 = vshll.u32 %v22857_v43, %v5047_v24 }
 0x3d1   : > { %v5060_v0 = vshrl.u32 %v22860_v13, %v5048_v59  ;;  %v5062_v63 = vshll.u32 %v22860_v13, %v5047_v24  ;;  %v5052_v15 = vor.u32 %v5051_v34, %v5050_v62  ;;  %v5063_v20 = vshrl.u32 %v22845_v61, %v5048_v59 }
 0x3d2   : > { %v5055_v5 = vor.u32 %v5054_v50, %v5053_v8  ;;  %vm4882_vm14 = vc.u32 %v18767_v42, %v18770_v16  ;;  %v4883_v28 = vadd.s32 1, %v18771_v6  ;;  %v5058_v40 = vor.u32 %v5057_v17, %v5056_v32 }
 0x3d3   : > { %v5081_v58 = vshll.u32 %v5041_v37, 8  ;;  %v5061_v11 = vor.u32 %v5060_v0, %v5059_v60  ;;  %v5064_v19 = vor.u32 %v5063_v20, %v5062_v63  ;;  %vm5066_vm15 = vcmp.lt.s32.totalorder %v5046_v38, 2 }
 0x3d4   : > { %vm5067_vm0 = vcmp.lt.s32.totalorder %v5046_v38, 3  ;;  %v4884_v46 = vsel %vm4882_vm14, %v4883_v28, %v18771_v6  ;;  %vm5068_vm1 = vcmp.lt.s32.totalorder %v5046_v38, 4  ;;  %v5069_v24 = vsel %vm5065_vm13, %v5049_v36, %v5052_v15 }
 0x3d5   : > { %v5073_v62 = vsel %vm5065_vm13, %v5052_v15, %v5055_v5  ;;  %v4885_v59 = vadd.s32 %v4884_v46, %v4880_v54  ;;  %v5070_v18 = vsel %vm5068_vm1, %v5058_v40, 2102212464  ;;  %v5074_v25 = vsel %vm5068_vm1, %v5061_v11, 920167782 }
 0x3d6   : > { %v5077_v22 = vsel %vm5065_vm13, %v5055_v5, %v5058_v40  ;;  %v4696_v34 = vor.u32 4788187, %v4695_v21  ;;  %v5071_v37 = vsel %vm5067_vm0, %v5055_v5, %v5070_v18  ;;  %v5075_v8 = vsel %vm5067_vm0, %v5058_v40, %v5074_v25 }
 0x3d7   : > { %v5078_v50 = vsel %vm5068_vm1, %v5064_v19, 1326507024  ;;  %v4886_v32 = vadd.s32 536870912, %v4885_v59  ;;  %v5076_v17 = vsel %vm5066_vm15, %v5073_v62, %v5075_v8  ;;  %v18794_v60 = vshrl.u32 %v18739_v10, 30 }
 0x3d8   : > { %v5079_v6 = vsel %vm5067_vm0, %v5061_v11, %v5078_v50  ;;  %v5072_v54 = vsel %vm5066_vm15, %v5069_v24, %v5071_v37  ;;  %v18799_v0 = vmul.u32.u64.low %v5081_v58, %v5076_v17  ;;  %v18800_v63 = vmul.u32.u64.high %v5081_v58, %v5076_v17, %v18799_v0 }
 0x3d9   : > { %v5080_v36 = vsel %vm5066_vm15, %v5077_v22, %v5079_v6  ;;  %v18804_v21 = vshrl.u32 %v4886_v32, 30  ;;  %v18810_v10 = vshrl.u32 %v18690_v55, 5  ;;  %v4747_v20 = vshll.u32 %v22857_v43, %v18708_v44 }
 0x3da   : > { %v18806_v15 = vmul.u32.u64.low %v5081_v58, %v5080_v36  ;;  %v18807_v5 = vmul.u32.u64.high %v5081_v58, %v5080_v36, %v18806_v15  ;;  %v4748_v38 = vshrl.u32 %v22860_v13, %v18728_v14  ;;  %v4721_v28 = vand.u32 2147483647, %v18535_v30 }
 0x3db   : > { %23396 = vst [vmem:[#allocation65_spill] sm:$0xff] %v18804_v21  ;;  %v4492_v55 = vmul.f32 %v4491_v39, %v4489_v35  ;;  %v4888_v11 = vshll.u32 %v18804_v21, 30  ;;  %v5088_v19 = vmul.u32 %v5081_v58, %v5072_v54  ;;  %v4576_v46 = vshll.u32 %v18794_v60, 30 }
 0x3dc   : > { %v4697_v24 = vand.u32 2147483647, %v4696_v34  ;;  %v4699_v62 = vcvt.s32.f32 %v18732_v9  ;;  %v5091_v18 = vadd.s32 1, %v18800_v63  ;;  %vm5090_vm4 = vc.u32 %v18807_v5, %v18799_v0 }
 0x3dd   : > { %v18836_v52 = vsub.s32 %v4885_v59, %v4888_v11  ;;  %v12996_v35 = vmul.f32 -1.442695, %v18531_v27  ;;  %v4493_v9 = vxor.u32 2147483648, %v4492_v55  ;;  %v4932_v58 = vand.u32 2139095040, %v18688_v57 }
 0x3de   : > { %v5092_v39 = vsel %vm5090_vm4, %v5091_v18, %v18800_v63  ;;  %v18847_v25 = vsub.s32 %v18722_v56, %v4576_v46  ;;  %v4700_v59 = vmul.f32 %v4699_v62, %v4697_v24  ;;  %v18849_v22 = vor.u32 %v4748_v38, %v4747_v20  ;;  %v14348_v24 = vpop.eup %14347 }
 0x3df   : > { %v18843_v53 = vadd.s32 %v5092_v39, %v5088_v19  ;;  %v4891_v34 = vsub.s32 0, %v18836_v52  ;;  %v18854_v37 = vand.u32 8388607, %v4721_v28  ;;  %v4752_v8 = vor.u32 %v4751_v3, %v4750_v26 }
 0x3e0   : > { %vm4756_vm6 = vcmp.lt.s32.totalorder %v18810_v10, 4  ;;  %v5140_v50 = vand.u32 2139095040, %v18693_v29  ;;  %v4579_v32 = vsub.s32 0, %v18847_v25  ;;  %14351 = vpow2.f32 %v12996_v35 }
 0x3e1   : > { %v18866_v17 = vmul.f32 -1.442695, %v18535_v30  ;;  %v4738_v6 = vshll.u32 %v22849_v51, %v18708_v44  ;;  %v4494_v54 = vsel %vm4411_vm2, %v4493_v9, %v4492_v55  ;;  %v5094_v36 = vadd.s32 536870912, %v18843_v53 }
 0x3e2   : > { %v4933_v63 = vshrl.u32 %v4932_v58, 23  ;;  %v4701_v48 = vxor.u32 2147483648, %v4700_v59  ;;  %v18878_v15 = vsel %vm4756_vm6, %v18849_v22, 920167782  ;;  %v12883_v20 = vmin.u32 %v4891_v34, %v18836_v52  ;;  %v18900_v34 = vpop.eup %14349 }
 0x3e3   : > { %v12871_v38 = vmin.u32 %v4579_v32, %v18847_v25  ;;  %v18884_v11 = vsel %vm4756_vm6, %v4752_v8, 1326507024  ;;  %v5141_v55 = vshrl.u32 %v5140_v50, 23  ;;  %v4729_v19 = vor.u32 8388608, %v18854_v37 }
 0x3e4   : > { %v4737_v46 = vshrl.u32 %v22849_v51, %v18728_v14  ;;  %v4497_v62 = vsel %vm18819_vm3, %v18527_v2, %v4494_v54  ;;  %v4741_v26 = vshll.u32 %v22851_v49, %v18708_v44  ;;  %v4742_v3 = vshrl.u32 %v22854_v4, %v18728_v14 }
 0x3e5   : > { %v4581_v18 = vclz %v12871_v38  ;;  %v18896_v35 = vshrl.u32 %v5094_v36, 30  ;;  %v12886_v39 = vadd.s32 4294967169, %v4933_v63  ;;  %v4569_v9 = vadd.s32 %v18667_v12, %v18673_v1 }
 0x3e6   : > { %v4740_v58 = vor.u32 %v4739_v31, %v4738_v6  ;;  %v4702_v8 = vsel %vm4619_vm5, %v4701_v48, %v4700_v59  ;;  %v4893_v50 = vclz %v12883_v20  ;;  %v4744_v54 = vshll.u32 %v22854_v4, %v18708_v44 }
 0x3e7   : > { %23401 = vst [vmem:[#allocation62_spill] sm:$0xff] %v18896_v35  ;;  %v12872_v32 = vadd.s32 4294967294, %v4581_v18  ;;  %14353 = vcosq.f32 %v4497_v62  ;;  %v12894_v36 = vadd.s32 4294967169, %v5141_v55  ;;  %v7786_v38 = vadd.f32 1.0, %v14348_v24 }
 0x3e8   : > { %v4745_v63 = vshrl.u32 %v22857_v43, %v18728_v14  ;;  %14355 = vsinq.f32 %v4497_v62  ;;  %v4743_v12 = vor.u32 %v4742_v3, %v4741_v26  ;;  %vm4753_vm10 = vcmp.lt.s32.totalorder %v18810_v10, 1 }
 0x3e9   : > { %vm12873_vm9 = vcmp.lt.s32.totalorder %v12872_v32, 0  ;;  %v4705_v1 = vsel %vm18861_vm7, %v18531_v27, %v4702_v8  ;;  %v5096_v59 = vshll.u32 %v18896_v35, 30  ;;  %v4939_v6 = vadd.s32 1, %v12886_v39 }
 0x3ea   : > { %v4584_v31 = vsel %vm12873_vm9, 0, %v12872_v32  ;;  %v18914_v44 = vpop.eup %14351  ;;  %v12884_v48 = vadd.s32 4294967294, %v4893_v50  ;;  %v23402_v20 = vand.u32 2147483647, %v18533_v47  ;;  %v5147_v18 = vadd.s32 1, %v12894_v36 }
 0x3eb   : > { %v4585_v55 = vsub.s32 32, %v4584_v31  ;;  %v4586_v24 = vshll.u32 %v18847_v25, %v4584_v31  ;;  %v4589_v62 = vsub.s32 4294967266, %v4584_v31  ;;  %v4599_v26 = vsub.s32 4, %v18794_v60 }
 0x3ec   : > { %vm18918_vm11 = vcmp.le.f32.partialorder %v23402_v20, 0.7853982  ;;  %14357 = vrcp.f32 %v7786_v38  ;;  %v4746_v3 = vor.u32 %v4745_v63, %v4744_v54  ;;  %v18925_v39 = vmul.f32 -1.442695, %v18683_v41 }
 0x3ed   : > { %v4587_v8 = vshrl.u32 %v4569_v9, %v4585_v55  ;;  %v4590_v50 = vadd.s32 127, %v4589_v62  ;;  %v4757_v32 = vsel %vm4753_vm10, %v4737_v46, %v4740_v58  ;;  %14359 = vcosq.f32 %v4705_v1 }
 0x3ee   : > { %v18930_v20 = vsub.s32 %v18843_v53, %v5096_v59  ;;  %vm4940_vm12 = vcmp.gt.s32.totalorder %v4939_v6, 0  ;;  %vm4755_vm13 = vcmp.lt.s32.totalorder %v18810_v10, 3  ;;  %vm12885_vm14 = vcmp.lt.s32.totalorder %v12884_v48, 0 }
 0x3ef   : > { %v4588_v25 = vor.u32 %v4587_v8, %v4586_v24  ;;  %v4591_v36 = vshll.u32 %v4590_v50, 23  ;;  %vm4754_vm15 = vcmp.lt.s32.totalorder %v18810_v10, 2  ;;  %vm5148_vm0 = vcmp.gt.s32.totalorder %v5147_v18, 0 }
 0x3f0   : > { %v4600_v9 = vsel %vm4515_vm8, %v4599_v26, %v18794_v60  ;;  %v4758_v46 = vsel %vm4756_vm6, %v4746_v3, 2102212464  ;;  %v4761_v53 = vsel %vm4753_vm10, %v4740_v58, %v4743_v12  ;;  %v4763_v63 = vsel %vm4755_vm13, %v4746_v3, %v18878_v15 }
 0x3f1   : > { %v4592_v54 = vor.u32 4788187, %v4591_v36  ;;  %v4595_v38 = vcvt.s32.f32 %v4588_v25  ;;  %v4765_v59 = vsel %vm4753_vm10, %v4743_v12, %v4746_v3  ;;  %v18946_v31 = vpop.eup %14353  ;;  %14361 = vsinq.f32 %v4705_v1 }
 0x3f2   : > { %v18948_v55 = vsel %vm12885_vm14, 0, %v12884_v48  ;;  %v5099_v60 = vsub.s32 0, %v18930_v20  ;;  %v18952_v24 = vsel %vm4940_vm12, %v4939_v6, 0  ;;  %v18954_v58 = vpop.eup %14355  ;;  %v18956_v62 = vsel %vm5148_vm0, %v5147_v18, 0 }
 0x3f3   : > { %v4593_v26 = vand.u32 2147483647, %v4592_v54  ;;  %v4767_v15 = vsel %vm4755_vm13, %v18849_v22, %v18884_v11  ;;  %v4769_v1 = vshll.u32 %v4729_v19, 8  ;;  %v4602_v48 = vsel %vm18918_vm11, 0, %v4600_v9 }
 0x3f4   : > { %v4759_v6 = vsel %vm4755_vm13, %v4743_v12, %v4758_v46  ;;  %v4764_v3 = vsel %vm4754_vm15, %v4761_v53, %v4763_v63  ;;  %v4768_v18 = vsel %vm4754_vm15, %v4765_v59, %v4767_v15  ;;  %v4901_v8 = vsub.s32 4294967266, %v18948_v55 }
 0x3f5   : > { %v4596_v50 = vmul.f32 %v4595_v38, %v4593_v26  ;;  %v18973_v25 = vmul.u32.u64.low %v4769_v1, %v4768_v18  ;;  %v18974_v22 = vmul.u32.u64.high %v4769_v1, %v4768_v18, %v18973_v25  ;;  %v4881_v19 = vadd.s32 %v18770_v16, %v18767_v42 }
 0x3f6   : > { %v14358_v11 = vpop.eup %14357  ;;  %v18982_v12 = vadd.s32 %v18799_v0, %v18807_v5  ;;  %v12891_v36 = vmin.u32 %v5099_v60, %v18930_v20  ;;  %v18986_v9 = vand.u32 31, %v18952_v24  ;;  %v4760_v38 = vsel %vm4754_vm15, %v4757_v32, %v4759_v6 }
 0x3f7   : > { %v4597_v54 = vxor.u32 2147483648, %v4596_v50  ;;  %v18994_v63 = vmul.u32.u64.low %v4769_v1, %v4764_v3  ;;  %v18995_v59 = vmul.u32.u64.high %v4769_v1, %v4764_v3, %v18994_v63  ;;  %v19000_v16 = vpop.eup %14359  ;;  %v19003_v0 = vand.u32 31, %v18956_v62 }
 0x3f8   : > { %v4606_v5 = vadd.s32 3, %v4602_v48  ;;  %v19005_v60 = vand.u32 3, %v4602_v48  ;;  %v4495_v26 = vsub.s32 4, %v18608_v7  ;;  %v4897_v15 = vsub.s32 32, %v18948_v55 }
 0x3f9   : > { %v4902_v10 = vadd.s32 127, %v4901_v8  ;;  %v4598_v32 = vsel %vm4515_vm8, %v4597_v54, %v4596_v50  ;;  %v19012_v6 = vmul.f32 %v14358_v11, %v18533_v47  ;;  %v4776_v18 = vmul.u32 %v4769_v1, %v4760_v38 }
 0x3fa   : > { %v18976_v37 = vpop.f32.mrb[164].mxu0  ;;  %v4601_v3 = vsel %vm18918_vm11, %v18533_v47, %v4598_v32  ;;  %vm4778_vm1 = vc.u32 %v18974_v22, %v18994_v63  ;;  %v4496_v48 = vsel %vm4411_vm2, %v4495_v26, %v18608_v7  ;;  %v5101_v25 = vclz %v12891_v36 }
 0x3fb   : > { %23405 = vst [vmem:[#allocation67_spill] sm:$0xff] %v18976_v37  ;;  %v18988_v46 = vpop.f32.mrb[164].mxu1  ;;  %v18990_v53 = vpop.f32.mrb[165].mxu0  ;;  %14363 = vcosq.f32 %v4601_v3  ;;  %v4779_v8 = vadd.s32 1, %v18995_v59  ;;  %v4498_v50 = vsel %vm18819_vm3, 0, %v4496_v48  ;;  %v4898_v14 = vshll.u32 %v18836_v52, %v18948_v55 }
 0x3fc   : > { %23406 = vst [vmem:[#allocation66_spill] sm:$0xff] %v18988_v46  ;;  %23407 = vst [vmem:[#allocation56_spill] sm:$0xff] %v18990_v53  ;;  %v18998_v42 = vpop.f32.mrb[165].mxu1  ;;  %v19025_v11 = vpop.eup %14361  ;;  %14365 = vsinq.f32 %v4601_v3  ;;  %v19029_v1 = vand.u32 3, %v4606_v5  ;;  %v4502_v54 = vadd.s32 3, %v4498_v50  ;;  %v4899_v38 = vshrl.u32 %v4881_v19, %v4897_v15 }
 0x3fd   : > { %23408 = vst [vmem:[#allocation25_spill] sm:$0xff] %v18998_v42  ;;  %v4780_v32 = vsel %vm4778_vm1, %v4779_v8, %v18995_v59  ;;  %v6166_v7 = vand.u32 3, %v4498_v50  ;;  %v7785_v36 = vadd.f32 1.0, %v18900_v34  ;;  %v4903_v26 = vshll.u32 %v4902_v10, 23 }
 0x3fe   : > { %v4781_v61 = vadd.s32 %v4780_v32, %v4776_v18  ;;  %14367 = vpow2.f32 %v18866_v17  ;;  %v4503_v40 = vand.u32 3, %v4502_v54  ;;  %v12892_v48 = vadd.s32 4294967294, %v5101_v25 }
 0x3ff   : > { %vm6270_vm2 = vcmp.lt.s32.totalorder %v19005_v60, 2  ;;  %v4506_v52 = vxor.u32 2147483648, %v18954_v58  ;;  %v4509_v55 = vxor.u32 2147483648, %v18946_v31  ;;  %v4703_v5 = vsub.s32 4, %v18631_v45 }
 0x400   : > { %v4782_v19 = vadd.s32 536870912, %v4781_v61  ;;  %vm6168_vm4 = vcmp.eq.s32.totalorder %v6166_v7, 0  ;;  %vm6171_vm6 = vcmp.eq.s32.totalorder %v6166_v7, 2  ;;  %14369 = vrcp.f32 %v7785_v36 }
 0x401   : > { %vm4608_vm8 = vcmp.lt.s32.totalorder %v19029_v1, 2  ;;  %vm4609_vm9 = vcmp.eq.s32.totalorder %v19029_v1, 0  ;;  %vm4612_vm10 = vcmp.eq.s32.totalorder %v19029_v1, 2  ;;  %vm6271_vm11 = vcmp.eq.s32.totalorder %v19005_v60, 0  ;;  %v19179_v1 = vld [vmem:[%s22655_s7] sm:$0xff] }
 0x402   : > { %v19043_v17 = vor.u32 %v4899_v38, %v4898_v14  ;;  %v19045_v34 = vshrl.u32 %v4782_v19, 30  ;;  %vm4505_vm12 = vcmp.eq.s32.totalorder %v4503_v40, 0  ;;  %vm6167_vm13 = vcmp.lt.s32.totalorder %v6166_v7, 2 }
 0x403   : > { %vm4508_vm14 = vcmp.eq.s32.totalorder %v4503_v40, 2  ;;  %v6170_v59 = vsel %vm6168_vm4, %v18946_v31, %v4506_v52  ;;  %v6173_v15 = vsel %vm6171_vm6, %v4509_v55, %v18954_v58  ;;  %v4704_v10 = vsel %vm4619_vm5, %v4703_v5, %v18631_v45 }
 0x404   : > { %v19052_v3 = vor.u32 4788187, %v4903_v26  ;;  %vm12893_vm15 = vcmp.lt.s32.totalorder %v12892_v48, 0  ;;  %vm6274_vm0 = vcmp.eq.s32.totalorder %v19005_v60, 2  ;;  %v4784_v18 = vshll.u32 %v19045_v34, 30 }
 0x405   : > { %v14364_v25 = vpop.eup %14363  ;;  %vm4501_vm1 = vweird.f32 %v18527_v2  ;;  %vm4504_vm3 = vcmp.lt.s32.totalorder %v4503_v40, 2  ;;  %v4507_v8 = vsel %vm4505_vm12, %v18946_v31, %v4506_v52  ;;  %v4706_v50 = vsel %vm18861_vm7, 0, %v4704_v10 }
 0x406   : > { %v14366_v14 = vpop.eup %14365  ;;  %v4613_v54 = vxor.u32 2147483648, %v14364_v25  ;;  %v19060_v38 = vsub.s32 %v4781_v61, %v4784_v18  ;;  %v4510_v45 = vsel %vm4508_vm14, %v4509_v55, %v18954_v58  ;;  %v6174_v32 = vsel %vm6167_vm13, %v6170_v59, %v6173_v15 }
 0x407   : > { %v19066_v26 = vsel %vm12893_vm15, 0, %v12892_v48  ;;  %v4610_v5 = vxor.u32 2147483648, %v14366_v14  ;;  %vm4723_vm5 = vcmp.lt.s32.totalorder %v18535_v30, 0  ;;  %v4710_v31 = vadd.s32 3, %v4706_v50 }
 0x408   : > { %v14368_v52 = vpop.eup %14367  ;;  %v4614_v56 = vsel %vm4612_vm10, %v4613_v54, %v14366_v14  ;;  %v6276_v61 = vsel %vm6274_vm0, %v4613_v54, %v14366_v14  ;;  %v4777_v58 = vadd.s32 %v18994_v63, %v18974_v22  ;;  %v4787_v7 = vsub.s32 0, %v19060_v38 }
 0x409   : > { %v4611_v48 = vsel %vm4609_vm9, %v14364_v25, %v4610_v5  ;;  %v6273_v55 = vsel %vm6271_vm11, %v14364_v25, %v4610_v5  ;;  %v4511_v19 = vsel %vm4504_vm3, %v4507_v8, %v4510_v45  ;;  %v6175_v59 = vsel %vm4501_vm1, nan, %v6174_v32 }
 0x40a   : > { %v14370_v15 = vpop.eup %14369  ;;  %v4615_v10 = vsel %vm4608_vm8, %v4611_v48, %v4614_v56  ;;  %v6277_v22 = vsel %vm6270_vm2, %v6273_v55, %v6276_v61  ;;  %v12879_v63 = vmin.u32 %v4787_v7, %v19060_v38  ;;  %v4711_v18 = vand.u32 3, %v4710_v31 }
 0x40b   : > { %vm23409_vm7 = vweird.f32 %v18533_v47  ;;  %v4807_v25 = vsub.s32 4, %v19045_v34  ;;  %v7788_v8 = vadd.f32 1.0, %v14368_v52  ;;  %vm19096_vm3 = vcmp.le.f32.partialorder %v4721_v28, 0.7853982 }
 0x40c   : > { %v4616_v14 = vsel %vm23409_vm7, nan, %v4615_v10  ;;  %vm23410_vm4 = vmmov %vm23409_vm7  ;;  %v4789_v60 = vclz %v12879_v63  ;;  %v4512_v45 = vsel %vm4501_vm1, nan, %v4511_v19  ;;  %v4714_v32 = vxor.u32 2147483648, %v19025_v11 }
 0x40d   : > { %v6278_v40 = vsel %vm23410_vm4, nan, %v6277_v22  ;;  %v13689_v54 = vpack.c.bf16 %v4616_v14, %v19012_v6  ;;  %v19105_v31 = vmul.f32 2.0, %v6175_v59  ;;  %v7833_v52 = vmul.f32 %v14370_v15, %v18527_v2 }
 0x40e   : > { %v19103_v5 = vmul.f32 2.0, %v6278_v40  ;;  %v4717_v6 = vxor.u32 2147483648, %v19000_v16  ;;  %v12880_v56 = vadd.s32 4294967294, %v4789_v60  ;;  %vm4712_vm2 = vcmp.lt.s32.totalorder %v4711_v18, 2 }
 0x40f   : > { %13690 = vmatprep.subr.bf16.mxu0 %v13689_v54  ;;  %vm4713_vm6 = vcmp.eq.s32.totalorder %v4711_v18, 0  ;;  %vm4716_vm8 = vcmp.eq.s32.totalorder %v4711_v18, 2  ;;  %v13691_v28 = vpack.c.bf16 %v4512_v45, %v7833_v52  ;;  %vm4709_vm9 = vweird.f32 %v18531_v27 }
 0x410   : > { %v4715_v61 = vsel %vm4713_vm6, %v19000_v16, %v4714_v32  ;;  %v4718_v7 = vsel %vm4716_vm8, %v4717_v6, %v19025_v11  ;;  %vm12881_vm10 = vcmp.lt.s32.totalorder %v12880_v56, 0  ;;  %v4808_v48 = vsel %vm4723_vm5, %v4807_v25, %v19045_v34 }
 0x411   : > { %14371 = vrcp.f32 %v7788_v8  ;;  %v6372_v55 = vand.u32 3, %v4706_v50  ;;  %v4792_v19 = vsel %vm12881_vm10, 0, %v12880_v56  ;;  %13692 = vmatpush1.bf16.msra.mxu0 %v13691_v28  ;;  %v4719_v59 = vsel %vm4712_vm2, %v4715_v61, %v4718_v7 }
 0x412   : > { %v7850_v15 = vmul.f32 %v19103_v5, %v4616_v14  ;;  %v7849_v10 = vmul.f32 %v19105_v31, %v4512_v45  ;;  %v4793_v22 = vsub.s32 32, %v4792_v19  ;;  %v4794_v63 = vshll.u32 %v19060_v38, %v4792_v19 }
 0x413   : > { %v4797_v18 = vsub.s32 4294967266, %v4792_v19  ;;  %vm6373_vm11 = vcmp.lt.s32.totalorder %v6372_v55, 2  ;;  %vm6374_vm12 = vcmp.eq.s32.totalorder %v6372_v55, 0  ;;  %vm6377_vm13 = vcmp.eq.s32.totalorder %v6372_v55, 2 }
 0x414   : > { %v7787_v40 = vadd.f32 1.0, %v18914_v44  ;;  %v7866_v34 = vmul.f32 %v7850_v15, %v19103_v5  ;;  %v4795_v25 = vshrl.u32 %v4777_v58, %v4793_v22  ;;  %v6376_v8 = vsel %vm6374_vm12, %v19000_v16, %v4714_v32 }
 0x415   : > { %v4798_v50 = vadd.s32 127, %v4797_v18  ;;  %v6379_v54 = vsel %vm6377_vm13, %v4717_v6, %v19025_v11  ;;  %v4810_v60 = vsel %vm19096_vm3, 0, %v4808_v48  ;;  %v7865_v38 = vmul.f32 %v7849_v10, %v19105_v31 }
 0x416   : > { %v6380_v52 = vsel %vm6373_vm11, %v6376_v8, %v6379_v54  ;;  %v7882_v56 = vsub.f32 %v7866_v34, %v4616_v14  ;;  %v4796_v28 = vor.u32 %v4795_v25, %v4794_v63  ;;  %v19127_v44 = vsel %vm4709_vm9, nan, %v4719_v59 }
 0x417   : > { %v4799_v61 = vshll.u32 %v4798_v50, 23  ;;  %v6381_v58 = vsel %vm4709_vm9, nan, %v6380_v52  ;;  %v7881_v11 = vsub.f32 %v7865_v38, %v4512_v45  ;;  %14373 = vrcp.f32 %v7787_v40 }
 0x418   : > { %v19131_v7 = vmul.f32 2.0, %v6381_v58  ;;  %v13693_v16 = vpack.c.bf16 %v7882_v56, %v7850_v15  ;;  %v7898_v32 = vmul.f32 %v7882_v56, %v19103_v5  ;;  %v4803_v48 = vcvt.s32.f32 %v4796_v28 }
 0x419   : > { %v4800_v6 = vor.u32 4788187, %v4799_v61  ;;  %v22848_v14 = vand.u32 2147483647, %v18976_v37  ;;  %v13695_v55 = vpack.c.bf16 %v7881_v11, %v7849_v10  ;;  %v7897_v22 = vmul.f32 %v7881_v11, %v19105_v31 }
 0x41a   : > { %13694 = vmatprep.subr.bf16.mxu0 %v13693_v16  ;;  %v19137_v19 = vmul.f32 %v19131_v7, %v19127_v44  ;;  %v7914_v59 = vsub.f32 %v7898_v32, %v7850_v15  ;;  %v5105_v45 = vsub.s32 32, %v19066_v26  ;;  %v5244_v25 = vand.u32 2139095040, %v18976_v37 }
 0x41b   : > { %v14372_v63 = vpop.eup %14371  ;;  %v4801_v34 = vand.u32 2147483647, %v4800_v6  ;;  %13696 = vmatpush1.bf16.msra.mxu0 %v13695_v55  ;;  %v7913_v15 = vsub.f32 %v7897_v22, %v7849_v10  ;;  %v4814_v52 = vadd.s32 3, %v4810_v60  ;;  %v5248_v28 = vand.u32 8388607, %v22848_v14 }
 0x41c   : > { %v7867_v50 = vmul.f32 %v19137_v19, %v19131_v7  ;;  %v7930_v8 = vmul.f32 %v7914_v59, %v19103_v5  ;;  %v5245_v38 = vshrl.u32 %v5244_v25, 23  ;;  %v5109_v61 = vsub.s32 4294967266, %v19066_v26 }
 0x41d   : > { %v4804_v54 = vmul.f32 %v4803_v48, %v4801_v34  ;;  %v7929_v32 = vmul.f32 %v7913_v15, %v19105_v31  ;;  %v19156_v6 = vshrl.u32 %v18982_v12, %v5105_v45  ;;  %v19158_v5 = vand.u32 3, %v4810_v60 }
 0x41e   : > { %v19152_v58 = vsub.f32 %v7867_v50, %v19127_v44  ;;  %v7946_v16 = vsub.f32 %v7930_v8, %v7882_v56  ;;  %v12898_v10 = vadd.s32 4294967169, %v5245_v38  ;;  %v22847_v25 = vand.u32 2147483647, %v18988_v46 }
 0x41f   : > { %v4805_v55 = vxor.u32 2147483648, %v4804_v54  ;;  %v7945_v22 = vsub.f32 %v7929_v32, %v7881_v11  ;;  %v19165_v56 = vand.u32 3, %v4814_v52  ;;  %v5249_v31 = vor.u32 8388608, %v5248_v28 }
 0x420   : > { %v13697_v48 = vpack.c.bf16 %v7946_v16, %v7914_v59  ;;  %v7899_v34 = vmul.f32 %v19152_v58, %v19131_v7  ;;  %v5251_v8 = vadd.s32 1, %v12898_v10  ;;  %v5452_v59 = vand.u32 2139095040, %v18988_v46 }
 0x421   : > { %v4806_v50 = vsel %vm4723_vm5, %v4805_v55, %v4804_v54  ;;  %v13699_v60 = vpack.c.bf16 %v7945_v22, %v7913_v15  ;;  %v14374_v45 = vpop.eup %14373  ;;  %v19174_v38 = vadd.s32 127, %v5109_v61  ;;  %vm22899_vm14 = vcmask 392192  }
 0x422   : > { %v4809_v12 = vsel %vm19096_vm3, %v18535_v30, %v4806_v50  ;;  %13698 = vmatprep.subr.bf16.mxu0 %v13697_v48  ;;  %v19171_v11 = vsub.f32 %v7899_v34, %v19137_v19  ;;  %vm5252_vm15 = vcmp.gt.s32.totalorder %v5251_v8, 0  ;;  %v5453_v15 = vshrl.u32 %v5452_v59, 23 }
 0x423   : > { %14375 = vcosq.f32 %v4809_v12  ;;  %13700 = vmatpush1.bf16.msra.mxu0 %v13699_v60  ;;  %v5253_v54 = vsel %vm5252_vm15, %v5251_v8, 0  ;;  %v19183_v52 = vand.u32 8388607, %v22847_v25  ;;  %vm4820_vm0 = vcmp.eq.s32.totalorder %v19165_v56, 2 }
 0x424   : > { %14377 = vsinq.f32 %v4809_v12  ;;  %vm6480_vm1 = vcmp.eq.s32.totalorder %v19158_v5, 2  ;;  %v19188_v28 = vmul.f32 %v14372_v63, %v18535_v30  ;;  %v5255_v61 = vand.u32 31, %v5253_v54 }
 0x425   : > { %vm4817_vm5 = vcmp.eq.s32.totalorder %v19165_v56, 0  ;;  %vm6477_vm7 = vcmp.eq.s32.totalorder %v19158_v5, 0  ;;  %v19193_v16 = vmul.f32 %v14374_v45, %v18531_v27  ;;  %v19197_v32 = vmul.f32 %v19171_v11, %v19131_v7 }
 0x426   : > { %v5254_v55 = vshrl.u32 %v5253_v54, 5  ;;  %v19199_v10 = vshll.u32 %v5249_v31, 8  ;;  %vm4816_vm4 = vcmp.lt.s32.totalorder %v19165_v56, 2  ;;  %vm6476_vm3 = vcmp.lt.s32.totalorder %v19158_v5, 2  ;;  %13010 = vmatmul.mubr.msk.f32.vlgmr.msra.gmra.mrb[168].mxu0 %vm22899_vm14, %v19179_v1 }
 0x427   : > { %v5256_v63 = vsub.s32 32, %v5255_v61  ;;  %v5258_v48 = vshll.u32 %v22849_v51, %v5255_v61  ;;  %v5261_v22 = vshll.u32 %v22851_v49, %v5255_v61  ;;  %v5264_v34 = vshll.u32 %v22854_v4, %v5255_v61  ;;  %8172 = vmatprep.mubr.f32.mxu0 %v23387_v23 }
 0x428   : > { %vm4813_vm2 = vweird.f32 %v18535_v30  ;;  %v5267_v7 = vshll.u32 %v22857_v43, %v5255_v61  ;;  %v5270_v50 = vshll.u32 %v22860_v13, %v5255_v61  ;;  %v12906_v31 = vadd.s32 4294967169, %v5453_v15 }
 0x429   : > { %v5457_v8 = vor.u32 8388608, %v19183_v52  ;;  %v5257_v12 = vshrl.u32 %v22849_v51, %v5256_v63  ;;  %v5259_v60 = vshrl.u32 %v22851_v49, %v5256_v63  ;;  %v5262_v59 = vshrl.u32 %v22854_v4, %v5256_v63 }
 0x42a   : > { %v5265_v45 = vshrl.u32 %v22857_v43, %v5256_v63  ;;  %v5268_v54 = vshrl.u32 %v22860_v13, %v5256_v63  ;;  %v23413_v25 = vmov 1326507024   ;;  %vm5273_vm6 = vcmp.lt.s32.totalorder %v5254_v55, 1 }
 0x42b   : > { %v5271_v14 = vshrl.u32 %v23413_v25, %v5256_v63  ;;  %vm5274_vm8 = vcmp.lt.s32.totalorder %v5254_v55, 2  ;;  %v5260_v61 = vor.u32 %v5259_v60, %v5258_v48  ;;  %v5263_v15 = vor.u32 %v5262_v59, %v5261_v22 }
 0x42c   : > { %v5266_v40 = vor.u32 %v5265_v45, %v5264_v34  ;;  %vm5276_vm9 = vcmp.lt.s32.totalorder %v5254_v55, 4  ;;  %v5269_v52 = vor.u32 %v5268_v54, %v5267_v7  ;;  %vm5275_vm10 = vcmp.lt.s32.totalorder %v5254_v55, 3 }
 0x42d   : > { %v5272_v36 = vor.u32 %v5271_v14, %v5270_v50  ;;  %v5459_v18 = vadd.s32 1, %v12906_v31  ;;  %v14376_v51 = vpop.eup %14375  ;;  %v5277_v49 = vsel %vm5273_vm6, %v5257_v12, %v5260_v61  ;;  %v5281_v4 = vsel %vm5273_vm6, %v5260_v61, %v5263_v15 }
 0x42e   : > { %v5278_v47 = vsel %vm5276_vm9, %v5266_v40, 2102212464  ;;  %v5285_v27 = vsel %vm5273_vm6, %v5263_v15, %v5266_v40  ;;  %v14378_v43 = vpop.eup %14377  ;;  %v4821_v2 = vxor.u32 2147483648, %v14376_v51  ;;  %v5282_v35 = vsel %vm5276_vm9, %v5269_v52, 920167782 }
 0x42f   : > { %v5279_v13 = vsel %vm5275_vm10, %v5263_v15, %v5278_v47  ;;  %v5286_v63 = vsel %vm5276_vm9, %v5272_v36, 1326507024  ;;  %v4818_v21 = vxor.u32 2147483648, %v14378_v43  ;;  %v5283_v22 = vsel %vm5275_vm10, %v5266_v40, %v5282_v35 }
 0x430   : > { %v5280_v48 = vsel %vm5274_vm8, %v5277_v49, %v5279_v13  ;;  %v5287_v34 = vsel %vm5275_vm10, %v5269_v52, %v5286_v63  ;;  %v4822_v14 = vsel %vm4820_vm0, %v4821_v2, %v14378_v43  ;;  %v6482_v7 = vsel %vm6480_vm1, %v4821_v2, %v14378_v43 }
 0x431   : > { %v5284_v50 = vsel %vm5274_vm8, %v5281_v4, %v5283_v22  ;;  %v5288_v31 = vsel %vm5274_vm8, %v5285_v27, %v5287_v34  ;;  %v4819_v47 = vsel %vm4817_vm5, %v14376_v51, %v4818_v21  ;;  %v6479_v36 = vsel %vm6477_vm7, %v14376_v51, %v4818_v21 }
 0x432   : > { %v19231_v49 = vmul.u32.u64.low %v19199_v10, %v5288_v31  ;;  %v19232_v13 = vmul.u32.u64.high %v19199_v10, %v5288_v31, %v19231_v49  ;;  %v4823_v35 = vsel %vm4816_vm4, %v4819_v47, %v4822_v14  ;;  %v6483_v2 = vsel %vm6476_vm3, %v6479_v36, %v6482_v7 }
 0x433   : > { %v19239_v4 = vmul.u32.u64.low %v19199_v10, %v5284_v50  ;;  %v19240_v43 = vmul.u32.u64.high %v19199_v10, %v5284_v50, %v19239_v4  ;;  %v4824_v27 = vsel %vm4813_vm2, nan, %v4823_v35  ;;  %v6484_v51 = vsel %vm4813_vm2, nan, %v6483_v2 }
 0x434   : > { %v13703_v21 = vpack.c.bf16 %v19127_v44, %v19193_v16  ;;  %vm5460_vm11 = vcmp.gt.s32.totalorder %v5459_v18, 0  ;;  %v7724_v40 = vmul.f32 2.0, %v6484_v51  ;;  %v13701_v56 = vpack.c.bf16 %v4824_v27, %v19188_v28 }
 0x435   : > { %v13707_v5 = vpack.c.bf16 %v19152_v58, %v19137_v19  ;;  %v5461_v55 = vsel %vm5460_vm11, %v5459_v18, 0  ;;  %v7947_v12 = vsub.f32 %v19197_v32, %v19152_v58  ;;  %v5296_v60 = vmul.u32 %v19199_v10, %v5280_v48 }
 0x436   : > { %vm5298_vm12 = vc.u32 %v19232_v13, %v19239_v4  ;;  %v5463_v59 = vand.u32 31, %v5461_v55  ;;  %13702 = vmatprep.subr.bf16.mxu1 %v13701_v56  ;;  %v7852_v45 = vmul.f32 %v7724_v40, %v4824_v27  ;;  %v5299_v44 = vadd.s32 1, %v19240_v43 }
 0x437   : > { %v5462_v16 = vshrl.u32 %v5461_v55, 5  ;;  %v19258_v54 = vshll.u32 %v5457_v8, 8  ;;  %13704 = vmatpush1.bf16.msra.mxu1 %v13703_v21  ;;  %v23414_v19 = vmov 683565275   ;;  %v23415_v61 = vmov 2475754826  }
 0x438   : > { %v5464_v28 = vsub.s32 32, %v5463_v59  ;;  %v5466_v18 = vshll.u32 %v23414_v19, %v5463_v59  ;;  %v5469_v15 = vshll.u32 %v23415_v61, %v5463_v59  ;;  %v23416_v58 = vmov 2131351028  }
 0x439   : > { %v5472_v32 = vshll.u32 %v23416_v58, %v5463_v59  ;;  %v7868_v10 = vmul.f32 %v7852_v45, %v7724_v40  ;;  %v5300_v52 = vsel %vm5298_vm12, %v5299_v44, %v19240_v43  ;;  %v23417_v63 = vmov 2102212464  }
 0x43a   : > { %v5475_v48 = vshll.u32 %v23417_v63, %v5463_v59  ;;  %v23418_v22 = vmov 920167782   ;;  %v5301_v14 = vadd.s32 %v5300_v52, %v5296_v60  ;;  %v5465_v7 = vshrl.u32 %v23414_v19, %v5464_v28 }
 0x43b   : > { %v5478_v34 = vshll.u32 %v23418_v22, %v5463_v59  ;;  %v5467_v8 = vshrl.u32 %v23415_v61, %v5464_v28  ;;  %v5470_v50 = vshrl.u32 %v23416_v58, %v5464_v28  ;;  %v7884_v31 = vsub.f32 %v7868_v10, %v4824_v27 }
 0x43c   : > { %v5473_v47 = vshrl.u32 %v23417_v63, %v5464_v28  ;;  %v5476_v36 = vshrl.u32 %v23418_v22, %v5464_v28  ;;  %v5479_v49 = vshrl.u32 %v23413_v25, %v5464_v28  ;;  %v5302_v35 = vadd.s32 536870912, %v5301_v14 }
 0x43d   : > { %v5468_v2 = vor.u32 %v5467_v8, %v5466_v18  ;;  %v5471_v43 = vor.u32 %v5470_v50, %v5469_v15  ;;  %vm5481_vm13 = vcmp.lt.s32.totalorder %v5462_v16, 1  ;;  %v13705_v51 = vpack.c.bf16 %v7884_v31, %v7852_v45  ;;  %v19280_v50 = vpop.f32.mrb[166].mxu0 }
 0x43e   : > { %v7900_v21 = vmul.f32 %v7884_v31, %v7724_v40  ;;  %v5474_v56 = vor.u32 %v5473_v47, %v5472_v32  ;;  %v5477_v55 = vor.u32 %v5476_v36, %v5475_v48  ;;  %v19272_v60 = vshrl.u32 %v5302_v35, 30  ;;  %23420 = vst [vmem:[#allocation36_spill] sm:$0xff] %v19280_v50 }
 0x43f   : > { %v5480_v59 = vor.u32 %v5479_v49, %v5478_v34  ;;  %vm5482_vm15 = vcmp.lt.s32.totalorder %v5462_v16, 2  ;;  %vm5483_vm0 = vcmp.lt.s32.totalorder %v5462_v16, 3  ;;  %13706 = vmatprep.subr.bf16.mxu1 %v13705_v51  ;;  %vm5484_vm1 = vcmp.lt.s32.totalorder %v5462_v16, 4 }
 0x440   : > { %23419 = vst [vmem:[#allocation70_spill] sm:$0xff] %v19272_v60  ;;  %v7916_v27 = vsub.f32 %v7900_v21, %v7852_v45  ;;  %v5485_v44 = vsel %vm5481_vm13, %v5465_v7, %v5468_v2  ;;  %v5489_v28 = vsel %vm5481_vm13, %v5468_v2, %v5471_v43  ;;  %13708 = vmatpush1.bf16.msra.mxu1 %v13707_v5  ;;  %v5304_v18 = vshll.u32 %v19272_v60, 30 }
 0x441   : > { %v5486_v15 = vsel %vm5484_vm1, %v5474_v56, 2102212464  ;;  %v5490_v10 = vsel %vm5484_vm1, %v5477_v55, 920167782  ;;  %v5493_v32 = vsel %vm5481_vm13, %v5471_v43, %v5474_v56  ;;  %v5494_v8 = vsel %vm5484_vm1, %v5480_v59, 1326507024 }
 0x442   : > { %v7932_v52 = vmul.f32 %v7916_v27, %v7724_v40  ;;  %v5487_v48 = vsel %vm5483_vm0, %v5471_v43, %v5486_v15  ;;  %v5491_v34 = vsel %vm5483_vm0, %v5474_v56, %v5490_v10  ;;  %v5111_v45 = vshll.u32 %v19174_v38, 23 }
 0x443   : > { %v5488_v7 = vsel %vm5482_vm15, %v5485_v44, %v5487_v48  ;;  %v5492_v5 = vsel %vm5482_vm15, %v5489_v28, %v5491_v34  ;;  %v5495_v47 = vsel %vm5483_vm0, %v5477_v55, %v5494_v8  ;;  %v13711_v2 = vpack.c.bf16 %v7947_v12, %v19171_v11 }
 0x444   : > { %v7948_v36 = vsub.f32 %v7932_v52, %v7884_v31  ;;  %v5496_v49 = vsel %vm5482_vm15, %v5493_v32, %v5495_v47  ;;  %v19288_v40 = vmul.u32.u64.low %v19258_v54, %v5492_v5  ;;  %v19289_v35 = vmul.u32.u64.high %v19258_v54, %v5492_v5, %v19288_v40 }
 0x445   : > { %v19293_v43 = vsub.s32 %v5301_v14, %v5304_v18  ;;  %v19296_v38 = vmul.u32.u64.low %v19258_v54, %v5496_v49  ;;  %v19297_v51 = vmul.u32.u64.high %v19258_v54, %v5496_v49, %v19296_v38  ;;  %vm4827_vm5 = vcmp.lt.s32.totalorder %v18683_v41, 0 }
 0x446   : > { %v23421_v21 = vand.u32 2147483647, %v19052_v3  ;;  %v23422_v16 = vcvt.s32.f32 %v19043_v17  ;;  %v19305_v56 = vsub.s32 32, %v18986_v9  ;;  %v13709_v55 = vpack.c.bf16 %v7948_v36, %v7916_v27 }
 0x447   : > { %v23423_v59 = vand.u32 2147483647, %v18683_v41  ;;  %v23426_v12 = vshll.u32 %v18930_v20, %v19066_v26  ;;  %v5112_v44 = vor.u32 4788187, %v5111_v45  ;;  %v5504_v3 = vmul.u32 %v19258_v54, %v5488_v7 }
 0x448   : > { %v4908_v31 = vmul.f32 %v23422_v16, %v23421_v21  ;;  %14379 = vpow2.f32 %v18925_v39  ;;  %v13000_v17 = vmul.f32 -1.442695, %v18686_v33  ;;  %v19321_v27 = vsub.s32 32, %v19003_v0  ;;  %13710 = vmatprep.subr.bf16.mxu1 %v13709_v55 }
 0x449   : > { %vm19309_vm7 = vcmp.le.f32.partialorder %v23423_v59, 0.7853982  ;;  %v5108_v14 = vor.u32 %v19156_v6, %v23426_v12  ;;  %v5507_v28 = vadd.s32 1, %v19289_v35  ;;  %v19325_v18 = vshrl.u32 %v18952_v24, 5  ;;  %13712 = vmatpush1.bf16.msra.mxu1 %v13711_v2 }
 0x44a   : > { %v4955_v20 = vshll.u32 %v23417_v63, %v18986_v9  ;;  %v5307_v26 = vsub.s32 0, %v19293_v43  ;;  %vm5506_vm4 = vc.u32 %v19297_v51, %v19288_v40  ;;  %v4909_v39 = vxor.u32 2147483648, %v4908_v31 }
 0x44b   : > { %v4956_v6 = vshrl.u32 %v23418_v22, %v19305_v56  ;;  %v4958_v54 = vshll.u32 %v23418_v22, %v18986_v9  ;;  %v5508_v15 = vsel %vm5506_vm4, %v5507_v28, %v19289_v35  ;;  %v5113_v24 = vand.u32 2147483647, %v5112_v44 }
 0x44c   : > { %v5115_v10 = vcvt.s32.f32 %v5108_v14  ;;  %v4959_v32 = vshrl.u32 %v23413_v25, %v19305_v56  ;;  %v5509_v52 = vadd.s32 %v5508_v15, %v5504_v3  ;;  %vm5035_vm3 = vcmp.lt.s32.totalorder %v18686_v33, 0  ;;  %13011 = vmatmul.mubr.msk.f32.vlgmr.msra.gmra.mrb[168].mxu1 %vm22899_vm14, %v19179_v1 }
 0x44d   : > { %v5163_v48 = vshll.u32 %v23417_v63, %v19003_v0  ;;  %v5164_v34 = vshrl.u32 %v23418_v22, %v19321_v27  ;;  %v5348_v8 = vand.u32 2139095040, %v18990_v53  ;;  %14381 = vpow2.f32 %v13000_v17  ;;  %8243 = vmatprep.mubr.f32.mxu1 %v23387_v23 }
 0x44e   : > { %v19348_v45 = vshrl.u32 %v18956_v62, 5  ;;  %v12899_v7 = vmin.u32 %v5307_v26, %v19293_v43  ;;  %v5510_v5 = vadd.s32 536870912, %v5509_v52  ;;  %v4910_v47 = vsel %vm4827_vm5, %v4909_v39, %v4908_v31 }
 0x44f   : > { %vm4964_vm2 = vcmp.lt.s32.totalorder %v19325_v18, 4  ;;  %v19356_v36 = vmul.f32 -1.442695, %v18688_v57  ;;  %v22866_v1 = vand.u32 2147483647, %v18688_v57  ;;  %v5116_v49 = vmul.f32 %v5115_v10, %v5113_v24 }
 0x450   : > { %v4957_v35 = vor.u32 %v4956_v6, %v4955_v20  ;;  %v4960_v2 = vor.u32 %v4959_v32, %v4958_v54  ;;  %v19359_v62 = vshrl.u32 %v5510_v5, 30  ;;  %v23428_v38 = vand.u32 2147483647, %v18686_v33 }
 0x451   : > { %v19367_v16 = vor.u32 %v5164_v34, %v5163_v48  ;;  %v19371_v31 = vshll.u32 %v23418_v22, %v19003_v0  ;;  %v19375_v55 = vshrl.u32 %v23413_v25, %v19321_v27  ;;  %v5349_v59 = vshrl.u32 %v5348_v8, 23 }
 0x452   : > { %23427 = vst [vmem:[#allocation72_spill] sm:$0xff] %v19359_v62  ;;  %vm19363_vm6 = vcmp.le.f32.partialorder %v23428_v38, 0.7853982  ;;  %v4913_v12 = vsel %vm19309_vm7, %v18683_v41, %v4910_v47  ;;  %vm5172_vm8 = vcmp.lt.s32.totalorder %v19348_v45, 4  ;;  %v5309_v14 = vclz %v12899_v7  ;;  %v19382_v3 = vpop.eup %14379 }
 0x453   : > { %v5512_v44 = vshll.u32 %v19359_v62, 30  ;;  %v19385_v17 = vmul.f32 -1.442695, %v18693_v29  ;;  %v4936_v28 = vand.u32 8388607, %v22866_v1  ;;  %v4946_v20 = vshll.u32 %v23414_v19, %v18986_v9 }
 0x454   : > { %v4947_v26 = vshrl.u32 %v23415_v61, %v19305_v56  ;;  %v5117_v39 = vxor.u32 2147483648, %v5116_v49  ;;  %v4970_v6 = vsel %vm4964_vm2, %v4957_v35, 920167782  ;;  %v4974_v54 = vsel %vm4964_vm2, %v4960_v2, 1326507024 }
 0x455   : > { %v19397_v15 = vsub.s32 %v5509_v52, %v5512_v44  ;;  %14383 = vcosq.f32 %v4913_v12  ;;  %v5168_v24 = vor.u32 %v19375_v55, %v19371_v31  ;;  %v19404_v10 = vsel %vm5172_vm8, %v19367_v16, 920167782 }
 0x456   : > { %v12902_v32 = vadd.s32 4294967169, %v5349_v59  ;;  %14385 = vsinq.f32 %v4913_v12  ;;  %v12900_v48 = vadd.s32 4294967294, %v5309_v14  ;;  %v4949_v8 = vshll.u32 %v23415_v61, %v18986_v9 }
 0x457   : > { %v5515_v34 = vsub.s32 0, %v19397_v15  ;;  %v4937_v7 = vor.u32 8388608, %v4936_v28  ;;  %v4948_v52 = vor.u32 %v4947_v26, %v4946_v20  ;;  %v4950_v5 = vshrl.u32 %v23416_v58, %v19305_v56  ;;  %v19413_v2 = vpop.eup %14381 }
 0x458   : > { %v4952_v47 = vshll.u32 %v23416_v58, %v18986_v9  ;;  %v5118_v38 = vsel %vm5035_vm3, %v5117_v39, %v5116_v49  ;;  %v13002_v31 = vmul.f32 -1.442695, %v18976_v37  ;;  %v4953_v55 = vshrl.u32 %v23417_v63, %v19305_v56  ;;  %v19431_v39 = vpop.f32.mrb[166].mxu1 }
 0x459   : > { %vm4961_vm9 = vcmp.lt.s32.totalorder %v19325_v18, 1  ;;  %v12907_v59 = vmin.u32 %v5515_v34, %v19397_v15  ;;  %v5355_v12 = vadd.s32 1, %v12902_v32  ;;  %v5556_v14 = vand.u32 2139095040, %v18998_v42  ;;  %23431 = vst [vmem:[#allocation71_spill] sm:$0xff] %v19431_v39 }
 0x45a   : > { %v4951_v44 = vor.u32 %v4950_v5, %v4949_v8  ;;  %vm12901_vm10 = vcmp.lt.s32.totalorder %v12900_v48, 0  ;;  %v4945_v9 = vshrl.u32 %v23414_v19, %v19305_v56  ;;  %v4954_v28 = vor.u32 %v4953_v55, %v4952_v47  ;;  %v19441_v5 = vpop.f32.mrb[167].mxu0  ;;  %v19443_v47 = vpop.f32.mrb[167].mxu1 }
 0x45b   : > { %vm4963_vm11 = vcmp.lt.s32.totalorder %v19325_v18, 3  ;;  %vm4962_vm12 = vcmp.lt.s32.totalorder %v19325_v18, 2  ;;  %v4977_v26 = vshll.u32 %v4937_v7, 8  ;;  %v5121_v32 = vsel %vm19363_vm6, %v18686_v33, %v5118_v38  ;;  %23432 = vst [vmem:[#allocation17_spill] sm:$0xff] %v19441_v5  ;;  %23433 = vst [vmem:[#allocation73_spill] sm:$0xff] %v19443_v47 }
 0x45c   : > { %v4969_v49 = vsel %vm4961_vm9, %v4948_v52, %v4951_v44  ;;  %v4975_v20 = vsel %vm4963_vm11, %v4957_v35, %v4974_v54  ;;  %v13004_v56 = vmul.f32 -1.442695, %v18988_v46  ;;  %v4966_v34 = vsel %vm4964_vm2, %v4954_v28, 2102212464 }
 0x45d   : > { %v4971_v8 = vsel %vm4963_vm11, %v4954_v28, %v4970_v6  ;;  %v19445_v35 = vsel %vm12901_vm10, 0, %v12900_v48  ;;  %v5517_v54 = vclz %v12907_v59  ;;  %vm5356_vm13 = vcmp.gt.s32.totalorder %v5355_v12, 0 }
 0x45e   : > { %v4973_v7 = vsel %vm4961_vm9, %v4951_v44, %v4954_v28  ;;  %v4965_v38 = vsel %vm4961_vm9, %v4945_v9, %v4948_v52  ;;  %v4967_v55 = vsel %vm4963_vm11, %v4951_v44, %v4966_v34  ;;  %v4972_v6 = vsel %vm4962_vm12, %v4969_v49, %v4971_v8 }
 0x45f   : > { %v4976_v1 = vsel %vm4962_vm12, %v4973_v7, %v4975_v20  ;;  %v19457_v30 = vpop.eup %14383  ;;  %14387 = vcosq.f32 %v5121_v32  ;;  %v5557_v48 = vshrl.u32 %v5556_v14, 23  ;;  %v5182_v52 = vsel %vm5172_vm8, %v5168_v24, 1326507024 }
 0x460   : > { %v19459_v59 = vmul.u32.u64.low %v4977_v26, %v4976_v1  ;;  %v19460_v62 = vmul.u32.u64.high %v4977_v26, %v4976_v1, %v19459_v59  ;;  %v19462_v28 = vpop.eup %14385  ;;  %14389 = vsinq.f32 %v5121_v32  ;;  %v5317_v44 = vsub.s32 4294967266, %v19445_v35 }
 0x461   : > { %v19467_v9 = vsel %vm5356_vm13, %v5355_v12, 0  ;;  %14391 = vpow2.f32 %v13002_v31  ;;  %v4968_v49 = vsel %vm4962_vm12, %v4965_v38, %v4967_v55  ;;  %v5313_v1 = vsub.s32 32, %v19445_v35 }
 0x462   : > { %v19471_v20 = vmul.u32.u64.low %v4977_v26, %v4972_v6  ;;  %v19472_v34 = vmul.u32.u64.high %v4977_v26, %v4972_v6, %v19471_v20  ;;  %v12908_v14 = vadd.s32 4294967294, %v5517_v54  ;;  %14393 = vpow2.f32 %v13004_v56 }
 0x463   : > { %v22870_v32 = vand.u32 2147483647, %v18693_v29  ;;  %v5297_v24 = vadd.s32 %v19239_v4, %v19232_v13  ;;  %v19480_v12 = vand.u32 31, %v19467_v9  ;;  %v19483_v31 = vmul.f32 -1.442695, %v18990_v53 }
 0x464   : > { %v12910_v18 = vadd.s32 4294967169, %v5557_v48  ;;  %v5318_v8 = vadd.s32 127, %v5317_v44  ;;  %v4984_v7 = vmul.u32 %v4977_v26, %v4968_v49  ;;  %vm4986_vm15 = vc.u32 %v19460_v62, %v19471_v20 }
 0x465   : > { %23434 = vst [vmem:[#allocation57_spill] sm:$0xff] %v19483_v31  ;;  %v5144_v56 = vand.u32 8388607, %v22870_v32  ;;  %v4987_v54 = vadd.s32 1, %v19472_v34  ;;  %v5154_v13 = vshll.u32 %v23414_v19, %v19003_v0  ;;  %v5155_v4 = vshrl.u32 %v23415_v61, %v19321_v27 }
 0x466   : > { %v5157_v38 = vshll.u32 %v23415_v61, %v19003_v0  ;;  %v5315_v55 = vshrl.u32 %v5297_v24, %v5313_v1  ;;  %vm12909_vm0 = vcmp.lt.s32.totalorder %v12908_v14, 0  ;;  %v5158_v6 = vshrl.u32 %v23416_v58, %v19321_v27 }
 0x467   : > { %v5145_v26 = vor.u32 8388608, %v5144_v56  ;;  %v4988_v48 = vsel %vm4986_vm15, %v4987_v54, %v19472_v34  ;;  %v5156_v59 = vor.u32 %v5155_v4, %v5154_v13  ;;  %v5160_v44 = vshll.u32 %v23416_v58, %v19003_v0 }
 0x468   : > { %v5161_v49 = vshrl.u32 %v23417_v63, %v19321_v27  ;;  %v5319_v32 = vshll.u32 %v5318_v8, 23  ;;  %v4989_v60 = vadd.s32 %v4988_v48, %v4984_v7  ;;  %v5159_v31 = vor.u32 %v5158_v6, %v5157_v38 }
 0x469   : > { %vm5169_vm1 = vcmp.lt.s32.totalorder %v19348_v45, 1  ;;  %v19504_v1 = vpop.eup %14387  ;;  %v19506_v24 = vsel %vm12909_vm0, 0, %v12908_v14  ;;  %v5153_v56 = vshrl.u32 %v23414_v19, %v19321_v27  ;;  %vm5171_vm4 = vcmp.lt.s32.totalorder %v19348_v45, 3 }
 0x46a   : > { %v5162_v34 = vor.u32 %v5161_v49, %v5160_v44  ;;  %v19511_v54 = vpop.eup %14389  ;;  %v4990_v0 = vadd.s32 536870912, %v4989_v60  ;;  %vm5170_vm2 = vcmp.lt.s32.totalorder %v19348_v45, 2  ;;  %v5177_v8 = vsel %vm5169_vm1, %v5156_v59, %v5159_v31 }
 0x46b   : > { %v5183_v7 = vsel %vm5171_vm4, %v19367_v16, %v5182_v52  ;;  %v19519_v14 = vpop.eup %14391  ;;  %v5185_v38 = vshll.u32 %v5145_v26, 8  ;;  %v5505_v48 = vadd.s32 %v19288_v40, %v19297_v51  ;;  %v5563_v44 = vadd.s32 1, %v12910_v18 }
 0x46c   : > { %23435 = vst [vmem:[#allocation31_spill] sm:$0xff] %v19519_v14  ;;  %v5174_v27 = vsel %vm5172_vm8, %v5162_v34, 2102212464  ;;  %v5179_v13 = vsel %vm5171_vm4, %v5162_v34, %v19404_v10  ;;  %v5181_v4 = vsel %vm5169_vm1, %v5159_v31, %v5162_v34  ;;  %v19528_v6 = vpop.eup %14393  ;;  %v19533_v16 = vmul.f32 -1.442695, %v18998_v42 }
 0x46d   : > { %23436 = vst [vmem:[#allocation26_spill] sm:$0xff] %v19528_v6  ;;  %v4991_v52 = vshrl.u32 %v4990_v0, 30  ;;  %v5314_v49 = vshll.u32 %v19293_v43, %v19445_v35  ;;  %v5320_v14 = vor.u32 4788187, %v5319_v32  ;;  %v5525_v10 = vsub.s32 4294967266, %v19506_v24 }
 0x46e   : > { %23437 = vst [vmem:[#allocation58_spill] sm:$0xff] %v19533_v16  ;;  %v5184_v34 = vsel %vm5170_vm2, %v5181_v4, %v5183_v7  ;;  %v5173_v6 = vsel %vm5169_vm1, %v5153_v56, %v5156_v59  ;;  %v5175_v40 = vsel %vm5171_vm4, %v5159_v31, %v5174_v27  ;;  %v5180_v51 = vsel %vm5170_vm2, %v5177_v8, %v5179_v13  ;;  %v23438_v59 = vld [vmem:[#allocation65_spill] sm:$0xff] }
 0x46f   : > { %v4992_v26 = vshll.u32 %v4991_v52, 30  ;;  %v5316_v18 = vor.u32 %v5315_v55, %v5314_v49  ;;  %v19547_v0 = vsub.s32 32, %v19480_v12  ;;  %v5521_v32 = vsub.s32 32, %v19506_v24 }
 0x470   : > { %v19549_v43 = vmul.u32.u64.low %v5185_v38, %v5184_v34  ;;  %v19550_v35 = vmul.u32.u64.high %v5185_v38, %v5184_v34, %v19549_v43  ;;  %vm5564_vm8 = vcmp.gt.s32.totalorder %v5563_v44, 0  ;;  %vm4931_vm9 = vcmp.lt.s32.totalorder %v18688_v57, 0 }
 0x471   : > { %v19554_v7 = vsub.s32 %v4989_v60, %v4992_v26  ;;  %v4911_v56 = vsub.s32 4, %v23438_v59  ;;  %v5526_v31 = vadd.s32 127, %v5525_v10  ;;  %v5176_v8 = vsel %vm5170_vm2, %v5173_v6, %v5175_v40 }
 0x472   : > { %v19559_v55 = vmul.u32.u64.low %v5185_v38, %v5180_v51  ;;  %v19560_v27 = vmul.u32.u64.high %v5185_v38, %v5180_v51, %v19559_v55  ;;  %v5321_v13 = vand.u32 2147483647, %v5320_v14  ;;  %v19565_v4 = vshll.u32 %v23417_v63, %v19480_v12 }
 0x473   : > { %v4995_v49 = vsub.s32 0, %v19554_v7  ;;  %14395 = vpow2.f32 %v19356_v36  ;;  %v5323_v60 = vcvt.s32.f32 %v5316_v18  ;;  %v19571_v10 = vshrl.u32 %v23418_v22, %v19547_v0 }
 0x474   : > { %v19573_v45 = vsel %vm5564_vm8, %v5563_v44, 0  ;;  %v4912_v6 = vsel %vm4827_vm5, %v4911_v56, %v23438_v59  ;;  %v5523_v14 = vshrl.u32 %v5505_v48, %v5521_v32  ;;  %v23440_v34 = vand.u32 2147483647, %v18688_v57 }
 0x475   : > { %23439 = vst [vmem:[#allocation41_spill] sm:$0xff] %v19573_v45  ;;  %v12887_v36 = vmin.u32 %v4995_v49, %v19554_v7  ;;  %v5192_v40 = vmul.u32 %v5185_v38, %v5176_v8  ;;  %vm5194_vm11 = vc.u32 %v19550_v35, %v19559_v55  ;;  %v5527_v51 = vshll.u32 %v5526_v31, 23 }
 0x476   : > { %vm19580_vm10 = vcmp.le.f32.partialorder %v23440_v34, 0.7853982  ;;  %v5015_v44 = vsub.s32 4, %v4991_v52  ;;  %v5195_v18 = vadd.s32 1, %v19560_v27  ;;  %v4914_v43 = vsel %vm19309_vm7, 0, %v4912_v6 }
 0x477   : > { %v19590_v48 = vmul.f32 %v5323_v60, %v5321_v13  ;;  %v5522_v32 = vshll.u32 %v19397_v15, %v19506_v24  ;;  %v19595_v59 = vand.u32 31, %v19573_v45  ;;  %v4997_v56 = vclz %v12887_v36  ;;  %v23443_v36 = vld [vmem:[#allocation62_spill] sm:$0xff] }
 0x478   : > { %v5196_v38 = vsel %vm5194_vm11, %v5195_v18, %v19560_v27  ;;  %v4918_v8 = vadd.s32 3, %v4914_v43  ;;  %v4922_v31 = vxor.u32 2147483648, %v19462_v28  ;;  %v6578_v49 = vand.u32 3, %v4914_v43 }
 0x479   : > { %v19599_v34 = vor.u32 %v5523_v14, %v5522_v32  ;;  %v4985_v11 = vadd.s32 %v19471_v20, %v19460_v62  ;;  %v12888_v13 = vadd.s32 4294967294, %v4997_v56  ;;  %v5197_v60 = vadd.s32 %v5196_v38, %v5192_v40 }
 0x47a   : > { %v19603_v6 = vor.u32 4788187, %v5527_v51  ;;  %v5016_v15 = vsel %vm4931_vm9, %v5015_v44, %v4991_v52  ;;  %14397 = vpow2.f32 %v19385_v17  ;;  %v4925_v24 = vxor.u32 2147483648, %v19457_v30 }
 0x47b   : > { %vm12889_vm5 = vcmp.lt.s32.totalorder %v12888_v13, 0  ;;  %v5198_v27 = vadd.s32 536870912, %v5197_v60  ;;  %vm6580_vm7 = vcmp.eq.s32.totalorder %v6578_v49, 0  ;;  %v5119_v14 = vsub.s32 4, %v23443_v36 }
 0x47c   : > { %v5000_v18 = vsel %vm12889_vm5, 0, %v12888_v13  ;;  %v4919_v43 = vand.u32 3, %v4918_v8  ;;  %v6582_v62 = vsel %vm6580_vm7, %v19457_v30, %v4922_v31  ;;  %vm6583_vm12 = vcmp.eq.s32.totalorder %v6578_v49, 2 }
 0x47d   : > { %v14396_v20 = vpop.eup %14395  ;;  %v5001_v40 = vsub.s32 32, %v5000_v18  ;;  %v5002_v51 = vshll.u32 %v19554_v7, %v5000_v18  ;;  %v5005_v32 = vsub.s32 4294967266, %v5000_v18  ;;  %v5199_v52 = vshrl.u32 %v5198_v27, 30 }
 0x47e   : > { %v5018_v56 = vsel %vm19580_vm10, 0, %v5016_v15  ;;  %v6585_v38 = vsel %vm6583_vm12, %v4925_v24, %v19462_v28  ;;  %vm6579_vm13 = vcmp.lt.s32.totalorder %v6578_v49, 2  ;;  %v7790_v42 = vadd.f32 1.0, %v14396_v20 }
 0x47f   : > { %v5003_v13 = vshrl.u32 %v4985_v11, %v5001_v40  ;;  %v5006_v8 = vadd.s32 127, %v5005_v32  ;;  %v5200_v16 = vshll.u32 %v5199_v52, 30  ;;  %vm5139_vm15 = vcmp.lt.s32.totalorder %v18693_v29, 0 }
 0x480   : > { %vm4921_vm0 = vcmp.eq.s32.totalorder %v4919_v43, 0  ;;  %vm4924_vm1 = vcmp.eq.s32.totalorder %v4919_v43, 2  ;;  %v6586_v7 = vsel %vm6579_vm13, %v6582_v62, %v6585_v38  ;;  %v5120_v15 = vsel %vm5035_vm3, %v5119_v14, %v23443_v36 }
 0x481   : > { %v5004_v27 = vor.u32 %v5003_v13, %v5002_v51  ;;  %v5007_v18 = vshll.u32 %v5006_v8, 23  ;;  %v19618_v17 = vsub.s32 %v5197_v60, %v5200_v16  ;;  %v5022_v44 = vadd.s32 3, %v5018_v56 }
 0x482   : > { %vm4917_vm4 = vweird.f32 %v18683_v41  ;;  %v4923_v11 = vsel %vm4921_vm0, %v19457_v30, %v4922_v31  ;;  %v4926_v49 = vsel %vm4924_vm1, %v4925_v24, %v19462_v28  ;;  %v19629_v60 = vand.u32 3, %v5018_v56 }
 0x483   : > { %v5008_v20 = vor.u32 4788187, %v5007_v18  ;;  %v5011_v40 = vcvt.s32.f32 %v5004_v27  ;;  %v5203_v32 = vsub.s32 0, %v19618_v17  ;;  %v6587_v62 = vsel %vm4917_vm4, nan, %v6586_v7 }
 0x484   : > { %v14398_v16 = vpop.eup %14397  ;;  %14399 = vrcp.f32 %v7790_v42  ;;  %vm4920_vm2 = vcmp.lt.s32.totalorder %v4919_v43, 2  ;;  %v5122_v36 = vsel %vm19363_vm6, 0, %v5120_v15  ;;  %v23444_v30 = vand.u32 2147483647, %v18693_v29 }
 0x485   : > { %v5009_v14 = vand.u32 2147483647, %v5008_v20  ;;  %v12895_v31 = vmin.u32 %v5203_v32, %v19618_v17  ;;  %v5223_v24 = vsub.s32 4, %v5199_v52  ;;  %v5126_v51 = vadd.s32 3, %v5122_v36 }
 0x486   : > { %vm19635_vm3 = vcmp.le.f32.partialorder %v23444_v30, 0.7853982  ;;  %v5193_v56 = vadd.s32 %v19559_v55, %v19550_v35  ;;  %v4927_v38 = vsel %vm4920_vm2, %v4923_v11, %v4926_v49  ;;  %v19642_v42 = vmul.f32 2.0, %v6587_v62 }
 0x487   : > { %v7789_v21 = vadd.f32 1.0, %v19382_v3  ;;  %v5012_v43 = vmul.f32 %v5011_v40, %v5009_v14  ;;  %v19645_v13 = vand.u32 3, %v5022_v44  ;;  %v5205_v8 = vclz %v12895_v31 }
 0x488   : > { %v5130_v7 = vxor.u32 2147483648, %v19511_v54  ;;  %v7792_v27 = vadd.f32 1.0, %v14398_v16  ;;  %v5127_v18 = vand.u32 3, %v5126_v51  ;;  %v5133_v15 = vxor.u32 2147483648, %v19504_v1 }
 0x489   : > { %v6784_v20 = vand.u32 3, %v5122_v36  ;;  %v5013_v32 = vxor.u32 2147483648, %v5012_v43  ;;  %v12896_v30 = vadd.s32 4294967294, %v5205_v8  ;;  %v5224_v35 = vsel %vm5139_vm15, %v5223_v24, %v5199_v52 }
 0x48a   : > { %v19653_v55 = vsel %vm4917_vm4, nan, %v4927_v38  ;;  %14401 = vrcp.f32 %v7789_v21  ;;  %vm5129_vm6 = vcmp.eq.s32.totalorder %v5127_v18, 0  ;;  %v7791_v3 = vadd.f32 1.0, %v19413_v2 }
 0x48b   : > { %v19658_v44 = vmul.f32 %v19642_v42, %v19653_v55  ;;  %v5014_v11 = vsel %vm4931_vm9, %v5013_v32, %v5012_v43  ;;  %vm12897_vm8 = vcmp.lt.s32.totalorder %v12896_v30, 0  ;;  %v5131_v49 = vsel %vm5129_vm6, %v19504_v1, %v5130_v7 }
 0x48c   : > { %vm5132_vm11 = vcmp.eq.s32.totalorder %v5127_v18, 2  ;;  %v5017_v52 = vsel %vm19580_vm10, %v18688_v57, %v5014_v11  ;;  %v5208_v40 = vsel %vm12897_vm8, 0, %v12896_v30  ;;  %vm6786_vm5 = vcmp.eq.s32.totalorder %v6784_v20, 0 }
 0x48d   : > { %v5134_v62 = vsel %vm5132_vm11, %v5133_v15, %v19511_v54  ;;  %14403 = vcosq.f32 %v5017_v52  ;;  %v5209_v2 = vsub.s32 32, %v5208_v40  ;;  %v5210_v16 = vshll.u32 %v19618_v17, %v5208_v40 }
 0x48e   : > { %v5213_v36 = vsub.s32 4294967266, %v5208_v40  ;;  %v14400_v14 = vpop.eup %14399  ;;  %14405 = vsinq.f32 %v5017_v52  ;;  %v5226_v31 = vsel %vm19635_vm3, 0, %v5224_v35  ;;  %vm5125_vm9 = vweird.f32 %v18686_v33 }
 0x48f   : > { %v6788_v24 = vsel %vm6786_vm5, %v19504_v1, %v5130_v7  ;;  %v5211_v26 = vshrl.u32 %v5193_v56, %v5209_v2  ;;  %vm5128_vm10 = vcmp.lt.s32.totalorder %v5127_v18, 2  ;;  %vm6789_vm7 = vcmp.eq.s32.totalorder %v6784_v20, 2 }
 0x490   : > { %v5214_v51 = vadd.s32 127, %v5213_v36  ;;  %v5135_v38 = vsel %vm5128_vm10, %v5131_v49, %v5134_v62  ;;  %vm6785_vm12 = vcmp.lt.s32.totalorder %v6784_v20, 2  ;;  %v6791_v21 = vsel %vm6789_vm7, %v5133_v15, %v19511_v54 }
 0x491   : > { %v7869_v17 = vmul.f32 %v19658_v44, %v19642_v42  ;;  %vm6686_vm13 = vcmp.eq.s32.totalorder %v19629_v60, 2  ;;  %v5212_v43 = vor.u32 %v5211_v26, %v5210_v16  ;;  %v6792_v32 = vsel %vm6785_vm12, %v6788_v24, %v6791_v21 }
 0x492   : > { %v5215_v8 = vshll.u32 %v5214_v51, 23  ;;  %14407 = vrcp.f32 %v7791_v3  ;;  %vm6683_vm0 = vcmp.eq.s32.totalorder %v19629_v60, 0  ;;  %v6793_v1 = vsel %vm5125_vm9, nan, %v6792_v32 }
 0x493   : > { %v19680_v56 = vsub.f32 %v7869_v17, %v19653_v55  ;;  %v22876_v7 = vand.u32 2147483647, %v19280_v50  ;;  %v5660_v54 = vand.u32 2139095040, %v19280_v50  ;;  %vm6682_vm1 = vcmp.lt.s32.totalorder %v19629_v60, 2 }
 0x494   : > { %v5216_v18 = vor.u32 4788187, %v5215_v8  ;;  %v5219_v15 = vcvt.s32.f32 %v5212_v43  ;;  %14409 = vrcp.f32 %v7792_v27  ;;  %v19685_v20 = vmul.f32 2.0, %v6793_v1  ;;  %v14402_v30 = vpop.eup %14401 }
 0x495   : > { %vm5021_vm4 = vweird.f32 %v18688_v57  ;;  %v5230_v35 = vadd.s32 3, %v5226_v31  ;;  %v19690_v3 = vsel %vm5125_vm9, nan, %v5135_v38  ;;  %v7901_v11 = vmul.f32 %v19680_v56, %v19642_v42 }
 0x496   : > { %v5661_v49 = vshrl.u32 %v5660_v54, 23  ;;  %vm5024_vm2 = vcmp.lt.s32.totalorder %v19645_v13, 2  ;;  %vm5025_vm6 = vcmp.eq.s32.totalorder %v19645_v13, 0  ;;  %v5217_v52 = vand.u32 2147483647, %v5216_v18 }
 0x497   : > { %v19698_v27 = vmul.f32 %v19685_v20, %v19690_v3  ;;  %vm5028_vm8 = vcmp.eq.s32.totalorder %v19645_v13, 2  ;;  %v7917_v40 = vsub.f32 %v7901_v11, %v19658_v44  ;;  %v5664_v2 = vand.u32 8388607, %v22876_v7  ;;  %v14404_v16 = vpop.eup %14403 }
 0x498   : > { %v12914_v62 = vadd.s32 4294967169, %v5661_v49  ;;  %v7838_v36 = vmul.f32 %v14400_v14, %v18688_v57  ;;  %v5220_v24 = vmul.f32 %v5219_v15, %v5217_v52  ;;  %v7837_v26 = vmul.f32 %v14402_v30, %v18683_v41  ;;  %v14406_v38 = vpop.eup %14405 }
 0x499   : > { %v7871_v51 = vmul.f32 %v19698_v27, %v19685_v20  ;;  %v5029_v21 = vxor.u32 2147483648, %v14404_v16  ;;  %v19708_v17 = vand.u32 3, %v5230_v35  ;;  %v19710_v43 = vand.u32 3, %v5226_v31 }
 0x49a   : > { %v5667_v8 = vadd.s32 1, %v12914_v62  ;;  %v5026_v32 = vxor.u32 2147483648, %v14406_v38  ;;  %v5221_v1 = vxor.u32 2147483648, %v5220_v24  ;;  %v13715_v54 = vpack.c.bf16 %v19653_v55, %v7837_v26 }
 0x49b   : > { %v7933_v18 = vmul.f32 %v7917_v40, %v19642_v42  ;;  %v5030_v14 = vsel %vm5028_vm8, %v5029_v21, %v14406_v38  ;;  %v6688_v15 = vsel %vm6686_vm13, %v5029_v21, %v14406_v38  ;;  %v19719_v30 = vsub.f32 %v7871_v51, %v19690_v3 }
 0x49c   : > { %v5665_v35 = vor.u32 8388608, %v5664_v2  ;;  %v14408_v11 = vpop.eup %14407  ;;  %v5027_v31 = vsel %vm5025_vm6, %v14404_v16, %v5026_v32  ;;  %v6685_v49 = vsel %vm6683_vm0, %v14404_v16, %v5026_v32  ;;  %v5222_v42 = vsel %vm5139_vm15, %v5221_v1, %v5220_v24 }
 0x49d   : > { %v5868_v55 = vand.u32 2139095040, %v19431_v39  ;;  %v5031_v52 = vsel %vm5024_vm2, %v5027_v31, %v5030_v14  ;;  %v6689_v62 = vsel %vm6682_vm1, %v6685_v49, %v6688_v15  ;;  %v5225_v2 = vsel %vm19635_vm3, %v18693_v29, %v5222_v42 }
 0x49e   : > { %vm5668_vm11 = vcmp.gt.s32.totalorder %v5667_v8, 0  ;;  %v14410_v26 = vpop.eup %14409  ;;  %v5032_v16 = vsel %vm5021_vm4, nan, %v5031_v52  ;;  %v6690_v24 = vsel %vm5021_vm4, nan, %v6689_v62  ;;  %14411 = vcosq.f32 %v5225_v2 }
 0x49f   : > { %v7949_v51 = vsub.f32 %v7933_v18, %v19680_v56  ;;  %v19740_v13 = vmul.f32 2.0, %v6690_v24  ;;  %v13713_v38 = vpack.c.bf16 %v5032_v16, %v7838_v36  ;;  %14413 = vsinq.f32 %v5225_v2 }
 0x4a0   : > { %v22875_v60 = vand.u32 2147483647, %v19431_v39  ;;  %v19744_v28 = vmul.f32 %v14408_v11, %v18686_v33  ;;  %v7903_v21 = vmul.f32 %v19719_v30, %v19685_v20  ;;  %v5669_v32 = vsel %vm5668_vm11, %v5667_v8, 0 }
 0x4a1   : > { %v5869_v1 = vshrl.u32 %v5868_v55, 23  ;;  %13714 = vmatprep.subr.bf16.mxu0 %v13713_v38  ;;  %v19749_v14 = vmul.f32 %v14410_v26, %v18693_v29  ;;  %v7854_v18 = vmul.f32 %v19740_v13, %v5032_v16  ;;  %v13719_v36 = vpack.c.bf16 %v19680_v56, %v19658_v44 }
 0x4a2   : > { %v5671_v15 = vand.u32 31, %v5669_v32  ;;  %vm5236_vm15 = vcmp.eq.s32.totalorder %v19708_v17, 2  ;;  %vm6892_vm3 = vcmp.eq.s32.totalorder %v19710_v43, 2  ;;  %13716 = vmatpush1.bf16.msra.mxu0 %v13715_v54  ;;  %v19758_v8 = vpack.c.bf16 %v7949_v51, %v7917_v40 }
 0x4a3   : > { %v19761_v31 = vsub.f32 %v7903_v21, %v19698_v27  ;;  %v19763_v49 = vshll.u32 %v5665_v35, 8  ;;  %vm5233_vm5 = vcmp.eq.s32.totalorder %v19708_v17, 0  ;;  %vm6889_vm9 = vcmp.eq.s32.totalorder %v19710_v43, 0 }
 0x4a4   : > { %v7870_v44 = vmul.f32 %v7854_v18, %v19740_v13  ;;  %v19768_v56 = vshrl.u32 %v5669_v32, 5  ;;  %v5672_v42 = vsub.s32 32, %v5671_v15  ;;  %v19772_v54 = vand.u32 8388607, %v22875_v60 }
 0x4a5   : > { %vm5232_vm10 = vcmp.lt.s32.totalorder %v19708_v17, 2  ;;  %vm6888_vm7 = vcmp.lt.s32.totalorder %v19710_v43, 2  ;;  %v19778_v40 = vmul.f32 %v19761_v31, %v19685_v20  ;;  %v5674_v35 = vshll.u32 %v23414_v19, %v5671_v15 }
 0x4a6   : > { %v5677_v55 = vshll.u32 %v23415_v61, %v5671_v15  ;;  %v12922_v52 = vadd.s32 4294967169, %v5869_v1  ;;  %vm5229_vm12 = vweird.f32 %v18693_v29  ;;  %v7886_v62 = vsub.f32 %v7870_v44, %v5032_v16 }
 0x4a7   : > { %v5675_v2 = vshrl.u32 %v23415_v61, %v5672_v42  ;;  %v5678_v26 = vshrl.u32 %v23416_v58, %v5672_v42  ;;  %v5680_v24 = vshll.u32 %v23416_v58, %v5671_v15  ;;  %v5681_v51 = vshrl.u32 %v23417_v63, %v5672_v42 }
 0x4a8   : > { %v5683_v38 = vshll.u32 %v23417_v63, %v5671_v15  ;;  %v5684_v20 = vshrl.u32 %v23418_v22, %v5672_v42  ;;  %v5687_v21 = vshrl.u32 %v23413_v25, %v5672_v42  ;;  %v13717_v32 = vpack.c.bf16 %v7886_v62, %v7854_v18  ;;  %v14412_v44 = vpop.eup %14411 }
 0x4a9   : > { %v7902_v1 = vmul.f32 %v7886_v62, %v19740_v13  ;;  %v5673_v60 = vshrl.u32 %v23414_v19, %v5672_v42  ;;  %v5686_v16 = vshll.u32 %v23418_v22, %v5671_v15  ;;  %v5676_v7 = vor.u32 %v5675_v2, %v5674_v35  ;;  %v14414_v41 = vpop.eup %14413 }
 0x4aa   : > { %v5679_v11 = vor.u32 %v5678_v26, %v5677_v55  ;;  %v5682_v33 = vor.u32 %v5681_v51, %v5680_v24  ;;  %v5685_v57 = vor.u32 %v5684_v20, %v5683_v38  ;;  %v5237_v39 = vxor.u32 2147483648, %v14412_v44  ;;  %13718 = vmatprep.subr.bf16.mxu0 %v13717_v32 }
 0x4ab   : > { %v7918_v50 = vsub.f32 %v7902_v1, %v7854_v18  ;;  %v5688_v53 = vor.u32 %v5687_v21, %v5686_v16  ;;  %vm5689_vm13 = vcmp.lt.s32.totalorder %v19768_v56, 1  ;;  %v5234_v45 = vxor.u32 2147483648, %v14414_v41  ;;  %13720 = vmatpush1.bf16.msra.mxu0 %v13719_v36 }
 0x4ac   : > { %vm5690_vm0 = vcmp.lt.s32.totalorder %v19768_v56, 2  ;;  %vm5691_vm1 = vcmp.lt.s32.totalorder %v19768_v56, 3  ;;  %vm5692_vm4 = vcmp.lt.s32.totalorder %v19768_v56, 4  ;;  %v5238_v15 = vsel %vm5236_vm15, %v5237_v39, %v14414_v41 }
 0x4ad   : > { %v6894_v42 = vsel %vm6892_vm3, %v5237_v39, %v14414_v41  ;;  %v7934_v35 = vmul.f32 %v7918_v50, %v19740_v13  ;;  %v5694_v18 = vsel %vm5692_vm4, %v5682_v33, 2102212464  ;;  %v5235_v36 = vsel %vm5233_vm5, %v14412_v44, %v5234_v45 }
 0x4ae   : > { %v6891_v55 = vsel %vm6889_vm9, %v14412_v44, %v5234_v45  ;;  %v5693_v2 = vsel %vm5689_vm13, %v5673_v60, %v5676_v7  ;;  %v5695_v26 = vsel %vm5691_vm1, %v5679_v11, %v5694_v18  ;;  %v5239_v41 = vsel %vm5232_vm10, %v5235_v36, %v5238_v15 }
 0x4af   : > { %v6895_v39 = vsel %vm6888_vm7, %v6891_v55, %v6894_v42  ;;  %v7950_v13 = vsub.f32 %v7934_v35, %v7886_v62  ;;  %v5697_v24 = vsel %vm5689_vm13, %v5676_v7, %v5679_v11  ;;  %v5240_v51 = vsel %vm5229_vm12, nan, %v5239_v41  ;;  %v19868_v55 = vld [vmem:[%s22655_s7] sm:$0xff] }
 0x4b0   : > { %v6896_v45 = vsel %vm5229_vm12, nan, %v6895_v39  ;;  %v5698_v60 = vsel %vm5692_vm4, %v5685_v57, 920167782  ;;  %v5701_v17 = vsel %vm5689_vm13, %v5679_v11, %v5682_v33  ;;  %v13725_v43 = vpack.c.bf16 %v5240_v51, %v19749_v14 }
 0x4b1   : > { %v7728_v38 = vmul.f32 2.0, %v6896_v45  ;;  %v13721_v20 = vpack.c.bf16 %v7950_v13, %v7918_v50  ;;  %v5699_v62 = vsel %vm5691_vm1, %v5682_v33, %v5698_v60  ;;  %v7951_v7 = vsub.f32 %v19778_v40, %v19719_v30 }
 0x4b2   : > { %v5700_v21 = vsel %vm5690_vm0, %v5697_v24, %v5699_v62  ;;  %v5702_v32 = vsel %vm5692_vm4, %v5688_v53, 1326507024  ;;  %v5875_v1 = vadd.s32 1, %v12922_v52  ;;  %13726 = vmatprep.subr.bf16.mxu1 %v13725_v43  ;;  %v23447_v33 = vpack.c.bf16 %v19690_v3, %v19744_v28 }
 0x4b3   : > { %v7856_v16 = vmul.f32 %v7728_v38, %v5240_v51  ;;  %13722 = vmatprep.subr.bf16.mxu0 %v13721_v20  ;;  %v5703_v14 = vsel %vm5691_vm1, %v5685_v57, %v5702_v32  ;;  %v19838_v50 = vmul.u32.u64.low %v19763_v49, %v5700_v21  ;;  %v19839_v11 = vmul.u32.u64.high %v19763_v49, %v5700_v21, %v19838_v50 }
 0x4b4   : > { %13728 = vmatpush1.bf16.msra.mxu1 %v23447_v33  ;;  %13724 = vmatpush1.bf16.msra.mxu0 %v19758_v8  ;;  %v5696_v53 = vsel %vm5690_vm0, %v5693_v2, %v5695_v26  ;;  %v5704_v40 = vsel %vm5690_vm0, %v5701_v17, %v5703_v14  ;;  %v5873_v52 = vor.u32 8388608, %v19772_v54  ;;  %vm5876_vm2 = vcmp.gt.s32.totalorder %v5875_v1, 0 }
 0x4b5   : > { %v7872_v57 = vmul.f32 %v7856_v16, %v7728_v38  ;;  %v19852_v44 = vmul.u32.u64.low %v19763_v49, %v5704_v40  ;;  %v19853_v15 = vmul.u32.u64.high %v19763_v49, %v5704_v40, %v19852_v44  ;;  %v5877_v42 = vsel %vm5876_vm2, %v5875_v1, 0 }
 0x4b6   : > { %v23448_v3 = vand.u32 2147483647, %v19603_v6  ;;  %v23449_v28 = vcvt.s32.f32 %v19599_v34  ;;  %v13731_v35 = vpack.c.bf16 %v19719_v30, %v19698_v27  ;;  %v5879_v56 = vand.u32 31, %v5877_v42 }
 0x4b7   : > { %v5764_v18 = vand.u32 2139095040, %v19441_v5  ;;  %v7888_v54 = vsub.f32 %v7872_v57, %v5240_v51  ;;  %v13735_v36 = vpack.c.bf16 %v7951_v7, %v19761_v31  ;;  %13012 = vmatmul.mubr.msk.f32.vlgmr.msra.gmra.mrb[170].mxu0 %vm22899_vm14, %v19868_v55  ;;  %v5712_v34 = vmul.u32 %v19763_v49, %v5696_v53 }
 0x4b8   : > { %v19859_v8 = vmul.f32 %v23449_v28, %v23448_v3  ;;  %v5715_v6 = vadd.s32 1, %v19839_v11  ;;  %v19874_v2 = vshrl.u32 %v5877_v42, 5  ;;  %v5880_v27 = vsub.s32 32, %v5879_v56  ;;  %8314 = vmatprep.mubr.f32.mxu0 %v23387_v23 }
 0x4b9   : > { %v5882_v30 = vshll.u32 %v23414_v19, %v5879_v56  ;;  %v19877_v26 = vshll.u32 %v5873_v52, 8  ;;  %v13729_v31 = vpack.c.bf16 %v7888_v54, %v7856_v16  ;;  %v7904_v41 = vmul.f32 %v7888_v54, %v7728_v38 }
 0x4ba   : > { %vm5714_vm6 = vc.u32 %v19853_v15, %v19838_v50  ;;  %v5885_v39 = vshll.u32 %v23415_v61, %v5879_v56  ;;  %v5883_v13 = vshrl.u32 %v23415_v61, %v5880_v27  ;;  %v5886_v24 = vshrl.u32 %v23416_v58, %v5880_v27 }
 0x4bb   : > { %v5716_v49 = vsel %vm5714_vm6, %v5715_v6, %v19839_v11  ;;  %v5888_v51 = vshll.u32 %v23416_v58, %v5879_v56  ;;  %13730 = vmatprep.subr.bf16.mxu1 %v13729_v31  ;;  %v7920_v45 = vsub.f32 %v7904_v41, %v7856_v16  ;;  %v5889_v17 = vshrl.u32 %v23417_v63, %v5880_v27 }
 0x4bc   : > { %v5717_v60 = vadd.s32 %v5716_v49, %v5712_v34  ;;  %v5891_v43 = vshll.u32 %v23417_v63, %v5879_v56  ;;  %13732 = vmatpush1.bf16.msra.mxu1 %v13731_v35  ;;  %v5884_v20 = vor.u32 %v5883_v13, %v5882_v30  ;;  %v5887_v62 = vor.u32 %v5886_v24, %v5885_v39 }
 0x4bd   : > { %v5892_v7 = vshrl.u32 %v23418_v22, %v5880_v27  ;;  %v5894_v21 = vshll.u32 %v23418_v22, %v5879_v56  ;;  %v7936_v32 = vmul.f32 %v7920_v45, %v7728_v38  ;;  %v5890_v14 = vor.u32 %v5889_v17, %v5888_v51 }
 0x4be   : > { %v5718_v1 = vadd.s32 536870912, %v5717_v60  ;;  %v5895_v11 = vshrl.u32 %v23413_v25, %v5880_v27  ;;  %v5881_v33 = vshrl.u32 %v23414_v19, %v5880_v27  ;;  %vm5897_vm8 = vcmp.lt.s32.totalorder %v19874_v2, 1 }
 0x4bf   : > { %v5893_v16 = vor.u32 %v5892_v7, %v5891_v43  ;;  %vm5898_vm11 = vcmp.lt.s32.totalorder %v19874_v2, 2  ;;  %vm5243_vm15 = vcmp.lt.s32.totalorder %v18976_v37, 0  ;;  %v7952_v53 = vsub.f32 %v7936_v32, %v7888_v54 }
 0x4c0   : > { %v19896_v40 = vshrl.u32 %v5718_v1, 30  ;;  %v5896_v52 = vor.u32 %v5895_v11, %v5894_v21  ;;  %vm5900_vm3 = vcmp.lt.s32.totalorder %v19874_v2, 4  ;;  %vm5899_vm5 = vcmp.lt.s32.totalorder %v19874_v2, 3 }
 0x4c1   : > { %v5902_v38 = vsel %vm5900_vm3, %v5890_v14, 2102212464  ;;  %v5905_v57 = vsel %vm5897_vm8, %v5884_v20, %v5887_v62  ;;  %v5906_v44 = vsel %vm5900_vm3, %v5893_v16, 920167782  ;;  %v13733_v42 = vpack.c.bf16 %v7952_v53, %v7920_v45 }
 0x4c2   : > { %23450 = vst [vmem:[#allocation59_spill] sm:$0xff] %v19896_v40  ;;  %v5720_v3 = vshll.u32 %v19896_v40, 30  ;;  %v5901_v28 = vsel %vm5897_vm8, %v5881_v33, %v5884_v20  ;;  %v5907_v35 = vsel %vm5899_vm5, %v5890_v14, %v5906_v44  ;;  %v23451_v56 = vand.u32 2147483647, %v18976_v37 }
 0x4c3   : > { %vm5451_vm10 = vcmp.lt.s32.totalorder %v18988_v46, 0  ;;  %v5903_v34 = vsel %vm5899_vm5, %v5887_v62, %v5902_v38  ;;  %v5908_v6 = vsel %vm5898_vm11, %v5905_v57, %v5907_v35  ;;  %v5909_v27 = vsel %vm5897_vm8, %v5887_v62, %v5890_v14  ;;  %13734 = vmatprep.subr.bf16.mxu1 %v13733_v42 }
 0x4c4   : > { %vm19909_vm9 = vcmp.le.f32.partialorder %v23451_v56, 0.7853982  ;;  %v5910_v30 = vsel %vm5900_vm3, %v5896_v52, 1326507024  ;;  %v19920_v31 = vsub.s32 %v5717_v60, %v5720_v3  ;;  %v5325_v13 = vxor.u32 2147483648, %v19590_v48  ;;  %13736 = vmatpush1.bf16.msra.mxu1 %v13735_v36  ;;  %v23457_v52 = vld [vmem:[#allocation41_spill] sm:$0xff] }
 0x4c5   : > { %v5911_v41 = vsel %vm5899_vm5, %v5893_v16, %v5910_v30  ;;  %v19925_v39 = vmul.u32.u64.low %v19877_v26, %v5908_v6  ;;  %v19926_v49 = vmul.u32.u64.high %v19877_v26, %v5908_v6, %v19925_v39  ;;  %v5765_v51 = vshrl.u32 %v5764_v18, 23  ;;  %v23458_v30 = vld [vmem:[#allocation56_spill] sm:$0xff] }
 0x4c6   : > { %v5912_v24 = vsel %vm5898_vm11, %v5909_v27, %v5911_v41  ;;  %v5972_v45 = vand.u32 2139095040, %v19443_v47  ;;  %v23454_v60 = vand.u32 2147483647, %v18988_v46  ;;  %v19942_v43 = vsub.s32 32, %v19595_v59 }
 0x4c7   : > { %v5723_v20 = vsub.s32 0, %v19920_v31  ;;  %v19946_v36 = vmul.u32.u64.low %v19877_v26, %v5912_v24  ;;  %v19947_v62 = vmul.u32.u64.high %v19877_v26, %v5912_v24, %v19946_v36  ;;  %v19950_v7 = vshrl.u32 %v19467_v9, 5  ;;  %13013 = vmatmul.mubr.msk.f32.vlgmr.msra.gmra.mrb[170].mxu1 %vm22899_vm14, %v19868_v55 }
 0x4c8   : > { %vm19937_vm7 = vcmp.le.f32.partialorder %v23454_v60, 0.7853982  ;;  %v5374_v18 = vshll.u32 %v23418_v22, %v19480_v12  ;;  %v5375_v21 = vshrl.u32 %v23413_v25, %v19547_v0  ;;  %v5904_v32 = vsel %vm5898_vm11, %v5901_v28, %v5903_v34  ;;  %8385 = vmatprep.mubr.f32.mxu1 %v23387_v23 }
 0x4c9   : > { %v5533_v1 = vxor.u32 2147483648, %v19859_v8  ;;  %v19961_v14 = vor.u32 %v19571_v10, %v19565_v4  ;;  %v12915_v9 = vmin.u32 %v5723_v20, %v19920_v31  ;;  %v5923_v11 = vadd.s32 1, %v19926_v49 }
 0x4ca   : > { %v5326_v33 = vsel %vm5243_vm15, %v5325_v13, %v19590_v48  ;;  %v5579_v2 = vshll.u32 %v23417_v63, %v19595_v59  ;;  %v12918_v16 = vadd.s32 4294967169, %v5765_v51  ;;  %v5973_v53 = vshrl.u32 %v5972_v45, 23 }
 0x4cb   : > { %v5580_v4 = vshrl.u32 %v23418_v22, %v19942_v43  ;;  %v5725_v10 = vclz %v12915_v9  ;;  %v5920_v55 = vmul.u32 %v19877_v26, %v5904_v32  ;;  %vm5922_vm12 = vc.u32 %v19947_v62, %v19925_v39 }
 0x4cc   : > { %v19979_v38 = vshrl.u32 %v23457_v52, 5  ;;  %v5582_v48 = vshll.u32 %v23418_v22, %v19595_v59  ;;  %v5583_v57 = vshrl.u32 %v23413_v25, %v19942_v43  ;;  %v5924_v44 = vsel %vm5922_vm12, %v5923_v11, %v19926_v49  ;;  %v23460_v11 = vld [vmem:[#allocation36_spill] sm:$0xff] }
 0x4cd   : > { %v5329_v42 = vsel %vm19909_vm9, %v18976_v37, %v5326_v33  ;;  %v5534_v26 = vsel %vm5451_vm10, %v5533_v1, %v19859_v8  ;;  %v12916_v3 = vadd.s32 4294967294, %v5725_v10  ;;  %v5925_v28 = vadd.s32 %v5924_v44, %v5920_v55 }
 0x4ce   : > { %v5376_v35 = vor.u32 %v5375_v21, %v5374_v18  ;;  %vm5380_vm13 = vcmp.lt.s32.totalorder %v19950_v7, 4  ;;  %v5771_v56 = vadd.s32 1, %v12918_v16  ;;  %v12926_v34 = vadd.s32 4294967169, %v5973_v53 }
 0x4cf   : > { %v19993_v6 = vor.u32 %v5580_v4, %v5579_v2  ;;  %vm12917_vm0 = vcmp.lt.s32.totalorder %v12916_v3, 0  ;;  %v5926_v27 = vadd.s32 536870912, %v5925_v28  ;;  %v22888_v41 = vand.u32 2147483647, %v23458_v30 }
 0x4d0   : > { %14415 = vcosq.f32 %v5329_v42  ;;  %v5537_v49 = vsel %vm19937_vm7, %v18988_v46, %v5534_v26  ;;  %v5584_v13 = vor.u32 %v5583_v57, %v5582_v48  ;;  %v19999_v8 = vsel %vm12917_vm0, 0, %v12916_v3 }
 0x4d1   : > { %14417 = vsinq.f32 %v5329_v42  ;;  %v5386_v24 = vsel %vm5380_vm13, %v19961_v14, 920167782  ;;  %vm5588_vm1 = vcmp.lt.s32.totalorder %v19979_v38, 4  ;;  %v20005_v51 = vshrl.u32 %v5926_v27, 30 }
 0x4d2   : > { %vm5772_vm4 = vcmp.gt.s32.totalorder %v5771_v56, 0  ;;  %v5979_v45 = vadd.s32 1, %v12926_v34  ;;  %v5362_v60 = vshll.u32 %v23414_v19, %v19480_v12  ;;  %v5363_v20 = vshrl.u32 %v23415_v61, %v19547_v0 }
 0x4d3   : > { %23459 = vst [vmem:[#allocation21_spill] sm:$0xff] %v20005_v51  ;;  %14419 = vcosq.f32 %v5537_v49  ;;  %v5733_v36 = vsub.s32 4294967266, %v19999_v8  ;;  %v5928_v18 = vshll.u32 %v20005_v51, 30  ;;  %v5352_v21 = vand.u32 8388607, %v22888_v41 }
 0x4d4   : > { %14421 = vsinq.f32 %v5537_v49  ;;  %v5390_v32 = vsel %vm5380_vm13, %v5376_v35, 1326507024  ;;  %v20020_v1 = vsel %vm5588_vm1, %v19993_v6, 920167782  ;;  %v20024_v9 = vsel %vm5588_vm1, %v5584_v13, 1326507024 }
 0x4d5   : > { %v13006_v33 = vmul.f32 -1.442695, %v23460_v11  ;;  %v20027_v2 = vsub.s32 %v5925_v28, %v5928_v18  ;;  %v5773_v16 = vsel %vm5772_vm4, %v5771_v56, 0  ;;  %v5361_v53 = vshrl.u32 %v23414_v19, %v19547_v0 }
 0x4d6   : > { %vm5980_vm2 = vcmp.gt.s32.totalorder %v5979_v45, 0  ;;  %v5364_v4 = vor.u32 %v5363_v20, %v5362_v60  ;;  %v5365_v10 = vshll.u32 %v23415_v61, %v19480_v12  ;;  %v5366_v55 = vshrl.u32 %v23416_v58, %v19547_v0 }
 0x4d7   : > { %v5734_v52 = vadd.s32 127, %v5733_v36  ;;  %v5931_v48 = vsub.s32 0, %v20027_v2  ;;  %v5353_v57 = vor.u32 8388608, %v5352_v21  ;;  %v5368_v44 = vshll.u32 %v23416_v58, %v19480_v12 }
 0x4d8   : > { %v5713_v42 = vadd.s32 %v19838_v50, %v19853_v15  ;;  %v20040_v26 = vand.u32 31, %v5773_v16  ;;  %v5367_v3 = vor.u32 %v5366_v55, %v5365_v10  ;;  %v5369_v28 = vshrl.u32 %v23417_v63, %v19547_v0 }
 0x4d9   : > { %v5729_v35 = vsub.s32 32, %v19999_v8  ;;  %v12923_v56 = vmin.u32 %v5931_v48, %v20027_v2  ;;  %v5981_v34 = vsel %vm5980_vm2, %v5979_v45, 0  ;;  %vm5377_vm6 = vcmp.lt.s32.totalorder %v19950_v7, 1 }
 0x4da   : > { %v20047_v27 = vpop.eup %14415  ;;  %v5370_v49 = vor.u32 %v5369_v28, %v5368_v44  ;;  %vm5378_vm8 = vcmp.lt.s32.totalorder %v19950_v7, 2  ;;  %vm5379_vm11 = vcmp.lt.s32.totalorder %v19950_v7, 3  ;;  %v5385_v12 = vsel %vm5377_vm6, %v5364_v4, %v5367_v3 }
 0x4db   : > { %v20051_v50 = vpop.eup %14417  ;;  %v5735_v15 = vshll.u32 %v5734_v52, 23  ;;  %v5381_v13 = vsel %vm5377_vm6, %v5361_v53, %v5364_v4  ;;  %v5391_v0 = vsel %vm5379_vm11, %v19961_v14, %v5390_v32  ;;  %v5393_v60 = vshll.u32 %v5353_v57, 8 }
 0x4dc   : > { %v20055_v20 = vsub.s32 32, %v20040_v26  ;;  %v5382_v45 = vsel %vm5380_vm13, %v5370_v49, 2102212464  ;;  %v5387_v36 = vsel %vm5379_vm11, %v5370_v49, %v5386_v24  ;;  %v5389_v18 = vsel %vm5377_vm6, %v5367_v3, %v5370_v49 }
 0x4dd   : > { %v20059_v21 = vpop.eup %14419  ;;  %v5731_v10 = vshrl.u32 %v5713_v42, %v5729_v35  ;;  %v5933_v55 = vclz %v12923_v56  ;;  %v5383_v48 = vsel %vm5379_vm11, %v5367_v3, %v5382_v45  ;;  %v5388_v52 = vsel %vm5378_vm8, %v5385_v12, %v5387_v36  ;;  %v23461_v35 = vld [vmem:[#allocation71_spill] sm:$0xff] }
 0x4de   : > { %v20063_v53 = vpop.eup %14421  ;;  %v5384_v14 = vsel %vm5378_vm8, %v5381_v13, %v5383_v48  ;;  %v5392_v32 = vsel %vm5378_vm8, %v5389_v18, %v5391_v0  ;;  %v20069_v4 = vmul.u32.u64.low %v5393_v60, %v5388_v52  ;;  %v20070_v57 = vmul.u32.u64.high %v5393_v60, %v5388_v52, %v20069_v4 }
 0x4df   : > { %v5730_v24 = vshll.u32 %v19920_v31, %v19999_v8  ;;  %v5736_v44 = vor.u32 4788187, %v5735_v15  ;;  %v20075_v42 = vmul.u32.u64.low %v5393_v60, %v5392_v32  ;;  %v20076_v3 = vmul.u32.u64.high %v5393_v60, %v5392_v32, %v20075_v42 }
 0x4e0   : > { %14423 = vpow2.f32 %v13006_v33  ;;  %v20080_v28 = vadd.s32 %v19925_v39, %v19947_v62  ;;  %v20083_v56 = vmul.f32 -1.442695, %v23461_v35  ;;  %v20086_v7 = vmul.f32 -1.442695, %v19441_v5  ;;  %v23464_v39 = vld [vmem:[#allocation25_spill] sm:$0xff] }
 0x4e1   : > { %v5732_v49 = vor.u32 %v5731_v10, %v5730_v24  ;;  %v12924_v12 = vadd.s32 4294967294, %v5933_v55  ;;  %v20088_v13 = vand.u32 31, %v5981_v34  ;;  %v5400_v31 = vmul.u32 %v5393_v60, %v5384_v14 }
 0x4e2   : > { %23462 = vst [vmem:[#allocation18_spill] sm:$0xff] %v20083_v56  ;;  %23463 = vst [vmem:[#allocation16_spill] sm:$0xff] %v20086_v7  ;;  %v20090_v8 = vshrl.u32 %v5773_v16, 5  ;;  %v5787_v33 = vshll.u32 %v23417_v63, %v20040_v26  ;;  %v5403_v15 = vadd.s32 1, %v20070_v57  ;;  %v22887_v62 = vand.u32 2147483647, %v23464_v39 }
 0x4e3   : > { %v5737_v0 = vand.u32 2147483647, %v5736_v44  ;;  %v5788_v45 = vshrl.u32 %v23418_v22, %v20055_v20  ;;  %v20100_v36 = vshll.u32 %v23418_v22, %v20040_v26  ;;  %vm5402_vm3 = vc.u32 %v20076_v3, %v20069_v4  ;;  %v23470_v7 = vld [vmem:[#allocation57_spill] sm:$0xff] }
 0x4e4   : > { %v20106_v16 = vshrl.u32 %v23413_v25, %v20055_v20  ;;  %v20108_v60 = vshrl.u32 %v5981_v34, 5  ;;  %v5404_v18 = vsel %vm5402_vm3, %v5403_v15, %v20070_v57  ;;  %v5560_v10 = vand.u32 8388607, %v22887_v62 }
 0x4e5   : > { %v5739_v55 = vcvt.s32.f32 %v5732_v49  ;;  %vm12925_vm5 = vcmp.lt.s32.totalorder %v12924_v12, 0  ;;  %v20114_v48 = vsub.s32 32, %v20088_v13  ;;  %v5405_v52 = vadd.s32 %v5404_v18, %v5400_v31 }
 0x4e6   : > { %vm22897_vm12 = vcmp.lt.s32.totalorder %v23460_v11, 0  ;;  %v5570_v14 = vshll.u32 %v23414_v19, %v19595_v59  ;;  %v5571_v34 = vshrl.u32 %v23415_v61, %v19942_v43  ;;  %v5573_v32 = vshll.u32 %v23415_v61, %v19595_v59 }
 0x4e7   : > { %v5574_v57 = vshrl.u32 %v23416_v58, %v19942_v43  ;;  %v5740_v24 = vmul.f32 %v5739_v55, %v5737_v0  ;;  %v20125_v44 = vor.u32 %v5788_v45, %v5787_v33  ;;  %v5406_v42 = vadd.s32 536870912, %v5405_v52 }
 0x4e8   : > { %v5576_v49 = vshll.u32 %v23416_v58, %v19595_v59  ;;  %v5792_v31 = vor.u32 %v20106_v16, %v20100_v36  ;;  %v5561_v15 = vor.u32 8388608, %v5560_v10  ;;  %v5577_v62 = vshrl.u32 %v23417_v63, %v19942_v43 }
 0x4e9   : > { %v5575_v18 = vor.u32 %v5574_v57, %v5573_v32  ;;  %v5936_v41 = vsel %vm12925_vm5, 0, %v12924_v12  ;;  %vm5796_vm13 = vcmp.lt.s32.totalorder %v20090_v8, 4  ;;  %v20135_v29 = vshrl.u32 %v5406_v42, 30 }
 0x4ea   : > { %vm5585_vm0 = vcmp.lt.s32.totalorder %v19979_v38, 1  ;;  %vm5587_vm4 = vcmp.lt.s32.totalorder %v19979_v38, 3  ;;  %v20139_v33 = vpop.eup %14423  ;;  %v23466_v59 = vand.u32 2147483647, %v23460_v11  ;;  %v23467_v0 = vmov 0 }
 0x4eb   : > { %23465 = vst [vmem:[#allocation69_spill] sm:$0xff] %v20139_v33  ;;  %v5996_v45 = vshrl.u32 %v23418_v22, %v20114_v48  ;;  %v5999_v12 = vshrl.u32 %v23413_v25, %v20114_v48  ;;  %v5572_v36 = vor.u32 %v5571_v34, %v5570_v14  ;;  %v5578_v16 = vor.u32 %v5577_v62, %v5576_v49 }
 0x4ec   : > { %vm20143_vm2 = vcmp.le.f32.partialorder %v23466_v59, 0.7853982  ;;  %v5741_v10 = vxor.u32 2147483648, %v5740_v24  ;;  %v5408_v55 = vshll.u32 %v20135_v29, 30  ;;  %vm5586_vm6 = vcmp.lt.s32.totalorder %v19979_v38, 2 }
 0x4ed   : > { %v23468_v0 = vsel %vm20143_vm2, 4294967295, %v23467_v0  ;;  %v5599_v32 = vsel %vm5587_vm4, %v19993_v6, %v20024_v9  ;;  %v5941_v57 = vsub.s32 4294967266, %v5936_v41  ;;  %v5995_v42 = vshll.u32 %v23417_v63, %v20088_v13 }
 0x4ee   : > { %23469 = vst [vmem:[#allocation42_spill] sm:$0xff] %v23468_v0  ;;  %v5597_v59 = vsel %vm5585_vm0, %v5575_v18, %v5578_v16  ;;  %v20161_v25 = vshll.u32 %v5561_v15, 8  ;;  %v5937_v62 = vsub.s32 32, %v5936_v41  ;;  %v5998_v14 = vshll.u32 %v23418_v22, %v20088_v13 }
 0x4ef   : > { %v20165_v34 = vsub.s32 %v5405_v52, %v5408_v55  ;;  %v5569_v49 = vshrl.u32 %v23414_v19, %v19942_v43  ;;  %v5590_v6 = vsel %vm5588_vm1, %v5578_v16, 2102212464  ;;  %v5593_v9 = vsel %vm5585_vm0, %v5572_v36, %v5575_v18 }
 0x4f0   : > { %v5595_v15 = vsel %vm5587_vm4, %v5578_v16, %v20020_v1  ;;  %v5600_v33 = vsel %vm5586_vm6, %v5597_v59, %v5599_v32  ;;  %v5742_v52 = vsel %vm22897_vm12, %v5741_v10, %v5740_v24  ;;  %v20180_v55 = vor.u32 %v5996_v45, %v5995_v42 }
 0x4f1   : > { %v6000_v22 = vor.u32 %v5999_v12, %v5998_v14  ;;  %v5411_v43 = vsub.s32 0, %v20165_v34  ;;  %v5942_v51 = vadd.s32 127, %v5941_v57  ;;  %14425 = vpow2.f32 %v23470_v7  ;;  %v23472_v14 = vld [vmem:[#allocation70_spill] sm:$0xff] }
 0x4f2   : > { %v20185_v56 = vmul.u32.u64.low %v20161_v25, %v5600_v33  ;;  %v20186_v40 = vmul.u32.u64.high %v20161_v25, %v5600_v33, %v20185_v56  ;;  %v5589_v16 = vsel %vm5585_vm0, %v5569_v49, %v5572_v36  ;;  %v5591_v24 = vsel %vm5587_vm4, %v5575_v18, %v5590_v6 }
 0x4f3   : > { %v12903_v1 = vmin.u32 %v5411_v43, %v20165_v34  ;;  %v5596_v45 = vsel %vm5586_vm6, %v5593_v9, %v5595_v15  ;;  %v5939_v12 = vshrl.u32 %v20080_v28, %v5937_v62  ;;  %v20199_v7 = vsel %vm5796_vm13, %v20125_v44, 920167782 }
 0x4f4   : > { %vm22898_vm1 = vcmp.lt.s32.totalorder %v20108_v60, 4  ;;  %v20203_v56 = vmul.f32 -1.442695, %v19443_v47  ;;  %v20208_v33 = vsel %vm20143_vm2, %v23460_v11, %v5742_v52  ;;  %v20212_v18 = vsel %vm5796_vm13, %v5792_v31, 1326507024 }
 0x4f5   : > { %v20217_v28 = vsel %vm22898_vm1, %v20180_v55, 920167782  ;;  %vm5347_vm8 = vcmp.lt.s32.totalorder %v23458_v30, 0  ;;  %v5413_v36 = vclz %v12903_v1  ;;  %v5938_v10 = vshll.u32 %v20027_v2, %v5936_v41  ;;  %v23476_v1 = vld [vmem:[#allocation72_spill] sm:$0xff] }
 0x4f6   : > { %23471 = vst [vmem:[#allocation45_spill] sm:$0xff] %v20203_v56  ;;  %v5592_v32 = vsel %vm5586_vm6, %v5589_v16, %v5591_v24  ;;  %v20224_v57 = vmul.u32.u64.low %v20161_v25, %v5596_v45  ;;  %v20225_v42 = vmul.u32.u64.high %v20161_v25, %v5596_v45, %v20224_v57  ;;  %v5943_v31 = vshll.u32 %v5942_v51, 23 }
 0x4f7   : > { %v20230_v59 = vsel %vm22898_vm1, %v6000_v22, 1326507024  ;;  %v12904_v62 = vadd.s32 4294967294, %v5413_v36  ;;  %v5327_v49 = vsub.s32 4, %v23472_v14  ;;  %14427 = vcosq.f32 %v20208_v33 }
 0x4f8   : > { %v20234_v6 = vor.u32 %v5939_v12, %v5938_v10  ;;  %v23473_v38 = vand.u32 2147483647, %v23458_v30  ;;  %v5401_v51 = vadd.s32 %v20069_v4, %v20076_v3  ;;  %v5431_v2 = vsub.s32 4, %v20135_v29 }
 0x4f9   : > { %vm12905_vm3 = vcmp.lt.s32.totalorder %v12904_v62, 0  ;;  %v5608_v22 = vmul.u32 %v20161_v25, %v5592_v32  ;;  %vm5610_vm5 = vc.u32 %v20186_v40, %v20224_v57  ;;  %v5328_v9 = vsel %vm5243_vm15, %v5327_v49, %v23472_v14 }
 0x4fa   : > { %vm20238_vm11 = vcmp.le.f32.partialorder %v23473_v38, 0.7853982  ;;  %v5416_v15 = vsel %vm12905_vm3, 0, %v12904_v62  ;;  %v5611_v52 = vadd.s32 1, %v20225_v42  ;;  %v5330_v43 = vsel %vm19909_vm9, 0, %v5328_v9 }
 0x4fb   : > { %v5535_v4 = vsub.s32 4, %v23476_v1  ;;  %v5944_v3 = vor.u32 4788187, %v5943_v31  ;;  %v5417_v16 = vsub.s32 32, %v5416_v15  ;;  %v5421_v24 = vsub.s32 4294967266, %v5416_v15  ;;  %v14426_v25 = vpop.eup %14425 }
 0x4fc   : > { %v5334_v45 = vadd.s32 3, %v5330_v43  ;;  %v5612_v12 = vsel %vm5610_vm5, %v5611_v52, %v20225_v42  ;;  %v5338_v36 = vxor.u32 2147483648, %v20051_v50  ;;  %v5341_v10 = vxor.u32 2147483648, %v20047_v27 }
 0x4fd   : > { %v6990_v32 = vand.u32 3, %v5330_v43  ;;  %v5418_v62 = vshll.u32 %v20165_v34, %v5416_v15  ;;  %v5419_v14 = vshrl.u32 %v5401_v51, %v5417_v16  ;;  %v5422_v49 = vadd.s32 127, %v5421_v24  ;;  %v23477_v15 = vld [vmem:[#allocation58_spill] sm:$0xff] }
 0x4fe   : > { %v5613_v54 = vadd.s32 %v5612_v12, %v5608_v22  ;;  %v5432_v31 = vsel %vm5347_vm8, %v5431_v2, %v20135_v29  ;;  %v5335_v38 = vand.u32 3, %v5334_v45  ;;  %v5536_v42 = vsel %vm5451_vm10, %v5535_v4, %v23476_v1  ;;  %v23478_v1 = vld [vmem:[#allocation31_spill] sm:$0xff] }
 0x4ff   : > { %vm6992_vm15 = vcmp.eq.s32.totalorder %v6990_v32, 0  ;;  %v5420_v9 = vor.u32 %v5419_v14, %v5418_v62  ;;  %v5423_v52 = vshll.u32 %v5422_v49, 23  ;;  %vm6995_vm9 = vcmp.eq.s32.totalorder %v6990_v32, 2 }
 0x500   : > { %v5614_v0 = vadd.s32 536870912, %v5613_v54  ;;  %v5945_v43 = vand.u32 2147483647, %v5944_v3  ;;  %v7794_v56 = vadd.f32 1.0, %v14426_v25  ;;  %v6994_v34 = vsel %vm6992_vm15, %v20047_v27, %v5338_v36 }
 0x501   : > { %v6997_v51 = vsel %vm6995_vm9, %v5341_v10, %v20051_v50  ;;  %v5424_v22 = vor.u32 4788187, %v5423_v52  ;;  %v5434_v29 = vsel %vm20238_vm11, 0, %v5432_v31  ;;  %14429 = vpow2.f32 %v23477_v15  ;;  %v20270_v16 = vpop.eup %14427 }
 0x502   : > { %v5615_v2 = vshrl.u32 %v5614_v0, 30  ;;  %vm5337_vm10 = vcmp.eq.s32.totalorder %v5335_v38, 0  ;;  %vm6991_vm0 = vcmp.lt.s32.totalorder %v6990_v32, 2  ;;  %v7793_v4 = vadd.f32 1.0, %v23478_v1 }
 0x503   : > { %v5538_v3 = vsel %vm19937_vm7, 0, %v5536_v42  ;;  %v5425_v24 = vand.u32 2147483647, %v5424_v22  ;;  %v5427_v45 = vcvt.s32.f32 %v5420_v9  ;;  %v6998_v12 = vsel %vm6991_vm0, %v6994_v34, %v6997_v51 }
 0x504   : > { %v5616_v25 = vshll.u32 %v5615_v2, 30  ;;  %14431 = vrcp.f32 %v7794_v56  ;;  %vm5333_vm4 = vweird.f32 %v18976_v37  ;;  %v5339_v0 = vsel %vm5337_vm10, %v20047_v27, %v5338_v36 }
 0x505   : > { %vm5340_vm6 = vcmp.eq.s32.totalorder %v5335_v38, 2  ;;  %v5428_v62 = vmul.f32 %v5427_v45, %v5425_v24  ;;  %v5639_v49 = vsub.s32 4, %v5615_v2  ;;  %v5947_v31 = vcvt.s32.f32 %v20234_v6 }
 0x506   : > { %v20277_v14 = vsub.s32 %v5613_v54, %v5616_v25  ;;  %v5342_v32 = vsel %vm5340_vm6, %v5341_v10, %v20051_v50  ;;  %v5438_v17 = vadd.s32 3, %v5434_v29  ;;  %v6999_v42 = vsel %vm5333_vm4, nan, %v6998_v12  ;;  %v20315_v12 = vpop.f32.mrb[168].mxu0 }
 0x507   : > { %v5542_v9 = vadd.s32 3, %v5538_v3  ;;  %v5429_v52 = vxor.u32 2147483648, %v5428_v62  ;;  %vm5336_vm7 = vcmp.lt.s32.totalorder %v5335_v38, 2  ;;  %14433 = vrcp.f32 %v7793_v4  ;;  %23482 = vst [vmem:[#allocation40_spill] sm:$0xff] %v20315_v12 }
 0x508   : > { %v5619_v56 = vsub.s32 0, %v20277_v14  ;;  %v20284_v27 = vmul.f32 %v5947_v31, %v5945_v43  ;;  %v23479_v36 = vand.u32 2147483647, %v23464_v39  ;;  %vm5555_vm5 = vcmp.lt.s32.totalorder %v23464_v39, 0 }
 0x509   : > { %v5343_v50 = vsel %vm5336_vm7, %v5339_v0, %v5342_v32  ;;  %v5430_v6 = vsel %vm5347_vm8, %v5429_v52, %v5428_v62  ;;  %v5640_v38 = vsel %vm5555_vm5, %v5639_v49, %v5615_v2  ;;  %v20298_v34 = vmul.f32 2.0, %v6999_v42 }
 0x50a   : > { %vm20288_vm3 = vcmp.le.f32.partialorder %v23479_v36, 0.7853982  ;;  %v12911_v10 = vmin.u32 %v5619_v56, %v20277_v14  ;;  %v5433_v43 = vsel %vm20238_vm11, %v23458_v30, %v5430_v6  ;;  %v20303_v51 = vand.u32 3, %v5438_v17 }
 0x50b   : > { %v20305_v22 = vand.u32 3, %v5434_v29  ;;  %v5543_v15 = vand.u32 3, %v5542_v9  ;;  %v14430_v1 = vpop.eup %14429  ;;  %14435 = vcosq.f32 %v5433_v43  ;;  %v5546_v24 = vxor.u32 2147483648, %v20063_v53 }
 0x50c   : > { %v5621_v4 = vclz %v12911_v10  ;;  %v5549_v45 = vxor.u32 2147483648, %v20059_v21  ;;  %14437 = vsinq.f32 %v5433_v43  ;;  %v5642_v2 = vsel %vm20288_vm3, 0, %v5640_v38  ;;  %v23483_v38 = vld [vmem:[#allocation26_spill] sm:$0xff] }
 0x50d   : > { %v20313_v41 = vsel %vm5333_vm4, nan, %v5343_v50  ;;  %v7196_v25 = vand.u32 3, %v5538_v3  ;;  %v5609_v0 = vadd.s32 %v20224_v57, %v20186_v40  ;;  %v7796_v31 = vadd.f32 1.0, %v14430_v1 }
 0x50e   : > { %v12912_v62 = vadd.s32 4294967294, %v5621_v4  ;;  %v20322_v49 = vmul.f32 %v20298_v34, %v20313_v41  ;;  %v14432_v32 = vpop.eup %14431  ;;  %vm5544_vm8 = vcmp.lt.s32.totalorder %v5543_v15, 2  ;;  %vm5545_vm11 = vcmp.eq.s32.totalorder %v5543_v15, 0 }
 0x50f   : > { %vm5548_vm15 = vcmp.eq.s32.totalorder %v5543_v15, 2  ;;  %vm5444_vm9 = vcmp.eq.s32.totalorder %v20303_v51, 2  ;;  %vm7098_vm10 = vcmp.eq.s32.totalorder %v20305_v22, 2  ;;  %v5646_v3 = vadd.s32 3, %v5642_v2 }
 0x510   : > { %vm12913_vm0 = vcmp.lt.s32.totalorder %v12912_v62, 0  ;;  %v5547_v17 = vsel %vm5545_vm11, %v20059_v21, %v5546_v24  ;;  %v5550_v40 = vsel %vm5548_vm15, %v5549_v45, %v20063_v53  ;;  %vm5441_vm4 = vcmp.eq.s32.totalorder %v20303_v51, 0 }
 0x511   : > { %vm7095_vm6 = vcmp.eq.s32.totalorder %v20305_v22, 0  ;;  %v5624_v57 = vsel %vm12913_vm0, 0, %v12912_v62  ;;  %vm7198_vm7 = vcmp.eq.s32.totalorder %v7196_v25, 0  ;;  %vm7201_vm12 = vcmp.eq.s32.totalorder %v7196_v25, 2  ;;  %v14434_v9 = vpop.eup %14433 }
 0x512   : > { %v7873_v42 = vmul.f32 %v20322_v49, %v20298_v34  ;;  %vm5440_vm1 = vcmp.lt.s32.totalorder %v20303_v51, 2  ;;  %vm7094_vm14 = vcmp.lt.s32.totalorder %v20305_v22, 2  ;;  %v5625_v52 = vsub.s32 32, %v5624_v57 }
 0x513   : > { %v5629_v56 = vsub.s32 4294967266, %v5624_v57  ;;  %v7200_v36 = vsel %vm7198_vm7, %v20059_v21, %v5546_v24  ;;  %v7203_v50 = vsel %vm7201_vm12, %v5549_v45, %v20063_v53  ;;  %vm5437_vm11 = vweird.f32 %v23458_v30 }
 0x514   : > { %v7842_v6 = vmul.f32 %v14432_v32, %v23458_v30  ;;  %vm5541_vm15 = vweird.f32 %v18988_v46  ;;  %v5551_v10 = vsel %vm5544_vm8, %v5547_v17, %v5550_v40  ;;  %v7795_v43 = vadd.f32 1.0, %v23483_v38 }
 0x515   : > { %v5626_v1 = vshll.u32 %v20277_v14, %v5624_v57  ;;  %v5627_v4 = vshrl.u32 %v5609_v0, %v5625_v52  ;;  %v5630_v62 = vadd.s32 127, %v5629_v56  ;;  %vm7197_vm0 = vcmp.lt.s32.totalorder %v7196_v25, 2  ;;  %v14436_v45 = vpop.eup %14435 }
 0x516   : > { %14439 = vrcp.f32 %v7796_v31  ;;  %v7841_v21 = vmul.f32 %v14434_v9, %v18976_v37  ;;  %v7204_v24 = vsel %vm7197_vm0, %v7200_v36, %v7203_v50  ;;  %v20344_v53 = vsub.f32 %v7873_v42, %v20313_v41  ;;  %v14438_v17 = vpop.eup %14437 }
 0x517   : > { %v5628_v32 = vor.u32 %v5627_v4, %v5626_v1  ;;  %v5631_v29 = vshll.u32 %v5630_v62, 23  ;;  %v20346_v12 = vand.u32 3, %v5646_v3  ;;  %v20348_v15 = vand.u32 3, %v5642_v2 }
 0x518   : > { %v5445_v40 = vxor.u32 2147483648, %v14436_v45  ;;  %v13739_v14 = vpack.c.bf16 %v20313_v41, %v7841_v21  ;;  %v20353_v25 = vsel %vm5541_vm15, nan, %v5551_v10  ;;  %v5761_v0 = vand.u32 2147483647, %v19441_v5 }
 0x519   : > { %v5442_v31 = vxor.u32 2147483648, %v14438_v17  ;;  %v5632_v57 = vor.u32 4788187, %v5631_v29  ;;  %v7205_v42 = vsel %vm5541_vm15, nan, %v7204_v24  ;;  %14441 = vrcp.f32 %v7795_v43 }
 0x51a   : > { %v5446_v2 = vsel %vm5444_vm9, %v5445_v40, %v14438_v17  ;;  %v7100_v3 = vsel %vm7098_vm10, %v5445_v40, %v14438_v17  ;;  %v7905_v41 = vmul.f32 %v20344_v53, %v20298_v34  ;;  %v5779_v9 = vshrl.u32 %v23415_v61, %v20055_v20 }
 0x51b   : > { %v5443_v52 = vsel %vm5441_vm4, %v14436_v45, %v5442_v31  ;;  %v7097_v29 = vsel %vm7095_vm6, %v14436_v45, %v5442_v31  ;;  %v5633_v56 = vand.u32 2147483647, %v5632_v57  ;;  %v5635_v36 = vcvt.s32.f32 %v5628_v32 }
 0x51c   : > { %v5447_v50 = vsel %vm5440_vm1, %v5443_v52, %v5446_v2  ;;  %v7101_v10 = vsel %vm7094_vm14, %v7097_v29, %v7100_v3  ;;  %v20374_v38 = vmul.f32 2.0, %v7205_v42  ;;  %v5768_v43 = vand.u32 8388607, %v5761_v0 }
 0x51d   : > { %v5448_v1 = vsel %vm5437_vm11, nan, %v5447_v50  ;;  %v7102_v4 = vsel %vm5437_vm11, nan, %v7101_v10  ;;  %v5636_v62 = vmul.f32 %v5635_v36, %v5633_v56  ;;  %v5778_v21 = vshll.u32 %v23414_v19, %v20040_v26 }
 0x51e   : > { %v7730_v51 = vmul.f32 2.0, %v7102_v4  ;;  %v13737_v24 = vpack.c.bf16 %v5448_v1, %v7842_v6  ;;  %v20385_v22 = vsub.f32 %v7905_v41, %v20322_v49  ;;  %v5777_v45 = vshrl.u32 %v23414_v19, %v20055_v20 }
 0x51f   : > { %v5637_v32 = vxor.u32 2147483648, %v5636_v62  ;;  %v5780_v17 = vor.u32 %v5779_v9, %v5778_v21  ;;  %v5781_v40 = vshll.u32 %v23415_v61, %v20040_v26  ;;  %v5782_v31 = vshrl.u32 %v23416_v58, %v20055_v20 }
 0x520   : > { %v14440_v57 = vpop.eup %14439  ;;  %13738 = vmatprep.subr.bf16.mxu0 %v13737_v24  ;;  %v7858_v42 = vmul.f32 %v7730_v51, %v5448_v1  ;;  %v20395_v6 = vmul.f32 %v20374_v38, %v20353_v25  ;;  %v5784_v2 = vshll.u32 %v23416_v58, %v20040_v26  ;;  %v5785_v3 = vshrl.u32 %v23417_v63, %v20055_v20 }
 0x521   : > { %v5638_v41 = vsel %vm5555_vm5, %v5637_v32, %v5636_v62  ;;  %13740 = vmatpush1.bf16.msra.mxu0 %v13739_v14  ;;  %v5769_v9 = vor.u32 8388608, %v5768_v43  ;;  %v5783_v52 = vor.u32 %v5782_v31, %v5781_v40  ;;  %vm5793_vm14 = vcmp.lt.s32.totalorder %v20090_v8, 1 }
 0x522   : > { %v5641_v29 = vsel %vm20288_vm3, %v23464_v39, %v5638_v41  ;;  %v7874_v56 = vmul.f32 %v7858_v42, %v7730_v51  ;;  %v5786_v36 = vor.u32 %v5785_v3, %v5784_v2  ;;  %vm5795_vm12 = vcmp.lt.s32.totalorder %v20090_v8, 3 }
 0x523   : > { %v14442_v26 = vpop.eup %14441  ;;  %14443 = vcosq.f32 %v5641_v29  ;;  %v7937_v20 = vmul.f32 %v20385_v22, %v20298_v34  ;;  %v5801_v14 = vsel %vm5793_vm14, %v5780_v17, %v5783_v52  ;;  %v5807_v50 = vsel %vm5795_vm12, %v20125_v44, %v20212_v18 }
 0x524   : > { %14445 = vsinq.f32 %v5641_v29  ;;  %v7890_v10 = vsub.f32 %v7874_v56, %v5448_v1  ;;  %v5798_v54 = vsel %vm5796_vm13, %v5786_v36, 2102212464  ;;  %v5803_v43 = vsel %vm5795_vm12, %v5786_v36, %v20199_v7 }
 0x525   : > { %vm5794_vm1 = vcmp.lt.s32.totalorder %v20090_v8, 2  ;;  %v5797_v4 = vsel %vm5793_vm14, %v5777_v45, %v5780_v17  ;;  %v5799_v62 = vsel %vm5795_vm12, %v5783_v52, %v5798_v54  ;;  %v5805_v34 = vsel %vm5793_vm14, %v5783_v52, %v5786_v36 }
 0x526   : > { %v13741_v21 = vpack.c.bf16 %v7890_v10, %v7858_v42  ;;  %v7906_v24 = vmul.f32 %v7890_v10, %v7730_v51  ;;  %v5804_v44 = vsel %vm5794_vm1, %v5801_v14, %v5803_v43  ;;  %v5808_v18 = vsel %vm5794_vm1, %v5805_v34, %v5807_v50 }
 0x527   : > { %vm7304_vm13 = vcmp.eq.s32.totalorder %v20348_v15, 2  ;;  %v13743_v7 = vpack.c.bf16 %v20344_v53, %v20322_v49  ;;  %v7875_v1 = vmul.f32 %v20395_v6, %v20374_v38  ;;  %v5809_v45 = vshll.u32 %v5769_v9, 8 }
 0x528   : > { %vm7301_vm3 = vcmp.eq.s32.totalorder %v20348_v15, 0  ;;  %v20433_v32 = vmul.f32 %v14442_v26, %v18988_v46  ;;  %13742 = vmatprep.subr.bf16.mxu0 %v13741_v21  ;;  %v7922_v17 = vsub.f32 %v7906_v24, %v7858_v42  ;;  %v7953_v40 = vsub.f32 %v7937_v20, %v20344_v53  ;;  %v20450_v42 = vpop.f32.mrb[168].mxu1 }
 0x529   : > { %v5800_v31 = vsel %vm5794_vm1, %v5797_v4, %v5799_v62  ;;  %vm7300_vm5 = vcmp.lt.s32.totalorder %v20348_v15, 2  ;;  %13744 = vmatpush1.bf16.msra.mxu0 %v13743_v7  ;;  %v20439_v49 = vmul.u32.u64.low %v5809_v45, %v5808_v18  ;;  %v20440_v2 = vmul.u32.u64.high %v5809_v45, %v5808_v18, %v20439_v49 }
 0x52a   : > { %v20442_v3 = vmul.u32.u64.low %v5809_v45, %v5804_v44  ;;  %v20443_v41 = vmul.u32.u64.high %v5809_v45, %v5804_v44, %v20442_v3  ;;  %vm5645_vm8 = vweird.f32 %v23464_v39  ;;  %vm5648_vm9 = vcmp.lt.s32.totalorder %v20346_v12, 2 }
 0x52b   : > { %vm5649_vm10 = vcmp.eq.s32.totalorder %v20346_v12, 0  ;;  %v7938_v53 = vmul.f32 %v7922_v17, %v7730_v51  ;;  %v5969_v8 = vand.u32 2147483647, %v19443_v47  ;;  %vm5652_vm4 = vcmp.eq.s32.totalorder %v20346_v12, 2  ;;  %v20507_v12 = vld [vmem:[%s22655_s7] sm:$0xff] }
 0x52c   : > { %v7844_v9 = vmul.f32 %v14440_v57, %v23464_v39  ;;  %v13751_v52 = vpack.c.bf16 %v20353_v25, %v20433_v32  ;;  %v20457_v29 = vsub.f32 %v7875_v1, %v20353_v25  ;;  %v13747_v36 = vpack.c.bf16 %v7953_v40, %v20385_v22 }
 0x52d   : > { %v7954_v56 = vsub.f32 %v7938_v53, %v7890_v10  ;;  %v5816_v26 = vmul.u32 %v5809_v45, %v5800_v31  ;;  %v5987_v51 = vshrl.u32 %v23415_v61, %v20114_v48  ;;  %v14444_v20 = vpop.eup %14443  ;;  %vm5818_vm6 = vc.u32 %v20440_v2, %v20442_v3 }
 0x52e   : > { %v5819_v14 = vadd.s32 1, %v20443_v41  ;;  %v5990_v57 = vshrl.u32 %v23416_v58, %v20114_v48  ;;  %v5993_v25 = vshrl.u32 %v23417_v63, %v20114_v48  ;;  %v14446_v50 = vpop.eup %14445  ;;  %vm5867_vm7 = vcmp.lt.s32.totalorder %v23461_v35, 0 }
 0x52f   : > { %v5653_v22 = vxor.u32 2147483648, %v14444_v20  ;;  %v13745_v10 = vpack.c.bf16 %v7954_v56, %v7922_v17  ;;  %v5976_v54 = vand.u32 8388607, %v5969_v8  ;;  %v5986_v43 = vshll.u32 %v23414_v19, %v20088_v13 }
 0x530   : > { %v5650_v4 = vxor.u32 2147483648, %v14446_v50  ;;  %v5820_v62 = vsel %vm5818_vm6, %v5819_v14, %v20443_v41  ;;  %v5989_v34 = vshll.u32 %v23415_v61, %v20088_v13  ;;  %v5992_v21 = vshll.u32 %v23416_v58, %v20088_v13 }
 0x531   : > { %v5654_v24 = vsel %vm5652_vm4, %v5653_v22, %v14446_v50  ;;  %v7306_v44 = vsel %vm7304_vm13, %v5653_v22, %v14446_v50  ;;  %13746 = vmatprep.subr.bf16.mxu0 %v13745_v10  ;;  %v5821_v18 = vadd.s32 %v5820_v62, %v5816_v26  ;;  %v5988_v7 = vor.u32 %v5987_v51, %v5986_v43 }
 0x532   : > { %v5651_v1 = vsel %vm5649_vm10, %v14444_v20, %v5650_v4  ;;  %v7303_v45 = vsel %vm7301_vm3, %v14444_v20, %v5650_v4  ;;  %13748 = vmatpush1.bf16.msra.mxu0 %v13747_v36  ;;  %v5991_v32 = vor.u32 %v5990_v57, %v5989_v34  ;;  %v5994_v17 = vor.u32 %v5993_v25, %v5992_v21  ;;  %v23490_v21 = vld [vmem:[#allocation59_spill] sm:$0xff] }
 0x533   : > { %v23484_v13 = vand.u32 2147483647, %v23461_v35  ;;  %v5655_v31 = vsel %vm5648_vm9, %v5651_v1, %v5654_v24  ;;  %v7307_v49 = vsel %vm7300_vm5, %v7303_v45, %v7306_v44  ;;  %v7907_v41 = vmul.f32 %v20457_v29, %v20374_v38 }
 0x534   : > { %v5822_v53 = vadd.s32 536870912, %v5821_v18  ;;  %v5656_v56 = vsel %vm5645_vm8, nan, %v5655_v31  ;;  %v7308_v36 = vsel %vm5645_vm8, nan, %v7307_v49  ;;  %v5977_v26 = vor.u32 8388608, %v5976_v54  ;;  %v20562_v49 = vpop.f32.mrb[169].mxu0 }
 0x535   : > { %vm20489_vm11 = vcmp.le.f32.partialorder %v23484_v13, 0.7853982  ;;  %vm6001_vm15 = vcmp.lt.s32.totalorder %v20108_v60, 1  ;;  %v7732_v51 = vmul.f32 2.0, %v7308_v36  ;;  %v13749_v20 = vpack.c.bf16 %v5656_v56, %v7844_v9 }
 0x536   : > { %vm23487_vm0 = vcmask 392192   ;;  %v20511_v15 = vshrl.u32 %v5822_v53, 30  ;;  %vm6003_vm14 = vcmp.lt.s32.totalorder %v20108_v60, 3  ;;  %v6009_v14 = vsel %vm6001_vm15, %v5988_v7, %v5991_v32 }
 0x537   : > { %13014 = vmatmul.mubr.msk.f32.vlgmr.msra.gmra.mrb[172].mxu0 %vm23487_vm0, %v20507_v12  ;;  %v6011_v57 = vsel %vm6003_vm14, %v5994_v17, %v20217_v28  ;;  %v6013_v9 = vsel %vm6001_vm15, %v5991_v32, %v5994_v17  ;;  %v6015_v25 = vsel %vm6003_vm14, %v20180_v55, %v20230_v59  ;;  %14447 = vsinq.f32 %v20208_v33  ;;  %13750 = vmatprep.subr.bf16.mxu1 %v13749_v20  ;;  %vm23498_vm4 = vmmov %vm23487_vm0 }
 0x538   : > { %8456 = vmatprep.mubr.f32.mxu0 %v23387_v23  ;;  %v7860_v50 = vmul.f32 %v7732_v51, %v5656_v56  ;;  %v5824_v22 = vshll.u32 %v20511_v15, 30  ;;  %vm6002_vm12 = vcmp.lt.s32.totalorder %v20108_v60, 2  ;;  %v23488_v28 = vxor.u32 2147483648, %v20284_v27  ;;  %13752 = vmatpush1.bf16.msra.mxu1 %v13751_v52 }
 0x539   : > { %vm23489_vm1 = vcmp.lt.s32.totalorder %v20108_v60, 4  ;;  %v6016_v59 = vsel %vm6002_vm12, %v6013_v9, %v6015_v25  ;;  %v6017_v33 = vshll.u32 %v5977_v26, 8  ;;  %v5985_v4 = vshrl.u32 %v23414_v19, %v20114_v48  ;;  %v23494_v25 = vld [vmem:[#allocation45_spill] sm:$0xff] }
 0x53a   : > { %v5950_v10 = vsel %vm5867_vm7, %v23488_v28, %v20284_v27  ;;  %v6006_v55 = vsel %vm23489_vm1, %v5994_v17, 2102212464  ;;  %v7876_v54 = vmul.f32 %v7860_v50, %v7732_v51  ;;  %v20538_v43 = vsub.s32 %v5821_v18, %v5824_v22  ;;  %v23491_v17 = vld [vmem:[#allocation18_spill] sm:$0xff] }
 0x53b   : > { %v6012_v62 = vsel %vm6002_vm12, %v6009_v14, %v6011_v57  ;;  %v7923_v34 = vsub.f32 %v7907_v41, %v20395_v6  ;;  %v20545_v27 = vmul.u32.u64.low %v6017_v33, %v6016_v59  ;;  %v20546_v52 = vmul.u32.u64.high %v6017_v33, %v6016_v59, %v20545_v27 }
 0x53c   : > { %v5743_v24 = vsub.s32 4, %v23490_v21  ;;  %v7892_v44 = vsub.f32 %v7876_v54, %v5656_v56  ;;  %v5827_v1 = vsub.s32 0, %v20538_v43  ;;  %v6005_v18 = vsel %vm6001_vm15, %v5985_v4, %v5988_v7  ;;  %v23492_v7 = vld [vmem:[#allocation16_spill] sm:$0xff] }
 0x53d   : > { %v6007_v45 = vsel %vm6003_vm14, %v5991_v32, %v6006_v55  ;;  %v5953_v48 = vsel %vm20489_vm11, %v23461_v35, %v5950_v10  ;;  %14449 = vpow2.f32 %v23491_v17  ;;  %v13755_v32 = vpack.c.bf16 %v20457_v29, %v20395_v6 }
 0x53e   : > { %v20558_v13 = vmul.u32.u64.low %v6017_v33, %v6012_v62  ;;  %v20559_v31 = vmul.u32.u64.high %v6017_v33, %v6012_v62, %v20558_v13  ;;  %v13753_v41 = vpack.c.bf16 %v7892_v44, %v7860_v50  ;;  %v7908_v53 = vmul.f32 %v7892_v44, %v7732_v51 }
 0x53f   : > { %v12919_v56 = vmin.u32 %v5827_v1, %v20538_v43  ;;  %14451 = vpow2.f32 %v23492_v7  ;;  %v7939_v36 = vmul.f32 %v7923_v34, %v20374_v38  ;;  %v6008_v26 = vsel %vm6002_vm12, %v6005_v18, %v6007_v45 }
 0x540   : > { %vm23493_vm13 = vcmp.lt.s32.totalorder %v23460_v11, 0  ;;  %13754 = vmatprep.subr.bf16.mxu1 %v13753_v41  ;;  %v7924_v14 = vsub.f32 %v7908_v53, %v7860_v50  ;;  %v5847_v9 = vsub.s32 4, %v20511_v15  ;;  %14453 = vpow2.f32 %v23494_v25 }
 0x541   : > { %v5744_v20 = vsel %vm23493_vm13, %v5743_v24, %v23490_v21  ;;  %v5829_v57 = vclz %v12919_v56  ;;  %14455 = vcosq.f32 %v5953_v48  ;;  %13756 = vmatpush1.bf16.msra.mxu1 %v13755_v32  ;;  %vm6026_vm3 = vc.u32 %v20546_v52, %v20558_v13  ;;  %v20579_v60 = vpop.eup %14447 }
 0x542   : > { %v6027_v38 = vadd.s32 1, %v20559_v31  ;;  %v7940_v6 = vmul.f32 %v7924_v14, %v7732_v51  ;;  %v6024_v28 = vmul.u32 %v6017_v33, %v6008_v26  ;;  %v5746_v50 = vsel %vm20143_vm2, 0, %v5744_v20 }
 0x543   : > { %v12920_v22 = vadd.s32 4294967294, %v5829_v57  ;;  %v7955_v55 = vsub.f32 %v7939_v36, %v20457_v29  ;;  %vm5763_vm5 = vcmp.lt.s32.totalorder %v19441_v5, 0  ;;  %v5817_v59 = vadd.s32 %v20442_v3, %v20440_v2 }
 0x544   : > { %v6028_v54 = vsel %vm6026_vm3, %v6027_v38, %v20559_v31  ;;  %v7956_v4 = vsub.f32 %v7940_v6, %v7892_v44  ;;  %v5848_v51 = vsel %vm5763_vm5, %v5847_v9, %v20511_v15  ;;  %v5750_v27 = vadd.s32 3, %v5746_v50 }
 0x545   : > { %vm12921_vm8 = vcmp.lt.s32.totalorder %v12920_v22, 0  ;;  %v6029_v62 = vadd.s32 %v6028_v54, %v6024_v28  ;;  %v5754_v21 = vxor.u32 2147483648, %v20579_v60  ;;  %v7402_v24 = vand.u32 3, %v5746_v50  ;;  %v23499_v28 = vld [vmem:[#allocation21_spill] sm:$0xff] }
 0x546   : > { %v5832_v33 = vsel %vm12921_vm8, 0, %v12920_v22  ;;  %v13757_v29 = vpack.c.bf16 %v7956_v4, %v7924_v14  ;;  %v5757_v45 = vxor.u32 2147483648, %v20270_v16  ;;  %14457 = vsinq.f32 %v5953_v48 }
 0x547   : > { %v5833_v1 = vsub.s32 32, %v5832_v33  ;;  %v5837_v18 = vsub.s32 4294967266, %v5832_v33  ;;  %v20593_v2 = vpop.eup %14449  ;;  %v13759_v3 = vpack.c.bf16 %v7955_v55, %v7923_v34  ;;  %vm20597_vm2 = vcmp.le.f32.partialorder %v5761_v0, 0.7853982  ;;  %v20604_v34 = vpop.f32.mrb[169].mxu1 }
 0x548   : > { %v6030_v15 = vadd.s32 536870912, %v6029_v62  ;;  %13758 = vmatprep.subr.bf16.mxu1 %v13757_v29  ;;  %v5834_v31 = vshll.u32 %v20538_v43, %v5832_v33  ;;  %v5850_v56 = vsel %vm20597_vm2, 0, %v5848_v51  ;;  %v5751_v48 = vand.u32 3, %v5750_v27  ;;  %v23500_v27 = vld [vmem:[#allocation69_spill] sm:$0xff] }
 0x549   : > { %v14452_v17 = vpop.eup %14451  ;;  %v5835_v41 = vshrl.u32 %v5817_v59, %v5833_v1  ;;  %v5838_v53 = vadd.s32 127, %v5837_v18  ;;  %13760 = vmatpush1.bf16.msra.mxu1 %v13759_v3  ;;  %vm7404_vm9 = vcmp.eq.s32.totalorder %v7402_v24, 0  ;;  %vm7407_vm10 = vcmp.eq.s32.totalorder %v7402_v24, 2 }
 0x54a   : > { %v6031_v7 = vshrl.u32 %v6030_v15, 30  ;;  %v14454_v0 = vpop.eup %14453  ;;  %v7406_v26 = vsel %vm7404_vm9, %v20270_v16, %v5754_v21  ;;  %v7409_v20 = vsel %vm7407_vm10, %v5757_v45, %v20579_v60  ;;  %v7798_v14 = vadd.f32 1.0, %v14452_v17 }
 0x54b   : > { %v5836_v32 = vor.u32 %v5835_v41, %v5834_v31  ;;  %v5839_v36 = vshll.u32 %v5838_v53, 23  ;;  %v20608_v43 = vpop.eup %14455  ;;  %v5854_v25 = vadd.s32 3, %v5850_v56  ;;  %vm5749_vm6 = vweird.f32 %v23460_v11 }
 0x54c   : > { %v6032_v57 = vshll.u32 %v6031_v7, 30  ;;  %13015 = vmatmul.mubr.msk.f32.vlgmr.msra.gmra.mrb[172].mxu1 %vm23498_vm4, %v20507_v12  ;;  %vm7403_vm15 = vcmp.lt.s32.totalorder %v7402_v24, 2  ;;  %vm5971_vm0 = vcmp.lt.s32.totalorder %v19443_v47, 0  ;;  %v7800_v6 = vadd.f32 1.0, %v14454_v0 }
 0x54d   : > { %v5840_v9 = vor.u32 4788187, %v5839_v36  ;;  %v7410_v22 = vsel %vm7403_vm15, %v7406_v26, %v7409_v20  ;;  %v5951_v10 = vsub.s32 4, %v23499_v28  ;;  %8527 = vmatprep.mubr.f32.mxu1 %v23387_v23  ;;  %v5843_v55 = vcvt.s32.f32 %v5836_v32 }
 0x54e   : > { %v20614_v38 = vsub.s32 %v6029_v62, %v6032_v57  ;;  %vm5753_vm14 = vcmp.eq.s32.totalorder %v5751_v48, 0  ;;  %vm5756_vm12 = vcmp.eq.s32.totalorder %v5751_v48, 2  ;;  %v7411_v33 = vsel %vm5749_vm6, nan, %v7410_v22 }
 0x54f   : > { %v5841_v50 = vand.u32 2147483647, %v5840_v9  ;;  %v5755_v54 = vsel %vm5753_vm14, %v20270_v16, %v5754_v21  ;;  %v5758_v4 = vsel %vm5756_vm12, %v5757_v45, %v20579_v60  ;;  %v5952_v51 = vsel %vm5867_vm7, %v5951_v10, %v23499_v28 }
 0x550   : > { %v6035_v59 = vsub.s32 0, %v20614_v38  ;;  %v7797_v24 = vadd.f32 1.0, %v23500_v27  ;;  %v5954_v29 = vsel %vm20489_vm11, 0, %v5952_v51  ;;  %v14458_v1 = vpop.eup %14457  ;;  %v20629_v18 = vand.u32 3, %v5854_v25  ;;  %v23503_v51 = vld [vmem:[#allocation40_spill] sm:$0xff] }
 0x551   : > { %v5844_v62 = vmul.f32 %v5843_v55, %v5841_v50  ;;  %v20631_v3 = vand.u32 3, %v5850_v56  ;;  %14459 = vrcp.f32 %v7798_v14  ;;  %v6055_v21 = vsub.s32 4, %v6031_v7 }
 0x552   : > { %v12927_v16 = vmin.u32 %v6035_v59, %v20614_v38  ;;  %vm5752_vm7 = vcmp.lt.s32.totalorder %v5751_v48, 2  ;;  %v5958_v45 = vadd.s32 3, %v5954_v29  ;;  %14461 = vrcp.f32 %v7800_v6 }
 0x553   : > { %v5845_v60 = vxor.u32 2147483648, %v5844_v62  ;;  %v5759_v17 = vsel %vm5752_vm7, %v5755_v54, %v5758_v4  ;;  %v20634_v31 = vmul.f32 2.0, %v7411_v33  ;;  %14463 = vrcp.f32 %v7797_v24 }
 0x554   : > { %v6037_v15 = vclz %v12927_v16  ;;  %v5959_v41 = vand.u32 3, %v5958_v45  ;;  %v5962_v53 = vxor.u32 2147483648, %v14458_v1  ;;  %vm20643_vm11 = vcmp.le.f32.partialorder %v5969_v8, 0.7853982 }
 0x555   : > { %v5846_v40 = vsel %vm5763_vm5, %v5845_v60, %v5844_v62  ;;  %v5965_v32 = vxor.u32 2147483648, %v20608_v43  ;;  %v7608_v36 = vand.u32 3, %v5954_v29  ;;  %v6025_v26 = vadd.s32 %v20558_v13, %v20546_v52 }
 0x556   : > { %v5849_v56 = vsel %vm20597_vm2, %v19441_v5, %v5846_v40  ;;  %v12928_v0 = vadd.s32 4294967294, %v6037_v15  ;;  %v6056_v20 = vsel %vm5971_vm0, %v6055_v21, %v6031_v7  ;;  %v20654_v44 = vsel %vm5749_vm6, nan, %v5759_v17 }
 0x557   : > { %14465 = vcosq.f32 %v5849_v56  ;;  %vm5961_vm13 = vcmp.eq.s32.totalorder %v5959_v41, 0  ;;  %v7799_v8 = vadd.f32 1.0, %v20593_v2  ;;  %vm5964_vm3 = vcmp.eq.s32.totalorder %v5959_v41, 2 }
 0x558   : > { %14467 = vsinq.f32 %v5849_v56  ;;  %vm12929_vm1 = vcmp.lt.s32.totalorder %v12928_v0, 0  ;;  %v5963_v57 = vsel %vm5961_vm13, %v20608_v43, %v5962_v53  ;;  %v20660_v9 = vmul.f32 %v20634_v31, %v20654_v44 }
 0x559   : > { %v6040_v14 = vsel %vm12929_vm1, 0, %v12928_v0  ;;  %v5966_v7 = vsel %vm5964_vm3, %v5965_v32, %v14458_v1  ;;  %vm7610_vm5 = vcmp.eq.s32.totalorder %v7608_v36, 0  ;;  %vm7510_vm8 = vcmp.eq.s32.totalorder %v20631_v3, 2 }
 0x55a   : > { %v6041_v52 = vsub.s32 32, %v6040_v14  ;;  %v6045_v13 = vsub.s32 4294967266, %v6040_v14  ;;  %vm5960_vm2 = vcmp.lt.s32.totalorder %v5959_v41, 2  ;;  %vm7609_vm9 = vcmp.lt.s32.totalorder %v7608_v36, 2 }
 0x55b   : > { %v7612_v25 = vsel %vm7610_vm5, %v20608_v43, %v5962_v53  ;;  %vm7613_vm10 = vcmp.eq.s32.totalorder %v7608_v36, 2  ;;  %v14460_v2 = vpop.eup %14459  ;;  %vm5857_vm4 = vcmp.eq.s32.totalorder %v20629_v18, 0  ;;  %vm7507_vm6 = vcmp.eq.s32.totalorder %v20631_v3, 0 }
 0x55c   : > { %v6042_v6 = vshll.u32 %v20614_v38, %v6040_v14  ;;  %v6043_v22 = vshrl.u32 %v6025_v26, %v6041_v52  ;;  %v6046_v28 = vadd.s32 127, %v6045_v13  ;;  %v7615_v10 = vsel %vm7613_vm10, %v5965_v32, %v14458_v1  ;;  %v14462_v59 = vpop.eup %14461 }
 0x55d   : > { %vm5856_vm15 = vcmp.lt.s32.totalorder %v20629_v18, 2  ;;  %vm7506_vm14 = vcmp.lt.s32.totalorder %v20631_v3, 2  ;;  %vm5957_vm12 = vweird.f32 %v23461_v35  ;;  %v5967_v50 = vsel %vm5960_vm2, %v5963_v57, %v5966_v7  ;;  %v14464_v33 = vpop.eup %14463 }
 0x55e   : > { %v7616_v55 = vsel %vm7609_vm9, %v7612_v25, %v7615_v10  ;;  %v7877_v43 = vmul.f32 %v20660_v9, %v20634_v31  ;;  %vm5853_vm7 = vweird.f32 %v19441_v5  ;;  %v6044_v54 = vor.u32 %v6043_v22, %v6042_v6 }
 0x55f   : > { %v6047_v4 = vshll.u32 %v6046_v28, 23  ;;  %v7617_v38 = vsel %vm5957_vm12, nan, %v7616_v55  ;;  %v8537_v62 = vand.u32 2139095040, %v23503_v51  ;;  %v6058_v27 = vsel %vm20643_vm11, 0, %v6056_v20 }
 0x560   : > { %v20678_v24 = vmul.f32 2.0, %v7617_v38  ;;  %14469 = vrcp.f32 %v7799_v8  ;;  %v20681_v29 = vsub.f32 %v7877_v43, %v20654_v44  ;;  %v20685_v16 = vsel %vm5957_vm12, nan, %v5967_v50 }
 0x561   : > { %v6048_v1 = vor.u32 4788187, %v6047_v4  ;;  %v8534_v60 = vand.u32 2147483647, %v23503_v51  ;;  %v8538_v21 = vshrl.u32 %v8537_v62, 23  ;;  %v14466_v45 = vpop.eup %14465  ;;  %vm5860_vm1 = vcmp.eq.s32.totalorder %v20629_v18, 2 }
 0x562   : > { %v7846_v15 = vmul.f32 %v14460_v2, %v19441_v5  ;;  %v20692_v17 = vmul.f32 %v20678_v24, %v20685_v16  ;;  %v7909_v40 = vmul.f32 %v20681_v29, %v20634_v31  ;;  %v14468_v41 = vpop.eup %14467  ;;  %v5861_v53 = vxor.u32 2147483648, %v14466_v45 }
 0x563   : > { %v6049_v56 = vand.u32 2147483647, %v6048_v1  ;;  %v6051_v0 = vcvt.s32.f32 %v6044_v54  ;;  %v13018_v32 = vadd.s32 4294967169, %v8538_v21  ;;  %v5858_v36 = vxor.u32 2147483648, %v14468_v41 }
 0x564   : > { %v6062_v26 = vadd.s32 3, %v6058_v27  ;;  %v7879_v20 = vmul.f32 %v20692_v17, %v20678_v24  ;;  %v7925_v8 = vsub.f32 %v7909_v40, %v20660_v9  ;;  %v5862_v14 = vsel %vm5860_vm1, %v5861_v53, %v14468_v41 }
 0x565   : > { %v7512_v57 = vsel %vm7510_vm8, %v5861_v53, %v14468_v41  ;;  %v6052_v52 = vmul.f32 %v6051_v0, %v6049_v56  ;;  %v8541_v13 = vand.u32 8388607, %v8534_v60  ;;  %v5859_v7 = vsel %vm5857_vm4, %v14466_v45, %v5858_v36 }
 0x566   : > { %v7509_v25 = vsel %vm7507_vm6, %v14466_v45, %v5858_v36  ;;  %v7941_v2 = vmul.f32 %v7925_v8, %v20634_v31  ;;  %v8544_v6 = vadd.s32 1, %v13018_v32  ;;  %v5863_v22 = vsel %vm5856_vm15, %v5859_v7, %v5862_v14 }
 0x567   : > { %v7513_v28 = vsel %vm7506_vm14, %v7509_v25, %v7512_v57  ;;  %v6053_v10 = vxor.u32 2147483648, %v6052_v52  ;;  %v20712_v50 = vand.u32 3, %v6058_v27  ;;  %v5864_v55 = vsel %vm5853_vm7, nan, %v5863_v22 }
 0x568   : > { %v7514_v43 = vsel %vm5853_vm7, nan, %v7513_v28  ;;  %v7845_v54 = vmul.f32 %v14464_v33, %v23460_v11  ;;  %v20720_v31 = vsub.f32 %v7879_v20, %v20685_v16  ;;  %v13761_v18 = vpack.c.bf16 %v5864_v55, %v7846_v15 }
 0x569   : > { %v7734_v4 = vmul.f32 2.0, %v7514_v43  ;;  %v6054_v3 = vsel %vm5971_vm0, %v6053_v10, %v6052_v52  ;;  %v8542_v38 = vor.u32 8388608, %v8541_v13  ;;  %v7957_v21 = vsub.f32 %v7941_v2, %v20681_v29 }
 0x56a   : > { %v14470_v62 = vpop.eup %14469  ;;  %v6057_v27 = vsel %vm20643_vm11, %v19443_v47, %v6054_v3  ;;  %v13763_v1 = vpack.c.bf16 %v20654_v44, %v7845_v54  ;;  %vm8545_vm13 = vcmp.gt.s32.totalorder %v8544_v6, 0  ;;  %13762 = vmatprep.subr.bf16.mxu0 %v13761_v18  ;;  %v20729_v33 = vand.u32 3, %v6062_v26 }
 0x56b   : > { %14471 = vcosq.f32 %v6057_v27  ;;  %v7862_v45 = vmul.f32 %v7734_v4, %v5864_v55  ;;  %v8546_v15 = vsel %vm8545_vm13, %v8544_v6, 0  ;;  %v20732_v40 = vmul.f32 %v14462_v59, %v19443_v47 }
 0x56c   : > { %14473 = vsinq.f32 %v6057_v27  ;;  %13764 = vmatpush1.bf16.msra.mxu0 %v13763_v1  ;;  %v7911_v48 = vmul.f32 %v20720_v31, %v20678_v24  ;;  %v8548_v41 = vand.u32 31, %v8546_v15  ;;  %v20737_v44 = vmul.f32 %v14470_v62, %v23461_v35 }
 0x56d   : > { %v7878_v53 = vmul.f32 %v7862_v45, %v7734_v4  ;;  %v13767_v56 = vpack.c.bf16 %v20681_v29, %v20660_v9  ;;  %v20741_v0 = vshll.u32 %v8542_v38, 8  ;;  %v20743_v32 = vpack.c.bf16 %v7957_v21, %v7925_v8 }
 0x56e   : > { %v8549_v36 = vsub.s32 32, %v8548_v41  ;;  %v8551_v59 = vshll.u32 %v23414_v19, %v8548_v41  ;;  %v8554_v26 = vshll.u32 %v23415_v61, %v8548_v41  ;;  %vm6068_vm0 = vcmp.eq.s32.totalorder %v20729_v33, 2 }
 0x56f   : > { %vm7716_vm11 = vcmp.eq.s32.totalorder %v20712_v50, 2  ;;  %v7894_v20 = vsub.f32 %v7878_v53, %v5864_v55  ;;  %v8547_v14 = vshrl.u32 %v8546_v15, 5  ;;  %v8557_v57 = vshll.u32 %v23416_v58, %v8548_v41 }
 0x570   : > { %v8560_v52 = vshll.u32 %v23417_v63, %v8548_v41  ;;  %vm6065_vm3 = vcmp.eq.s32.totalorder %v20729_v33, 0  ;;  %vm7713_vm5 = vcmp.eq.s32.totalorder %v20712_v50, 0  ;;  %v20754_v9 = vsub.f32 %v7911_v48, %v20692_v17 }
 0x571   : > { %v8552_v29 = vshrl.u32 %v23415_v61, %v8549_v36  ;;  %v8555_v8 = vshrl.u32 %v23416_v58, %v8549_v36  ;;  %v23504_v13 = vmov 920167782   ;;  %vm6064_vm8 = vcmp.lt.s32.totalorder %v20729_v33, 2 }
 0x572   : > { %v8563_v7 = vshll.u32 %v23504_v13, %v8548_v41  ;;  %vm7712_vm2 = vcmp.lt.s32.totalorder %v20712_v50, 2  ;;  %v13765_v25 = vpack.c.bf16 %v7894_v20, %v7862_v45  ;;  %v7910_v2 = vmul.f32 %v7894_v20, %v7734_v4 }
 0x573   : > { %v8558_v6 = vshrl.u32 %v23417_v63, %v8549_v36  ;;  %v8561_v22 = vshrl.u32 %v23504_v13, %v8549_v36  ;;  %vm6061_vm9 = vweird.f32 %v19443_v47  ;;  %v8550_v28 = vshrl.u32 %v23414_v19, %v8549_v36 }
 0x574   : > { %v8553_v10 = vor.u32 %v8552_v29, %v8551_v59  ;;  %v8556_v55 = vor.u32 %v8555_v8, %v8554_v26  ;;  %v23505_v43 = vmov 1326507024   ;;  %13766 = vmatprep.subr.bf16.mxu0 %v13765_v25  ;;  %v7926_v18 = vsub.f32 %v7910_v2, %v7862_v45 }
 0x575   : > { %v8564_v54 = vshrl.u32 %v23505_v43, %v8549_v36  ;;  %v8559_v3 = vor.u32 %v8558_v6, %v8557_v57  ;;  %v8562_v38 = vor.u32 %v8561_v22, %v8560_v52  ;;  %vm8566_vm10 = vcmp.lt.s32.totalorder %v8547_v14, 1  ;;  %13768 = vmatpush1.bf16.msra.mxu0 %v13767_v56  ;;  %v14472_v1 = vpop.eup %14471 }
 0x576   : > { %vm8568_vm4 = vcmp.lt.s32.totalorder %v8547_v14, 3  ;;  %vm8569_vm6 = vcmp.lt.s32.totalorder %v8547_v14, 4  ;;  %v8745_v27 = vand.u32 2139095040, %v20450_v42  ;;  %v7942_v21 = vmul.f32 %v7926_v18, %v7734_v4  ;;  %v14474_v41 = vpop.eup %14473 }
 0x577   : > { %v8565_v62 = vor.u32 %v8564_v54, %v8563_v7  ;;  %vm8567_vm15 = vcmp.lt.s32.totalorder %v8547_v14, 2  ;;  %v8571_v15 = vsel %vm8569_vm6, %v8559_v3, 2102212464  ;;  %v8574_v48 = vsel %vm8566_vm10, %v8553_v10, %v8556_v55 }
 0x578   : > { %v6069_v53 = vxor.u32 2147483648, %v14472_v1  ;;  %v8570_v45 = vsel %vm8566_vm10, %v8550_v28, %v8553_v10  ;;  %v8572_v36 = vsel %vm8568_vm4, %v8556_v55, %v8571_v15  ;;  %v8575_v56 = vsel %vm8569_vm6, %v8562_v38, 920167782 }
 0x579   : > { %v6066_v59 = vxor.u32 2147483648, %v14474_v41  ;;  %v7958_v26 = vsub.f32 %v7942_v21, %v7894_v20  ;;  %v8576_v57 = vsel %vm8568_vm4, %v8559_v3, %v8575_v56  ;;  %v8578_v52 = vsel %vm8566_vm10, %v8556_v55, %v8559_v3 }
 0x57a   : > { %v6070_v4 = vsel %vm6068_vm0, %v6069_v53, %v14474_v41  ;;  %v7718_v29 = vsel %vm7716_vm11, %v6069_v53, %v14474_v41  ;;  %v8577_v8 = vsel %vm8567_vm15, %v8574_v48, %v8576_v57  ;;  %v8579_v7 = vsel %vm8569_vm6, %v8565_v62, 1326507024 }
 0x57b   : > { %v6067_v25 = vsel %vm6065_vm3, %v14472_v1, %v6066_v59  ;;  %v7715_v20 = vsel %vm7713_vm5, %v14472_v1, %v6066_v59  ;;  %v13769_v2 = vpack.c.bf16 %v7958_v26, %v7926_v18  ;;  %v8580_v6 = vsel %vm8568_vm4, %v8562_v38, %v8579_v7 }
 0x57c   : > { %v6071_v22 = vsel %vm6064_vm8, %v6067_v25, %v6070_v4  ;;  %v7719_v28 = vsel %vm7712_vm2, %v7715_v20, %v7718_v29  ;;  %v8573_v10 = vsel %vm8567_vm15, %v8570_v45, %v8572_v36  ;;  %v8581_v55 = vsel %vm8567_vm15, %v8578_v52, %v8580_v6 }
 0x57d   : > { %v6072_v54 = vsel %vm6061_vm9, nan, %v6071_v22  ;;  %v7720_v3 = vsel %vm6061_vm9, nan, %v7719_v28  ;;  %13770 = vmatprep.subr.bf16.mxu0 %v13769_v2  ;;  %v20796_v18 = vmul.u32.u64.low %v20741_v0, %v8581_v55  ;;  %v20797_v38 = vmul.u32.u64.high %v20741_v0, %v8581_v55, %v20796_v18 }
 0x57e   : > { %v7736_v33 = vmul.f32 2.0, %v7720_v3  ;;  %v13773_v62 = vpack.c.bf16 %v6072_v54, %v20732_v40  ;;  %13772 = vmatpush1.bf16.msra.mxu0 %v20743_v32  ;;  %v20802_v50 = vmul.u32.u64.low %v20741_v0, %v8577_v8  ;;  %v20803_v14 = vmul.u32.u64.high %v20741_v0, %v8577_v8, %v20802_v50 }
 0x57f   : > { %v13775_v1 = vpack.c.bf16 %v20685_v16, %v20737_v44  ;;  %v22904_v21 = vand.u32 2147483647, %v20450_v42  ;;  %v8746_v15 = vshrl.u32 %v8745_v27, 23  ;;  %v7943_v41 = vmul.f32 %v20754_v9, %v20678_v24 }
 0x580   : > { %13774 = vmatprep.subr.bf16.mxu1 %v13773_v62  ;;  %v7864_v48 = vmul.f32 %v7736_v33, %v6072_v54  ;;  %v8641_v40 = vand.u32 2139095040, %v20562_v49  ;;  %vm23506_vm14 = vcmask 392192   ;;  %v8589_v32 = vmul.u32 %v20741_v0, %v8573_v10 }
 0x581   : > { %13776 = vmatpush1.bf16.msra.mxu1 %v13775_v1  ;;  %13016 = vmatmul.mubr.msk.f32.vlgmr.msra.gmra.mrb[174].mxu0 %vm23506_vm14, %v20507_v12  ;;  %vm8591_vm12 = vc.u32 %v20797_v38, %v20802_v50  ;;  %v13026_v16 = vadd.s32 4294967169, %v8746_v15  ;;  %v8592_v27 = vadd.s32 1, %v20803_v14  ;;  %v8749_v24 = vand.u32 8388607, %v22904_v21  ;;  %vm23507_vm3 = vmmov %vm23506_vm14 }
 0x582   : > { %v7880_v44 = vmul.f32 %v7864_v48, %v7736_v33  ;;  %12154 = vmatprep.mubr.f32.mxu0 %v23387_v23  ;;  %v7959_v36 = vsub.f32 %v7943_v41, %v20720_v31  ;;  %v8642_v59 = vshrl.u32 %v8641_v40, 23  ;;  %v13779_v4 = vpack.c.bf16 %v20720_v31, %v20692_v17 }
 0x583   : > { %v8752_v53 = vadd.s32 1, %v13026_v16  ;;  %v8593_v56 = vsel %vm8591_vm12, %v8592_v27, %v20803_v14  ;;  %v8750_v20 = vor.u32 8388608, %v8749_v24 }
 0x584   : > { %v7896_v45 = vsub.f32 %v7880_v44, %v6072_v54  ;;  %v8594_v0 = vadd.s32 %v8593_v56, %v8589_v32  ;;  %v13783_v25 = vpack.c.bf16 %v7959_v36, %v20754_v9  ;;  %v13022_v2 = vadd.s32 4294967169, %v8642_v59 }
 0x585   : > { %vm8753_vm7 = vcmp.gt.s32.totalorder %v8752_v53, 0  ;;  %v8790_v32 = vshll.u32 %v8750_v20, 8  ;;  %v13146_v20 = vmul.f32 -1.442695, %v23503_v51 }
 0x586   : > { %v13777_v26 = vpack.c.bf16 %v7896_v45, %v7864_v48  ;;  %v7912_v57 = vmul.f32 %v7896_v45, %v7736_v33  ;;  %v8754_v52 = vsel %vm8753_vm7, %v8752_v53, 0  ;;  %v8595_v29 = vadd.s32 536870912, %v8594_v0 }
 0x587   : > { %v8756_v8 = vand.u32 31, %v8754_v52  ;;  %v8755_v22 = vshrl.u32 %v8754_v52, 5  ;;  %v8648_v24 = vadd.s32 1, %v13022_v2  ;;  %14475 = vpow2.f32 %v13146_v20 }
 0x588   : > { %13778 = vmatprep.subr.bf16.mxu1 %v13777_v26  ;;  %v7928_v7 = vsub.f32 %v7912_v57, %v7864_v48  ;;  %v20826_v6 = vshrl.u32 %v8595_v29, 30  ;;  %vm8536_vm7 = vcmp.lt.s32.totalorder %v23503_v51, 0 }
 0x589   : > { %13780 = vmatpush1.bf16.msra.mxu1 %v13779_v4  ;;  %v8757_v28 = vsub.s32 32, %v8756_v8  ;;  %v8759_v10 = vshll.u32 %v23414_v19, %v8756_v8  ;;  %v8762_v54 = vshll.u32 %v23415_v61, %v8756_v8  ;;  %v8765_v17 = vshll.u32 %v23416_v58, %v8756_v8 }
 0x58a   : > { %v7944_v55 = vmul.f32 %v7928_v7, %v7736_v33  ;;  %v8768_v31 = vshll.u32 %v23417_v63, %v8756_v8  ;;  %v8597_v3 = vshll.u32 %v20826_v6, 30  ;;  %v8771_v62 = vshll.u32 %v23504_v13, %v8756_v8 }
 0x58b   : > { %v8758_v9 = vshrl.u32 %v23414_v19, %v8757_v28  ;;  %v8760_v18 = vshrl.u32 %v23415_v61, %v8757_v28  ;;  %v8763_v1 = vshrl.u32 %v23416_v58, %v8757_v28  ;;  %v8766_v15 = vshrl.u32 %v23417_v63, %v8757_v28 }
 0x58c   : > { %v7960_v14 = vsub.f32 %v7944_v55, %v7896_v45  ;;  %v8769_v33 = vshrl.u32 %v23504_v13, %v8757_v28  ;;  %v20839_v48 = vsub.s32 %v8594_v0, %v8597_v3  ;;  %v8772_v40 = vshrl.u32 %v23505_v43, %v8757_v28 }
 0x58d   : > { %v8761_v41 = vor.u32 %v8760_v18, %v8759_v10  ;;  %v8764_v44 = vor.u32 %v8763_v1, %v8762_v54  ;;  %v8767_v27 = vor.u32 %v8766_v15, %v8765_v17  ;;  %vm8774_vm1 = vcmp.lt.s32.totalorder %v8755_v22, 1 }
 0x58e   : > { %v13781_v16 = vpack.c.bf16 %v7960_v14, %v7928_v7  ;;  %v8600_v53 = vsub.s32 0, %v20839_v48  ;;  %v8770_v36 = vor.u32 %v8769_v33, %v8768_v31  ;;  %v8773_v45 = vor.u32 %v8772_v40, %v8771_v62 }
 0x58f   : > { %vm8775_vm13 = vcmp.lt.s32.totalorder %v8755_v22, 2  ;;  %vm8776_vm0 = vcmp.lt.s32.totalorder %v8755_v22, 3  ;;  %vm8777_vm11 = vcmp.lt.s32.totalorder %v8755_v22, 4  ;;  %v8778_v56 = vsel %vm8774_vm1, %v8758_v9, %v8761_v41 }
 0x590   : > { %13782 = vmatprep.subr.bf16.mxu1 %v13781_v16  ;;  %v13019_v59 = vmin.u32 %v8600_v53, %v20839_v48  ;;  %v8779_v0 = vsel %vm8777_vm11, %v8767_v27, 2102212464  ;;  %v8782_v26 = vsel %vm8774_vm1, %v8761_v41, %v8764_v44  ;;  %v8783_v57 = vsel %vm8777_vm11, %v8770_v36, 920167782 }
 0x591   : > { %13784 = vmatpush1.bf16.msra.mxu1 %v13783_v25  ;;  %v8780_v52 = vsel %vm8776_vm0, %v8764_v44, %v8779_v0  ;;  %v8784_v4 = vsel %vm8776_vm0, %v8767_v27, %v8783_v57  ;;  %v8786_v29 = vsel %vm8774_vm1, %v8764_v44, %v8767_v27  ;;  %v8787_v8 = vsel %vm8777_vm11, %v8773_v45, 1326507024 }
 0x592   : > { %v8602_v7 = vclz %v13019_v59  ;;  %v8785_v2 = vsel %vm8775_vm13, %v8782_v26, %v8784_v4  ;;  %v8788_v28 = vsel %vm8776_vm0, %v8770_v36, %v8787_v8  ;;  %v22903_v54 = vand.u32 2147483647, %v20562_v49 }
 0x593   : > { %v8789_v25 = vsel %vm8775_vm13, %v8786_v29, %v8788_v28  ;;  %v20849_v10 = vmul.u32.u64.low %v8790_v32, %v8785_v2  ;;  %v20850_v55 = vmul.u32.u64.high %v8790_v32, %v8785_v2, %v20849_v10  ;;  %v8781_v31 = vsel %vm8775_vm13, %v8778_v56, %v8780_v52 }
 0x594   : > { %13017 = vmatmul.mubr.msk.f32.vlgmr.msra.gmra.mrb[174].mxu1 %vm23507_vm3, %v20507_v12  ;;  %v13020_v17 = vadd.s32 4294967294, %v8602_v7  ;;  %v20855_v3 = vmul.u32.u64.low %v8790_v32, %v8789_v25  ;;  %v20856_v9 = vmul.u32.u64.high %v8790_v32, %v8789_v25, %v20855_v3  ;;  %vm8649_vm5 = vcmp.gt.s32.totalorder %v8648_v24, 0  ;;  %v20859_v12 = vpop.f32.mrb[170].mxu0 }
 0x595   : > { %12225 = vmatprep.mubr.f32.mxu1 %v23387_v23  ;;  %v8650_v18 = vsel %vm8649_vm5, %v8648_v24, 0  ;;  %v8797_v14 = vmul.u32 %v8790_v32, %v8781_v31  ;;  %v8800_v1 = vadd.s32 1, %v20850_v55  ;;  %v20862_v33 = vpop.f32.mrb[171].mxu0  ;;  %v8645_v22 = vand.u32 8388607, %v22903_v54 }
 0x596   : > { %vm13021_vm8 = vcmp.lt.s32.totalorder %v13020_v17, 0  ;;  %v8652_v15 = vand.u32 31, %v8650_v18  ;;  %v8590_v40 = vadd.s32 %v20802_v50, %v20797_v38  ;;  %vm8799_vm2 = vc.u32 %v20856_v9, %v20849_v10 }
 0x597   : > { %v8605_v62 = vsel %vm13021_vm8, 0, %v13020_v17  ;;  %v8801_v32 = vsel %vm8799_vm2, %v8800_v1, %v20850_v55  ;;  %v8651_v45 = vshrl.u32 %v8650_v18, 5  ;;  %v8646_v50 = vor.u32 8388608, %v8645_v22 }
 0x598   : > { %v8610_v41 = vsub.s32 4294967266, %v8605_v62  ;;  %v8606_v16 = vsub.s32 32, %v8605_v62  ;;  %v8653_v44 = vsub.s32 32, %v8652_v15  ;;  %v8655_v27 = vshll.u32 %v23414_v19, %v8652_v15 }
 0x599   : > { %v8658_v24 = vshll.u32 %v23415_v61, %v8652_v15  ;;  %v8661_v53 = vshll.u32 %v23416_v58, %v8652_v15  ;;  %v8802_v36 = vadd.s32 %v8801_v32, %v8797_v14  ;;  %v8664_v26 = vshll.u32 %v23417_v63, %v8652_v15 }
 0x59a   : > { %v8656_v56 = vshrl.u32 %v23415_v61, %v8653_v44  ;;  %v8659_v59 = vshrl.u32 %v23416_v58, %v8653_v44  ;;  %v8611_v38 = vadd.s32 127, %v8610_v41  ;;  %v8662_v0 = vshrl.u32 %v23417_v63, %v8653_v44 }
 0x59b   : > { %v8607_v57 = vshll.u32 %v20839_v48, %v8605_v62  ;;  %v8608_v52 = vshrl.u32 %v8590_v40, %v8606_v16  ;;  %v8803_v4 = vadd.s32 536870912, %v8802_v36  ;;  %v8665_v29 = vshrl.u32 %v23504_v13, %v8653_v44  ;;  %v14476_v62 = vpop.eup %14475 }
 0x59c   : > { %v8657_v8 = vor.u32 %v8656_v56, %v8655_v27  ;;  %v8660_v7 = vor.u32 %v8659_v59, %v8658_v24  ;;  %v8663_v20 = vor.u32 %v8662_v0, %v8661_v53  ;;  %v8667_v2 = vshll.u32 %v23504_v13, %v8652_v15 }
 0x59d   : > { %v20881_v28 = vshrl.u32 %v8803_v4, 30  ;;  %v8666_v25 = vor.u32 %v8665_v29, %v8664_v26  ;;  %v8668_v55 = vshrl.u32 %v23505_v43, %v8653_v44  ;;  %vm8670_vm9 = vcmp.lt.s32.totalorder %v8651_v45, 1 }
 0x59e   : > { %v8612_v17 = vshll.u32 %v8611_v38, 23  ;;  %v8654_v31 = vshrl.u32 %v23414_v19, %v8653_v44  ;;  %vm8672_vm10 = vcmp.lt.s32.totalorder %v8651_v45, 3  ;;  %vm8673_vm4 = vcmp.lt.s32.totalorder %v8651_v45, 4 }
 0x59f   : > { %v8805_v48 = vshll.u32 %v20881_v28, 30  ;;  %v8669_v3 = vor.u32 %v8668_v55, %v8667_v2  ;;  %vm8671_vm6 = vcmp.lt.s32.totalorder %v8651_v45, 2  ;;  %v22902_v18 = vand.u32 2147483647, %v20604_v34 }
 0x5a0   : > { %v8675_v14 = vsel %vm8673_vm4, %v8663_v20, 2102212464  ;;  %v8678_v1 = vsel %vm8670_vm9, %v8657_v8, %v8660_v7  ;;  %v8679_v15 = vsel %vm8673_vm4, %v8666_v25, 920167782  ;;  %v8686_v41 = vshll.u32 %v8646_v50, 8  ;;  %v20900_v50 = vpop.f32.mrb[170].mxu1 }
 0x5a1   : > { %v8609_v22 = vor.u32 %v8608_v52, %v8607_v57  ;;  %v20890_v40 = vsub.s32 %v8802_v36, %v8805_v48  ;;  %v8680_v16 = vsel %vm8672_vm10, %v8663_v20, %v8679_v15  ;;  %v8849_v44 = vand.u32 2139095040, %v20604_v34  ;;  %v20909_v52 = vpop.f32.mrb[171].mxu1 }
 0x5a2   : > { %v8613_v32 = vor.u32 4788187, %v8612_v17  ;;  %v8674_v27 = vsel %vm8670_vm9, %v8654_v31, %v8657_v8  ;;  %v8676_v24 = vsel %vm8672_vm10, %v8660_v7, %v8675_v14  ;;  %v8681_v53 = vsel %vm8671_vm6, %v8678_v1, %v8680_v16 }
 0x5a3   : > { %v8808_v56 = vsub.s32 0, %v20890_v40  ;;  %v8682_v59 = vsel %vm8670_vm9, %v8660_v7, %v8663_v20  ;;  %v8683_v38 = vsel %vm8673_vm4, %v8669_v3, 1326507024  ;;  %v8853_v57 = vand.u32 8388607, %v22902_v18 }
 0x5a4   : > { %v8684_v36 = vsel %vm8672_vm10, %v8666_v25, %v8683_v38  ;;  %v20903_v0 = vmul.u32.u64.low %v8686_v41, %v8681_v53  ;;  %v20904_v26 = vmul.u32.u64.high %v8686_v41, %v8681_v53, %v20903_v0  ;;  %v8677_v29 = vsel %vm8671_vm6, %v8674_v27, %v8676_v24 }
 0x5a5   : > { %v13027_v4 = vmin.u32 %v8808_v56, %v20890_v40  ;;  %v8685_v8 = vsel %vm8671_vm6, %v8682_v59, %v8684_v36  ;;  %v8850_v7 = vshrl.u32 %v8849_v44, 23  ;;  %v8614_v20 = vand.u32 2147483647, %v8613_v32 }
 0x5a6   : > { %v8616_v2 = vcvt.s32.f32 %v8609_v22  ;;  %v20914_v55 = vmul.u32.u64.low %v8686_v41, %v8685_v8  ;;  %v20915_v25 = vmul.u32.u64.high %v8686_v41, %v8685_v8, %v20914_v55  ;;  %v11910_v48 = vadd.f32 1.0, %v14476_v62 }
 0x5a7   : > { %v8810_v17 = vclz %v13027_v4  ;;  %v13030_v31 = vadd.s32 4294967169, %v8850_v7  ;;  %v8693_v3 = vmul.u32 %v8686_v41, %v8677_v29  ;;  %v8696_v14 = vadd.s32 1, %v20904_v26 }
 0x5a8   : > { %v13148_v15 = vmul.f32 -1.442695, %v20450_v42  ;;  %v20919_v53 = vmul.f32 %v8616_v2, %v8614_v20  ;;  %vm8695_vm15 = vc.u32 %v20915_v25, %v20903_v0  ;;  %v8854_v45 = vor.u32 8388608, %v8853_v57 }
 0x5a9   : > { %v13028_v1 = vadd.s32 4294967294, %v8810_v17  ;;  %v8856_v16 = vadd.s32 1, %v13030_v31  ;;  %v8697_v22 = vsel %vm8695_vm15, %v8696_v14, %v20904_v26  ;;  %v22901_v44 = vand.u32 2147483647, %v20859_v12 }
 0x5aa   : > { %14477 = vrcp.f32 %v11910_v48  ;;  %v8698_v41 = vadd.s32 %v8697_v22, %v8693_v3  ;;  %v8798_v27 = vadd.s32 %v20849_v10, %v20856_v9  ;;  %v20928_v24 = vmul.f32 -1.442695, %v20562_v49 }
 0x5ab   : > { %vm13029_vm14 = vcmp.lt.s32.totalorder %v13028_v1, 0  ;;  %vm8857_vm12 = vcmp.gt.s32.totalorder %v8856_v16, 0  ;;  %14479 = vpow2.f32 %v13148_v15  ;;  %v8953_v56 = vand.u32 2139095040, %v20859_v12 }
 0x5ac   : > { %v8813_v62 = vsel %vm13029_vm14, 0, %v13028_v1  ;;  %v8858_v32 = vsel %vm8857_vm12, %v8856_v16, 0  ;;  %v8699_v36 = vadd.s32 536870912, %v8698_v41  ;;  %v20932_v29 = vshll.u32 %v8854_v45, 8 }
 0x5ad   : > { %v8814_v38 = vsub.s32 32, %v8813_v62  ;;  %v8860_v26 = vand.u32 31, %v8858_v32  ;;  %v8818_v57 = vsub.s32 4294967266, %v8813_v62  ;;  %v8859_v4 = vshrl.u32 %v8858_v32, 5 }
 0x5ae   : > { %v20936_v8 = vand.u32 8388607, %v22901_v44  ;;  %v20938_v10 = vshrl.u32 %v8699_v36, 30  ;;  %v8815_v2 = vshll.u32 %v20890_v40, %v8813_v62  ;;  %v8954_v31 = vshrl.u32 %v8953_v56, 23 }
 0x5af   : > { %v8861_v9 = vsub.s32 32, %v8860_v26  ;;  %v8863_v7 = vshll.u32 %v23414_v19, %v8860_v26  ;;  %v8866_v20 = vshll.u32 %v23415_v61, %v8860_v26  ;;  %v8869_v55 = vshll.u32 %v23416_v58, %v8860_v26 }
 0x5b0   : > { %v8872_v17 = vshll.u32 %v23417_v63, %v8860_v26  ;;  %v8816_v48 = vshrl.u32 %v8798_v27, %v8814_v38  ;;  %v8701_v3 = vshll.u32 %v20938_v10, 30  ;;  %v8819_v15 = vadd.s32 127, %v8818_v57 }
 0x5b1   : > { %v8864_v14 = vshrl.u32 %v23415_v61, %v8861_v9  ;;  %v8867_v1 = vshrl.u32 %v23416_v58, %v8861_v9  ;;  %v8870_v16 = vshrl.u32 %v23417_v63, %v8861_v9  ;;  %v8873_v45 = vshrl.u32 %v23504_v13, %v8861_v9 }
 0x5b2   : > { %vm8878_vm1 = vcmp.lt.s32.totalorder %v8859_v4, 1  ;;  %v20951_v40 = vsub.s32 %v8698_v41, %v8701_v3  ;;  %v8875_v32 = vshll.u32 %v23504_v13, %v8860_v26  ;;  %v8862_v27 = vshrl.u32 %v23414_v19, %v8861_v9 }
 0x5b3   : > { %v8865_v22 = vor.u32 %v8864_v14, %v8863_v7  ;;  %v8868_v62 = vor.u32 %v8867_v1, %v8866_v20  ;;  %v8871_v56 = vor.u32 %v8870_v16, %v8869_v55  ;;  %v8874_v38 = vor.u32 %v8873_v45, %v8872_v17 }
 0x5b4   : > { %v8876_v36 = vshrl.u32 %v23505_v43, %v8861_v9  ;;  %v20956_v44 = vpop.eup %14477  ;;  %v8704_v57 = vsub.s32 0, %v20951_v40  ;;  %vm8879_vm13 = vcmp.lt.s32.totalorder %v8859_v4, 2  ;;  %vm8880_vm0 = vcmp.lt.s32.totalorder %v8859_v4, 3 }
 0x5b5   : > { %vm8881_vm11 = vcmp.lt.s32.totalorder %v8859_v4, 4  ;;  %v14480_v18 = vpop.eup %14479  ;;  %v8820_v41 = vshll.u32 %v8819_v15, 23  ;;  %v8886_v20 = vsel %vm8878_vm1, %v8865_v22, %v8868_v62  ;;  %vm20962_vm3 = vcmp.le.f32.partialorder %v8534_v60, 0.7853982 }
 0x5b6   : > { %v8877_v3 = vor.u32 %v8876_v36, %v8875_v32  ;;  %v8883_v7 = vsel %vm8881_vm11, %v8871_v56, 2102212464  ;;  %v13023_v9 = vmin.u32 %v8704_v57, %v20951_v40  ;;  %v8887_v55 = vsel %vm8881_vm11, %v8874_v38, 920167782 }
 0x5b7   : > { %v8890_v17 = vsel %vm8878_vm1, %v8868_v62, %v8871_v56  ;;  %v13034_v14 = vadd.s32 4294967169, %v8954_v31  ;;  %v8882_v1 = vsel %vm8878_vm1, %v8862_v27, %v8865_v22  ;;  %v8884_v15 = vsel %vm8880_vm0, %v8868_v62, %v8883_v7 }
 0x5b8   : > { %v8888_v16 = vsel %vm8880_vm0, %v8871_v56, %v8887_v55  ;;  %v8891_v45 = vsel %vm8881_vm11, %v8877_v3, 1326507024  ;;  %v8817_v32 = vor.u32 %v8816_v48, %v8815_v2  ;;  %v8706_v36 = vclz %v13023_v9 }
 0x5b9   : > { %v8889_v60 = vsel %vm8879_vm13, %v8886_v20, %v8888_v16  ;;  %v8892_v54 = vsel %vm8880_vm0, %v8874_v38, %v8891_v45  ;;  %v8821_v21 = vor.u32 4788187, %v8820_v41  ;;  %v8885_v22 = vsel %vm8879_vm13, %v8882_v1, %v8884_v15 }
 0x5ba   : > { %v8893_v57 = vsel %vm8879_vm13, %v8890_v17, %v8892_v54  ;;  %v20975_v59 = vmul.u32.u64.low %v20932_v29, %v8889_v60  ;;  %v20976_v47 = vmul.u32.u64.high %v20932_v29, %v8889_v60, %v20975_v59  ;;  %v13024_v31 = vadd.s32 4294967294, %v8706_v36 }
 0x5bb   : > { %v20981_v62 = vmul.u32.u64.low %v20932_v29, %v8893_v57  ;;  %v20982_v27 = vmul.u32.u64.high %v20932_v29, %v8893_v57, %v20981_v62  ;;  %v8620_v2 = vsub.s32 4, %v20826_v6  ;;  %v11912_v48 = vadd.f32 1.0, %v14480_v18 }
 0x5bc   : > { %14481 = vpow2.f32 %v20928_v24  ;;  %v8960_v56 = vadd.s32 1, %v13034_v14  ;;  %v23510_v54 = vxor.u32 2147483648, %v20919_v53  ;;  %v8694_v4 = vadd.s32 %v20903_v0, %v20915_v25 }
 0x5bd   : > { %vm13025_vm5 = vcmp.lt.s32.totalorder %v13024_v31, 0  ;;  %v9161_v41 = vand.u32 2139095040, %v20900_v50  ;;  %v8901_v7 = vmul.u32 %v20932_v29, %v8885_v22  ;;  %v8904_v18 = vadd.s32 1, %v20976_v47 }
 0x5be   : > { %v8619_v38 = vsel %vm8536_vm7, %v23510_v54, %v20919_v53  ;;  %v20994_v3 = vsel %vm13025_vm5, 0, %v13024_v31  ;;  %vm8961_vm8 = vcmp.gt.s32.totalorder %v8960_v56, 0  ;;  %v8822_v24 = vand.u32 2147483647, %v8821_v21 }
 0x5bf   : > { %v8824_v20 = vcvt.s32.f32 %v8817_v32  ;;  %v8710_v9 = vsub.s32 32, %v20994_v3  ;;  %v8958_v55 = vor.u32 8388608, %v20936_v8  ;;  %v21003_v0 = vsel %vm8536_vm7, %v8620_v2, %v20826_v6 }
 0x5c0   : > { %vm8903_vm2 = vc.u32 %v20982_v27, %v20975_v59  ;;  %v21008_v25 = vmul.f32 -1.442695, %v20604_v34  ;;  %v8962_v53 = vsel %vm8961_vm8, %v8960_v56, 0  ;;  %14483 = vrcp.f32 %v11912_v48 }
 0x5c1   : > { %v8714_v21 = vsub.s32 4294967266, %v20994_v3  ;;  %v8905_v29 = vsel %vm8903_vm2, %v8904_v18, %v20976_v47  ;;  %v9162_v17 = vshrl.u32 %v9161_v41, 23  ;;  %v8622_v8 = vsel %vm20962_vm3, %v23503_v51, %v8619_v38 }
 0x5c2   : > { %v8906_v14 = vadd.s32 %v8905_v29, %v8901_v7  ;;  %v8963_v6 = vshrl.u32 %v8962_v53, 5  ;;  %v8964_v1 = vand.u32 31, %v8962_v53  ;;  %v21015_v15 = vmul.f32 %v8824_v20, %v8822_v24 }
 0x5c3   : > { %v8711_v16 = vshll.u32 %v20951_v40, %v20994_v3  ;;  %v8712_v45 = vshrl.u32 %v8694_v4, %v8710_v9  ;;  %v21019_v32 = vshll.u32 %v8958_v55, 8  ;;  %v8715_v31 = vadd.s32 127, %v8714_v21 }
 0x5c4   : > { %v8907_v36 = vadd.s32 536870912, %v8906_v14  ;;  %v8965_v60 = vsub.s32 32, %v8964_v1  ;;  %v8967_v47 = vshll.u32 %v23414_v19, %v8964_v1  ;;  %v8970_v57 = vshll.u32 %v23415_v61, %v8964_v1 }
 0x5c5   : > { %v8973_v22 = vshll.u32 %v23416_v58, %v8964_v1  ;;  %v8976_v62 = vshll.u32 %v23417_v63, %v8964_v1  ;;  %v13042_v2 = vadd.s32 4294967169, %v9162_v17  ;;  %vm8982_vm9 = vcmp.lt.s32.totalorder %v8963_v6, 1 }
 0x5c6   : > { %v21025_v48 = vpop.eup %14481  ;;  %v21027_v56 = vshrl.u32 %v8907_v36, 30  ;;  %v8968_v40 = vshrl.u32 %v23415_v61, %v8965_v60  ;;  %v8971_v54 = vshrl.u32 %v23416_v58, %v8965_v60  ;;  %vm8744_vm10 = vcmp.lt.s32.totalorder %v20450_v42, 0 }
 0x5c7   : > { %v8966_v38 = vshrl.u32 %v23414_v19, %v8965_v60  ;;  %v8974_v4 = vshrl.u32 %v23417_v63, %v8965_v60  ;;  %v8977_v41 = vshrl.u32 %v23504_v13, %v8965_v60  ;;  %v8979_v3 = vshll.u32 %v23504_v13, %v8964_v1 }
 0x5c8   : > { %v8909_v7 = vshll.u32 %v21027_v56, 30  ;;  %v8969_v18 = vor.u32 %v8968_v40, %v8967_v47  ;;  %v8972_v24 = vor.u32 %v8971_v54, %v8970_v57  ;;  %v8980_v20 = vshrl.u32 %v23505_v43, %v8965_v60 }
 0x5c9   : > { %v8716_v9 = vshll.u32 %v8715_v31, 23  ;;  %v8975_v55 = vor.u32 %v8974_v4, %v8973_v22  ;;  %v8978_v53 = vor.u32 %v8977_v41, %v8976_v62  ;;  %vm8984_vm4 = vcmp.lt.s32.totalorder %v8963_v6, 3 }
 0x5ca   : > { %v21038_v21 = vsub.s32 %v8906_v14, %v8909_v7  ;;  %v8981_v29 = vor.u32 %v8980_v20, %v8979_v3  ;;  %vm8983_vm6 = vcmp.lt.s32.totalorder %v8963_v6, 2  ;;  %vm8985_vm15 = vcmp.lt.s32.totalorder %v8963_v6, 4  ;;  %v21040_v17 = vpop.eup %14483 }
 0x5cb   : > { %23511 = vst [vmem:[#allocation48_spill] sm:$0xff] %v21040_v17  ;;  %v8986_v36 = vsel %vm8982_vm9, %v8966_v38, %v8969_v18  ;;  %v8987_v1 = vsel %vm8985_vm15, %v8975_v55, 2102212464  ;;  %v8990_v35 = vsel %vm8982_vm9, %v8969_v18, %v8972_v24  ;;  %v8991_v47 = vsel %vm8985_vm15, %v8978_v53, 920167782 }
 0x5cc   : > { %v8912_v57 = vsub.s32 0, %v21038_v21  ;;  %v8988_v60 = vsel %vm8984_vm4, %v8972_v24, %v8987_v1  ;;  %v8992_v31 = vsel %vm8984_vm4, %v8975_v55, %v8991_v47  ;;  %v8994_v14 = vsel %vm8982_vm9, %v8972_v24, %v8975_v55 }
 0x5cd   : > { %v8713_v22 = vor.u32 %v8712_v45, %v8711_v16  ;;  %v8717_v62 = vor.u32 4788187, %v8716_v9  ;;  %v8993_v40 = vsel %vm8983_vm6, %v8990_v35, %v8992_v31  ;;  %v8995_v54 = vsel %vm8985_vm15, %v8981_v29, 1326507024 }
 0x5ce   : > { %14485 = vcosq.f32 %v8622_v8  ;;  %v8826_v38 = vxor.u32 2147483648, %v21015_v15  ;;  %v13031_v4 = vmin.u32 %v8912_v57, %v21038_v21  ;;  %v8996_v41 = vsel %vm8984_vm4, %v8978_v53, %v8995_v54 }
 0x5cf   : > { %v8989_v3 = vsel %vm8983_vm6, %v8986_v36, %v8988_v60  ;;  %v8997_v7 = vsel %vm8983_vm6, %v8994_v14, %v8996_v41  ;;  %v21055_v18 = vmul.u32.u64.low %v21019_v32, %v8993_v40  ;;  %v21056_v20 = vmul.u32.u64.high %v21019_v32, %v8993_v40, %v21055_v18 }
 0x5d0   : > { %v8914_v16 = vclz %v13031_v4  ;;  %v21060_v35 = vmul.u32.u64.low %v21019_v32, %v8997_v7  ;;  %v21061_v45 = vmul.u32.u64.high %v21019_v32, %v8997_v7, %v21060_v35  ;;  %v22907_v24 = vand.u32 2147483647, %v20900_v50 }
 0x5d1   : > { %14487 = vsinq.f32 %v8622_v8  ;;  %v8718_v9 = vand.u32 2147483647, %v8717_v62  ;;  %v8720_v55 = vcvt.s32.f32 %v8713_v22  ;;  %v9168_v53 = vadd.s32 1, %v13042_v2 }
 0x5d2   : > { %v21067_v6 = vsel %vm8744_vm10, %v8826_v38, %v21015_v15  ;;  %v13032_v29 = vadd.s32 4294967294, %v8914_v16  ;;  %v9005_v36 = vmul.u32 %v21019_v32, %v8989_v3  ;;  %v13150_v1 = vmul.f32 -1.442695, %v20859_v12 }
 0x5d3   : > { %v8902_v47 = vadd.s32 %v20975_v59, %v20982_v27  ;;  %v9008_v57 = vadd.s32 1, %v21056_v20  ;;  %vm9169_vm14 = vcmp.gt.s32.totalorder %v9168_v53, 0  ;;  %v13152_v8 = vmul.f32 -1.442695, %v20900_v50 }
 0x5d4   : > { %vm13033_vm12 = vcmp.lt.s32.totalorder %v13032_v29, 0  ;;  %vm9007_vm7 = vc.u32 %v21061_v45, %v21055_v18  ;;  %v9165_v15 = vand.u32 8388607, %v22907_v24  ;;  %v9170_v2 = vsel %vm9169_vm14, %v9168_v53, 0 }
 0x5d5   : > { %v21079_v60 = vmul.f32 %v8720_v55, %v8718_v9  ;;  %v8917_v32 = vsel %vm13033_vm12, 0, %v13032_v29  ;;  %v9009_v31 = vsel %vm9007_vm7, %v9008_v57, %v21056_v20  ;;  %v9172_v14 = vand.u32 31, %v9170_v2 }
 0x5d6   : > { %v8918_v59 = vsub.s32 32, %v8917_v32  ;;  %v8919_v27 = vshll.u32 %v21038_v21, %v8917_v32  ;;  %v8922_v22 = vsub.s32 4294967266, %v8917_v32  ;;  %v9010_v62 = vadd.s32 %v9009_v31, %v9005_v36 }
 0x5d7   : > { %v21083_v40 = vshrl.u32 %v9170_v2, 5  ;;  %v9173_v54 = vsub.s32 32, %v9172_v14  ;;  %v9175_v38 = vshll.u32 %v23414_v19, %v9172_v14  ;;  %v9178_v4 = vshll.u32 %v23415_v61, %v9172_v14 }
 0x5d8   : > { %v21087_v41 = vpop.eup %14485  ;;  %v8920_v3 = vshrl.u32 %v8902_v47, %v8918_v59  ;;  %v8923_v7 = vadd.s32 127, %v8922_v22  ;;  %v9011_v16 = vadd.s32 536870912, %v9010_v62  ;;  %v9181_v20 = vshll.u32 %v23416_v58, %v9172_v14 }
 0x5d9   : > { %v23512_v35 = vand.u32 2147483647, %v20450_v42  ;;  %vm8640_vm13 = vcmp.lt.s32.totalorder %v20562_v49, 0  ;;  %v9176_v9 = vshrl.u32 %v23415_v61, %v9173_v54  ;;  %v9179_v55 = vshrl.u32 %v23416_v58, %v9173_v54 }
 0x5da   : > { %v9182_v53 = vshrl.u32 %v23417_v63, %v9173_v54  ;;  %v9184_v29 = vshll.u32 %v23417_v63, %v9172_v14  ;;  %v8921_v36 = vor.u32 %v8920_v3, %v8919_v27  ;;  %v8924_v47 = vshll.u32 %v8923_v7, 23 }
 0x5db   : > { %vm21092_vm1 = vcmp.le.f32.partialorder %v23512_v35, 0.7853982  ;;  %v21101_v57 = vshrl.u32 %v9011_v16, 30  ;;  %v9185_v2 = vshrl.u32 %v23504_v13, %v9173_v54  ;;  %v21104_v32 = vpop.eup %14487  ;;  %v8722_v31 = vxor.u32 2147483648, %v21079_v60 }
 0x5dc   : > { %14489 = vpow2.f32 %v13150_v1  ;;  %v9166_v59 = vor.u32 8388608, %v9165_v15  ;;  %v9187_v22 = vshll.u32 %v23504_v13, %v9172_v14  ;;  %v23515_v35 = vand.u32 2147483647, %v20562_v49 }
 0x5dd   : > { %v8925_v27 = vor.u32 4788187, %v8924_v47  ;;  %v9013_v3 = vshll.u32 %v21101_v57, 30  ;;  %v9177_v7 = vor.u32 %v9176_v9, %v9175_v38  ;;  %v9180_v16 = vor.u32 %v9179_v55, %v9178_v4 }
 0x5de   : > { %vm21110_vm0 = vcmp.le.f32.partialorder %v23515_v35, 0.7853982  ;;  %v9183_v5 = vor.u32 %v9182_v53, %v9181_v20  ;;  %v9186_v11 = vor.u32 %v9185_v2, %v9184_v29  ;;  %v9188_v39 = vshrl.u32 %v23505_v43, %v9173_v54 }
 0x5df   : > { %vm9190_vm11 = vcmp.lt.s32.totalorder %v21083_v40, 1  ;;  %v8928_v1 = vcvt.s32.f32 %v8921_v36  ;;  %v21117_v15 = vsub.s32 %v9010_v62, %v9013_v3  ;;  %v9174_v14 = vshrl.u32 %v23414_v19, %v9173_v54 }
 0x5e0   : > { %14491 = vpow2.f32 %v13152_v8  ;;  %v8926_v35 = vand.u32 2147483647, %v8925_v27  ;;  %v9189_v46 = vor.u32 %v9188_v39, %v9187_v22  ;;  %vm9192_vm5 = vcmp.lt.s32.totalorder %v21083_v40, 3 }
 0x5e1   : > { %vm9193_vm8 = vcmp.lt.s32.totalorder %v21083_v40, 4  ;;  %vm8848_vm2 = vcmp.lt.s32.totalorder %v20604_v34, 0  ;;  %v9016_v38 = vsub.s32 0, %v21117_v15  ;;  %vm9191_vm9 = vcmp.lt.s32.totalorder %v21083_v40, 2 }
 0x5e2   : > { %v9195_v4 = vsel %vm9193_vm8, %v9183_v5, 2102212464  ;;  %v9198_v62 = vsel %vm9190_vm11, %v9177_v7, %v9180_v16  ;;  %v9199_v20 = vsel %vm9193_vm8, %v9186_v11, 920167782  ;;  %v9202_v8 = vsel %vm9190_vm11, %v9180_v16, %v9183_v5 }
 0x5e3   : > { %v9203_v54 = vsel %vm9193_vm8, %v9189_v46, 1326507024  ;;  %v9206_v39 = vshll.u32 %v9166_v59, 8  ;;  %v13035_v9 = vmin.u32 %v9016_v38, %v21117_v15  ;;  %v9194_v55 = vsel %vm9190_vm11, %v9174_v14, %v9177_v7 }
 0x5e4   : > { %v9200_v53 = vsel %vm9192_vm5, %v9183_v5, %v9199_v20  ;;  %v9057_v29 = vand.u32 2139095040, %v20862_v33  ;;  %v8929_v36 = vmul.f32 %v8928_v1, %v8926_v35  ;;  %v9196_v47 = vsel %vm9192_vm5, %v9180_v16, %v9195_v4 }
 0x5e5   : > { %v9201_v2 = vsel %vm9191_vm9, %v9198_v62, %v9200_v53  ;;  %v9204_v46 = vsel %vm9192_vm5, %v9186_v11, %v9203_v54  ;;  %v8830_v59 = vsel %vm21092_vm1, %v20450_v42, %v21067_v6  ;;  %v8723_v5 = vsel %vm8640_vm13, %v8722_v31, %v21079_v60 }
 0x5e6   : > { %v9018_v22 = vclz %v13035_v9  ;;  %v9205_v27 = vsel %vm9191_vm9, %v9202_v8, %v9204_v46  ;;  %v14490_v3 = vpop.eup %14489  ;;  %v8828_v7 = vsub.s32 4, %v20881_v28  ;;  %v23518_v16 = vand.u32 2147483647, %v20604_v34 }
 0x5e7   : > { %14493 = vpow2.f32 %v21008_v25  ;;  %v21158_v6 = vmul.u32.u64.low %v9206_v39, %v9205_v27  ;;  %v21159_v1 = vmul.u32.u64.high %v9206_v39, %v9205_v27, %v21158_v6  ;;  %v9197_v60 = vsel %vm9191_vm9, %v9194_v55, %v9196_v47 }
 0x5e8   : > { %vm21153_vm4 = vcmp.le.f32.partialorder %v23518_v16, 0.7853982  ;;  %v13036_v14 = vadd.s32 4294967294, %v9018_v22  ;;  %v21163_v31 = vmul.u32.u64.low %v9206_v39, %v9201_v2  ;;  %v21164_v35 = vmul.u32.u64.high %v9206_v39, %v9201_v2, %v21163_v31 }
 0x5e9   : > { %14495 = vcosq.f32 %v8830_v59  ;;  %v8726_v38 = vsel %vm21110_vm0, %v20562_v49, %v8723_v5  ;;  %v8930_v4 = vxor.u32 2147483648, %v8929_v36  ;;  %v9058_v62 = vshrl.u32 %v9057_v29, 23 }
 0x5ea   : > { %v14492_v20 = vpop.eup %14491  ;;  %14497 = vsinq.f32 %v8830_v59  ;;  %v9006_v25 = vadd.s32 %v21055_v18, %v21061_v45  ;;  %vm13037_vm6 = vcmp.lt.s32.totalorder %v13036_v14, 0  ;;  %v22912_v40 = vand.u32 2147483647, %v20862_v33 }
 0x5eb   : > { %v9021_v8 = vsel %vm13037_vm6, 0, %v13036_v14  ;;  %v9213_v54 = vmul.u32 %v9206_v39, %v9197_v60  ;;  %vm9215_vm15 = vc.u32 %v21159_v1, %v21163_v31  ;;  %v13038_v9 = vadd.s32 4294967169, %v9058_v62 }
 0x5ec   : > { %14499 = vcosq.f32 %v8726_v38  ;;  %v9022_v55 = vsub.s32 32, %v9021_v8  ;;  %v9026_v53 = vsub.s32 4294967266, %v9021_v8  ;;  %v9216_v47 = vadd.s32 1, %v21164_v35 }
 0x5ed   : > { %v8931_v29 = vsel %vm8848_vm2, %v8930_v4, %v8929_v36  ;;  %v11914_v2 = vadd.f32 1.0, %v14490_v3  ;;  %v11916_v46 = vadd.f32 1.0, %v14492_v20  ;;  %v9064_v18 = vadd.s32 1, %v13038_v9 }
 0x5ee   : > { %v9027_v45 = vadd.s32 127, %v9026_v53  ;;  %v9217_v59 = vsel %vm9215_vm15, %v9216_v47, %v21164_v35  ;;  %v9061_v39 = vand.u32 8388607, %v22912_v40  ;;  %v9265_v5 = vand.u32 2139095040, %v20909_v52 }
 0x5ef   : > { %v9023_v22 = vshll.u32 %v21117_v15, %v9021_v8  ;;  %v9024_v27 = vshrl.u32 %v9006_v25, %v9022_v55  ;;  %v9218_v16 = vadd.s32 %v9217_v59, %v9213_v54  ;;  %vm9065_vm14 = vcmp.gt.s32.totalorder %v9064_v18, 0 }
 0x5f0   : > { %v21186_v36 = vsel %vm20962_vm3, 0, %v21003_v0  ;;  %14501 = vsinq.f32 %v8726_v38  ;;  %v9028_v3 = vshll.u32 %v9027_v45, 23  ;;  %v9066_v6 = vsel %vm9065_vm14, %v9064_v18, 0 }
 0x5f1   : > { %v21188_v14 = vpop.eup %14493  ;;  %v21193_v60 = vsel %vm8744_vm10, %v8828_v7, %v20881_v28  ;;  %14503 = vrcp.f32 %v11914_v2  ;;  %v9219_v15 = vadd.s32 536870912, %v9218_v16  ;;  %v9068_v35 = vand.u32 31, %v9066_v6 }
 0x5f2   : > { %v21198_v4 = vsel %vm21153_vm4, %v20604_v34, %v8931_v29  ;;  %14505 = vrcp.f32 %v11916_v46  ;;  %v9062_v26 = vor.u32 8388608, %v9061_v39  ;;  %v9025_v62 = vor.u32 %v9024_v27, %v9023_v22 }
 0x5f3   : > { %v21201_v38 = vpop.eup %14495  ;;  %v21203_v20 = vshrl.u32 %v9219_v15, 30  ;;  %v9069_v25 = vsub.s32 32, %v9068_v35  ;;  %v9266_v28 = vshrl.u32 %v9265_v5, 23  ;;  %v9029_v8 = vor.u32 4788187, %v9028_v3 }
 0x5f4   : > { %v21205_v7 = vpop.eup %14497  ;;  %v9067_v54 = vshrl.u32 %v9066_v6, 5  ;;  %v9071_v9 = vshll.u32 %v23414_v19, %v9068_v35  ;;  %v9074_v55 = vshll.u32 %v23415_v61, %v9068_v35  ;;  %v9077_v29 = vshll.u32 %v23416_v58, %v9068_v35 }
 0x5f5   : > { %23521 = vst [vmem:[#allocation35_spill] sm:$0xff] %v21203_v20  ;;  %v9221_v53 = vshll.u32 %v21203_v20, 30  ;;  %v9072_v47 = vshrl.u32 %v23415_v61, %v9069_v25  ;;  %v9080_v2 = vshll.u32 %v23417_v63, %v9068_v35  ;;  %v9075_v18 = vshrl.u32 %v23416_v58, %v9069_v25 }
 0x5f6   : > { %v21213_v46 = vpop.eup %14499  ;;  %v9078_v45 = vshrl.u32 %v23417_v63, %v9069_v25  ;;  %v9081_v59 = vshrl.u32 %v23504_v13, %v9069_v25  ;;  %v9083_v39 = vshll.u32 %v23504_v13, %v9068_v35  ;;  %v9032_v5 = vcvt.s32.f32 %v9025_v62 }
 0x5f7   : > { %v21219_v22 = vsub.s32 %v9218_v16, %v9221_v53  ;;  %v9084_v27 = vshrl.u32 %v23505_v43, %v9069_v25  ;;  %v13046_v3 = vadd.s32 4294967169, %v9266_v28  ;;  %v9030_v6 = vand.u32 2147483647, %v9029_v8 }
 0x5f8   : > { %v9070_v15 = vshrl.u32 %v23414_v19, %v9069_v25  ;;  %v9073_v40 = vor.u32 %v9072_v47, %v9071_v9  ;;  %v9076_v0 = vor.u32 %v9075_v18, %v9074_v55  ;;  %vm8952_vm3 = vcmp.lt.s32.totalorder %v20859_v12, 0 }
 0x5f9   : > { %v9224_v30 = vsub.s32 0, %v21219_v22  ;;  %v9079_v37 = vor.u32 %v9078_v45, %v9077_v29  ;;  %v9082_v20 = vor.u32 %v9081_v59, %v9080_v2  ;;  %vm9086_vm10 = vcmp.lt.s32.totalorder %v9067_v54, 1 }
 0x5fa   : > { %v21225_v23 = vpop.eup %14501  ;;  %v9085_v35 = vor.u32 %v9084_v27, %v9083_v39  ;;  %vm9088_vm12 = vcmp.lt.s32.totalorder %v9067_v54, 3  ;;  %vm9089_vm7 = vcmp.lt.s32.totalorder %v9067_v54, 4  ;;  %v23522_v16 = vand.u32 2147483647, %v20909_v52 }
 0x5fb   : > { %v21229_v28 = vpop.eup %14503  ;;  %v13043_v25 = vmin.u32 %v9224_v30, %v21219_v22  ;;  %vm9087_vm11 = vcmp.lt.s32.totalorder %v9067_v54, 2  ;;  %v9091_v8 = vsel %vm9089_vm7, %v9079_v37, 2102212464  ;;  %v9102_v9 = vshll.u32 %v9062_v26, 8 }
 0x5fc   : > { %v9269_v62 = vand.u32 8388607, %v23522_v16  ;;  %23523 = vst [vmem:[#allocation46_spill] sm:$0xff] %v21229_v28  ;;  %v21233_v55 = vpop.eup %14505  ;;  %v9033_v53 = vmul.f32 %v9032_v5, %v9030_v6  ;;  %v9094_v47 = vsel %vm9086_vm10, %v9073_v40, %v9076_v0  ;;  %v9095_v29 = vsel %vm9089_vm7, %v9082_v20, 920167782 }
 0x5fd   : > { %23524 = vst [vmem:[#allocation49_spill] sm:$0xff] %v21233_v55  ;;  %v9272_v2 = vadd.s32 1, %v13046_v3  ;;  %v9226_v18 = vclz %v13043_v25  ;;  %v9090_v45 = vsel %vm9086_vm10, %v9070_v15, %v9073_v40  ;;  %v9092_v59 = vsel %vm9088_vm12, %v9076_v0, %v9091_v8 }
 0x5fe   : > { %v9096_v39 = vsel %vm9088_vm12, %v9079_v37, %v9095_v29  ;;  %v9098_v27 = vsel %vm9086_vm10, %v9076_v0, %v9079_v37  ;;  %v9099_v26 = vsel %vm9089_vm7, %v9085_v35, 1326507024  ;;  %v9270_v16 = vor.u32 8388608, %v9269_v62 }
 0x5ff   : > { %v9097_v30 = vsel %vm9087_vm11, %v9094_v47, %v9096_v39  ;;  %v13044_v5 = vadd.s32 4294967294, %v9226_v18  ;;  %v9100_v6 = vsel %vm9088_vm12, %v9082_v20, %v9099_v26  ;;  %v9034_v3 = vxor.u32 2147483648, %v9033_v53 }
 0x600   : > { %v21244_v55 = vmul.u32.u64.low %v9102_v9, %v9097_v30  ;;  %v21245_v28 = vmul.u32.u64.high %v9102_v9, %v9097_v30, %v21244_v55  ;;  %v9093_v40 = vsel %vm9087_vm11, %v9090_v45, %v9092_v59  ;;  %v9101_v15 = vsel %vm9087_vm11, %v9098_v27, %v9100_v6 }
 0x601   : > { %vm9273_vm5 = vcmp.gt.s32.totalorder %v9272_v2, 0  ;;  %vm13045_vm8 = vcmp.lt.s32.totalorder %v13044_v5, 0  ;;  %v21250_v25 = vmul.u32.u64.low %v9102_v9, %v9101_v15  ;;  %v21251_v8 = vmul.u32.u64.high %v9102_v9, %v9101_v15, %v21250_v25 }
 0x602   : > { %v9274_v37 = vsel %vm9273_vm5, %v9272_v2, 0  ;;  %14507 = vcosq.f32 %v21198_v4  ;;  %v9229_v20 = vsel %vm13045_vm8, 0, %v13044_v5  ;;  %v9214_v62 = vadd.s32 %v21163_v31, %v21159_v1 }
 0x603   : > { %v9276_v35 = vand.u32 31, %v9274_v37  ;;  %v9234_v47 = vsub.s32 4294967266, %v9229_v20  ;;  %v9109_v29 = vmul.u32 %v9102_v9, %v9093_v40  ;;  %v9112_v54 = vadd.s32 1, %v21245_v28 }
 0x604   : > { %v9035_v18 = vsel %vm8952_vm3, %v9034_v3, %v9033_v53  ;;  %vm9111_vm9 = vc.u32 %v21251_v8, %v21244_v55  ;;  %v9275_v39 = vshrl.u32 %v9274_v37, 5  ;;  %v21265_v27 = vshll.u32 %v9270_v16, 8 }
 0x605   : > { %v9277_v45 = vsub.s32 32, %v9276_v35  ;;  %v9279_v59 = vshll.u32 %v23414_v19, %v9276_v35  ;;  %v9282_v2 = vshll.u32 %v23415_v61, %v9276_v35  ;;  %v9285_v30 = vshll.u32 %v23416_v58, %v9276_v35 }
 0x606   : > { %v9113_v1 = vsel %vm9111_vm9, %v9112_v54, %v21245_v28  ;;  %v8724_v53 = vsub.s32 4, %v20938_v10  ;;  %v23525_v26 = vand.u32 2147483647, %v20859_v12  ;;  %v9230_v6 = vsub.s32 32, %v9229_v20 }
 0x607   : > { %v9280_v31 = vshrl.u32 %v23415_v61, %v9277_v45  ;;  %v9283_v9 = vshrl.u32 %v23416_v58, %v9277_v45  ;;  %v9235_v3 = vadd.s32 127, %v9234_v47  ;;  %v9114_v40 = vadd.s32 %v9113_v1, %v9109_v29 }
 0x608   : > { %vm21273_vm6 = vcmp.le.f32.partialorder %v23525_v26, 0.7853982  ;;  %v9286_v16 = vshrl.u32 %v23417_v63, %v9277_v45  ;;  %v9288_v28 = vshll.u32 %v23417_v63, %v9276_v35  ;;  %v9289_v37 = vshrl.u32 %v23504_v13, %v9277_v45 }
 0x609   : > { %v9281_v15 = vor.u32 %v9280_v31, %v9279_v59  ;;  %v9284_v25 = vor.u32 %v9283_v9, %v9282_v2  ;;  %v9231_v54 = vshll.u32 %v21219_v22, %v9229_v20  ;;  %v9115_v0 = vadd.s32 536870912, %v9114_v40 }
 0x60a   : > { %v9278_v58 = vshrl.u32 %v23414_v19, %v9277_v45  ;;  %v9287_v26 = vor.u32 %v9286_v16, %v9285_v30  ;;  %v9290_v61 = vor.u32 %v9289_v37, %v9288_v28  ;;  %v9291_v17 = vshll.u32 %v23504_v13, %v9276_v35  ;;  %v21286_v2 = vpop.f32.mrb[172].mxu0 }
 0x60b   : > { %v9292_v47 = vshrl.u32 %v23505_v43, %v9277_v45  ;;  %vm9294_vm15 = vcmp.lt.s32.totalorder %v9275_v39, 1  ;;  %v9232_v29 = vshrl.u32 %v9214_v62, %v9230_v6  ;;  %v9236_v1 = vshll.u32 %v9235_v3, 23  ;;  %v21291_v30 = vpop.f32.mrb[173].mxu0 }
 0x60c   : > { %v21284_v59 = vshrl.u32 %v9115_v0, 30  ;;  %vm9296_vm14 = vcmp.lt.s32.totalorder %v9275_v39, 3  ;;  %v21288_v31 = vpop.eup %14507  ;;  %vm9295_vm10 = vcmp.lt.s32.totalorder %v9275_v39, 2  ;;  %vm9297_vm12 = vcmp.lt.s32.totalorder %v9275_v39, 4  ;;  %23529 = vst [vmem:[#allocation29_spill] sm:$0xff] %v21291_v30 }
 0x60d   : > { %v9293_v22 = vor.u32 %v9292_v47, %v9291_v17  ;;  %v9302_v20 = vsel %vm9294_vm15, %v9281_v15, %v9284_v25  ;;  %v9298_v45 = vsel %vm9294_vm15, %v9278_v58, %v9281_v15  ;;  %v9299_v62 = vsel %vm9297_vm12, %v9287_v26, 2102212464 }
 0x60e   : > { %23528 = vst [vmem:[#allocation53_spill] sm:$0xff] %v21284_v59  ;;  %v9117_v35 = vshll.u32 %v21284_v59, 30  ;;  %v9303_v9 = vsel %vm9297_vm12, %v9290_v61, 920167782  ;;  %v9300_v0 = vsel %vm9296_vm14, %v9284_v25, %v9299_v62  ;;  %v9306_v3 = vsel %vm9294_vm15, %v9284_v25, %v9287_v26 }
 0x60f   : > { %v9304_v6 = vsel %vm9296_vm14, %v9287_v26, %v9303_v9  ;;  %v9307_v16 = vsel %vm9297_vm12, %v9293_v22, 1326507024  ;;  %v9233_v17 = vor.u32 %v9232_v29, %v9231_v54  ;;  %v9237_v28 = vor.u32 4788187, %v9236_v1 }
 0x610   : > { %v21298_v37 = vsub.s32 %v9114_v40, %v9117_v35  ;;  %v9305_v47 = vsel %vm9295_vm10, %v9302_v20, %v9304_v6  ;;  %v13151_v30 = vmul.f32 -1.442695, %v20862_v33  ;;  %v9308_v59 = vsel %vm9296_vm14, %v9290_v61, %v9307_v16 }
 0x611   : > { %v21304_v58 = vmul.u32.u64.low %v21265_v27, %v9305_v47  ;;  %v21305_v15 = vmul.u32.u64.high %v21265_v27, %v9305_v47, %v21304_v58  ;;  %v9301_v25 = vsel %vm9295_vm10, %v9298_v45, %v9300_v0  ;;  %v9309_v54 = vsel %vm9295_vm10, %v9306_v3, %v9308_v59 }
 0x612   : > { %v9120_v62 = vsub.s32 0, %v21298_v37  ;;  %v8725_v40 = vsel %vm8640_vm13, %v8724_v53, %v20938_v10  ;;  %v21317_v26 = vsel %vm21273_vm6, %v20859_v12, %v9035_v18  ;;  %v9238_v22 = vand.u32 2147483647, %v9237_v28 }
 0x613   : > { %v21320_v61 = vmul.u32.u64.low %v21265_v27, %v9309_v54  ;;  %v21321_v29 = vmul.u32.u64.high %v21265_v27, %v9309_v54, %v21320_v61  ;;  %v8727_v1 = vsel %vm21110_vm0, 0, %v8725_v40  ;;  %v9240_v20 = vcvt.s32.f32 %v9233_v17 }
 0x614   : > { %v13039_v39 = vmin.u32 %v9120_v62, %v21298_v37  ;;  %v8731_v59 = vadd.s32 3, %v8727_v1  ;;  %v21329_v10 = vsel %vm21092_vm1, 0, %v21193_v60  ;;  %14509 = vsinq.f32 %v21198_v4 }
 0x615   : > { %v9317_v18 = vmul.u32 %v21265_v27, %v9301_v25  ;;  %v9320_v53 = vadd.s32 1, %v21305_v15  ;;  %v23530_v24 = vsub.s32 4, %v21101_v57  ;;  %14511 = vpow2.f32 %v13151_v30 }
 0x616   : > { %v9122_v45 = vclz %v13039_v39  ;;  %v8732_v9 = vand.u32 3, %v8731_v59  ;;  %14513 = vcosq.f32 %v21317_v26  ;;  %vm9319_vm1 = vc.u32 %v21321_v29, %v21304_v58 }
 0x617   : > { %v21339_v35 = vsel %vm8952_vm3, %v23530_v24, %v21101_v57  ;;  %v21345_v21 = vmul.f32 -1.442695, %v20909_v52  ;;  %v10394_v60 = vand.u32 3, %v8727_v1  ;;  %v21347_v4 = vmul.f32 %v9240_v20, %v9238_v22 }
 0x618   : > { %v9110_v27 = vadd.s32 %v21244_v55, %v21251_v8  ;;  %v13040_v0 = vadd.s32 4294967294, %v9122_v45  ;;  %v9321_v57 = vsel %vm9319_vm1, %v9320_v53, %v21305_v15  ;;  %vm8730_vm13 = vweird.f32 %v20562_v49 }
 0x619   : > { %v9322_v6 = vadd.s32 %v9321_v57, %v9317_v18  ;;  %v11911_v30 = vadd.f32 1.0, %v21025_v48  ;;  %v8932_v3 = vsub.s32 4, %v21027_v56  ;;  %vm8733_vm3 = vcmp.lt.s32.totalorder %v8732_v9, 2 }
 0x61a   : > { %vm13041_vm0 = vcmp.lt.s32.totalorder %v13040_v0, 0  ;;  %v8735_v16 = vxor.u32 2147483648, %v21225_v23  ;;  %v8738_v17 = vxor.u32 2147483648, %v21213_v46  ;;  %vm10396_vm7 = vcmp.eq.s32.totalorder %v10394_v60, 0 }
 0x61b   : > { %v9125_v28 = vsel %vm13041_vm0, 0, %v13040_v0  ;;  %v9323_v47 = vadd.s32 536870912, %v9322_v6  ;;  %vm10399_vm11 = vcmp.eq.s32.totalorder %v10394_v60, 2  ;;  %vm8734_vm5 = vcmp.eq.s32.totalorder %v8732_v9, 0 }
 0x61c   : > { %v9126_v55 = vsub.s32 32, %v9125_v28  ;;  %v9130_v8 = vsub.s32 4294967266, %v9125_v28  ;;  %vm8737_vm8 = vcmp.eq.s32.totalorder %v8732_v9, 2  ;;  %vm10395_vm9 = vcmp.lt.s32.totalorder %v10394_v60, 2 }
 0x61d   : > { %v21357_v15 = vshrl.u32 %v9323_v47, 30  ;;  %14515 = vrcp.f32 %v11911_v30  ;;  %v8933_v48 = vsel %vm8848_vm2, %v8932_v3, %v21027_v56  ;;  %v10398_v25 = vsel %vm10396_vm7, %v21213_v46, %v8735_v16 }
 0x61e   : > { %v9131_v62 = vadd.s32 127, %v9130_v8  ;;  %v10401_v54 = vsel %vm10399_vm11, %v8738_v17, %v21225_v23  ;;  %v8935_v40 = vsel %vm21153_vm4, 0, %v8933_v48  ;;  %v14510_v61 = vpop.eup %14509  ;;  %v8736_v22 = vsel %vm8734_vm5, %v21213_v46, %v8735_v16 }
 0x61f   : > { %v9325_v1 = vshll.u32 %v21357_v15, 30  ;;  %v8739_v20 = vsel %vm8737_vm8, %v8738_v17, %v21225_v23  ;;  %v8939_v39 = vadd.s32 3, %v8935_v40  ;;  %v21369_v59 = vpop.eup %14511  ;;  %v9127_v56 = vshll.u32 %v21298_v37, %v9125_v28 }
 0x620   : > { %v9128_v18 = vshrl.u32 %v9110_v27, %v9126_v55  ;;  %v9132_v53 = vshll.u32 %v9131_v62, 23  ;;  %v9318_v24 = vadd.s32 %v21304_v58, %v21321_v29  ;;  %v21374_v45 = vpop.eup %14513  ;;  %v10402_v0 = vsel %vm10395_vm9, %v10398_v25, %v10401_v54  ;;  %v21382_v27 = vpop.f32.mrb[172].mxu1 }
 0x621   : > { %v21376_v11 = vsub.s32 %v9322_v6, %v9325_v1  ;;  %v8940_v57 = vand.u32 3, %v8939_v39  ;;  %v10600_v46 = vand.u32 3, %v8935_v40  ;;  %v8740_v23 = vsel %vm8733_vm3, %v8736_v22, %v8739_v20  ;;  %23531 = vst [vmem:[#allocation39_spill] sm:$0xff] %v21382_v27  ;;  %v21387_v60 = vpop.f32.mrb[173].mxu1 }
 0x622   : > { %vm8938_vm2 = vweird.f32 %v20604_v34  ;;  %v8943_v30 = vxor.u32 2147483648, %v14510_v61  ;;  %v8946_v37 = vxor.u32 2147483648, %v21288_v31  ;;  %v11913_v58 = vadd.f32 1.0, %v21188_v14 }
 0x623   : > { %v9328_v3 = vsub.s32 0, %v21376_v11  ;;  %vm8942_vm4 = vcmp.eq.s32.totalorder %v8940_v57, 0  ;;  %v8627_v29 = vadd.s32 3, %v21186_v36  ;;  %v21389_v6 = vor.u32 %v9128_v18, %v9127_v56 }
 0x624   : > { %v21391_v9 = vor.u32 4788187, %v9132_v53  ;;  %v10403_v16 = vsel %vm8730_vm13, nan, %v10402_v0  ;;  %vm8945_vm15 = vcmp.eq.s32.totalorder %v8940_v57, 2  ;;  %vm10601_vm14 = vcmp.lt.s32.totalorder %v10600_v46, 2 }
 0x625   : > { %v13047_v17 = vmin.u32 %v9328_v3, %v21376_v11  ;;  %vm10602_vm10 = vcmp.eq.s32.totalorder %v10600_v46, 0  ;;  %vm10605_vm12 = vcmp.eq.s32.totalorder %v10600_v46, 2  ;;  %vm8941_vm1 = vcmp.lt.s32.totalorder %v8940_v57, 2 }
 0x626   : > { %v8944_v14 = vsel %vm8942_vm4, %v21288_v31, %v8943_v30  ;;  %v10604_v28 = vsel %vm10602_vm10, %v21288_v31, %v8943_v30  ;;  %v10607_v47 = vsel %vm10605_vm12, %v8946_v37, %v14510_v61  ;;  %v8947_v48 = vsel %vm8945_vm15, %v8946_v37, %v14510_v61 }
 0x627   : > { %v14516_v55 = vpop.eup %14515  ;;  %v9330_v8 = vclz %v13047_v17  ;;  %14517 = vrcp.f32 %v11913_v58  ;;  %v8628_v62 = vand.u32 3, %v8627_v29  ;;  %v21400_v25 = vsel %vm8730_vm13, nan, %v8740_v23 }
 0x628   : > { %v21402_v54 = vmul.f32 2.0, %v10403_v16  ;;  %v11959_v40 = vmul.f32 %v14516_v55, %v20562_v49  ;;  %v10608_v1 = vsel %vm10601_vm14, %v10604_v28, %v10607_v47  ;;  %v9136_v22 = vcvt.s32.f32 %v21389_v6 }
 0x629   : > { %v13048_v20 = vadd.s32 4294967294, %v9330_v8  ;;  %vm8626_vm0 = vweird.f32 %v23503_v51  ;;  %vm8630_vm3 = vcmp.eq.s32.totalorder %v8628_v62, 0  ;;  %v9134_v31 = vand.u32 2147483647, %v21391_v9 }
 0x62a   : > { %v13785_v61 = vpack.c.bf16 %v21400_v25, %v11959_v40  ;;  %v8948_v39 = vsel %vm8941_vm1, %v8944_v14, %v8947_v48  ;;  %v8631_v56 = vxor.u32 2147483648, %v21104_v32  ;;  %v10609_v18 = vsel %vm8938_vm2, nan, %v10608_v1 }
 0x62b   : > { %vm13049_vm13 = vcmp.lt.s32.totalorder %v13048_v20, 0  ;;  %vm8633_vm7 = vcmp.eq.s32.totalorder %v8628_v62, 2  ;;  %v10291_v49 = vand.u32 3, %v21186_v36  ;;  %vm8629_vm11 = vcmp.lt.s32.totalorder %v8628_v62, 2 }
 0x62c   : > { %v9333_v53 = vsel %vm13049_vm13, 0, %v13048_v20  ;;  %13786 = vmatprep.subr.bf16.mxu0 %v13785_v61  ;;  %v8632_v0 = vsel %vm8630_vm3, %v21087_v41, %v8631_v56  ;;  %v8634_v46 = vxor.u32 2147483648, %v21087_v41  ;;  %v11958_v37 = vmul.f32 %v20956_v44, %v23503_v51 }
 0x62d   : > { %v9334_v23 = vsub.s32 32, %v9333_v53  ;;  %v9335_v57 = vshll.u32 %v21376_v11, %v9333_v53  ;;  %v9338_v30 = vsub.s32 4294967266, %v9333_v53  ;;  %vm10292_vm5 = vcmp.lt.s32.totalorder %v10291_v49, 2 }
 0x62e   : > { %v8635_v3 = vsel %vm8633_vm7, %v8634_v46, %v21104_v32  ;;  %vm10293_vm8 = vcmp.eq.s32.totalorder %v10291_v49, 0  ;;  %vm10296_vm9 = vcmp.eq.s32.totalorder %v10291_v49, 2  ;;  %v8949_v17 = vsel %vm8938_vm2, nan, %v8948_v39  ;;  %v23535_v49 = vld [vmem:[#allocation48_spill] sm:$0xff] }
 0x62f   : > { %v9336_v36 = vshrl.u32 %v9318_v24, %v9334_v23  ;;  %v9339_v58 = vadd.s32 127, %v9338_v30  ;;  %v8636_v29 = vsel %vm8629_vm11, %v8632_v0, %v8635_v3  ;;  %v10295_v16 = vsel %vm10293_vm8, %v21087_v41, %v8631_v56 }
 0x630   : > { %v8637_v11 = vsel %vm8626_vm0, nan, %v8636_v29  ;;  %v10298_v14 = vsel %vm10296_vm9, %v8634_v46, %v21104_v32  ;;  %v8835_v44 = vadd.s32 3, %v21329_v10  ;;  %v21427_v47 = vmul.f32 2.0, %v10609_v18 }
 0x631   : > { %v14518_v28 = vpop.eup %14517  ;;  %v10299_v55 = vsel %vm10292_vm5, %v10295_v16, %v10298_v14  ;;  %v13787_v8 = vpack.c.bf16 %v8637_v11, %v11958_v37  ;;  %vm8834_vm4 = vweird.f32 %v20450_v42  ;;  %vm9160_vm15 = vcmp.lt.s32.totalorder %v20900_v50, 0 }
 0x632   : > { %v11961_v41 = vmul.f32 %v14518_v28, %v20604_v34  ;;  %v10300_v24 = vsel %vm8626_vm0, nan, %v10299_v55  ;;  %v8836_v48 = vand.u32 3, %v8835_v44  ;;  %v8839_v62 = vxor.u32 2147483648, %v21205_v7 }
 0x633   : > { %v9337_v32 = vor.u32 %v9336_v36, %v9335_v57  ;;  %v9340_v40 = vshll.u32 %v9339_v58, 23  ;;  %13788 = vmatpush1.bf16.msra.mxu0 %v13787_v8  ;;  %v8842_v1 = vxor.u32 2147483648, %v21201_v38  ;;  %v10497_v20 = vand.u32 3, %v21329_v10 }
 0x634   : > { %v13797_v61 = vpack.c.bf16 %v8949_v17, %v11961_v41  ;;  %vm8837_vm2 = vcmp.lt.s32.totalorder %v8836_v48, 2  ;;  %vm8838_vm14 = vcmp.eq.s32.totalorder %v8836_v48, 0  ;;  %vm8841_vm10 = vcmp.eq.s32.totalorder %v8836_v48, 2 }
 0x635   : > { %v23532_v39 = vand.u32 2147483647, %v20900_v50  ;;  %v21443_v51 = vmul.f32 2.0, %v10300_v24  ;;  %v8840_v56 = vsel %vm8838_vm14, %v21201_v38, %v8839_v62  ;;  %v8843_v18 = vsel %vm8841_vm10, %v8842_v1, %v21205_v7 }
 0x636   : > { %vm10498_vm1 = vcmp.lt.s32.totalorder %v10497_v20, 2  ;;  %vm9056_vm0 = vcmp.lt.s32.totalorder %v20862_v33, 0  ;;  %13798 = vmatprep.subr.bf16.mxu1 %v13797_v61  ;;  %v8844_v10 = vsel %vm8837_vm2, %v8840_v56, %v8843_v18  ;;  %vm10499_vm3 = vcmp.eq.s32.totalorder %v10497_v20, 0 }
 0x637   : > { %vm21439_vm12 = vcmp.le.f32.partialorder %v23532_v39, 0.7853982  ;;  %vm10502_vm13 = vcmp.eq.s32.totalorder %v10497_v20, 2  ;;  %v11960_v53 = vmul.f32 %v23535_v49, %v20450_v42  ;;  %v9341_v0 = vor.u32 4788187, %v9340_v40 }
 0x638   : > { %v8845_v46 = vsel %vm8834_vm4, nan, %v8844_v10  ;;  %v10501_v23 = vsel %vm10499_vm3, %v21201_v38, %v8839_v62  ;;  %v10504_v57 = vsel %vm10502_vm13, %v8842_v1, %v21205_v7  ;;  %v11975_v3 = vmul.f32 %v21402_v54, %v21400_v25 }
 0x639   : > { %v10505_v30 = vsel %vm10498_vm1, %v10501_v23, %v10504_v57  ;;  %v13799_v37 = vpack.c.bf16 %v8845_v46, %v11960_v53  ;;  %v11977_v36 = vmul.f32 %v21427_v47, %v8949_v17  ;;  %v9242_v58 = vxor.u32 2147483648, %v21347_v4 }
 0x63a   : > { %v23536_v29 = vand.u32 2147483647, %v20862_v33  ;;  %v9137_v38 = vmul.f32 %v9136_v22, %v9134_v31  ;;  %v10506_v7 = vsel %vm8834_vm4, nan, %v10505_v30  ;;  %v11974_v14 = vmul.f32 %v21443_v51, %v8637_v11 }
 0x63b   : > { %14519 = vsinq.f32 %v21317_v26  ;;  %v11848_v44 = vmul.f32 2.0, %v10506_v7  ;;  %13800 = vmatpush1.bf16.msra.mxu1 %v13799_v37  ;;  %v11991_v28 = vmul.f32 %v11975_v3, %v21402_v54  ;;  %v11993_v55 = vmul.f32 %v11977_v36, %v21427_v47 }
 0x63c   : > { %vm21460_vm7 = vcmp.le.f32.partialorder %v23536_v29, 0.7853982  ;;  %v9344_v8 = vcvt.s32.f32 %v9337_v32  ;;  %14521 = vpow2.f32 %v21345_v21  ;;  %v11990_v9 = vmul.f32 %v11974_v14, %v21443_v51 }
 0x63d   : > { %v9369_v6 = vand.u32 2139095040, %v21286_v2  ;;  %v9342_v22 = vand.u32 2147483647, %v9341_v0  ;;  %v12007_v42 = vsub.f32 %v11991_v28, %v21400_v25  ;;  %v12009_v31 = vsub.f32 %v11993_v55, %v8949_v17 }
 0x63e   : > { %v11976_v41 = vmul.f32 %v11848_v44, %v8845_v46  ;;  %v9243_v26 = vsel %vm9160_vm15, %v9242_v58, %v21347_v4  ;;  %v9138_v24 = vxor.u32 2147483648, %v9137_v38  ;;  %v12006_v48 = vsub.f32 %v11990_v9, %v8637_v11 }
 0x63f   : > { %v9370_v62 = vshrl.u32 %v9369_v6, 23  ;;  %v13789_v40 = vpack.c.bf16 %v12007_v42, %v11975_v3  ;;  %v13801_v32 = vpack.c.bf16 %v12009_v31, %v11977_v36  ;;  %v22926_v21 = vand.u32 2147483647, %v21286_v2 }
 0x640   : > { %v11992_v1 = vmul.f32 %v11976_v41, %v11848_v44  ;;  %v13791_v20 = vpack.c.bf16 %v12006_v48, %v11974_v14  ;;  %v12023_v61 = vmul.f32 %v12007_v42, %v21402_v54  ;;  %v12025_v39 = vmul.f32 %v12009_v31, %v21427_v47 }
 0x641   : > { %v12022_v25 = vmul.f32 %v12006_v48, %v21443_v51  ;;  %v21488_v17 = vsel %vm21439_vm12, %v20900_v50, %v9243_v26  ;;  %v21490_v4 = vmul.f32 %v9344_v8, %v9342_v22  ;;  %13790 = vmatprep.subr.bf16.mxu0 %v13789_v40  ;;  %13802 = vmatprep.subr.bf16.mxu1 %v13801_v32  ;;  %v13050_v56 = vadd.s32 4294967169, %v9370_v62 }
 0x642   : > { %v12008_v11 = vsub.f32 %v11992_v1, %v8845_v46  ;;  %v9139_v18 = vsel %vm9056_vm0, %v9138_v24, %v9137_v38  ;;  %13792 = vmatpush1.bf16.msra.mxu0 %v13791_v20  ;;  %v12039_v10 = vsub.f32 %v12023_v61, %v11975_v3  ;;  %v12041_v49 = vsub.f32 %v12025_v39, %v11977_v36  ;;  %v12086_v39 = vld [vmem:[%s22656_s8] sm:$0xff] }
 0x643   : > { %v12038_v53 = vsub.f32 %v12022_v25, %v11974_v14  ;;  %v9373_v57 = vand.u32 8388607, %v22926_v21  ;;  %v9376_v30 = vadd.s32 1, %v13050_v56  ;;  %14523 = vcosq.f32 %v21488_v17 }
 0x644   : > { %v13803_v0 = vpack.c.bf16 %v12008_v11, %v11976_v41  ;;  %v12024_v23 = vmul.f32 %v12008_v11, %v11848_v44  ;;  %v12055_v37 = vmul.f32 %v12039_v10, %v21402_v54  ;;  %v12057_v46 = vmul.f32 %v12041_v49, %v21427_v47 }
 0x645   : > { %v12054_v58 = vmul.f32 %v12038_v53, %v21443_v51  ;;  %v21500_v29 = vpop.eup %14519  ;;  %v21505_v3 = vsel %vm21460_vm7, %v20862_v33, %v9139_v18  ;;  %v9346_v36 = vxor.u32 2147483648, %v21490_v4  ;;  %vm9377_vm11 = vcmp.gt.s32.totalorder %v9376_v30, 0 }
 0x646   : > { %13804 = vmatpush1.bf16.msra.mxu1 %v13803_v0  ;;  %v12040_v38 = vsub.f32 %v12024_v23, %v11976_v41  ;;  %v21508_v7 = vpop.eup %14521  ;;  %v12071_v14 = vsub.f32 %v12055_v37, %v12007_v42  ;;  %v12073_v54 = vsub.f32 %v12057_v46, %v12009_v31  ;;  %v9378_v47 = vsel %vm9377_vm11, %v9376_v30, 0 }
 0x647   : > { %v12070_v28 = vsub.f32 %v12054_v58, %v12006_v48  ;;  %v9374_v51 = vor.u32 8388608, %v9373_v57  ;;  %v9380_v8 = vand.u32 31, %v9378_v47  ;;  %v22925_v9 = vand.u32 2147483647, %v21382_v27 }
 0x648   : > { %v12056_v55 = vmul.f32 %v12040_v38, %v11848_v44  ;;  %v13793_v6 = vpack.c.bf16 %v12071_v14, %v12039_v10  ;;  %v13805_v22 = vpack.c.bf16 %v12073_v54, %v12041_v49  ;;  %v9379_v24 = vshrl.u32 %v9378_v47, 5 }
 0x649   : > { %v13795_v26 = vpack.c.bf16 %v12070_v28, %v12038_v53  ;;  %v9381_v40 = vsub.s32 32, %v9380_v8  ;;  %v9383_v41 = vshll.u32 %v23414_v19, %v9380_v8  ;;  %v23539_v32 = vmov 2475754826  }
 0x64a   : > { %v12072_v62 = vsub.f32 %v12056_v55, %v12008_v11  ;;  %v9386_v1 = vshll.u32 %v23539_v32, %v9380_v8  ;;  %vm9264_vm5 = vcmp.lt.s32.totalorder %v20909_v52, 0  ;;  %13794 = vmatprep.subr.bf16.mxu0 %v13793_v6  ;;  %13806 = vmatprep.subr.bf16.mxu1 %v13805_v22  ;;  %v23540_v42 = vmov 2131351028  }
 0x64b   : > { %v9389_v44 = vshll.u32 %v23540_v42, %v9380_v8  ;;  %v9392_v31 = vshll.u32 %v23417_v63, %v9380_v8  ;;  %v9395_v48 = vshll.u32 %v23504_v13, %v9380_v8  ;;  %v9577_v20 = vand.u32 2139095040, %v21382_v27  ;;  %13796 = vmatpush1.bf16.msra.mxu0 %v13795_v26 }
 0x64c   : > { %v13807_v61 = vpack.c.bf16 %v12072_v62, %v12040_v38  ;;  %v9382_v25 = vshrl.u32 %v23414_v19, %v9381_v40  ;;  %v9384_v11 = vshrl.u32 %v23539_v32, %v9381_v40  ;;  %v9387_v56 = vshrl.u32 %v23540_v42, %v9381_v40 }
 0x64d   : > { %v9390_v18 = vshrl.u32 %v23417_v63, %v9381_v40  ;;  %v9393_v10 = vshrl.u32 %v23504_v13, %v9381_v40  ;;  %v9396_v49 = vshrl.u32 %v23505_v43, %v9381_v40  ;;  %vm9398_vm8 = vcmp.lt.s32.totalorder %v9379_v24, 1  ;;  %v21527_v23 = vpop.eup %14523 }
 0x64e   : > { %13808 = vmatpush1.bf16.msra.mxu1 %v13807_v61  ;;  %v9385_v53 = vor.u32 %v9384_v11, %v9383_v41  ;;  %v9388_v0 = vor.u32 %v9387_v56, %v9386_v1  ;;  %vm9400_vm9 = vcmp.lt.s32.totalorder %v9379_v24, 3  ;;  %vm9401_vm4 = vcmp.lt.s32.totalorder %v9379_v24, 4  ;;  %v23544_v61 = vld [vmem:[#allocation35_spill] sm:$0xff] }
 0x64f   : > { %vm23541_vm2 = vcmask 392192   ;;  %v9391_v57 = vor.u32 %v9390_v18, %v9389_v44  ;;  %v9394_v30 = vor.u32 %v9393_v10, %v9392_v31  ;;  %v9397_v37 = vor.u32 %v9396_v49, %v9395_v48 }
 0x650   : > { %13162 = vmatmul.mubr.msk.f32.vlgmr.msra.gmra.mrb[176].mxu0 %vm23541_vm2, %v12086_v39  ;;  %v9578_v46 = vshrl.u32 %v9577_v20, 23  ;;  %vm9399_vm14 = vcmp.lt.s32.totalorder %v9379_v24, 2  ;;  %v9402_v58 = vsel %vm9398_vm8, %v9382_v25, %v9385_v53  ;;  %v9406_v38 = vsel %vm9398_vm8, %v9385_v53, %v9388_v0  ;;  %vm23543_vm10 = vmmov %vm23541_vm2 }
 0x651   : > { %v9414_v14 = vshll.u32 %v9374_v51, 8  ;;  %v23542_v54 = vmov 0.0   ;;  %13163 = vmatmul.mubr.msk.f32.vlgmr.msra.gmra.mrb[176].mxu1 %vm23543_vm10, %v12086_v39  ;;  %v9403_v28 = vsel %vm9401_vm4, %v9391_v57, 2102212464  ;;  %v9407_v47 = vsel %vm9401_vm4, %v9394_v30, 920167782 }
 0x652   : > { %12296 = vmatprep.mubr.f32.mxu0 %v23542_v54  ;;  %v9410_v55 = vsel %vm9398_vm8, %v9388_v0, %v9391_v57  ;;  %v9411_v8 = vsel %vm9401_vm4, %v9397_v37, 1326507024  ;;  %v9404_v6 = vsel %vm9400_vm9, %v9388_v0, %v9403_v28  ;;  %v9408_v22 = vsel %vm9400_vm9, %v9391_v57, %v9407_v47  ;;  %12367 = vmatprep.mubr.f32.mxu1 %v23542_v54 }
 0x653   : > { %v9412_v26 = vsel %vm9400_vm9, %v9394_v30, %v9411_v8  ;;  %v9581_v51 = vand.u32 8388607, %v22925_v9  ;;  %v9405_v62 = vsel %vm9399_vm14, %v9402_v58, %v9404_v6  ;;  %v9409_v40 = vsel %vm9399_vm14, %v9406_v38, %v9408_v22 }
 0x654   : > { %v9413_v41 = vsel %vm9399_vm14, %v9410_v55, %v9412_v26  ;;  %v13058_v1 = vadd.s32 4294967169, %v9578_v46  ;;  %v21550_v48 = vmul.u32.u64.low %v9414_v14, %v9409_v40  ;;  %v21551_v20 = vmul.u32.u64.high %v9414_v14, %v9409_v40, %v21550_v48  ;;  %v21557_v56 = vpop.f32.mrb[174].mxu0  ;;  %v23549_v46 = vld [vmem:[#allocation29_spill] sm:$0xff] }
 0x655   : > { %v21547_v44 = vmul.u32.u64.low %v9414_v14, %v9413_v41  ;;  %v21548_v31 = vmul.u32.u64.high %v9414_v14, %v9413_v41, %v21547_v44  ;;  %v9244_v39 = vsub.s32 4, %v23544_v61  ;;  %14525 = vsinq.f32 %v21488_v17  ;;  %23545 = vst [vmem:[#allocation52_spill] sm:$0xff] %v21557_v56 }
 0x656   : > { %v13154_v25 = vmul.f32 -1.442695, %v21286_v2  ;;  %v9584_v11 = vadd.s32 1, %v13058_v1  ;;  %14527 = vcosq.f32 %v21505_v3  ;;  %v23546_v24 = vand.u32 2147483647, %v20909_v52 }
 0x657   : > { %v9347_v10 = vsel %vm9264_vm5, %v9346_v36, %v21490_v4  ;;  %v9582_v17 = vor.u32 8388608, %v9581_v51  ;;  %v21574_v49 = vsel %vm21273_vm6, 0, %v21339_v35  ;;  %14529 = vsinq.f32 %v21505_v3 }
 0x658   : > { %vm21562_vm1 = vcmp.le.f32.partialorder %v23546_v24, 0.7853982  ;;  %v9421_v53 = vmul.u32 %v9414_v14, %v9405_v62  ;;  %vm9585_vm3 = vcmp.gt.s32.totalorder %v9584_v11, 0  ;;  %vm9423_vm13 = vc.u32 %v21548_v31, %v21550_v48 }
 0x659   : > { %v9424_v0 = vadd.s32 1, %v21551_v20  ;;  %v9586_v57 = vsel %vm9585_vm3, %v9584_v11, 0  ;;  %v13156_v30 = vmul.f32 -1.442695, %v21382_v27  ;;  %v21584_v4 = vsel %vm9160_vm15, %v9244_v39, %v23544_v61 }
 0x65a   : > { %v21589_v5 = vsel %vm21562_vm1, %v20909_v52, %v9347_v10  ;;  %14531 = vpow2.f32 %v13154_v25  ;;  %v9588_v35 = vand.u32 31, %v9586_v57  ;;  %v9587_v36 = vshrl.u32 %v9586_v57, 5 }
 0x65b   : > { %v9425_v3 = vsel %vm9423_vm13, %v9424_v0, %v21551_v20  ;;  %v21592_v37 = vshll.u32 %v9582_v17, 8  ;;  %v9473_v58 = vand.u32 2139095040, %v23549_v46  ;;  %14533 = vpow2.f32 %v13156_v30 }
 0x65c   : > { %v9426_v38 = vadd.s32 %v9425_v3, %v9421_v53  ;;  %v9589_v14 = vsub.s32 32, %v9588_v35  ;;  %v9591_v28 = vshll.u32 %v23414_v19, %v9588_v35  ;;  %v9594_v47 = vshll.u32 %v23539_v32, %v9588_v35 }
 0x65d   : > { %v9597_v55 = vshll.u32 %v23540_v42, %v9588_v35  ;;  %v9600_v8 = vshll.u32 %v23417_v63, %v9588_v35  ;;  %v9603_v6 = vshll.u32 %v23504_v13, %v9588_v35  ;;  %vm9606_vm6 = vcmp.lt.s32.totalorder %v9587_v36, 1 }
 0x65e   : > { %v9427_v22 = vadd.s32 536870912, %v9426_v38  ;;  %v9590_v26 = vshrl.u32 %v23414_v19, %v9589_v14  ;;  %v9592_v51 = vshrl.u32 %v23539_v32, %v9589_v14  ;;  %v9595_v62 = vshrl.u32 %v23540_v42, %v9589_v14 }
 0x65f   : > { %v9598_v40 = vshrl.u32 %v23417_v63, %v9589_v14  ;;  %v9601_v41 = vshrl.u32 %v23504_v13, %v9589_v14  ;;  %v9604_v1 = vshrl.u32 %v23505_v43, %v9589_v14  ;;  %v21606_v44 = vpop.eup %14525  ;;  %vm9608_vm15 = vcmp.lt.s32.totalorder %v9587_v36, 3 }
 0x660   : > { %v21608_v20 = vshrl.u32 %v9427_v22, 30  ;;  %v9593_v61 = vor.u32 %v9592_v51, %v9591_v28  ;;  %v9596_v39 = vor.u32 %v9595_v62, %v9594_v47  ;;  %v21610_v25 = vpop.eup %14527  ;;  %vm9609_vm11 = vcmp.lt.s32.totalorder %v9587_v36, 4 }
 0x661   : > { %v9599_v11 = vor.u32 %v9598_v40, %v9597_v55  ;;  %v9602_v24 = vor.u32 %v9601_v41, %v9600_v8  ;;  %v9605_v10 = vor.u32 %v9604_v1, %v9603_v6  ;;  %v21612_v17 = vpop.eup %14529  ;;  %vm9607_vm8 = vcmp.lt.s32.totalorder %v9587_v36, 2 }
 0x662   : > { %v9429_v53 = vshll.u32 %v21608_v20, 30  ;;  %v9610_v0 = vsel %vm9606_vm6, %v9590_v26, %v9593_v61  ;;  %v9614_v57 = vsel %vm9606_vm6, %v9593_v61, %v9596_v39  ;;  %v9474_v6 = vshrl.u32 %v9473_v58, 23 }
 0x663   : > { %v9611_v30 = vsel %vm9609_vm11, %v9599_v11, 2102212464  ;;  %v9615_v35 = vsel %vm9609_vm11, %v9602_v24, 920167782  ;;  %v9618_v3 = vsel %vm9606_vm6, %v9596_v39, %v9599_v11  ;;  %v9619_v14 = vsel %vm9609_vm11, %v9605_v10, 1326507024 }
 0x664   : > { %v14532_v28 = vpop.eup %14531  ;;  %v21618_v47 = vsub.s32 %v9426_v38, %v9429_v53  ;;  %v9612_v55 = vsel %vm9608_vm15, %v9596_v39, %v9611_v30  ;;  %v9616_v8 = vsel %vm9608_vm15, %v9599_v11, %v9615_v35  ;;  %v9620_v26 = vsel %vm9608_vm15, %v9602_v24, %v9619_v14  ;;  %v21638_v24 = vpop.f32.mrb[175].mxu0 }
 0x665   : > { %v9613_v22 = vsel %vm9607_vm8, %v9610_v0, %v9612_v55  ;;  %v9617_v51 = vsel %vm9607_vm8, %v9614_v57, %v9616_v8  ;;  %v22924_v62 = vand.u32 2147483647, %v23549_v46  ;;  %v9621_v41 = vsel %vm9607_vm8, %v9618_v3, %v9620_v26  ;;  %v14534_v61 = vpop.eup %14533  ;;  %23550 = vst [vmem:[#allocation68_spill] sm:$0xff] %v21638_v24 }
 0x666   : > { %v9432_v40 = vsub.s32 0, %v21618_v47  ;;  %v21629_v38 = vmul.u32.u64.low %v21592_v37, %v9617_v51  ;;  %v21630_v1 = vmul.u32.u64.high %v21592_v37, %v9617_v51, %v21629_v38  ;;  %14535 = vcosq.f32 %v21589_v5 }
 0x667   : > { %v11918_v58 = vadd.f32 1.0, %v14532_v28  ;;  %v21635_v39 = vmul.u32.u64.low %v21592_v37, %v9621_v41  ;;  %v21636_v11 = vmul.u32.u64.high %v21592_v37, %v9621_v41, %v21635_v39  ;;  %v13054_v53 = vadd.s32 4294967169, %v9474_v6  ;;  %v21648_v3 = vpop.f32.mrb[174].mxu1 }
 0x668   : > { %v13051_v10 = vmin.u32 %v9432_v40, %v21618_v47  ;;  %v13155_v36 = vmul.f32 -1.442695, %v23549_v46  ;;  %v9681_v0 = vand.u32 2139095040, %v21387_v60  ;;  %14537 = vsinq.f32 %v21589_v5  ;;  %23551 = vst [vmem:[#allocation74_spill] sm:$0xff] %v21648_v3  ;;  %v21651_v6 = vpop.f32.mrb[175].mxu1 }
 0x669   : > { %v9629_v57 = vmul.u32 %v21592_v37, %v9613_v22  ;;  %v9477_v30 = vand.u32 8388607, %v22924_v62  ;;  %v22923_v35 = vand.u32 2147483647, %v21387_v60  ;;  %v9632_v28 = vadd.s32 1, %v21630_v1  ;;  %23552 = vst [vmem:[#allocation75_spill] sm:$0xff] %v21651_v6 }
 0x66a   : > { %v9434_v14 = vclz %v13051_v10  ;;  %v11920_v55 = vadd.f32 1.0, %v14534_v61  ;;  %v9480_v8 = vadd.s32 1, %v13054_v53  ;;  %v21656_v5 = vsel %vm21439_vm12, 0, %v21584_v4  ;;  %v23553_v53 = vld [vmem:[#allocation53_spill] sm:$0xff] }
 0x66b   : > { %14539 = vrcp.f32 %v11918_v58  ;;  %vm9631_vm9 = vc.u32 %v21636_v11, %v21629_v38  ;;  %v9682_v37 = vshrl.u32 %v9681_v0, 23  ;;  %v9422_v22 = vadd.s32 %v21550_v48, %v21548_v31 }
 0x66c   : > { %v13052_v51 = vadd.s32 4294967294, %v9434_v14  ;;  %v9633_v26 = vsel %vm9631_vm9, %v9632_v28, %v21630_v1  ;;  %vm9481_vm4 = vcmp.gt.s32.totalorder %v9480_v8, 0  ;;  %v9478_v41 = vor.u32 8388608, %v9477_v30 }
 0x66d   : > { %v9634_v40 = vadd.s32 %v9633_v26, %v9629_v57  ;;  %v9482_v61 = vsel %vm9481_vm4, %v9480_v8, 0  ;;  %14541 = vpow2.f32 %v13155_v36  ;;  %v21665_v4 = vand.u32 8388607, %v22923_v35 }
 0x66e   : > { %vm13053_vm2 = vcmp.lt.s32.totalorder %v13052_v51, 0  ;;  %14543 = vrcp.f32 %v11920_v55  ;;  %v9484_v34 = vand.u32 31, %v9482_v61  ;;  %v13062_v10 = vadd.s32 4294967169, %v9682_v37 }
 0x66f   : > { %v9437_v58 = vsel %vm13053_vm2, 0, %v13052_v51  ;;  %v9635_v39 = vadd.s32 536870912, %v9634_v40  ;;  %v21675_v55 = vshll.u32 %v9478_v41, 8  ;;  %vm9368_vm12 = vcmp.lt.s32.totalorder %v21286_v2, 0 }
 0x670   : > { %v9438_v48 = vsub.s32 32, %v9437_v58  ;;  %v9439_v1 = vshll.u32 %v21618_v47, %v9437_v58  ;;  %v9442_v0 = vsub.s32 4294967266, %v9437_v58  ;;  %v9485_v57 = vsub.s32 32, %v9484_v34  ;;  %v21669_v30 = vpop.eup %14535 }
 0x671   : > { %v21671_v36 = vshrl.u32 %v9635_v39, 30  ;;  %v9487_v14 = vshll.u32 %v23414_v19, %v9484_v34  ;;  %v9490_v28 = vshll.u32 %v23539_v32, %v9484_v34  ;;  %v9493_v26 = vshll.u32 %v23540_v42, %v9484_v34 }
 0x672   : > { %v9440_v8 = vshrl.u32 %v9422_v22, %v9438_v48  ;;  %v9443_v51 = vadd.s32 127, %v9442_v0  ;;  %v9488_v37 = vshrl.u32 %v23539_v32, %v9485_v57  ;;  %v21679_v35 = vpop.eup %14537  ;;  %v9483_v58 = vshrl.u32 %v9482_v61, 5 }
 0x673   : > { %23554 = vst [vmem:[#allocation51_spill] sm:$0xff] %v21671_v36  ;;  %v9637_v47 = vshll.u32 %v21671_v36, 30  ;;  %v9491_v39 = vshrl.u32 %v23540_v42, %v9485_v57  ;;  %v9494_v62 = vshrl.u32 %v23417_v63, %v9485_v57  ;;  %v9496_v41 = vshll.u32 %v23417_v63, %v9484_v34 }
 0x674   : > { %v9441_v9 = vor.u32 %v9440_v8, %v9439_v1  ;;  %v9444_v31 = vshll.u32 %v9443_v51, 23  ;;  %v9688_v21 = vadd.s32 1, %v13062_v10  ;;  %v9486_v0 = vshrl.u32 %v23414_v19, %v9485_v57 }
 0x675   : > { %v21685_v22 = vpop.eup %14539  ;;  %v21687_v48 = vsub.s32 %v9634_v40, %v9637_v47  ;;  %v9489_v6 = vor.u32 %v9488_v37, %v9487_v14  ;;  %v9492_v24 = vor.u32 %v9491_v39, %v9490_v28  ;;  %v9495_v61 = vor.u32 %v9494_v62, %v9493_v26 }
 0x676   : > { %23555 = vst [vmem:[#allocation15_spill] sm:$0xff] %v21685_v22  ;;  %v9445_v54 = vor.u32 4788187, %v9444_v31  ;;  %v9448_v3 = vcvt.s32.f32 %v9441_v9  ;;  %v9497_v36 = vshrl.u32 %v23504_v13, %v9485_v57  ;;  %v9499_v10 = vshll.u32 %v23504_v13, %v9484_v34 }
 0x677   : > { %v21691_v56 = vpop.eup %14541  ;;  %v9640_v1 = vsub.s32 0, %v21687_v48  ;;  %v9500_v40 = vshrl.u32 %v23505_v43, %v9485_v57  ;;  %vm9502_vm14 = vcmp.lt.s32.totalorder %v9483_v58, 1  ;;  %vm9503_vm10 = vcmp.lt.s32.totalorder %v9483_v58, 2 }
 0x678   : > { %v21697_v8 = vpop.eup %14543  ;;  %v9446_v14 = vand.u32 2147483647, %v9445_v54  ;;  %v9498_v28 = vor.u32 %v9497_v36, %v9496_v41  ;;  %vm9504_vm3 = vcmp.lt.s32.totalorder %v9483_v58, 3  ;;  %vm9505_vm13 = vcmp.lt.s32.totalorder %v9483_v58, 4 }
 0x679   : > { %23556 = vst [vmem:[#allocation13_spill] sm:$0xff] %v21697_v8  ;;  %v13059_v9 = vmin.u32 %v9640_v1, %v21687_v48  ;;  %v9501_v62 = vor.u32 %v9500_v40, %v9499_v10  ;;  %v9506_v31 = vsel %vm9502_vm14, %v9486_v0, %v9489_v6  ;;  %v23557_v51 = vand.u32 2147483647, %v21286_v2 }
 0x67a   : > { %v9449_v34 = vmul.f32 %v9448_v3, %v9446_v14  ;;  %v9507_v57 = vsel %vm9505_vm13, %v9495_v61, 2102212464  ;;  %v9510_v26 = vsel %vm9502_vm14, %v9489_v6, %v9492_v24  ;;  %v9511_v54 = vsel %vm9505_vm13, %v9498_v28, 920167782 }
 0x67b   : > { %vm21703_vm6 = vcmp.le.f32.partialorder %v23557_v51, 0.7853982  ;;  %v9642_v36 = vclz %v13059_v9  ;;  %v9508_v47 = vsel %vm9504_vm3, %v9492_v24, %v9507_v57  ;;  %v9512_v39 = vsel %vm9504_vm3, %v9495_v61, %v9511_v54 }
 0x67c   : > { %v9514_v41 = vsel %vm9502_vm14, %v9492_v24, %v9495_v61  ;;  %v9450_v1 = vxor.u32 2147483648, %v9449_v34  ;;  %v9630_v0 = vadd.s32 %v21629_v38, %v21636_v11  ;;  %v9513_v10 = vsel %vm9503_vm10, %v9510_v26, %v9512_v39 }
 0x67d   : > { %v9515_v40 = vsel %vm9505_vm13, %v9501_v62, 1326507024  ;;  %v13060_v51 = vadd.s32 4294967294, %v9642_v36  ;;  %v21716_v6 = vmul.u32.u64.low %v21675_v55, %v9513_v10  ;;  %v21717_v14 = vmul.u32.u64.high %v21675_v55, %v9513_v10, %v21716_v6 }
 0x67e   : > { %v9516_v3 = vsel %vm9504_vm3, %v9498_v28, %v9515_v40  ;;  %v9509_v9 = vsel %vm9503_vm10, %v9506_v31, %v9508_v47  ;;  %v9686_v24 = vor.u32 8388608, %v21665_v4  ;;  %vm9689_vm15 = vcmp.gt.s32.totalorder %v9688_v21, 0 }
 0x67f   : > { %v9517_v57 = vsel %vm9503_vm10, %v9514_v41, %v9516_v3  ;;  %vm13061_vm11 = vcmp.lt.s32.totalorder %v13060_v51, 0  ;;  %v23560_v61 = vsub.s32 4, %v23553_v53  ;;  %v9451_v62 = vsel %vm9368_vm12, %v9450_v1, %v9449_v34 }
 0x680   : > { %v21724_v38 = vmul.u32.u64.low %v21675_v55, %v9517_v57  ;;  %v21725_v11 = vmul.u32.u64.high %v21675_v55, %v9517_v57, %v21724_v38  ;;  %v9645_v31 = vsel %vm13061_vm11, 0, %v13060_v51  ;;  %v9690_v58 = vsel %vm9689_vm15, %v9688_v21, 0 }
 0x681   : > { %v9141_v28 = vsel %vm9056_vm0, %v23560_v61, %v23553_v53  ;;  %v13157_v26 = vmul.f32 -1.442695, %v21387_v60  ;;  %v9646_v4 = vsub.s32 32, %v9645_v31  ;;  %v9647_v54 = vshll.u32 %v21687_v48, %v9645_v31 }
 0x682   : > { %v9650_v36 = vsub.s32 4294967266, %v9645_v31  ;;  %v9525_v47 = vmul.u32 %v21675_v55, %v9509_v9  ;;  %v9528_v39 = vadd.s32 1, %v21717_v14  ;;  %v9692_v41 = vand.u32 31, %v9690_v58 }
 0x683   : > { %v21738_v10 = vshll.u32 %v9686_v24, 8  ;;  %v21742_v53 = vsel %vm21460_vm7, 0, %v9141_v28  ;;  %v9454_v21 = vsel %vm21703_vm6, %v21286_v2, %v9451_v62  ;;  %v9648_v34 = vshrl.u32 %v9630_v0, %v9646_v4 }
 0x684   : > { %v9651_v1 = vadd.s32 127, %v9650_v36  ;;  %vm9527_vm0 = vc.u32 %v21725_v11, %v21716_v6  ;;  %v9693_v48 = vsub.s32 32, %v9692_v41  ;;  %v9695_v40 = vshll.u32 %v23414_v19, %v9692_v41 }
 0x685   : > { %v9529_v55 = vsel %vm9527_vm0, %v9528_v39, %v21717_v14  ;;  %v9698_v51 = vshll.u32 %v23539_v32, %v9692_v41  ;;  %v9649_v3 = vor.u32 %v9648_v34, %v9647_v54  ;;  %v9701_v57 = vshll.u32 %v23540_v42, %v9692_v41 }
 0x686   : > { %v9652_v16 = vshll.u32 %v9651_v1, 23  ;;  %v9530_v9 = vadd.s32 %v9529_v55, %v9525_v47  ;;  %v9691_v24 = vshrl.u32 %v9690_v58, 5  ;;  %v9696_v38 = vshrl.u32 %v23539_v32, %v9693_v48 }
 0x687   : > { %v9699_v0 = vshrl.u32 %v23540_v42, %v9693_v48  ;;  %v9702_v61 = vshrl.u32 %v23417_v63, %v9693_v48  ;;  %v9694_v14 = vshrl.u32 %v23414_v19, %v9693_v48  ;;  %v9704_v31 = vshll.u32 %v23417_v63, %v9692_v41 }
 0x688   : > { %v9653_v28 = vor.u32 4788187, %v9652_v16  ;;  %v9531_v62 = vadd.s32 536870912, %v9530_v9  ;;  %v9656_v4 = vcvt.s32.f32 %v9649_v3  ;;  %v9697_v36 = vor.u32 %v9696_v38, %v9695_v40 }
 0x689   : > { %v9700_v54 = vor.u32 %v9699_v0, %v9698_v51  ;;  %v9705_v47 = vshrl.u32 %v23504_v13, %v9693_v48  ;;  %v9703_v58 = vor.u32 %v9702_v61, %v9701_v57  ;;  %v9707_v34 = vshll.u32 %v23504_v13, %v9692_v41 }
 0x68a   : > { %v21759_v39 = vshrl.u32 %v9531_v62, 30  ;;  %v9708_v1 = vshrl.u32 %v23505_v43, %v9693_v48  ;;  %v9654_v55 = vand.u32 2147483647, %v9653_v28  ;;  %vm9710_vm7 = vcmp.lt.s32.totalorder %v9691_v24, 1 }
 0x68b   : > { %v9706_v8 = vor.u32 %v9705_v47, %v9704_v31  ;;  %vm9712_vm8 = vcmp.lt.s32.totalorder %v9691_v24, 3  ;;  %vm9711_vm9 = vcmp.lt.s32.totalorder %v9691_v24, 2  ;;  %vm9713_vm4 = vcmp.lt.s32.totalorder %v9691_v24, 4 }
 0x68c   : > { %v9533_v16 = vshll.u32 %v21759_v39, 30  ;;  %v9709_v22 = vor.u32 %v9708_v1, %v9707_v34  ;;  %v9715_v40 = vsel %vm9713_vm4, %v9703_v58, 2102212464  ;;  %v9718_v51 = vsel %vm9710_vm7, %v9697_v36, %v9700_v54 }
 0x68d   : > { %v9719_v3 = vsel %vm9713_vm4, %v9706_v8, 920167782  ;;  %v9147_v38 = vadd.s32 3, %v21742_v53  ;;  %v9714_v41 = vsel %vm9710_vm7, %v9694_v14, %v9697_v36  ;;  %v9716_v48 = vsel %vm9712_vm8, %v9700_v54, %v9715_v40 }
 0x68e   : > { %v21766_v57 = vsub.s32 %v9530_v9, %v9533_v16  ;;  %v9720_v0 = vsel %vm9712_vm8, %v9703_v58, %v9719_v3  ;;  %v9657_v61 = vmul.f32 %v9656_v4, %v9654_v55  ;;  %v9722_v62 = vsel %vm9710_vm7, %v9700_v54, %v9703_v58 }
 0x68f   : > { %v9721_v28 = vsel %vm9711_vm9, %v9718_v51, %v9720_v0  ;;  %v9723_v31 = vsel %vm9713_vm4, %v9709_v22, 1326507024  ;;  %v9452_v47 = vsub.s32 4, %v21608_v20  ;;  %14545 = vpow2.f32 %v13157_v26 }
 0x690   : > { %v9536_v34 = vsub.s32 0, %v21766_v57  ;;  %v9724_v1 = vsel %vm9712_vm8, %v9706_v8, %v9723_v31  ;;  %v9717_v9 = vsel %vm9711_vm9, %v9714_v41, %v9716_v48  ;;  %14547 = vcosq.f32 %v9454_v21 }
 0x691   : > { %v9725_v14 = vsel %vm9711_vm9, %v9722_v62, %v9724_v1  ;;  %v21779_v36 = vmul.u32.u64.low %v21738_v10, %v9721_v28  ;;  %v21780_v16 = vmul.u32.u64.high %v21738_v10, %v9721_v28, %v21779_v36  ;;  %vm9576_vm2 = vcmp.lt.s32.totalorder %v21382_v27, 0 }
 0x692   : > { %v13055_v22 = vmin.u32 %v9536_v34, %v21766_v57  ;;  %v21786_v4 = vmul.u32.u64.low %v21738_v10, %v9725_v14  ;;  %v21787_v54 = vmul.u32.u64.high %v21738_v10, %v9725_v14, %v21786_v4  ;;  %14549 = vsinq.f32 %v9454_v21 }
 0x693   : > { %v9658_v8 = vxor.u32 2147483648, %v9657_v61  ;;  %v9526_v26 = vadd.s32 %v21716_v6, %v21725_v11  ;;  %v9148_v24 = vand.u32 3, %v9147_v38  ;;  %v9733_v55 = vmul.u32 %v21738_v10, %v9717_v9 }
 0x694   : > { %v9538_v58 = vclz %v13055_v22  ;;  %vm9146_vm14 = vweird.f32 %v20862_v33  ;;  %v9151_v40 = vxor.u32 2147483648, %v21612_v17  ;;  %v10806_v51 = vand.u32 3, %v21742_v53 }
 0x695   : > { %v9736_v3 = vadd.s32 1, %v21780_v16  ;;  %vm9150_vm10 = vcmp.eq.s32.totalorder %v9148_v24, 0  ;;  %vm9153_vm3 = vcmp.eq.s32.totalorder %v9148_v24, 2  ;;  %v11915_v21 = vadd.f32 1.0, %v21369_v59 }
 0x696   : > { %v13056_v41 = vadd.s32 4294967294, %v9538_v58  ;;  %vm9735_vm13 = vc.u32 %v21787_v54, %v21779_v36  ;;  %v9154_v6 = vxor.u32 2147483648, %v21610_v25  ;;  %v9348_v11 = vsub.s32 4, %v21357_v15 }
 0x697   : > { %v9737_v10 = vsel %vm9735_vm13, %v9736_v3, %v21780_v16  ;;  %vm9149_vm15 = vcmp.lt.s32.totalorder %v9148_v24, 2  ;;  %v9152_v38 = vsel %vm9150_vm10, %v21610_v25, %v9151_v40  ;;  %vm10808_vm11 = vcmp.eq.s32.totalorder %v10806_v51, 0 }
 0x698   : > { %vm13057_vm0 = vcmp.lt.s32.totalorder %v13056_v41, 0  ;;  %v9738_v53 = vadd.s32 %v9737_v10, %v9733_v55  ;;  %v9155_v48 = vsel %vm9153_vm3, %v9154_v6, %v21612_v17  ;;  %vm10807_vm7 = vcmp.lt.s32.totalorder %v10806_v51, 2 }
 0x699   : > { %v9541_v59 = vsel %vm13057_vm0, 0, %v13056_v41  ;;  %v10810_v0 = vsel %vm10808_vm11, %v21610_v25, %v9151_v40  ;;  %vm10811_vm8 = vcmp.eq.s32.totalorder %v10806_v51, 2  ;;  %14551 = vrcp.f32 %v11915_v21  ;;  %v21805_v28 = vpop.eup %14545 }
 0x69a   : > { %v9542_v62 = vsub.s32 32, %v9541_v59  ;;  %v9543_v31 = vshll.u32 %v21766_v57, %v9541_v59  ;;  %v9546_v34 = vsub.s32 4294967266, %v9541_v59  ;;  %v9739_v1 = vadd.s32 536870912, %v9738_v53  ;;  %v21815_v22 = vpop.eup %14547 }
 0x69b   : > { %v9659_v9 = vsel %vm9576_vm2, %v9658_v8, %v9657_v61  ;;  %v9156_v14 = vsel %vm9149_vm15, %v9152_v38, %v9155_v48  ;;  %v10813_v16 = vsel %vm10811_vm8, %v9154_v6, %v21612_v17  ;;  %v9349_v25 = vsel %vm9264_vm5, %v9348_v11, %v21357_v15 }
 0x69c   : > { %v23561_v4 = vand.u32 2147483647, %v21382_v27  ;;  %v9544_v57 = vshrl.u32 %v9526_v26, %v9542_v62  ;;  %v9547_v55 = vadd.s32 127, %v9546_v34  ;;  %v21823_v40 = vshrl.u32 %v9739_v1, 30  ;;  %v21826_v8 = vpop.eup %14549 }
 0x69d   : > { %v10814_v61 = vsel %vm10807_vm7, %v10810_v0, %v10813_v16  ;;  %v9351_v17 = vsel %vm21562_vm1, 0, %v9349_v25  ;;  %vm9354_vm5 = vweird.f32 %v20909_v52  ;;  %v9359_v15 = vxor.u32 2147483648, %v21679_v35 }
 0x69e   : > { %vm21819_vm9 = vcmp.le.f32.partialorder %v23561_v4, 0.7853982  ;;  %v11917_v24 = vadd.f32 1.0, %v21508_v7  ;;  %v9545_v3 = vor.u32 %v9544_v57, %v9543_v31  ;;  %v9548_v21 = vshll.u32 %v9547_v55, 23 }
 0x69f   : > { %v9741_v26 = vshll.u32 %v21823_v40, 30  ;;  %v9362_v41 = vxor.u32 2147483648, %v21669_v30  ;;  %v10815_v51 = vsel %vm9146_vm14, nan, %v10814_v61  ;;  %v9355_v6 = vadd.s32 3, %v9351_v17 }
 0x6a0   : > { %v11012_v11 = vand.u32 3, %v9351_v17  ;;  %14553 = vrcp.f32 %v11917_v24  ;;  %v9549_v18 = vor.u32 4788187, %v9548_v21  ;;  %v9552_v10 = vcvt.s32.f32 %v9545_v3 }
 0x6a1   : > { %v21837_v38 = vsub.s32 %v9738_v53, %v9741_v26  ;;  %v9043_v48 = vadd.s32 3, %v21574_v49  ;;  %v9356_v59 = vand.u32 3, %v9355_v6  ;;  %v21851_v57 = vsel %vm21819_vm9, %v21382_v27, %v9659_v9 }
 0x6a2   : > { %vm11013_vm1 = vcmp.lt.s32.totalorder %v11012_v11, 2  ;;  %vm11014_vm4 = vcmp.eq.s32.totalorder %v11012_v11, 0  ;;  %vm11017_vm10 = vcmp.eq.s32.totalorder %v11012_v11, 2  ;;  %v9550_v7 = vand.u32 2147483647, %v9549_v18 }
 0x6a3   : > { %v9744_v0 = vsub.s32 0, %v21837_v38  ;;  %v11016_v62 = vsel %vm11014_vm4, %v21669_v30, %v9359_v15  ;;  %v11019_v31 = vsel %vm11017_vm10, %v9362_v41, %v21679_v35  ;;  %v14552_v34 = vpop.eup %14551  ;;  %vm9357_vm3 = vcmp.lt.s32.totalorder %v9356_v59, 2 }
 0x6a4   : > { %vm9358_vm13 = vcmp.eq.s32.totalorder %v9356_v59, 0  ;;  %vm9361_vm15 = vcmp.eq.s32.totalorder %v9356_v59, 2  ;;  %v11020_v1 = vsel %vm11013_vm1, %v11016_v62, %v11019_v31  ;;  %v21843_v53 = vmul.f32 %v9552_v10, %v9550_v7 }
 0x6a5   : > { %v13063_v16 = vmin.u32 %v9744_v0, %v21837_v38  ;;  %v11963_v25 = vmul.f32 %v14552_v34, %v20862_v33  ;;  %v9360_v4 = vsel %vm9358_vm13, %v21669_v30, %v9359_v15  ;;  %v21855_v55 = vsel %vm9146_vm14, nan, %v9156_v14 }
 0x6a6   : > { %v9363_v61 = vsel %vm9361_vm15, %v9362_v41, %v21679_v35  ;;  %v9044_v17 = vand.u32 3, %v9043_v48  ;;  %v11021_v26 = vsel %vm9354_vm5, nan, %v11020_v1  ;;  %v9734_v30 = vadd.s32 %v21779_v36, %v21787_v54  ;;  %v23564_v48 = vld [vmem:[#allocation46_spill] sm:$0xff] }
 0x6a7   : > { %v9746_v24 = vclz %v13063_v16  ;;  %v13809_v3 = vpack.c.bf16 %v21855_v55, %v11963_v25  ;;  %v9364_v21 = vsel %vm9357_vm3, %v9360_v4, %v9363_v61  ;;  %v21863_v15 = vmul.f32 2.0, %v10815_v51 }
 0x6a8   : > { %vm9042_vm11 = vweird.f32 %v20859_v12  ;;  %vm9046_vm0 = vcmp.eq.s32.totalorder %v9044_v17, 0  ;;  %v9554_v33 = vxor.u32 2147483648, %v21843_v53  ;;  %v9047_v35 = vxor.u32 2147483648, %v21500_v29 }
 0x6a9   : > { %v13064_v9 = vadd.s32 4294967294, %v9746_v24  ;;  %13810 = vmatprep.subr.bf16.mxu0 %v13809_v3  ;;  %vm9049_vm14 = vcmp.eq.s32.totalorder %v9044_v17, 2  ;;  %v21870_v41 = vsel %vm9354_vm5, nan, %v9364_v21  ;;  %v21872_v6 = vmul.f32 2.0, %v11021_v26 }
 0x6aa   : > { %v14554_v14 = vpop.eup %14553  ;;  %v9050_v36 = vxor.u32 2147483648, %v21374_v45  ;;  %v10703_v54 = vand.u32 3, %v21574_v49  ;;  %vm9045_vm8 = vcmp.lt.s32.totalorder %v9044_v17, 2  ;;  %v9048_v11 = vsel %vm9046_vm0, %v21374_v45, %v9047_v35 }
 0x6ab   : > { %vm13065_vm7 = vcmp.lt.s32.totalorder %v13064_v9, 0  ;;  %v11965_v51 = vmul.f32 %v14554_v14, %v20909_v52  ;;  %v11962_v59 = vmul.f32 %v23564_v48, %v20859_v12  ;;  %vm9250_vm5 = vweird.f32 %v20900_v50 }
 0x6ac   : > { %v9749_v18 = vsel %vm13065_vm7, 0, %v13064_v9  ;;  %v9051_v10 = vsel %vm9049_vm14, %v9050_v36, %v21500_v29  ;;  %vm10704_vm1 = vcmp.lt.s32.totalorder %v10703_v54, 2  ;;  %vm10705_vm4 = vcmp.eq.s32.totalorder %v10703_v54, 0 }
 0x6ad   : > { %v9750_v7 = vsub.s32 32, %v9749_v18  ;;  %v9751_v0 = vshll.u32 %v21837_v38, %v9749_v18  ;;  %v9754_v62 = vsub.s32 4294967266, %v9749_v18  ;;  %v13821_v31 = vpack.c.bf16 %v21870_v41, %v11965_v51  ;;  %v23568_v51 = vld [vmem:[#allocation49_spill] sm:$0xff] }
 0x6ae   : > { %v9052_v49 = vsel %vm9045_vm8, %v9048_v11, %v9051_v10  ;;  %vm10708_vm10 = vcmp.eq.s32.totalorder %v10703_v54, 2  ;;  %v9251_v52 = vadd.s32 3, %v21656_v5  ;;  %v10707_v25 = vsel %vm10705_vm4, %v21374_v45, %v9047_v35 }
 0x6af   : > { %v9752_v34 = vshrl.u32 %v9734_v30, %v9750_v7  ;;  %v9755_v1 = vadd.s32 127, %v9754_v62  ;;  %13822 = vmatprep.subr.bf16.mxu1 %v13821_v31  ;;  %v9053_v16 = vsel %vm9042_vm11, nan, %v9052_v49  ;;  %vm9472_vm3 = vcmp.lt.s32.totalorder %v23549_v46, 0 }
 0x6b0   : > { %v10710_v38 = vsel %vm10708_vm10, %v9050_v36, %v21500_v29  ;;  %v13811_v4 = vpack.c.bf16 %v9053_v16, %v11962_v59  ;;  %v9252_v61 = vand.u32 3, %v9251_v52  ;;  %v9255_v17 = vxor.u32 2147483648, %v21606_v44 }
 0x6b1   : > { %v9753_v24 = vor.u32 %v9752_v34, %v9751_v0  ;;  %v9756_v3 = vshll.u32 %v9755_v1, 23  ;;  %v10711_v21 = vsel %vm10704_vm1, %v10707_v25, %v10710_v38  ;;  %v9258_v26 = vxor.u32 2147483648, %v21527_v23 }
 0x6b2   : > { %v10712_v30 = vsel %vm9042_vm11, nan, %v10711_v21  ;;  %13812 = vmatpush1.bf16.msra.mxu0 %v13811_v4  ;;  %vm9253_vm13 = vcmp.lt.s32.totalorder %v9252_v61, 2  ;;  %vm9254_vm15 = vcmp.eq.s32.totalorder %v9252_v61, 0  ;;  %vm9257_vm0 = vcmp.eq.s32.totalorder %v9252_v61, 2 }
 0x6b3   : > { %v9757_v45 = vor.u32 4788187, %v9756_v3  ;;  %v9760_v9 = vcvt.s32.f32 %v9753_v24  ;;  %v21895_v29 = vmul.f32 2.0, %v10712_v30  ;;  %v9256_v35 = vsel %vm9254_vm15, %v21527_v23, %v9255_v17 }
 0x6b4   : > { %v23565_v14 = vand.u32 2147483647, %v23549_v46  ;;  %v9259_v54 = vsel %vm9257_vm0, %v9258_v26, %v21606_v44  ;;  %v10909_v12 = vand.u32 3, %v21656_v5  ;;  %v11964_v11 = vmul.f32 %v23568_v51, %v20900_v50 }
 0x6b5   : > { %v11979_v18 = vmul.f32 %v21863_v15, %v21855_v55  ;;  %vm9680_vm11 = vcmp.lt.s32.totalorder %v21387_v60, 0  ;;  %v9758_v10 = vand.u32 2147483647, %v9757_v45  ;;  %v9260_v48 = vsel %vm9253_vm13, %v9256_v35, %v9259_v54 }
 0x6b6   : > { %vm21900_vm14 = vcmp.le.f32.partialorder %v23565_v14, 0.7853982  ;;  %v11981_v59 = vmul.f32 %v21872_v6, %v21870_v41  ;;  %v11978_v7 = vmul.f32 %v21895_v29, %v9053_v16  ;;  %v9261_v0 = vsel %vm9250_vm5, nan, %v9260_v48 }
 0x6b7   : > { %vm10910_vm7 = vcmp.lt.s32.totalorder %v10909_v12, 2  ;;  %vm10911_vm8 = vcmp.eq.s32.totalorder %v10909_v12, 0  ;;  %vm10914_vm1 = vcmp.eq.s32.totalorder %v10909_v12, 2  ;;  %v9761_v5 = vmul.f32 %v9760_v9, %v9758_v10  ;;  %v23573_v10 = vld [vmem:[#allocation51_spill] sm:$0xff] }
 0x6b8   : > { %v10913_v62 = vsel %vm10911_vm8, %v21527_v23, %v9255_v17  ;;  %v10916_v31 = vsel %vm10914_vm1, %v9258_v26, %v21606_v44  ;;  %v13823_v49 = vpack.c.bf16 %v9261_v0, %v11964_v11  ;;  %v11995_v34 = vmul.f32 %v11979_v18, %v21863_v15  ;;  %v23569_v44 = vld [vmem:[#allocation52_spill] sm:$0xff] }
 0x6b9   : > { %v10917_v52 = vsel %vm10910_vm7, %v10913_v62, %v10916_v31  ;;  %v11997_v1 = vmul.f32 %v11981_v59, %v21872_v6  ;;  %v11994_v25 = vmul.f32 %v11978_v7, %v21895_v29  ;;  %v9555_v38 = vsel %vm9472_vm3, %v9554_v33, %v21843_v53 }
 0x6ba   : > { %v9762_v4 = vxor.u32 2147483648, %v9761_v5  ;;  %v10918_v23 = vsel %vm9250_vm5, nan, %v10917_v52  ;;  %13824 = vmatpush1.bf16.msra.mxu1 %v13823_v49  ;;  %v9782_v61 = vand.u32 2147483647, %v23569_v44  ;;  %v12011_v24 = vsub.f32 %v11995_v34, %v21855_v55 }
 0x6bb   : > { %v11852_v17 = vmul.f32 2.0, %v10918_v23  ;;  %v12013_v3 = vsub.f32 %v11997_v1, %v21870_v41  ;;  %v12010_v21 = vsub.f32 %v11994_v25, %v9053_v16  ;;  %v21936_v26 = vsel %vm9368_vm12, %v9452_v47, %v21608_v20 }
 0x6bc   : > { %14555 = vcosq.f32 %v21851_v57  ;;  %v23570_v50 = vand.u32 2147483647, %v21387_v60  ;;  %v9785_v55 = vand.u32 2139095040, %v23569_v44  ;;  %v13813_v33 = vpack.c.bf16 %v12011_v24, %v11979_v18 }
 0x6bd   : > { %14557 = vsinq.f32 %v21851_v57  ;;  %v13825_v41 = vpack.c.bf16 %v12013_v3, %v11981_v59  ;;  %v13815_v16 = vpack.c.bf16 %v12010_v21, %v11978_v7  ;;  %v9558_v20 = vsel %vm21900_vm14, %v23549_v46, %v9555_v38 }
 0x6be   : > { %vm21941_vm5 = vcmp.le.f32.partialorder %v23570_v50, 0.7853982  ;;  %v11980_v47 = vmul.f32 %v11852_v17, %v9261_v0  ;;  %v12027_v30 = vmul.f32 %v12011_v24, %v21863_v15  ;;  %v12029_v45 = vmul.f32 %v12013_v3, %v21872_v6  ;;  %13814 = vmatprep.subr.bf16.mxu0 %v13813_v33  ;;  %v23574_v50 = vld [vmem:[#allocation74_spill] sm:$0xff] }
 0x6bf   : > { %v9763_v9 = vsel %vm9680_vm11, %v9762_v4, %v9761_v5  ;;  %13826 = vmatprep.subr.bf16.mxu1 %v13825_v41  ;;  %v12026_v35 = vmul.f32 %v12010_v21, %v21895_v29  ;;  %v9786_v57 = vshrl.u32 %v9785_v55, 23  ;;  %v9789_v14 = vand.u32 8388607, %v9782_v61  ;;  %13816 = vmatpush1.bf16.msra.mxu0 %v13815_v16 }
 0x6c0   : > { %v11996_v54 = vmul.f32 %v11980_v47, %v11852_v17  ;;  %v12043_v12 = vsub.f32 %v12027_v30, %v11979_v18  ;;  %v12045_v51 = vsub.f32 %v12029_v45, %v11981_v59  ;;  %v13158_v11 = vmul.f32 -1.442695, %v23569_v44 }
 0x6c1   : > { %v9660_v48 = vsub.s32 4, %v23573_v10  ;;  %14559 = vcosq.f32 %v9558_v20  ;;  %v12042_v62 = vsub.f32 %v12026_v35, %v11978_v7  ;;  %v13066_v31 = vadd.s32 4294967169, %v9786_v57 }
 0x6c2   : > { %v21962_v5 = vsel %vm21941_vm5, %v21387_v60, %v9763_v9  ;;  %v12012_v49 = vsub.f32 %v11996_v54, %v9261_v0  ;;  %v12059_v52 = vmul.f32 %v12043_v12, %v21863_v15  ;;  %v12061_v34 = vmul.f32 %v12045_v51, %v21872_v6 }
 0x6c3   : > { %v12058_v18 = vmul.f32 %v12042_v62, %v21895_v29  ;;  %v9790_v59 = vor.u32 8388608, %v9789_v14  ;;  %v9792_v1 = vadd.s32 1, %v13066_v31  ;;  %14561 = vpow2.f32 %v13158_v11 }
 0x6c4   : > { %v13827_v25 = vpack.c.bf16 %v12012_v49, %v11980_v47  ;;  %v12075_v38 = vsub.f32 %v12059_v52, %v12011_v24  ;;  %v12077_v4 = vsub.f32 %v12061_v34, %v12013_v3  ;;  %v12028_v7 = vmul.f32 %v12012_v49, %v11852_v17 }
 0x6c5   : > { %v12074_v23 = vsub.f32 %v12058_v18, %v12010_v21  ;;  %vm9793_vm12 = vcmp.gt.s32.totalorder %v9792_v1, 0  ;;  %v22935_v55 = vand.u32 2147483647, %v23574_v50  ;;  %v9993_v33 = vand.u32 2139095040, %v23574_v50 }
 0x6c6   : > { %v21969_v0 = vpop.eup %14555  ;;  %13828 = vmatpush1.bf16.msra.mxu1 %v13827_v25  ;;  %v13817_v15 = vpack.c.bf16 %v12075_v38, %v12043_v12  ;;  %v13829_v6 = vpack.c.bf16 %v12077_v4, %v12045_v51  ;;  %v12044_v41 = vsub.f32 %v12028_v7, %v11980_v47  ;;  %v9794_v29 = vsel %vm9793_vm12, %v9792_v1, 0 }
 0x6c7   : > { %23575 = vst [vmem:[#allocation61_spill] sm:$0xff] %v21969_v0  ;;  %v21971_v16 = vpop.eup %14557  ;;  %v21976_v24 = vsel %vm9576_vm2, %v9660_v48, %v23573_v10  ;;  %14563 = vsinq.f32 %v9558_v20  ;;  %v13819_v3 = vpack.c.bf16 %v12074_v23, %v12042_v62  ;;  %v9796_v21 = vand.u32 31, %v9794_v29 }
 0x6c8   : > { %23576 = vst [vmem:[#allocation55_spill] sm:$0xff] %v21971_v16  ;;  %14565 = vcosq.f32 %v21962_v5  ;;  %13818 = vmatprep.subr.bf16.mxu0 %v13817_v15  ;;  %13830 = vmatprep.subr.bf16.mxu1 %v13829_v6  ;;  %v12060_v30 = vmul.f32 %v12044_v41, %v11852_v17  ;;  %v9795_v45 = vshrl.u32 %v9794_v29, 5  ;;  %v21979_v9 = vshll.u32 %v9790_v59, 8 }
 0x6c9   : > { %13820 = vmatpush1.bf16.msra.mxu0 %v13819_v3  ;;  %v9797_v47 = vsub.s32 32, %v9796_v21  ;;  %v9799_v35 = vshll.u32 %v23414_v19, %v9796_v21  ;;  %v9994_v57 = vshrl.u32 %v9993_v33, 23  ;;  %v21984_v14 = vand.u32 8388607, %v22935_v55 }
 0x6ca   : > { %v12076_v20 = vsub.f32 %v12060_v30, %v12012_v49  ;;  %v9802_v54 = vshll.u32 %v23539_v32, %v9796_v21  ;;  %v9805_v12 = vshll.u32 %v23540_v42, %v9796_v21  ;;  %v9808_v51 = vshll.u32 %v23417_v63, %v9796_v21  ;;  %v14622_v49 = vld [vmem:[%s22656_s8] sm:$0xff] }
 0x6cb   : > { %v21989_v17 = vpop.eup %14559  ;;  %v9800_v11 = vshrl.u32 %v23539_v32, %v9797_v47  ;;  %v9803_v10 = vshrl.u32 %v23540_v42, %v9797_v47  ;;  %v9806_v48 = vshrl.u32 %v23417_v63, %v9797_v47  ;;  %v9811_v62 = vshll.u32 %v23504_v13, %v9796_v21 }
 0x6cc   : > { %v13831_v31 = vpack.c.bf16 %v12076_v20, %v12044_v41  ;;  %vm23577_vm2 = vcmask 392192   ;;  %v9809_v52 = vshrl.u32 %v23504_v13, %v9797_v47  ;;  %v9812_v34 = vshrl.u32 %v23505_v43, %v9797_v47 }
 0x6cd   : > { %13164 = vmatmul.mubr.msk.f32.vlgmr.msra.gmra.mrb[178].mxu0 %vm23577_vm2, %v14622_v49  ;;  %vm9814_vm4 = vcmp.lt.s32.totalorder %v9795_v45, 1  ;;  %v14562_v18 = vpop.eup %14561  ;;  %v9798_v59 = vshrl.u32 %v23414_v19, %v9797_v47  ;;  %v9801_v1 = vor.u32 %v9800_v11, %v9799_v35  ;;  %v9804_v25 = vor.u32 %v9803_v10, %v9802_v54  ;;  %vm23579_vm0 = vmmov %vm23577_vm2 }
 0x6ce   : > { %v9807_v38 = vor.u32 %v9806_v48, %v9805_v12  ;;  %v23578_v4 = vmov 0.0   ;;  %13832 = vmatpush1.bf16.msra.mxu1 %v13831_v31  ;;  %v9810_v7 = vor.u32 %v9809_v52, %v9808_v51  ;;  %v9813_v23 = vor.u32 %v9812_v34, %v9811_v62  ;;  %v23580_v34 = vld [vmem:[#allocation68_spill] sm:$0xff] }
 0x6cf   : > { %12438 = vmatprep.mubr.f32.mxu0 %v23578_v4  ;;  %vm9816_vm10 = vcmp.lt.s32.totalorder %v9795_v45, 3  ;;  %vm9817_vm13 = vcmp.lt.s32.totalorder %v9795_v45, 4  ;;  %v9818_v33 = vsel %vm9814_vm4, %v9798_v59, %v9801_v1  ;;  %v9822_v6 = vsel %vm9814_vm4, %v9801_v1, %v9804_v25 }
 0x6d0   : > { %v9819_v15 = vsel %vm9817_vm13, %v9807_v38, 2102212464  ;;  %v9826_v41 = vsel %vm9814_vm4, %v9804_v25, %v9807_v38  ;;  %vm9815_vm15 = vcmp.lt.s32.totalorder %v9795_v45, 2  ;;  %v9823_v3 = vsel %vm9817_vm13, %v9810_v7, 920167782 }
 0x6d1   : > { %v9820_v29 = vsel %vm9816_vm10, %v9804_v25, %v9819_v15  ;;  %v9827_v21 = vsel %vm9817_vm13, %v9813_v23, 1326507024  ;;  %v22003_v30 = vpop.eup %14563  ;;  %13165 = vmatmul.mubr.msk.f32.vlgmr.msra.gmra.mrb[178].mxu1 %vm23579_vm0, %v14622_v49  ;;  %v9824_v47 = vsel %vm9816_vm10, %v9807_v38, %v9823_v3  ;;  %v11922_v20 = vadd.f32 1.0, %v14562_v18  ;;  %v23582_v25 = vld [vmem:[#allocation75_spill] sm:$0xff] }
 0x6d2   : > { %v9828_v35 = vsel %vm9816_vm10, %v9810_v7, %v9827_v21  ;;  %v13074_v54 = vadd.s32 4294967169, %v9994_v57  ;;  %v22006_v12 = vpop.eup %14565  ;;  %v9821_v51 = vsel %vm9815_vm15, %v9818_v33, %v9820_v29  ;;  %v9825_v11 = vsel %vm9815_vm15, %v9822_v6, %v9824_v47  ;;  %12509 = vmatprep.mubr.f32.mxu1 %v23578_v4 }
 0x6d3   : > { %v9829_v10 = vsel %vm9815_vm15, %v9826_v41, %v9828_v35  ;;  %v9998_v48 = vor.u32 8388608, %v21984_v14  ;;  %v22015_v31 = vmul.u32.u64.low %v21979_v9, %v9825_v11  ;;  %v22016_v49 = vmul.u32.u64.high %v21979_v9, %v9825_v11, %v22015_v31 }
 0x6d4   : > { %v22011_v45 = vmul.u32.u64.low %v21979_v9, %v9829_v10  ;;  %v22012_v62 = vmul.u32.u64.high %v21979_v9, %v9829_v10, %v22011_v45  ;;  %14567 = vsinq.f32 %v21962_v5  ;;  %v10000_v57 = vadd.s32 1, %v13074_v54 }
 0x6d5   : > { %v13160_v52 = vmul.f32 -1.442695, %v23574_v50  ;;  %v22934_v18 = vand.u32 2147483647, %v23580_v34  ;;  %v22025_v14 = vsel %vm21703_vm6, 0, %v21936_v26  ;;  %v22030_v59 = vsel %vm21819_vm9, 0, %v21976_v24 }
 0x6d6   : > { %23581 = vst [vmem:[#allocation20_spill] sm:$0xff] %v22030_v59  ;;  %14569 = vrcp.f32 %v11922_v20  ;;  %v9837_v1 = vmul.u32 %v21979_v9, %v9821_v51  ;;  %vm10001_vm7 = vcmp.gt.s32.totalorder %v10000_v57, 0  ;;  %v9889_v5 = vand.u32 2139095040, %v23580_v34 }
 0x6d7   : > { %v10097_v38 = vand.u32 2139095040, %v23582_v25  ;;  %vm9839_vm8 = vc.u32 %v22012_v62, %v22015_v31  ;;  %v9840_v37 = vadd.s32 1, %v22016_v49  ;;  %v10002_v26 = vsel %vm10001_vm7, %v10000_v57, 0 }
 0x6d8   : > { %v22038_v7 = vshll.u32 %v9998_v48, 8  ;;  %v10004_v23 = vand.u32 31, %v10002_v26  ;;  %14571 = vpow2.f32 %v13160_v52  ;;  %v22042_v58 = vand.u32 8388607, %v22934_v18 }
 0x6d9   : > { %v22045_v24 = vmul.f32 -1.442695, %v23580_v34  ;;  %v9841_v9 = vsel %vm9839_vm8, %v9840_v37, %v22016_v49  ;;  %v10003_v33 = vshrl.u32 %v10002_v26, 5  ;;  %v22050_v6 = vmul.f32 -1.442695, %v23582_v25 }
 0x6da   : > { %vm9784_vm6 = vcmp.lt.s32.totalorder %v23569_v44, 0  ;;  %v9842_v41 = vadd.s32 %v9841_v9, %v9837_v1  ;;  %v10005_v29 = vsub.s32 32, %v10004_v23  ;;  %v9890_v3 = vshrl.u32 %v9889_v5, 23 }
 0x6db   : > { %v10098_v21 = vshrl.u32 %v10097_v38, 23  ;;  %v10007_v47 = vshll.u32 %v23414_v19, %v10004_v23  ;;  %v10010_v35 = vshll.u32 %v23539_v32, %v10004_v23  ;;  %v10013_v20 = vshll.u32 %v23540_v42, %v10004_v23 }
 0x6dc   : > { %v10016_v54 = vshll.u32 %v23417_v63, %v10004_v23  ;;  %v9843_v51 = vadd.s32 536870912, %v9842_v41  ;;  %v10008_v11 = vshrl.u32 %v23539_v32, %v10005_v29  ;;  %v10011_v10 = vshrl.u32 %v23540_v42, %v10005_v29 }
 0x6dd   : > { %v10019_v48 = vshll.u32 %v23504_v13, %v10004_v23  ;;  %v10014_v45 = vshrl.u32 %v23417_v63, %v10005_v29  ;;  %v10017_v49 = vshrl.u32 %v23504_v13, %v10005_v29  ;;  %v10020_v57 = vshrl.u32 %v23505_v43, %v10005_v29 }
 0x6de   : > { %vm10022_vm9 = vcmp.lt.s32.totalorder %v10003_v33, 1  ;;  %v22063_v52 = vpop.eup %14567  ;;  %vm22067_vm1 = vcmp.le.f32.partialorder %v9782_v61, 0.7853982  ;;  %v9844_v5 = vshrl.u32 %v9843_v51, 30  ;;  %v10006_v38 = vshrl.u32 %v23414_v19, %v10005_v29 }
 0x6df   : > { %v10009_v37 = vor.u32 %v10008_v11, %v10007_v47  ;;  %v10012_v26 = vor.u32 %v10011_v10, %v10010_v35  ;;  %v10015_v9 = vor.u32 %v10014_v45, %v10013_v20  ;;  %v10018_v18 = vor.u32 %v10017_v49, %v10016_v54 }
 0x6e0   : > { %v22072_v23 = vpop.eup %14569  ;;  %v10021_v55 = vor.u32 %v10020_v57, %v10019_v48  ;;  %vm10024_vm12 = vcmp.lt.s32.totalorder %v10003_v33, 3  ;;  %v9845_v15 = vshll.u32 %v9844_v5, 30  ;;  %v9868_v4 = vsub.s32 4, %v9844_v5 }
 0x6e1   : > { %vm10025_vm2 = vcmp.lt.s32.totalorder %v10003_v33, 4  ;;  %v10030_v0 = vsel %vm10022_vm9, %v10009_v37, %v10012_v26  ;;  %v10034_v59 = vsel %vm10022_vm9, %v10012_v26, %v10015_v9  ;;  %vm10023_vm4 = vcmp.lt.s32.totalorder %v10003_v33, 2 }
 0x6e2   : > { %v10027_v61 = vsel %vm10025_vm2, %v10015_v9, 2102212464  ;;  %v10031_v16 = vsel %vm10025_vm2, %v10018_v18, 920167782  ;;  %v10035_v51 = vsel %vm10025_vm2, %v10021_v55, 1326507024  ;;  %v14572_v27 = vpop.eup %14571  ;;  %v22076_v29 = vsub.s32 %v9842_v41, %v9845_v15 }
 0x6e3   : > { %v10026_v47 = vsel %vm10022_vm9, %v10006_v38, %v10009_v37  ;;  %v10032_v35 = vsel %vm10024_vm12, %v10015_v9, %v10031_v16  ;;  %v9869_v20 = vsel %vm9784_vm6, %v9868_v4, %v9844_v5  ;;  %v10028_v54 = vsel %vm10024_vm12, %v10012_v26, %v10027_v61 }
 0x6e4   : > { %v10033_v11 = vsel %vm10023_vm4, %v10030_v0, %v10032_v35  ;;  %v10036_v10 = vsel %vm10024_vm12, %v10018_v18, %v10035_v51  ;;  %v9848_v48 = vsub.s32 0, %v22076_v29  ;;  %v11924_v16 = vadd.f32 1.0, %v14572_v27 }
 0x6e5   : > { %v10037_v45 = vsel %vm10023_vm4, %v10034_v59, %v10036_v10  ;;  %v22086_v55 = vmul.u32.u64.low %v22038_v7, %v10033_v11  ;;  %v22087_v15 = vmul.u32.u64.high %v22038_v7, %v10033_v11, %v22086_v55  ;;  %v9894_v57 = vor.u32 8388608, %v22042_v58 }
 0x6e6   : > { %v22090_v41 = vmul.u32.u64.low %v22038_v7, %v10037_v45  ;;  %v22091_v49 = vmul.u32.u64.high %v22038_v7, %v10037_v45, %v22090_v41  ;;  %v13067_v4 = vmin.u32 %v9848_v48, %v22076_v29  ;;  %v10029_v5 = vsel %vm10023_vm4, %v10026_v47, %v10028_v54 }
 0x6e7   : > { %v13070_v0 = vadd.s32 4294967169, %v9890_v3  ;;  %v13078_v33 = vadd.s32 4294967169, %v10098_v21  ;;  %v9838_v18 = vadd.s32 %v22015_v31, %v22012_v62  ;;  %v22099_v59 = vsel %vm22067_vm1, 0, %v9869_v20 }
 0x6e8   : > { %14573 = vpow2.f32 %v22045_v24  ;;  %v23585_v38 = vand.u32 2147483647, %v23582_v25  ;;  %v9850_v27 = vclz %v13067_v4  ;;  %v10048_v58 = vadd.s32 1, %v22087_v15 }
 0x6e9   : > { %v9896_v26 = vadd.s32 1, %v13070_v0  ;;  %v10104_v9 = vadd.s32 1, %v13078_v33  ;;  %v10045_v3 = vmul.u32 %v22038_v7, %v10029_v5  ;;  %vm10047_vm10 = vc.u32 %v22091_v49, %v22086_v55 }
 0x6ea   : > { %v22104_v37 = vand.u32 8388607, %v23585_v38  ;;  %14575 = vrcp.f32 %v11924_v16  ;;  %v22109_v62 = vshll.u32 %v9894_v57, 8  ;;  %v13068_v31 = vadd.s32 4294967294, %v9850_v27 }
 0x6eb   : > { %vm9992_vm13 = vcmp.lt.s32.totalorder %v23574_v50, 0  ;;  %v10049_v24 = vsel %vm10047_vm10, %v10048_v58, %v22087_v15  ;;  %vm9897_vm15 = vcmp.gt.s32.totalorder %v9896_v26, 0  ;;  %vm10105_vm0 = vcmp.gt.s32.totalorder %v10104_v9, 0 }
 0x6ec   : > { %v10050_v21 = vadd.s32 %v10049_v24, %v10045_v3  ;;  %v9898_v61 = vsel %vm9897_vm15, %v9896_v26, 0  ;;  %v22113_v51 = vsel %vm10105_vm0, %v10104_v9, 0  ;;  %vm13069_vm7 = vcmp.lt.s32.totalorder %v13068_v31, 0 }
 0x6ed   : > { %v22117_v7 = vadd.s32 %v22086_v55, %v22091_v49  ;;  %v9900_v35 = vand.u32 31, %v9898_v61  ;;  %v9853_v54 = vsel %vm13069_vm7, 0, %v13068_v31  ;;  %v22120_v10 = vshrl.u32 %v9898_v61, 5 }
 0x6ee   : > { %v10051_v11 = vadd.s32 536870912, %v10050_v21  ;;  %14577 = vpow2.f32 %v22050_v6  ;;  %v9854_v48 = vsub.s32 32, %v9853_v54  ;;  %v9858_v45 = vsub.s32 4294967266, %v9853_v54 }
 0x6ef   : > { %v9901_v15 = vsub.s32 32, %v9900_v35  ;;  %v22124_v41 = vand.u32 31, %v22113_v51  ;;  %v9855_v16 = vshll.u32 %v22076_v29, %v9853_v54  ;;  %v9903_v55 = vshll.u32 %v23414_v19, %v9900_v35 }
 0x6f0   : > { %v10052_v57 = vshrl.u32 %v10051_v11, 30  ;;  %v9906_v49 = vshll.u32 %v23539_v32, %v9900_v35  ;;  %v9856_v4 = vshrl.u32 %v9838_v18, %v9854_v48  ;;  %v9859_v5 = vadd.s32 127, %v9858_v45 }
 0x6f1   : > { %v9904_v0 = vshrl.u32 %v23539_v32, %v9901_v15  ;;  %v9909_v33 = vshll.u32 %v23540_v42, %v9900_v35  ;;  %v9907_v58 = vshrl.u32 %v23540_v42, %v9901_v15  ;;  %v9910_v26 = vshrl.u32 %v23417_v63, %v9901_v15 }
 0x6f2   : > { %v22131_v6 = vpop.eup %14573  ;;  %v10053_v38 = vshll.u32 %v10052_v57, 30  ;;  %v10076_v27 = vsub.s32 4, %v10052_v57  ;;  %v9857_v29 = vor.u32 %v9856_v4, %v9855_v16  ;;  %v9860_v9 = vshll.u32 %v9859_v5, 23 }
 0x6f3   : > { %v9902_v3 = vshrl.u32 %v23414_v19, %v9901_v15  ;;  %v9905_v31 = vor.u32 %v9904_v0, %v9903_v55  ;;  %v9908_v54 = vor.u32 %v9907_v58, %v9906_v49  ;;  %v9912_v11 = vshll.u32 %v23417_v63, %v9900_v35 }
 0x6f4   : > { %v22136_v24 = vpop.eup %14575  ;;  %v22138_v18 = vsub.s32 %v10050_v21, %v10053_v38  ;;  %v10077_v61 = vsel %vm9992_vm13, %v10076_v27, %v10052_v57  ;;  %v9861_v48 = vor.u32 4788187, %v9860_v9  ;;  %v9864_v45 = vcvt.s32.f32 %v9857_v29 }
 0x6f5   : > { %v9911_v47 = vor.u32 %v9910_v26, %v9909_v33  ;;  %v9913_v20 = vshrl.u32 %v23504_v13, %v9901_v15  ;;  %v23586_v16 = vand.u32 2147483647, %v23574_v50  ;;  %v9915_v55 = vshll.u32 %v23504_v13, %v9900_v35 }
 0x6f6   : > { %v10056_v21 = vsub.s32 0, %v22138_v18  ;;  %v9916_v57 = vshrl.u32 %v23505_v43, %v9901_v15  ;;  %vm9918_vm9 = vcmp.lt.s32.totalorder %v22120_v10, 1  ;;  %v9862_v49 = vand.u32 2147483647, %v9861_v48 }
 0x6f7   : > { %vm22146_vm8 = vcmp.le.f32.partialorder %v23586_v16, 0.7853982  ;;  %v9914_v5 = vor.u32 %v9913_v20, %v9912_v11  ;;  %vm9919_vm12 = vcmp.lt.s32.totalorder %v22120_v10, 2  ;;  %vm9920_vm2 = vcmp.lt.s32.totalorder %v22120_v10, 3 }
 0x6f8   : > { %v22156_v0 = vpop.eup %14577  ;;  %v13075_v33 = vmin.u32 %v10056_v21, %v22138_v18  ;;  %v9917_v38 = vor.u32 %v9916_v57, %v9915_v55  ;;  %vm9921_vm4 = vcmp.lt.s32.totalorder %v22120_v10, 4  ;;  %v9922_v35 = vsel %vm9918_vm9, %v9902_v3, %v9905_v31 }
 0x6f9   : > { %v9865_v27 = vmul.f32 %v9864_v45, %v9862_v49  ;;  %v9923_v15 = vsel %vm9921_vm4, %v9911_v47, 2102212464  ;;  %v9926_v58 = vsel %vm9918_vm9, %v9905_v31, %v9908_v54  ;;  %v9927_v20 = vsel %vm9921_vm4, %v9914_v5, 920167782 }
 0x6fa   : > { %v10058_v26 = vclz %v13075_v33  ;;  %v9924_v29 = vsel %vm9920_vm2, %v9908_v54, %v9923_v15  ;;  %v9928_v9 = vsel %vm9920_vm2, %v9911_v47, %v9927_v20  ;;  %v9930_v11 = vsel %vm9918_vm9, %v9908_v54, %v9911_v47 }
 0x6fb   : > { %v9866_v48 = vxor.u32 2147483648, %v9865_v27  ;;  %v9925_v3 = vsel %vm9919_vm12, %v9922_v35, %v9924_v29  ;;  %v9929_v45 = vsel %vm9919_vm12, %v9926_v58, %v9928_v9  ;;  %v9931_v16 = vsel %vm9921_vm4, %v9917_v38, 1326507024 }
 0x6fc   : > { %v13076_v31 = vadd.s32 4294967294, %v10058_v26  ;;  %v9932_v21 = vsel %vm9920_vm2, %v9914_v5, %v9931_v16  ;;  %v22177_v55 = vmul.u32.u64.low %v22109_v62, %v9929_v45  ;;  %v22178_v57 = vmul.u32.u64.high %v22109_v62, %v9929_v45, %v22177_v55 }
 0x6fd   : > { %v9933_v47 = vsel %vm9919_vm12, %v9930_v11, %v9932_v21  ;;  %v22184_v54 = vshrl.u32 %v22113_v51, 5  ;;  %v10109_v49 = vsub.s32 32, %v22124_v41  ;;  %v23589_v33 = vor.u32 8388608, %v22104_v37 }
 0x6fe   : > { %vm13077_vm10 = vcmp.lt.s32.totalorder %v13076_v31, 0  ;;  %v22192_v5 = vmul.u32.u64.low %v22109_v62, %v9933_v47  ;;  %v22193_v35 = vmul.u32.u64.high %v22109_v62, %v9933_v47, %v22192_v5  ;;  %v23590_v15 = vsub.s32 4, %v21759_v39 }
 0x6ff   : > { %v22189_v38 = vshll.u32 %v23589_v33, 8  ;;  %v9867_v51 = vsel %vm9784_vm6, %v9866_v48, %v9865_v27  ;;  %v10061_v58 = vsel %vm13077_vm10, 0, %v13076_v31  ;;  %v22204_v37 = vsel %vm22146_vm8, 0, %v10077_v61 }
 0x700   : > { %v9557_v10 = vsel %vm9472_vm3, %v23590_v15, %v21759_v39  ;;  %v9941_v20 = vmul.u32 %v22109_v62, %v9925_v3  ;;  %v10062_v26 = vsub.s32 32, %v10061_v58  ;;  %v10066_v29 = vsub.s32 4294967266, %v10061_v58 }
 0x701   : > { %v10110_v9 = vshrl.u32 %v23414_v19, %v10109_v49  ;;  %v10111_v11 = vshll.u32 %v23414_v19, %v22124_v41  ;;  %v9944_v45 = vadd.s32 1, %v22178_v57  ;;  %v10112_v39 = vshrl.u32 %v23539_v32, %v10109_v49 }
 0x702   : > { %v10114_v27 = vshll.u32 %v23539_v32, %v22124_v41  ;;  %v10115_v48 = vshrl.u32 %v23540_v42, %v10109_v49  ;;  %v10063_v61 = vshll.u32 %v22138_v18, %v10061_v58  ;;  %v10064_v62 = vshrl.u32 %v22117_v7, %v10062_v26 }
 0x703   : > { %v10067_v3 = vadd.s32 127, %v10066_v29  ;;  %vm9943_vm3 = vc.u32 %v22193_v35, %v22177_v55  ;;  %v10113_v19 = vor.u32 %v10112_v39, %v10111_v11  ;;  %v10117_v21 = vshll.u32 %v23540_v42, %v22124_v41 }
 0x704   : > { %v9945_v16 = vsel %vm9943_vm3, %v9944_v45, %v22178_v57  ;;  %v10116_v31 = vor.u32 %v10115_v48, %v10114_v27  ;;  %v10065_v47 = vor.u32 %v10064_v62, %v10063_v61  ;;  %v10118_v5 = vshrl.u32 %v23417_v63, %v10109_v49 }
 0x705   : > { %v10068_v33 = vshll.u32 %v10067_v3, 23  ;;  %v9946_v32 = vadd.s32 %v9945_v16, %v9941_v20  ;;  %v10120_v18 = vshll.u32 %v23417_v63, %v22124_v41  ;;  %v10121_v7 = vshrl.u32 %v23504_v13, %v10109_v49 }
 0x706   : > { %v10123_v15 = vshll.u32 %v23504_v13, %v22124_v41  ;;  %v10124_v57 = vshrl.u32 %v23505_v43, %v10109_v49  ;;  %v10072_v26 = vcvt.s32.f32 %v10065_v47  ;;  %v10119_v11 = vor.u32 %v10118_v5, %v10117_v21 }
 0x707   : > { %v10069_v58 = vor.u32 4788187, %v10068_v33  ;;  %v9947_v29 = vadd.s32 536870912, %v9946_v32  ;;  %v10122_v42 = vor.u32 %v10121_v7, %v10120_v18  ;;  %vm10126_vm6 = vcmp.lt.s32.totalorder %v22184_v54, 1 }
 0x708   : > { %v10125_v45 = vor.u32 %v10124_v57, %v10123_v15  ;;  %vm10127_vm15 = vcmp.lt.s32.totalorder %v22184_v54, 2  ;;  %vm10128_vm0 = vcmp.lt.s32.totalorder %v22184_v54, 3  ;;  %vm10129_vm7 = vcmp.lt.s32.totalorder %v22184_v54, 4 }
 0x709   : > { %v10070_v20 = vand.u32 2147483647, %v10069_v58  ;;  %v22231_v39 = vshrl.u32 %v9947_v29, 30  ;;  %v10130_v63 = vsel %vm10126_vm6, %v10110_v9, %v10113_v19  ;;  %v10131_v13 = vsel %vm10129_vm7, %v10119_v11, 2102212464 }
 0x70a   : > { %v10134_v43 = vsel %vm10126_vm6, %v10113_v19, %v10116_v31  ;;  %v10135_v41 = vsel %vm10129_vm7, %v10122_v42, 920167782  ;;  %v10132_v48 = vsel %vm10128_vm0, %v10116_v31, %v10131_v13  ;;  %v9870_v62 = vsel %vm22067_vm1, %v23569_v44, %v9867_v51 }
 0x70b   : > { %v10073_v49 = vmul.f32 %v10072_v26, %v10070_v20  ;;  %v9949_v27 = vshll.u32 %v22231_v39, 30  ;;  %v10136_v61 = vsel %vm10128_vm0, %v10119_v11, %v10135_v41  ;;  %v10138_v3 = vsel %vm10126_vm6, %v10116_v31, %v10119_v11 }
 0x70c   : > { %v10137_v9 = vsel %vm10127_vm15, %v10134_v43, %v10136_v61  ;;  %v10139_v16 = vsel %vm10129_vm7, %v10125_v45, 1326507024  ;;  %v10133_v47 = vsel %vm10127_vm15, %v10130_v63, %v10132_v48  ;;  %v9559_v31 = vsel %vm21900_vm14, 0, %v9557_v10 }
 0x70d   : > { %v10074_v19 = vxor.u32 2147483648, %v10073_v49  ;;  %v22251_v21 = vsub.s32 %v9946_v32, %v9949_v27  ;;  %v10140_v33 = vsel %vm10128_vm0, %v10122_v42, %v10139_v16  ;;  %14579 = vcosq.f32 %v9870_v62 }
 0x70e   : > { %v10141_v1 = vsel %vm10127_vm15, %v10138_v3, %v10140_v33  ;;  %v22260_v51 = vmul.u32.u64.low %v22189_v38, %v10137_v9  ;;  %v22261_v5 = vmul.u32.u64.high %v22189_v38, %v10137_v9, %v22260_v51  ;;  %14581 = vsinq.f32 %v9870_v62 }
 0x70f   : > { %v9952_v32 = vsub.s32 0, %v22251_v21  ;;  %v22267_v18 = vmul.u32.u64.low %v22189_v38, %v10141_v1  ;;  %v22268_v7 = vmul.u32.u64.high %v22189_v38, %v10141_v1, %v22267_v18  ;;  %v10075_v15 = vsel %vm9992_vm13, %v10074_v19, %v10073_v49 }
 0x710   : > { %v9942_v54 = vadd.s32 %v22177_v55, %v22193_v35  ;;  %vm9562_vm1 = vweird.f32 %v23549_v46  ;;  %v9563_v57 = vadd.s32 3, %v9559_v31  ;;  %v10149_v10 = vmul.u32 %v22189_v38, %v10133_v47 }
 0x711   : > { %v13071_v36 = vmin.u32 %v9952_v32, %v22251_v21  ;;  %v9567_v58 = vxor.u32 2147483648, %v22003_v30  ;;  %v9570_v26 = vxor.u32 2147483648, %v21989_v17  ;;  %v10152_v29 = vadd.s32 1, %v22261_v5 }
 0x712   : > { %v9564_v11 = vand.u32 3, %v9563_v57  ;;  %v11218_v42 = vand.u32 3, %v9559_v31  ;;  %v11919_v45 = vadd.f32 1.0, %v21691_v56  ;;  %v22284_v55 = vsel %vm22146_vm8, %v23574_v50, %v10075_v15 }
 0x713   : > { %v9954_v35 = vclz %v13071_v36  ;;  %vm10151_vm14 = vc.u32 %v22268_v7, %v22260_v51  ;;  %v9764_v38 = vsub.s32 4, %v21823_v40  ;;  %v22292_v4 = vadd.s32 %v22260_v51, %v22268_v7 }
 0x714   : > { %v10153_v20 = vsel %vm10151_vm14, %v10152_v29, %v22261_v5  ;;  %vm9565_vm13 = vcmp.lt.s32.totalorder %v9564_v11, 2  ;;  %vm9566_vm9 = vcmp.eq.s32.totalorder %v9564_v11, 0  ;;  %vm9569_vm12 = vcmp.eq.s32.totalorder %v9564_v11, 2 }
 0x715   : > { %v13072_v63 = vadd.s32 4294967294, %v9954_v35  ;;  %v10154_v13 = vadd.s32 %v10153_v20, %v10149_v10  ;;  %v9568_v43 = vsel %vm9566_vm9, %v21989_v17, %v9567_v58  ;;  %v9571_v56 = vsel %vm9569_vm12, %v9570_v26, %v22003_v30 }
 0x716   : > { %v9572_v41 = vsel %vm9565_vm13, %v9568_v43, %v9571_v56  ;;  %vm11220_vm8 = vcmp.eq.s32.totalorder %v11218_v42, 0  ;;  %14583 = vrcp.f32 %v11919_v45  ;;  %vm11223_vm4 = vcmp.eq.s32.totalorder %v11218_v42, 2 }
 0x717   : > { %vm13073_vm2 = vcmp.lt.s32.totalorder %v13072_v63, 0  ;;  %v10155_v49 = vadd.s32 536870912, %v10154_v13  ;;  %v11222_v27 = vsel %vm11220_vm8, %v21989_v17, %v9567_v58  ;;  %vm11219_vm10 = vcmp.lt.s32.totalorder %v11218_v42, 2  ;;  %v22299_v9 = vpop.eup %14579 }
 0x718   : > { %v9957_v48 = vsel %vm13073_vm2, 0, %v13072_v63  ;;  %v11225_v61 = vsel %vm11223_vm4, %v9570_v26, %v22003_v30  ;;  %v9765_v62 = vsel %vm9680_vm11, %v9764_v38, %v21823_v40  ;;  %v22305_v47 = vsel %vm9562_vm1, nan, %v9572_v41  ;;  %v22307_v17 = vpop.eup %14581 }
 0x719   : > { %v9958_v3 = vsub.s32 32, %v9957_v48  ;;  %v9962_v16 = vsub.s32 4294967266, %v9957_v48  ;;  %v22301_v19 = vshrl.u32 %v10155_v49, 30  ;;  %v9959_v33 = vshll.u32 %v22251_v21, %v9957_v48 }
 0x71a   : > { %v11226_v1 = vsel %vm11219_vm10, %v11222_v27, %v11225_v61  ;;  %v9767_v30 = vsel %vm21941_vm5, 0, %v9765_v62  ;;  %v9775_v40 = vxor.u32 2147483648, %v22063_v52  ;;  %vm9770_vm11 = vweird.f32 %v21387_v60 }
 0x71b   : > { %v9960_v51 = vshrl.u32 %v9942_v54, %v9958_v3  ;;  %v9963_v5 = vadd.s32 127, %v9962_v16  ;;  %v10157_v31 = vshll.u32 %v22301_v19, 30  ;;  %v11227_v32 = vsel %vm9562_vm1, nan, %v11226_v1 }
 0x71c   : > { %v22317_v18 = vmul.f32 2.0, %v11227_v32  ;;  %v9771_v7 = vadd.s32 3, %v9767_v30  ;;  %v9778_v21 = vxor.u32 2147483648, %v22006_v12  ;;  %v11424_v15 = vand.u32 3, %v9767_v30 }
 0x71d   : > { %v9961_v57 = vor.u32 %v9960_v51, %v9959_v33  ;;  %v9964_v53 = vshll.u32 %v9963_v5, 23  ;;  %v22320_v36 = vsub.s32 %v10154_v13, %v10157_v31  ;;  %v11921_v54 = vadd.f32 1.0, %v21805_v28 }
 0x71e   : > { %vm9888_vm5 = vcmp.lt.s32.totalorder %v23580_v34, 0  ;;  %v9772_v10 = vand.u32 3, %v9771_v7  ;;  %vm11425_vm3 = vcmp.lt.s32.totalorder %v11424_v15, 2  ;;  %vm11426_vm6 = vcmp.eq.s32.totalorder %v11424_v15, 0 }
 0x71f   : > { %vm11429_vm15 = vcmp.eq.s32.totalorder %v11424_v15, 2  ;;  %v23591_v58 = vand.u32 2147483647, %v23580_v34  ;;  %v9965_v29 = vor.u32 4788187, %v9964_v53  ;;  %v9968_v11 = vcvt.s32.f32 %v9961_v57 }
 0x720   : > { %v10160_v42 = vsub.s32 0, %v22320_v36  ;;  %v11428_v45 = vsel %vm11426_vm6, %v22006_v12, %v9775_v40  ;;  %v14584_v35 = vpop.eup %14583  ;;  %vm9773_vm7 = vcmp.lt.s32.totalorder %v9772_v10, 2  ;;  %vm9774_vm1 = vcmp.eq.s32.totalorder %v9772_v10, 0 }
 0x721   : > { %vm22326_vm0 = vcmp.le.f32.partialorder %v23591_v58, 0.7853982  ;;  %vm9777_vm14 = vcmp.eq.s32.totalorder %v9772_v10, 2  ;;  %v11431_v28 = vsel %vm11429_vm15, %v9778_v21, %v22063_v52  ;;  %v9966_v38 = vand.u32 2147483647, %v9965_v29 }
 0x722   : > { %v13079_v20 = vmin.u32 %v10160_v42, %v22320_v36  ;;  %v11967_v63 = vmul.f32 %v14584_v35, %v23549_v46  ;;  %v9776_v13 = vsel %vm9774_vm1, %v22006_v12, %v9775_v40  ;;  %vm9458_vm13 = vweird.f32 %v21286_v2 }
 0x723   : > { %v9779_v43 = vsel %vm9777_vm14, %v9778_v21, %v22063_v52  ;;  %v11432_v56 = vsel %vm11425_vm3, %v11428_v45, %v11431_v28  ;;  %14585 = vrcp.f32 %v11921_v54  ;;  %v9459_v41 = vadd.s32 3, %v22025_v14  ;;  %v22360_v21 = vpop.f32.mrb[176].mxu0  ;;  %v23594_v28 = vld [vmem:[#allocation15_spill] sm:$0xff] }
 0x724   : > { %v9969_v49 = vmul.f32 %v9968_v11, %v9966_v38  ;;  %v10162_v27 = vclz %v13079_v20  ;;  %v13833_v48 = vpack.c.bf16 %v22305_v47, %v11967_v63  ;;  %v9780_v61 = vsel %vm9773_vm7, %v9776_v13, %v9779_v43  ;;  %v22363_v53 = vpop.f32.mrb[177].mxu0  ;;  %v22369_v10 = vpop.f32.mrb[176].mxu1  ;;  %v23595_v20 = vld [vmem:[#allocation39_spill] sm:$0xff]  ;;  %v23596_v63 = vld [vmem:[#allocation20_spill] sm:$0xff] }
 0x725   : > { %v22344_v46 = vsel %vm9770_vm11, nan, %v9780_v61  ;;  %v11433_v12 = vsel %vm9770_vm11, nan, %v11432_v56  ;;  %v9460_v62 = vand.u32 3, %v9459_v41  ;;  %v9463_v52 = vxor.u32 2147483648, %v21826_v8 }
 0x726   : > { %v9970_v3 = vxor.u32 2147483648, %v9969_v49  ;;  %v13080_v16 = vadd.s32 4294967294, %v10162_v27  ;;  %13834 = vmatprep.subr.bf16.mxu0 %v13833_v48  ;;  %v22349_v33 = vmul.f32 2.0, %v11433_v12  ;;  %v9466_v1 = vxor.u32 2147483648, %v21815_v22  ;;  %v23597_v27 = vld [vmem:[#allocation55_spill] sm:$0xff]  ;;  %v22478_v12 = vld [vmem:[%s22656_s8] sm:$0xff] }
 0x727   : > { %vm9461_vm9 = vcmp.lt.s32.totalorder %v9460_v62, 2  ;;  %vm9462_vm12 = vcmp.eq.s32.totalorder %v9460_v62, 0  ;;  %vm9465_vm8 = vcmp.eq.s32.totalorder %v9460_v62, 2  ;;  %v11115_v30 = vand.u32 3, %v22025_v14 }
 0x728   : > { %v9971_v40 = vsel %vm9888_vm5, %v9970_v3, %v9969_v49  ;;  %vm13081_vm2 = vcmp.lt.s32.totalorder %v13080_v16, 0  ;;  %v9464_v51 = vsel %vm9462_vm12, %v21815_v22, %v9463_v52  ;;  %v9467_v5 = vsel %vm9465_vm8, %v9466_v1, %v21826_v8 }
 0x729   : > { %v9974_v31 = vsel %vm22326_vm0, %v23580_v34, %v9971_v40  ;;  %v10165_v32 = vsel %vm13081_vm2, 0, %v13080_v16  ;;  %v9468_v7 = vsel %vm9461_vm9, %v9464_v51, %v9467_v5  ;;  %vm11116_vm4 = vcmp.lt.s32.totalorder %v11115_v30, 2  ;;  %v23602_v51 = vld [vmem:[#allocation13_spill] sm:$0xff] }
 0x72a   : > { %14587 = vcosq.f32 %v9974_v31  ;;  %v10166_v15 = vsub.s32 32, %v10165_v32  ;;  %v10167_v14 = vshll.u32 %v22320_v36, %v10165_v32  ;;  %v10170_v57 = vsub.s32 4294967266, %v10165_v32  ;;  %v22374_v36 = vpop.f32.mrb[177].mxu1 }
 0x72b   : > { %14589 = vsinq.f32 %v9974_v31  ;;  %v22367_v54 = vsel %vm9458_vm13, nan, %v9468_v7  ;;  %vm11117_vm10 = vcmp.eq.s32.totalorder %v11115_v30, 0  ;;  %vm11120_vm11 = vcmp.eq.s32.totalorder %v11115_v30, 2 }
 0x72c   : > { %v10168_v58 = vshrl.u32 %v22292_v4, %v10166_v15  ;;  %v10171_v29 = vadd.s32 127, %v10170_v57  ;;  %v11119_v11 = vsel %vm11117_vm10, %v21815_v22, %v9463_v52  ;;  %v11122_v42 = vsel %vm11120_vm11, %v9466_v1, %v21826_v8  ;;  %v23601_v52 = vld [vmem:[#allocation61_spill] sm:$0xff] }
 0x72d   : > { %v14586_v45 = vpop.eup %14585  ;;  %v11123_v35 = vsel %vm11116_vm4, %v11119_v11, %v11122_v42  ;;  %v11966_v38 = vmul.f32 %v23594_v28, %v21286_v2  ;;  %vm9666_vm3 = vweird.f32 %v23595_v20  ;;  %v9667_v13 = vadd.s32 3, %v23596_v63 }
 0x72e   : > { %v10169_v43 = vor.u32 %v10168_v58, %v10167_v14  ;;  %v10172_v56 = vshll.u32 %v10171_v29, 23  ;;  %v11969_v4 = vmul.f32 %v14586_v45, %v21387_v60  ;;  %v11124_v22 = vsel %vm9458_vm13, nan, %v11123_v35 }
 0x72f   : > { %vm10096_vm6 = vcmp.lt.s32.totalorder %v23582_v25, 0  ;;  %v22385_v8 = vmul.f32 2.0, %v11124_v22  ;;  %v13835_v41 = vpack.c.bf16 %v22367_v54, %v11966_v38  ;;  %v9668_v49 = vand.u32 3, %v9667_v13 }
 0x730   : > { %v9671_v48 = vxor.u32 2147483648, %v23597_v27  ;;  %v23598_v61 = vand.u32 2147483647, %v23582_v25  ;;  %v10173_v62 = vor.u32 4788187, %v10172_v56  ;;  %v10176_v60 = vcvt.s32.f32 %v10169_v43 }
 0x731   : > { %v13845_v2 = vpack.c.bf16 %v22344_v46, %v11969_v4  ;;  %v9674_v3 = vxor.u32 2147483648, %v23601_v52  ;;  %13836 = vmatpush1.bf16.msra.mxu0 %v13835_v41  ;;  %vm9669_vm7 = vcmp.lt.s32.totalorder %v9668_v49, 2  ;;  %vm9670_vm1 = vcmp.eq.s32.totalorder %v9668_v49, 0 }
 0x732   : > { %vm22391_vm15 = vcmp.le.f32.partialorder %v23598_v61, 0.7853982  ;;  %vm9673_vm14 = vcmp.eq.s32.totalorder %v9668_v49, 2  ;;  %v11321_v16 = vand.u32 3, %v23596_v63  ;;  %v10174_v1 = vand.u32 2147483647, %v10173_v62 }
 0x733   : > { %13846 = vmatprep.subr.bf16.mxu1 %v13845_v2  ;;  %v9672_v30 = vsel %vm9670_vm1, %v23601_v52, %v9671_v48  ;;  %v9675_v40 = vsel %vm9673_vm14, %v9674_v3, %v23597_v27  ;;  %v11968_v5 = vmul.f32 %v23602_v51, %v23595_v20  ;;  %v11983_v42 = vmul.f32 %v22317_v18, %v22305_v47 }
 0x734   : > { %v9676_v31 = vsel %vm9669_vm7, %v9672_v30, %v9675_v40  ;;  %vm11322_vm13 = vcmp.lt.s32.totalorder %v11321_v16, 2  ;;  %vm11323_vm9 = vcmp.eq.s32.totalorder %v11321_v16, 0  ;;  %vm11326_vm12 = vcmp.eq.s32.totalorder %v11321_v16, 2  ;;  %v22402_v32 = vpop.eup %14587 }
 0x735   : > { %v10177_v7 = vmul.f32 %v10176_v60, %v10174_v1  ;;  %v9677_v15 = vsel %vm9666_vm3, nan, %v9676_v31  ;;  %v11325_v14 = vsel %vm11323_vm9, %v23601_v52, %v9671_v48  ;;  %v11328_v57 = vsel %vm11326_vm12, %v9674_v3, %v23597_v27  ;;  %v22408_v58 = vpop.eup %14589 }
 0x736   : > { %v11329_v29 = vsel %vm11322_vm13, %v11325_v14, %v11328_v57  ;;  %v13847_v11 = vpack.c.bf16 %v9677_v15, %v11968_v5  ;;  %v11985_v45 = vmul.f32 %v22349_v33, %v22344_v46  ;;  %v11982_v38 = vmul.f32 %v22385_v8, %v22367_v54 }
 0x737   : > { %v10178_v35 = vxor.u32 2147483648, %v10177_v7  ;;  %v11330_v28 = vsel %vm9666_vm3, nan, %v11329_v29  ;;  %v9972_v63 = vsub.s32 4, %v22231_v39  ;;  %14591 = vcosq.f32 %v22284_v55 }
 0x738   : > { %v11856_v13 = vmul.f32 2.0, %v11330_v28  ;;  %13848 = vmatpush1.bf16.msra.mxu1 %v13847_v11  ;;  %v11999_v43 = vmul.f32 %v11983_v42, %v22317_v18  ;;  %v12001_v56 = vmul.f32 %v11985_v45, %v22349_v33  ;;  %14593 = vsinq.f32 %v22284_v55 }
 0x739   : > { %v10179_v4 = vsel %vm10096_vm6, %v10178_v35, %v10177_v7  ;;  %v11998_v20 = vmul.f32 %v11982_v38, %v22385_v8  ;;  %v9973_v22 = vsel %vm9888_vm5, %v9972_v63, %v22231_v39  ;;  %v9983_v62 = vxor.u32 2147483648, %v22408_v58 }
 0x73a   : > { %v10182_v41 = vsel %vm22391_vm15, %v23582_v25, %v10179_v4  ;;  %v12015_v49 = vsub.f32 %v11999_v43, %v22305_v47  ;;  %v12017_v27 = vsub.f32 %v12001_v56, %v22344_v46  ;;  %v11984_v48 = vmul.f32 %v11856_v13, %v9677_v15 }
 0x73b   : > { %14595 = vcosq.f32 %v10182_v41  ;;  %v12014_v55 = vsub.f32 %v11998_v20, %v22367_v54  ;;  %v9975_v61 = vsel %vm22326_vm0, 0, %v9973_v22  ;;  %vm9978_vm5 = vweird.f32 %v23580_v34 }
 0x73c   : > { %14597 = vsinq.f32 %v10182_v41  ;;  %v13837_v60 = vpack.c.bf16 %v12015_v49, %v11983_v42  ;;  %v13849_v39 = vpack.c.bf16 %v12017_v27, %v11985_v45  ;;  %v12000_v2 = vmul.f32 %v11984_v48, %v11856_v13 }
 0x73d   : > { %v13839_v52 = vpack.c.bf16 %v12014_v55, %v11982_v38  ;;  %v12031_v3 = vmul.f32 %v12015_v49, %v22317_v18  ;;  %v12033_v47 = vmul.f32 %v12017_v27, %v22349_v33  ;;  %v12030_v46 = vmul.f32 %v12014_v55, %v22385_v8 }
 0x73e   : > { %13838 = vmatprep.subr.bf16.mxu0 %v13837_v60  ;;  %13850 = vmatprep.subr.bf16.mxu1 %v13849_v39  ;;  %v12016_v16 = vsub.f32 %v12000_v2, %v9677_v15  ;;  %v9979_v26 = vadd.s32 3, %v9975_v61  ;;  %v9986_v54 = vxor.u32 2147483648, %v22402_v32  ;;  %v11630_v1 = vand.u32 3, %v9975_v61 }
 0x73f   : > { %13840 = vmatpush1.bf16.msra.mxu0 %v13839_v52  ;;  %v12047_v30 = vsub.f32 %v12031_v3, %v11983_v42  ;;  %v12049_v40 = vsub.f32 %v12033_v47, %v11985_v45  ;;  %v12046_v51 = vsub.f32 %v12030_v46, %v11982_v38  ;;  %v11923_v5 = vadd.f32 1.0, %v22131_v6 }
 0x740   : > { %v13851_v31 = vpack.c.bf16 %v12016_v16, %v11984_v48  ;;  %v12032_v7 = vmul.f32 %v12016_v16, %v11856_v13  ;;  %v9980_v14 = vand.u32 3, %v9979_v26  ;;  %v10180_v57 = vsub.s32 4, %v22301_v19 }
 0x741   : > { %v12063_v29 = vmul.f32 %v12047_v30, %v22317_v18  ;;  %v12065_v15 = vmul.f32 %v12049_v40, %v22349_v33  ;;  %v12062_v11 = vmul.f32 %v12046_v51, %v22385_v8  ;;  %vm11631_vm0 = vcmp.lt.s32.totalorder %v11630_v1, 2  ;;  %v22448_v35 = vpop.eup %14591 }
 0x742   : > { %13852 = vmatpush1.bf16.msra.mxu1 %v13851_v31  ;;  %v12048_v42 = vsub.f32 %v12032_v7, %v11984_v48  ;;  %vm9982_vm8 = vcmp.eq.s32.totalorder %v9980_v14, 0  ;;  %vm9985_vm2 = vcmp.eq.s32.totalorder %v9980_v14, 2  ;;  %vm11632_vm4 = vcmp.eq.s32.totalorder %v11630_v1, 0  ;;  %v22450_v6 = vpop.eup %14593 }
 0x743   : > { %v12079_v45 = vsub.f32 %v12063_v29, %v12015_v49  ;;  %v12081_v28 = vsub.f32 %v12065_v15, %v12017_v27  ;;  %v12078_v38 = vsub.f32 %v12062_v11, %v12014_v55  ;;  %v9984_v63 = vsel %vm9982_vm8, %v22402_v32, %v9983_v62 }
 0x744   : > { %v12064_v18 = vmul.f32 %v12048_v42, %v11856_v13  ;;  %vm9981_vm10 = vcmp.lt.s32.totalorder %v9980_v14, 2  ;;  %v9987_v33 = vsel %vm9985_vm2, %v9986_v54, %v22408_v58  ;;  %v11634_v8 = vsel %vm11632_vm4, %v22402_v32, %v9983_v62 }
 0x745   : > { %v14596_v43 = vpop.eup %14595  ;;  %v13841_v56 = vpack.c.bf16 %v12079_v45, %v12047_v30  ;;  %v13853_v4 = vpack.c.bf16 %v12081_v28, %v12049_v40  ;;  %v9988_v20 = vsel %vm9981_vm10, %v9984_v63, %v9987_v33  ;;  %vm11635_vm11 = vcmp.eq.s32.totalorder %v11630_v1, 2 }
 0x746   : > { %v14598_v22 = vpop.eup %14597  ;;  %v13843_v41 = vpack.c.bf16 %v12078_v38, %v12046_v51  ;;  %v12080_v48 = vsub.f32 %v12064_v18, %v12016_v16  ;;  %v11637_v49 = vsel %vm11635_vm11, %v9986_v54, %v22408_v58  ;;  %14599 = vrcp.f32 %v11923_v5 }
 0x747   : > { %13842 = vmatprep.subr.bf16.mxu0 %v13841_v56  ;;  %13854 = vmatprep.subr.bf16.mxu1 %v13853_v4  ;;  %v22458_v13 = vsel %vm9978_vm5, nan, %v9988_v20  ;;  %v11638_v27 = vsel %vm11631_vm0, %v11634_v8, %v11637_v49  ;;  %v10181_v32 = vsel %vm10096_vm6, %v10180_v57, %v22301_v19  ;;  %v10191_v55 = vxor.u32 2147483648, %v14598_v22  ;;  %v23606_v49 = vld [vmem:[#allocation38_spill] sm:$0xff] }
 0x748   : > { %13844 = vmatpush1.bf16.msra.mxu0 %v13843_v41  ;;  %v13855_v61 = vpack.c.bf16 %v12080_v48, %v12048_v42  ;;  %v11639_v62 = vsel %vm9978_vm5, nan, %v11638_v27  ;;  %v10183_v58 = vsel %vm22391_vm15, 0, %v10181_v32  ;;  %v10194_v60 = vxor.u32 2147483648, %v14596_v43 }
 0x749   : > { %vm10186_vm3 = vweird.f32 %v23582_v25  ;;  %v10187_v39 = vadd.s32 3, %v10183_v58  ;;  %v11836_v2 = vand.u32 3, %v10183_v58  ;;  %v11925_v52 = vadd.f32 1.0, %v22156_v0 }
 0x74a   : > { %13856 = vmatpush1.bf16.msra.mxu1 %v13855_v61  ;;  %v22470_v3 = vmul.f32 2.0, %v11639_v62  ;;  %v9875_v19 = vadd.s32 3, %v22099_v59  ;;  %v9879_v47 = vxor.u32 2147483648, %v22307_v17  ;;  %v9882_v46 = vxor.u32 2147483648, %v22299_v9  ;;  %v22526_v62 = vpop.permute.xlu0 %12677 }
 0x74b   : > { %vm23603_vm6 = vcmask 392192   ;;  %v10188_v16 = vand.u32 3, %v10187_v39  ;;  %vm11837_vm15 = vcmp.lt.s32.totalorder %v11836_v2, 2  ;;  %vm11838_vm7 = vcmp.eq.s32.totalorder %v11836_v2, 0 }
 0x74c   : > { %13166 = vmatmul.mubr.msk.f32.vlgmr.msra.gmra.mrb[180].mxu0 %vm23603_vm6, %v22478_v12  ;;  %vm11841_vm1 = vcmp.eq.s32.totalorder %v11836_v2, 2  ;;  %v11840_v0 = vsel %vm11838_vm7, %v14596_v43, %v10191_v55  ;;  %14601 = vrcp.f32 %v11925_v52  ;;  %v9876_v54 = vand.u32 3, %v9875_v19  ;;  %vm23605_vm14 = vmmov %vm23603_vm6 }
 0x74d   : > { %v11843_v26 = vsel %vm11841_vm1, %v10194_v60, %v14598_v22  ;;  %v23604_v1 = vmov 0.0   ;;  %13167 = vmatmul.mubr.msk.f32.vlgmr.msra.gmra.mrb[180].mxu1 %vm23605_vm14, %v22478_v12  ;;  %vm10190_vm13 = vcmp.eq.s32.totalorder %v10188_v16, 0  ;;  %vm10193_vm9 = vcmp.eq.s32.totalorder %v10188_v16, 2 }
 0x74e   : > { %12580 = vmatprep.mubr.f32.mxu0 %v23604_v1  ;;  %v11844_v30 = vsel %vm11837_vm15, %v11840_v0, %v11843_v26  ;;  %vm9874_vm12 = vweird.f32 %v23569_v44  ;;  %vm10189_vm5 = vcmp.lt.s32.totalorder %v10188_v16, 2  ;;  %v10192_v40 = vsel %vm10190_vm13, %v14596_v43, %v10191_v55  ;;  %12651 = vmatprep.mubr.f32.mxu1 %v23604_v1  ;;  %v23607_v0 = vld [vmem:[#allocation44_spill] sm:$0xff]  ;;  %v23609_v1 = vld [vmem:[#allocation43_spill] sm:$0xff] }
 0x74f   : > { %v10195_v51 = vsel %vm10193_vm9, %v10194_v60, %v14598_v22  ;;  %v11845_v5 = vsel %vm10186_vm3, nan, %v11844_v30  ;;  %vm9877_vm0 = vcmp.lt.s32.totalorder %v9876_v54, 2  ;;  %vm9878_vm8 = vcmp.eq.s32.totalorder %v9876_v54, 0 }
 0x750   : > { %v10196_v31 = vsel %vm10189_vm5, %v10192_v40, %v10195_v51  ;;  %vm9881_vm2 = vcmp.eq.s32.totalorder %v9876_v54, 2  ;;  %v14600_v7 = vpop.eup %14599  ;;  %v22489_v14 = vmul.f32 2.0, %v11845_v5  ;;  %v9880_v57 = vsel %vm9878_vm8, %v22299_v9, %v9879_v47 }
 0x751   : > { %v9883_v29 = vsel %vm9881_vm2, %v9882_v46, %v22307_v17  ;;  %v11527_v15 = vand.u32 3, %v22099_v59  ;;  %v11971_v11 = vmul.f32 %v14600_v7, %v23580_v34  ;;  %v10197_v42 = vsel %vm10186_vm3, nan, %v10196_v31 }
 0x752   : > { %v9884_v45 = vsel %vm9877_vm0, %v9880_v57, %v9883_v29  ;;  %v11970_v28 = vmul.f32 %v22072_v23, %v23569_v44  ;;  %vm10082_vm6 = vweird.f32 %v23574_v50  ;;  %v10083_v8 = vadd.s32 3, %v22204_v37 }
 0x753   : > { %v9885_v38 = vsel %vm9874_vm12, nan, %v9884_v45  ;;  %vm11528_vm4 = vcmp.lt.s32.totalorder %v11527_v15, 2  ;;  %vm11529_vm10 = vcmp.eq.s32.totalorder %v11527_v15, 0  ;;  %vm11532_vm11 = vcmp.eq.s32.totalorder %v11527_v15, 2 }
 0x754   : > { %v13857_v63 = vpack.c.bf16 %v22458_v13, %v11971_v11  ;;  %v11531_v59 = vsel %vm11529_vm10, %v22299_v9, %v9879_v47  ;;  %v11534_v34 = vsel %vm11532_vm11, %v9882_v46, %v22307_v17  ;;  %v13859_v18 = vpack.c.bf16 %v9885_v38, %v11970_v28 }
 0x755   : > { %v11535_v33 = vsel %vm11528_vm4, %v11531_v59, %v11534_v34  ;;  %v10087_v23 = vxor.u32 2147483648, %v22450_v6  ;;  %v10090_v43 = vxor.u32 2147483648, %v22448_v35  ;;  %v11733_v4 = vand.u32 3, %v22204_v37 }
 0x756   : > { %13858 = vmatprep.subr.bf16.mxu0 %v13857_v63  ;;  %v11536_v56 = vsel %vm9874_vm12, nan, %v11535_v33  ;;  %v11972_v9 = vmul.f32 %v22136_v24, %v23574_v50  ;;  %v11987_v17 = vmul.f32 %v22470_v3, %v22458_v13  ;;  %v14602_v20 = vpop.eup %14601  ;;  %v10084_v41 = vand.u32 3, %v10083_v8  ;;  %v23608_v50 = vld [vmem:[#allocation50_spill] sm:$0xff] }
 0x757   : > { %v22515_v22 = vmul.f32 2.0, %v11536_v56  ;;  %13860 = vmatpush1.bf16.msra.mxu0 %v13859_v18  ;;  %v11989_v48 = vmul.f32 %v22489_v14, %v10197_v42  ;;  %v12658_v27 = vadd.f32 %v22360_v21, %v23606_v49  ;;  %v11973_v44 = vmul.f32 %v14602_v20, %v23582_v25  ;;  %v23613_v49 = vld [vmem:[#allocation64_spill] sm:$0xff] }
 0x758   : > { %vm11734_vm3 = vcmp.lt.s32.totalorder %v11733_v4, 2  ;;  %vm11735_vm15 = vcmp.eq.s32.totalorder %v11733_v4, 0  ;;  %vm11738_vm7 = vcmp.eq.s32.totalorder %v11733_v4, 2  ;;  %vm10085_vm1 = vcmp.lt.s32.totalorder %v10084_v41, 2 }
 0x759   : > { %vm10086_vm14 = vcmp.eq.s32.totalorder %v10084_v41, 0  ;;  %vm10089_vm13 = vcmp.eq.s32.totalorder %v10084_v41, 2  ;;  %v11737_v24 = vsel %vm11735_vm15, %v22448_v35, %v10087_v23  ;;  %v13869_v37 = vpack.c.bf16 %v10197_v42, %v11973_v44 }
 0x75a   : > { %v10088_v32 = vsel %vm10086_vm14, %v22448_v35, %v10087_v23  ;;  %v10091_v55 = vsel %vm10089_vm13, %v10090_v43, %v22450_v6  ;;  %v11740_v61 = vsel %vm11738_vm7, %v10090_v43, %v22450_v6  ;;  %v12003_v58 = vmul.f32 %v11987_v17, %v22470_v3 }
 0x75b   : > { %v10092_v21 = vsel %vm10085_vm1, %v10088_v32, %v10091_v55  ;;  %v11741_v25 = vsel %vm11734_vm3, %v11737_v24, %v11740_v61  ;;  %v12005_v60 = vmul.f32 %v11989_v48, %v22489_v14  ;;  %13870 = vmatprep.subr.bf16.mxu1 %v13869_v37  ;;  %v11986_v35 = vmul.f32 %v22515_v22, %v9885_v38  ;;  %v23614_v32 = vld [vmem:[#allocation33_spill] sm:$0xff] }
 0x75c   : > { %v10093_v39 = vsel %vm10082_vm6, nan, %v10092_v21  ;;  %v11742_v2 = vsel %vm10082_vm6, nan, %v11741_v25  ;;  %v12680_v52 = vadd.f32 %v22526_v62, %v12658_v27  ;;  %v12019_v47 = vsub.f32 %v12003_v58, %v22458_v13  ;;  %v23615_v21 = vld [vmem:[#allocation63_spill] sm:$0xff] }
 0x75d   : > { %v11860_v6 = vmul.f32 2.0, %v11742_v2  ;;  %v13871_v19 = vpack.c.bf16 %v10093_v39, %v11972_v9  ;;  %v12021_v46 = vsub.f32 %v12005_v60, %v10197_v42  ;;  %v12002_v16 = vmul.f32 %v11986_v35, %v22515_v22 }
 0x75e   : > { %12696 = vst [vmem:[%s22538_s23] sm:$0xff] %v12680_v52  ;;  %v12660_v26 = vadd.f32 %v22369_v10, %v23607_v0  ;;  %v12659_v54 = vadd.f32 %v22363_v53, %v23608_v50  ;;  %v12661_v30 = vadd.f32 %v22374_v36, %v23609_v1  ;;  %v13861_v40 = vpack.c.bf16 %v12019_v47, %v11987_v17  ;;  %v23619_v50 = vld [vmem:[#allocation25_spill] sm:$0xff] }
 0x75f   : > { %13872 = vmatpush1.bf16.msra.mxu1 %v13871_v19  ;;  %v13873_v13 = vpack.c.bf16 %v12021_v46, %v11989_v48  ;;  %v11988_v51 = vmul.f32 %v11860_v6, %v10093_v39  ;;  %v12035_v5 = vmul.f32 %v12019_v47, %v22470_v3  ;;  %v12018_v31 = vsub.f32 %v12002_v16, %v9885_v38 }
 0x760   : > { %v12037_v7 = vmul.f32 %v12021_v46, %v22489_v14  ;;  %v12682_v10 = vadd.f32 %v22526_v62, %v12660_v26  ;;  %v12681_v57 = vadd.f32 %v22526_v62, %v12659_v54  ;;  %13862 = vmatprep.subr.bf16.mxu0 %v13861_v40  ;;  %v12683_v29 = vadd.f32 %v22526_v62, %v12661_v30 }
 0x761   : > { %13874 = vmatprep.subr.bf16.mxu1 %v13873_v13  ;;  %v12004_v53 = vmul.f32 %v11988_v51, %v11860_v6  ;;  %v12051_v36 = vsub.f32 %v12035_v5, %v11987_v17  ;;  %v13863_v15 = vpack.c.bf16 %v12018_v31, %v11986_v35  ;;  %v12034_v42 = vmul.f32 %v12018_v31, %v22515_v22  ;;  %v23620_v13 = vld [vmem:[#allocation36_spill] sm:$0xff] }
 0x762   : > { %v12053_v11 = vsub.f32 %v12037_v7, %v11989_v48  ;;  %12698 = vst [vmem:[%s22538_s23 + $0x10] sm:$0xff] %v12682_v10  ;;  %12697 = vst [vmem:[%s22538_s23 + $0x8] sm:$0xff] %v12681_v57  ;;  %vm23610_vm9 = vcmask 392192  }
 0x763   : > { %v12020_v45 = vsub.f32 %v12004_v53, %v10093_v39  ;;  %v12067_v28 = vmul.f32 %v12051_v36, %v22470_v3  ;;  %12699 = vst [vmem:[%s22538_s23 + $0x18] sm:$0xff] %v12683_v29  ;;  %13864 = vmatpush1.bf16.msra.mxu0 %v13863_v15  ;;  %v12050_v63 = vsub.f32 %v12034_v42, %v11986_v35  ;;  %vm23611_vm12 = vmmov %vm23610_vm9  ;;  %v23616_v39 = vld [vmem:[#allocation67_spill] sm:$0xff] }
 0x764   : > { %v12069_v38 = vmul.f32 %v12053_v11, %v22489_v14  ;;  %v23622_v53 = vld [vmem:[#allocation71_spill] sm:$0xff] }
 0x765   : > { %v13875_v59 = vpack.c.bf16 %v12020_v45, %v11988_v51  ;;  %v12083_v34 = vsub.f32 %v12067_v28, %v12019_v47  ;;  %v12036_v18 = vmul.f32 %v12020_v45, %v11860_v6  ;;  %v12066_v8 = vmul.f32 %v12050_v63, %v22515_v22  ;;  %v23612_v22 = vld [vmem:[#allocation60_spill] sm:$0xff] }
 0x766   : > { %v12085_v33 = vsub.f32 %v12069_v38, %v12021_v46  ;;  %v23618_v46 = vld [vmem:[#allocation66_spill] sm:$0xff] }
 0x767   : > { %13876 = vmatpush1.bf16.msra.mxu1 %v13875_v59  ;;  %v13865_v23 = vpack.c.bf16 %v12083_v34, %v12051_v36  ;;  %v12052_v43 = vsub.f32 %v12036_v18, %v11988_v51  ;;  %v12082_v4 = vsub.f32 %v12066_v8, %v12018_v31  ;;  %v23621_v31 = vld [vmem:[#allocation17_spill] sm:$0xff] }
 0x768   : > { %v13877_v56 = vpack.c.bf16 %v12085_v33, %v12053_v11  ;;  %v23623_v11 = vld [vmem:[#allocation73_spill] sm:$0xff] }
 0x769   : > { %13866 = vmatprep.subr.bf16.mxu0 %v13865_v23  ;;  %v12068_v9 = vmul.f32 %v12052_v43, %v11860_v6  ;;  %v13867_v3 = vpack.c.bf16 %v12082_v4, %v12050_v63  ;;  %v23617_v6 = vld [vmem:[#allocation56_spill] sm:$0xff] }
 0x76a   : > { %13878 = vmatprep.subr.bf16.mxu1 %v13877_v56 }
 0x76b   : > { %v12084_v17 = vsub.f32 %v12068_v9, %v12020_v45  ;;  %13868 = vmatpush1.bf16.msra.mxu0 %v13867_v3 }
 0x76d   : > { %v13879_v14 = vpack.c.bf16 %v12084_v17, %v12052_v43 }
 0x76e   : > { %13168 = vmatmul.mubr.msk.f32.vlgmr.msra.gmra.mrb[182].mxu0 %vm23610_vm9, %v22478_v12 }
 0x76f   : > { %13880 = vmatpush1.bf16.msra.mxu1 %v13879_v14 }
 0x772   : > { %13169 = vmatmul.mubr.msk.f32.vlgmr.msra.gmra.mrb[182].mxu1 %vm23611_vm12, %v22478_v12 }
 0x7a0   : > { %v12298_v20 = vpop.f32.mrb[178].mxu0 }
 0x7a1   : > { %v12662_v41 = vadd.f32 %v12298_v20, %v23612_v22  ;;  %v12300_v48 = vpop.f32.mrb[179].mxu0 }
 0x7a2   : > { %v12663_v27 = vadd.f32 %v12300_v48, %v23613_v49 }
 0x7a3   : > { %v12684_v44 = vadd.f32 %v22526_v62, %v12662_v41 }
 0x7a4   : > { %v12685_v24 = vadd.f32 %v22526_v62, %v12663_v27  ;;  %v12369_v37 = vpop.f32.mrb[178].mxu1 }
 0x7a5   : > { %12700 = vst [vmem:[%s22538_s23 + $0x20] sm:$0xff] %v12684_v44  ;;  %v12664_v55 = vadd.f32 %v12369_v37, %v23614_v32  ;;  %v12371_v61 = vpop.f32.mrb[179].mxu1 }
 0x7a6   : > { %12701 = vst [vmem:[%s22538_s23 + $0x28] sm:$0xff] %v12685_v24  ;;  %v12665_v12 = vadd.f32 %v12371_v61, %v23615_v21 }
 0x7a7   : > { %v12686_v25 = vadd.f32 %v22526_v62, %v12664_v55 }
 0x7a8   : > { %v12687_v58 = vadd.f32 %v22526_v62, %v12665_v12 }
 0x7a9   : > { %12702 = vst [vmem:[%s22538_s23 + $0x30] sm:$0xff] %v12686_v25 }
 0x7aa   : > { %12703 = vst [vmem:[%s22538_s23 + $0x38] sm:$0xff] %v12687_v58 }
 0x81f   : > { %v12440_v60 = vpop.f32.mrb[180].mxu0 }
 0x820   : > { %v12666_v2 = vadd.f32 %v12440_v60, %v23616_v39  ;;  %v12442_v35 = vpop.f32.mrb[181].mxu0  ;;  %v12511_v52 = vpop.f32.mrb[180].mxu1 }
 0x821   : > { %v12667_v19 = vadd.f32 %v12442_v35, %v23617_v6  ;;  %v12668_v16 = vadd.f32 %v12511_v52, %v23618_v46  ;;  %v12513_v0 = vpop.f32.mrb[181].mxu1 }
 0x822   : > { %v12688_v47 = vadd.f32 %v22526_v62, %v12666_v2  ;;  %v12669_v54 = vadd.f32 %v12513_v0, %v23619_v50 }
 0x823   : > { %v12689_v26 = vadd.f32 %v22526_v62, %v12667_v19  ;;  %v12690_v1 = vadd.f32 %v22526_v62, %v12668_v16 }
 0x824   : > { %12704 = vst [vmem:[%s22538_s23 + $0x40] sm:$0xff] %v12688_v47  ;;  %v12691_v30 = vadd.f32 %v22526_v62, %v12669_v54 }
 0x825   : > { %12705 = vst [vmem:[%s22538_s23 + $0x48] sm:$0xff] %v12689_v26  ;;  %12706 = vst [vmem:[%s22538_s23 + $0x50] sm:$0xff] %v12690_v1 }
 0x826   : > { %12707 = vst [vmem:[%s22538_s23 + $0x58] sm:$0xff] %v12691_v30 }
 0x841   : > { %v12582_v40 = vpop.f32.mrb[182].mxu0 }
 0x842   : > { %v12670_v51 = vadd.f32 %v12582_v40, %v23620_v13  ;;  %v12584_v5 = vpop.f32.mrb[183].mxu0 }
 0x843   : > { %v12671_v7 = vadd.f32 %v12584_v5, %v23621_v31 }
 0x844   : > { %v12692_v10 = vadd.f32 %v22526_v62, %v12670_v51 }
 0x845   : > { %v12653_v57 = vpop.f32.mrb[182].mxu1  ;;  %v12693_v29 = vadd.f32 %v22526_v62, %v12671_v7 }
 0x846   : > { %v12672_v36 = vadd.f32 %v12653_v57, %v23622_v53  ;;  %v12655_v15 = vpop.f32.mrb[183].mxu1  ;;  %12708 = vst [vmem:[%s22538_s23 + $0x60] sm:$0xff] %v12692_v10 }
 0x847   : > { %v12673_v42 = vadd.f32 %v12655_v15, %v23623_v11  ;;  %12709 = vst [vmem:[%s22538_s23 + $0x68] sm:$0xff] %v12693_v29 }
 0x848   : > { %v12694_v45 = vadd.f32 %v22526_v62, %v12672_v36 }
 0x849   : > { %v12695_v28 = vadd.f32 %v22526_v62, %v12673_v42 }
 0x84a   : > { %12710 = vst [vmem:[%s22538_s23 + $0x70] sm:$0xff] %v12694_v45 }
 0x84b   : > { %12711 = vst [vmem:[%s22538_s23 + $0x78] sm:$0xff] %v12695_v28 }
 0x84c   : > { %14695 = shalt.err (!%p14692_p7)
}
 0x84d   : > { %s14696_s25 = scalar_lea.hbm %s22602_s21, 2048  ;;  %s14700_s20 = scalar_lea.hbm %s22657_s9, 4096 }
 0x84e   : > { %p14697_p9 = scmp.ne.s32.totalorder %s22602_s21, %s14696_s25  ;;  %p14701_p0 = scmp.lt.u32.totalorder %s22602_s21, %s22657_s9 }
 0x84f   : > { %p14702_p11 = scmp.lt.u32.totalorder %s14700_s20, %s14696_s25  ;;  %p14704_p4 = scmp.lt.u32.totalorder %s14696_s25, %s22602_s21 }
 0x850   : > { %p14698_p2 = pnand %p14697_p9, %p14909_p12 }
 0x851   : > { %p14703_p1 = por %p14702_p11, %p14701_p0 }
 0x852   : > { %p14699_p5 = pneg %p14698_p2 }
 0x853   : > { %p14705_p6 = por %p14704_p4, %p14703_p1 }
 0x855   : > { %p14706_p8 = pnand %p14705_p6, %p14699_p5 }
 0x857   : > { %14709 = shalt.err (!%p14706_p8)
}
 0x858   : > { %14015 = dma.vmem_to_hbm [thread:$0]  (%p14909_p12), %s22604_s14, 2048, %s22602_s21, %s12713_s13  }
 0x859 PF: > { %s23624_s19 = sld [smem:[#allocation11_spill]]  ;;  %s12739_s16 = sand.u32 1, %s14740_s30  }
 0x85a   : > { %p23626_p13 = scmp.ge.s32.totalorder %s14752_s12, 2  ;;  %s12740_s27 = scalar_lea.sflag [#allocation4], %s12739_s16 }
 0x85f   : > { %p23625_p10 = scmp.ne.s32.totalorder %s23624_s19, 0 }
 0x861   : > { %p14026_p3 = pnand %p23626_p13, %p23625_p10 }
 0x863   : > { %14735 = dma.done.wait (!%p14026_p3), %s12740_s27, 2048  }
 0x864   : > { %14737 = vsyncadd (!%p14026_p3), %s12740_s27, 4294965248  ;;  %s23627_s12 = sld [smem:[#allocation12_spill]]  ;;  %s23628_s30 = smov %s14744_s10 }
 0x865   : > { %s23629_s10 = smov %s14748_s11  ;;  %s23630_s11 = smov %s14905_s28 }
 0x86a   : > { %p23_p7 = scmp.ge.s32.totalorder %s23627_s12, 4  }
 0x86c   :  { %25 = sbr.rel (!%p23_p7) target bundleno = 6 (0x6), region = 105 }
 0x873   :  { %12745 = vsyncpa [#allocation3], 1 }
 0x874   :  { %12747 = vsyncpa [#allocation3 + $0x1], 1 }
 0x875   :  { %12748 = vsyncpa [#allocation6], 1 }
 0x876   :  { %12749 = vsyncpa [#allocation4], 1 }
 0x877   :  { %12751 = vsyncpa [#allocation4 + $0x1], 1 }

</bundles_post_ra>
